<compile_context>
chip_gen: v5e
topology: v5e:2x2
jax: 0.10.0
libtpu: 0.0.40
codegen_flags: <defaults>
</compile_context>

<pallas_src>
import jax
import jax.numpy as jnp
from jax import lax
from jax.experimental import pallas as pl
from jax.experimental.pallas import tpu as pltpu

_VMEM = pl.BlockSpec(memory_space=pltpu.MemorySpace.VMEM)
_H = 64        # LSTM hidden size
_EPS = 1e-5    # BatchNorm eps


# ----------------------------------------------------------------------------
# Fused kernel: conv trunk + residual blocks + BiLSTM + avgpool + MLP head.
# ----------------------------------------------------------------------------
def _ecg_fused_kernel(
    x_ref,                        # (B, L, 1)
    w1_ref, b1_ref,               # conv1     (5, 1, 32), (1, 32)
    w2_ref, b2_ref,               # conv2     (160, 64), (1, 64)
    bn1s_ref, bn1b_ref,           # bn1 scale/shift (1, 64)
    wr1_ref, br1_ref,             # residual1 (64, 32), (1, 32)
    wc1_ref, bc1_ref,             # res_conv1 (640, 32), (1, 32)
    wc2_ref, bc2_ref,             # res_conv2 (320, 32), (1, 32)
    bn2s_ref, bn2b_ref,           # bn2 scale/shift (1, 32)
    wr2_ref, br2_ref,             # residual2 (32, 32), (1, 32)
    wc3_ref, bc3_ref,             # res_conv3 (320, 32), (1, 32)
    wc4_ref, bc4_ref,             # res_conv4 (320, 32), (1, 32)
    bn3s_ref, bn3b_ref,           # bn3 scale/shift (1, 32)
    wih_ref, whh_ref, bih_ref,    # LSTM packed: (32, 8H), (2H, 8H), (1, 8H)
    wfc1_ref, bfc1_ref,           # fc1 (128, 100), (1, 100)
    wfc2_ref, bfc2_ref,           # fc2 (100, 1), (1, 1)
    o_ref,                        # (B, 1)
):
    f32 = jnp.float32
    B = x_ref.shape[0]
    H = _H

    # ---- helpers (all on VMEM-resident values; nothing touches HBM) --------
    def pad_same(x, K):
        # PyTorch 'same': left = (K-1)//2, extra pad goes to the right.
        lpad = (K - 1) // 2
        rpad = (K - 1) - lpad
        Bc, Lc, C = x.shape
        parts = []
        if lpad:
            parts.append(jnp.zeros((Bc, lpad, C), f32))
        parts.append(x)
        if rpad:
            parts.append(jnp.zeros((Bc, rpad, C), f32))
        return jnp.concatenate(parts, axis=1) if len(parts) > 1 else x

    def conv_same(x, w_flat, bias, K, relu):
        # im2col: one (B*L, K*Cin) x (K*Cin, Cout) MXU matmul per conv layer.
        Bc, Lc, Cin = x.shape
        Cout = w_flat.shape[1]
        xp = pad_same(x, K)
        if K > 1:
            xim = jnp.concatenate([xp[:, k:k + Lc, :] for k in range(K)], axis=-1)
        else:
            xim = xp
        y = jnp.dot(xim.reshape(Bc * Lc, K * Cin), w_flat,
                    preferred_element_type=f32) + bias
        if relu:
            y = jnp.maximum(y, 0.0)
        return y.reshape(Bc, Lc, Cout)

    def conv_cin1(x, w, bias, relu):
        # First layer (Cin == 1): K broadcast multiply-adds on the VPU.
        Bc, Lc, _ = x.shape
        K, _, Cout = w.shape
        xp = pad_same(x, K)
        acc = jnp.zeros((Bc, Lc, Cout), f32)
        for k in range(K):
            acc = acc + xp[:, k:k + Lc, :] * w[k]          # (B,L,1) * (1,Cout)
        acc = acc + bias
        if relu:
            acc = jnp.maximum(acc, 0.0)
        return acc

    def maxpool2(x):
        # MaxPool1d(kernel_size=2); L is even at every stage here.
        Bc, Lc, C = x.shape
        return jnp.max(x.reshape(Bc, Lc // 2, 2, C), axis=2)

    # ---- conv / residual trunk ---------------------------------------------
    x = x_ref[...]                                                    # (B, L, 1)
    h = conv_cin1(x, w1_ref[...], b1_ref[...], relu=True)             # (B, L, 32)
    h = conv_same(h, w2_ref[...], b2_ref[...], K=5, relu=True)        # (B, L, 64)
    x1 = maxpool2(h) * bn1s_ref[...] + bn1b_ref[...]                  # (B, L/2, 64)

    r = conv_same(maxpool2(x1), wr1_ref[...], br1_ref[...], K=1, relu=False)
    y = conv_same(x1, wc1_ref[...], bc1_ref[...], K=10, relu=True)    # (B, L/2, 32)
    y = conv_same(y, wc2_ref[...], bc2_ref[...], K=10, relu=True)
    x2 = maxpool2(y) * bn2s_ref[...] + bn2b_ref[...] + r              # (B, L/4, 32)

    r = conv_same(maxpool2(x2), wr2_ref[...], br2_ref[...], K=1, relu=False)
    y = conv_same(x2, wc3_ref[...], bc3_ref[...], K=10, relu=True)    # (B, L/4, 32)
    y = conv_same(y, wc4_ref[...], bc4_ref[...], K=10, relu=True)
    x3 = maxpool2(y) * bn3s_ref[...] + bn3b_ref[...] + r              # (B, T, 32)

    # ---- BiLSTM + global average pool + fc1/ReLU + fc2 ----------------------
    T = x3.shape[1]
    # Hoisted input projection, both directions, all timesteps:
    #   (B*T, 32) x (32, 8H); column layout [i,f,o,g]_fwd ++ [i,f,o,g]_bwd.
    proj = jnp.dot(x3.reshape(B * T, x3.shape[2]), wih_ref[...],
                   preferred_element_type=f32) + bih_ref[...]
    proj = proj.reshape(B, T, 8 * H)
    whh = whh_ref[...]                        # (2H, 8H) block-diagonal fwd/bwd

    def gate_update(g4, c):
        # per-direction gate layout [i, f, o, g]
        sio = jax.nn.sigmoid(g4[:, 0:3 * H])
        g_in = jnp.tanh(g4[:, 3 * H:4 * H])
        c_new = sio[:, H:2 * H] * c + sio[:, 0:H] * g_in
        h_new = sio[:, 2 * H:3 * H] * jnp.tanh(c_new)
        return h_new, c_new

    h_cat = jnp.zeros((B, 2 * H), f32)        # [h_fwd | h_bwd], lane-dense (128)
    c_f = jnp.zeros((B, H), f32)
    c_b = jnp.zeros((B, H), f32)
    acc_f = jnp.zeros((B, H), f32)
    acc_b = jnp.zeros((B, H), f32)
    # T is small and static -> fully unrolled recurrence with static indexing.
    # TODO(synk): for long sequences, switch to lax.fori_loop over a VMEM
    #             scratch holding `proj` to bound trace size.
    for s in range(T):
        g = jnp.dot(h_cat, whh, preferred_element_type=f32)           # (B, 8H)
        gf = g[:, 0:4 * H] + proj[:, s, 0:4 * H]                      # fwd @ t = s
        gb = g[:, 4 * H:8 * H] + proj[:, T - 1 - s, 4 * H:8 * H]      # bwd @ t = T-1-s
        h_f, c_f = gate_update(gf, c_f)
        h_b, c_b = gate_update(gb, c_b)
        h_cat = jnp.concatenate([h_f, h_b], axis=1)
        acc_f = acc_f + h_f
        acc_b = acc_b + h_b

    pooled = jnp.concatenate([acc_f, acc_b], axis=1) * (1.0 / T)      # (B, 128)
    hid = jnp.maximum(
        jnp.dot(pooled, wfc1_ref[...], preferred_element_type=f32) + bfc1_ref[...],
        0.0)
    out = jnp.dot(hid, wfc2_ref[...], preferred_element_type=f32) + bfc2_ref[...]
    o_ref[...] = out.astype(o_ref.dtype)


# ----------------------------------------------------------------------------
# Wrapper: one pallas_call, everything in VMEM (arrays are tiny).
# ----------------------------------------------------------------------------
def ecg_forward(x_ncw, packed):
    """x_ncw: PyTorch-layout input (B, 1, L); packed: pack_params(...) output."""
    x = jnp.transpose(x_ncw, (0, 2, 1)).astype(jnp.float32)           # (B, L, 1)
    B = x.shape[0]
    return pl.pallas_call(
        _ecg_fused_kernel,
        out_shape=jax.ShapeDtypeStruct((B, 1), jnp.float32),
        in_specs=[_VMEM] * (1 + len(packed)),
        out_specs=_VMEM,
    )(x, *packed)


# ----------------------------------------------------------------------------
# Synthetic parameters (PyTorch-like layout) + one-time weight prep.
# ----------------------------------------------------------------------------
def init_params(key):
    ks = iter(jax.random.split(key, 40))

    def conv(cin, cout, k):
        # (K, Cin, Cout) == torch Conv1d weight.permute(2, 1, 0)
        w = jax.random.normal(next(ks), (k, cin, cout), jnp.float32) / jnp.sqrt(cin * k)
        b = jax.random.normal(next(ks), (1, cout), jnp.float32) * 0.01
        return w, b

    def bn(c):
        return dict(
            gamma=1.0 + 0.1 * jax.random.normal(next(ks), (1, c), jnp.float32),
            beta=0.1 * jax.random.normal(next(ks), (1, c), jnp.float32),
            mean=0.1 * jax.random.normal(next(ks), (1, c), jnp.float32),
            var=1.0 + 0.5 * jax.random.uniform(next(ks), (1, c), jnp.float32),
        )

    H, I = _H, 32

    def mat(shape, fan):
        return jax.random.normal(next(ks), shape, jnp.float32) / jnp.sqrt(fan)

    return dict(
        conv1=conv(1, 32, 5),
        conv2=conv(32, 64, 5),
        bn1=bn(64),
        residual1=conv(64, 32, 1),
        res_conv1=conv(64, 32, 10),
        res_conv2=conv(32, 32, 10),
        bn2=bn(32),
        residual2=conv(32, 32, 1),
        res_conv3=conv(32, 32, 10),
        res_conv4=conv(32, 32, 10),
        bn3=bn(32),
        lstm=dict(
            # (I,4H)/(H,4H) == torch weight_ih/hh.T, gate order [i, f, g, o];
            # biases are the combined bias_ih + bias_hh.
            wih_f=mat((I, 4 * H), I), whh_f=mat((H, 4 * H), H),
            b_f=0.01 * jax.random.normal(next(ks), (1, 4 * H), jnp.float32),
            wih_b=mat((I, 4 * H), I), whh_b=mat((H, 4 * H), H),
            b_b=0.01 * jax.random.normal(next(ks), (1, 4 * H), jnp.float32),
        ),
        w_fc1=mat((128, 100), 128),
        b_fc1=0.01 * jax.random.normal(next(ks), (1, 100), jnp.float32),
        w_fc2=mat((100, 1), 100),
        b_fc2=0.01 * jax.random.normal(next(ks), (1, 1), jnp.float32),
    )


def pack_params(p):
    """One-time weight prep: flatten conv weights for im2col, fold BatchNorm
    into scale/shift, reorder LSTM gates to [i,f,o,g] and build the fused
    fwd/bwd block-diagonal recurrent weight."""
    H = _H

    def flat(wb):
        w, b = wb
        K, Cin, Cout = w.shape
        return w.reshape(K * Cin, Cout), b

    def bn_fold(d):
        scale = d['gamma'] * lax.rsqrt(d['var'] + _EPS)
        return scale, d['beta'] - d['mean'] * scale

    def regate(w):   # (X, 4H): torch [i, f, g, o] -> kernel [i, f, o, g]
        return jnp.concatenate(
            [w[:, 0:H], w[:, H:2 * H], w[:, 3 * H:4 * H], w[:, 2 * H:3 * H]], axis=1)

    l = p['lstm']
    wih = jnp.concatenate([regate(l['wih_f']), regate(l['wih_b'])], axis=1)   # (32, 8H)
    bih = jnp.concatenate([regate(l['b_f']), regate(l['b_b'])], axis=1)       # (1, 8H)
    z = jnp.zeros((H, 4 * H), jnp.float32)
    whh = jnp.concatenate(
        [jnp.concatenate([regate(l['whh_f']), z], axis=1),
         jnp.concatenate([z, regate(l['whh_b'])], axis=1)], axis=0)           # (2H, 8H)

    return (
        p['conv1'][0], p['conv1'][1],      # keep (K, 1, 32) for the Cin==1 path
        *flat(p['conv2']),
        *bn_fold(p['bn1']),
        *flat(p['residual1']),
        *flat(p['res_conv1']),
        *flat(p['res_conv2']),
        *bn_fold(p['bn2']),
        *flat(p['residual2']),
        *flat(p['res_conv3']),
        *flat(p['res_conv4']),
        *bn_fold(p['bn3']),
        wih, whh, bih,
        p['w_fc1'], p['b_fc1'], p['w_fc2'], p['b_fc2'],
    )


if __name__ == "__main__":
    key = jax.random.PRNGKey(0)
    pkey, xkey = jax.random.split(key)
    params = init_params(pkey)
    packed = pack_params(params)
    # PyTorch NCW input: batch=2, channels=1, length=64 (small stand-in for 300;
    # length divisible by 8 so the three MaxPool1d(2) stages stay exact).
    x = jax.random.normal(xkey, (2, 1, 64), jnp.float32)
    out = jax.jit(ecg_forward)(x, packed)
    jax.block_until_ready(out)
    assert out.shape == (2, 1)
    print("KERNEL_OK")
</pallas_src>

<mosaic_0001>
module attributes {stable_mosaic.version = 11 : i64} {
  func.func @_ecg_fused_kernel(%arg0: memref<2x64x1xf32, #tpu.memory_space<vmem>>, %arg1: memref<5x1x32xf32, #tpu.memory_space<vmem>>, %arg2: memref<1x32xf32, #tpu.memory_space<vmem>>, %arg3: memref<160x64xf32, #tpu.memory_space<vmem>>, %arg4: memref<1x64xf32, #tpu.memory_space<vmem>>, %arg5: memref<1x64xf32, #tpu.memory_space<vmem>>, %arg6: memref<1x64xf32, #tpu.memory_space<vmem>>, %arg7: memref<64x32xf32, #tpu.memory_space<vmem>>, %arg8: memref<1x32xf32, #tpu.memory_space<vmem>>, %arg9: memref<640x32xf32, #tpu.memory_space<vmem>>, %arg10: memref<1x32xf32, #tpu.memory_space<vmem>>, %arg11: memref<320x32xf32, #tpu.memory_space<vmem>>, %arg12: memref<1x32xf32, #tpu.memory_space<vmem>>, %arg13: memref<1x32xf32, #tpu.memory_space<vmem>>, %arg14: memref<1x32xf32, #tpu.memory_space<vmem>>, %arg15: memref<32x32xf32, #tpu.memory_space<vmem>>, %arg16: memref<1x32xf32, #tpu.memory_space<vmem>>, %arg17: memref<320x32xf32, #tpu.memory_space<vmem>>, %arg18: memref<1x32xf32, #tpu.memory_space<vmem>>, %arg19: memref<320x32xf32, #tpu.memory_space<vmem>>, %arg20: memref<1x32xf32, #tpu.memory_space<vmem>>, %arg21: memref<1x32xf32, #tpu.memory_space<vmem>>, %arg22: memref<1x32xf32, #tpu.memory_space<vmem>>, %arg23: memref<32x512xf32, #tpu.memory_space<vmem>>, %arg24: memref<128x512xf32, #tpu.memory_space<vmem>>, %arg25: memref<1x512xf32, #tpu.memory_space<vmem>>, %arg26: memref<128x100xf32, #tpu.memory_space<vmem>>, %arg27: memref<1x100xf32, #tpu.memory_space<vmem>>, %arg28: memref<100x1xf32, #tpu.memory_space<vmem>>, %arg29: memref<1x1xf32, #tpu.memory_space<vmem>>, %arg30: memref<2x1xf32, #tpu.memory_space<vmem>>) attributes {dimension_semantics = [], scalar_prefetch = 0 : i64, scratch_operands = 0 : i64, tpu.core_type = #tpu.core_type<tc>} {
    %c0 = arith.constant 0 : index
    %c0_0 = arith.constant 0 : index
    %c0_1 = arith.constant 0 : index
    %0 = vector.load %arg0[%c0, %c0_0, %c0_1] : memref<2x64x1xf32, #tpu.memory_space<vmem>>, vector<2x64x1xf32>
    %c0_2 = arith.constant 0 : index
    %c0_3 = arith.constant 0 : index
    %c0_4 = arith.constant 0 : index
    %1 = vector.load %arg1[%c0_2, %c0_3, %c0_4] : memref<5x1x32xf32, #tpu.memory_space<vmem>>, vector<5x1x32xf32>
    %c0_5 = arith.constant 0 : index
    %c0_6 = arith.constant 0 : index
    %2 = vector.load %arg2[%c0_5, %c0_6] : memref<1x32xf32, #tpu.memory_space<vmem>>, vector<1x32xf32>
    %cst = arith.constant 0.000000e+00 : f32
    %3 = vector.broadcast %cst : f32 to vector<2x2x1xf32>
    %cst_7 = arith.constant 0.000000e+00 : f32
    %4 = vector.broadcast %cst_7 : f32 to vector<2x2x1xf32>
    %5 = tpu.concatenate %3, %0, %4 in 1 : vector<2x2x1xf32>, vector<2x64x1xf32>, vector<2x2x1xf32> -> vector<2x68x1xf32>
    %cst_8 = arith.constant 0.000000e+00 : f32
    %6 = vector.broadcast %cst_8 : f32 to vector<2x64x32xf32>
    %7 = vector.extract_strided_slice %5 {offsets = [0, 0, 0], sizes = [2, 64, 1], strides = [1, 1, 1]} : vector<2x68x1xf32> to vector<2x64x1xf32>
    %8 = vector.extract_strided_slice %1 {offsets = [0, 0, 0], sizes = [1, 1, 32], strides = [1, 1, 1]} : vector<5x1x32xf32> to vector<1x1x32xf32>
    %9 = vector.shape_cast %8 : vector<1x1x32xf32> to vector<1x32xf32>
    %10 = vector.shape_cast %9 : vector<1x32xf32> to vector<1x1x32xf32>
    %11 = vector.broadcast %7 : vector<2x64x1xf32> to vector<2x64x32xf32>
    %12 = vector.broadcast %10 : vector<1x1x32xf32> to vector<2x64x32xf32>
    %13 = arith.mulf %11, %12 : vector<2x64x32xf32>
    %14 = arith.addf %6, %13 : vector<2x64x32xf32>
    %15 = vector.extract_strided_slice %5 {offsets = [0, 1, 0], sizes = [2, 64, 1], strides = [1, 1, 1]} : vector<2x68x1xf32> to vector<2x64x1xf32>
    %16 = vector.extract_strided_slice %1 {offsets = [1, 0, 0], sizes = [1, 1, 32], strides = [1, 1, 1]} : vector<5x1x32xf32> to vector<1x1x32xf32>
    %17 = vector.shape_cast %16 : vector<1x1x32xf32> to vector<1x32xf32>
    %18 = vector.shape_cast %17 : vector<1x32xf32> to vector<1x1x32xf32>
    %19 = vector.broadcast %15 : vector<2x64x1xf32> to vector<2x64x32xf32>
    %20 = vector.broadcast %18 : vector<1x1x32xf32> to vector<2x64x32xf32>
    %21 = arith.mulf %19, %20 : vector<2x64x32xf32>
    %22 = arith.addf %14, %21 : vector<2x64x32xf32>
    %23 = vector.extract_strided_slice %5 {offsets = [0, 2, 0], sizes = [2, 64, 1], strides = [1, 1, 1]} : vector<2x68x1xf32> to vector<2x64x1xf32>
    %24 = vector.extract_strided_slice %1 {offsets = [2, 0, 0], sizes = [1, 1, 32], strides = [1, 1, 1]} : vector<5x1x32xf32> to vector<1x1x32xf32>
    %25 = vector.shape_cast %24 : vector<1x1x32xf32> to vector<1x32xf32>
    %26 = vector.shape_cast %25 : vector<1x32xf32> to vector<1x1x32xf32>
    %27 = vector.broadcast %23 : vector<2x64x1xf32> to vector<2x64x32xf32>
    %28 = vector.broadcast %26 : vector<1x1x32xf32> to vector<2x64x32xf32>
    %29 = arith.mulf %27, %28 : vector<2x64x32xf32>
    %30 = arith.addf %22, %29 : vector<2x64x32xf32>
    %31 = vector.extract_strided_slice %5 {offsets = [0, 3, 0], sizes = [2, 64, 1], strides = [1, 1, 1]} : vector<2x68x1xf32> to vector<2x64x1xf32>
    %32 = vector.extract_strided_slice %1 {offsets = [3, 0, 0], sizes = [1, 1, 32], strides = [1, 1, 1]} : vector<5x1x32xf32> to vector<1x1x32xf32>
    %33 = vector.shape_cast %32 : vector<1x1x32xf32> to vector<1x32xf32>
    %34 = vector.shape_cast %33 : vector<1x32xf32> to vector<1x1x32xf32>
    %35 = vector.broadcast %31 : vector<2x64x1xf32> to vector<2x64x32xf32>
    %36 = vector.broadcast %34 : vector<1x1x32xf32> to vector<2x64x32xf32>
    %37 = arith.mulf %35, %36 : vector<2x64x32xf32>
    %38 = arith.addf %30, %37 : vector<2x64x32xf32>
    %39 = vector.extract_strided_slice %5 {offsets = [0, 4, 0], sizes = [2, 64, 1], strides = [1, 1, 1]} : vector<2x68x1xf32> to vector<2x64x1xf32>
    %40 = vector.extract_strided_slice %1 {offsets = [4, 0, 0], sizes = [1, 1, 32], strides = [1, 1, 1]} : vector<5x1x32xf32> to vector<1x1x32xf32>
    %41 = vector.shape_cast %40 : vector<1x1x32xf32> to vector<1x32xf32>
    %42 = vector.shape_cast %41 : vector<1x32xf32> to vector<1x1x32xf32>
    %43 = vector.broadcast %39 : vector<2x64x1xf32> to vector<2x64x32xf32>
    %44 = vector.broadcast %42 : vector<1x1x32xf32> to vector<2x64x32xf32>
    %45 = arith.mulf %43, %44 : vector<2x64x32xf32>
    %46 = arith.addf %38, %45 : vector<2x64x32xf32>
    %47 = vector.shape_cast %2 : vector<1x32xf32> to vector<1x1x32xf32>
    %48 = vector.broadcast %47 : vector<1x1x32xf32> to vector<2x64x32xf32>
    %49 = arith.addf %46, %48 : vector<2x64x32xf32>
    %cst_9 = arith.constant 0.000000e+00 : f32
    %50 = vector.broadcast %cst_9 : f32 to vector<2x64x32xf32>
    %51 = arith.maximumf %49, %50 : vector<2x64x32xf32>
    %c0_10 = arith.constant 0 : index
    %c0_11 = arith.constant 0 : index
    %52 = vector.load %arg3[%c0_10, %c0_11] : memref<160x64xf32, #tpu.memory_space<vmem>>, vector<160x64xf32>
    %c0_12 = arith.constant 0 : index
    %c0_13 = arith.constant 0 : index
    %53 = vector.load %arg4[%c0_12, %c0_13] : memref<1x64xf32, #tpu.memory_space<vmem>>, vector<1x64xf32>
    %cst_14 = arith.constant 0.000000e+00 : f32
    %54 = vector.broadcast %cst_14 : f32 to vector<2x2x32xf32>
    %cst_15 = arith.constant 0.000000e+00 : f32
    %55 = vector.broadcast %cst_15 : f32 to vector<2x2x32xf32>
    %56 = tpu.concatenate %54, %51, %55 in 1 : vector<2x2x32xf32>, vector<2x64x32xf32>, vector<2x2x32xf32> -> vector<2x68x32xf32>
    %57 = vector.extract_strided_slice %56 {offsets = [0, 0, 0], sizes = [2, 64, 32], strides = [1, 1, 1]} : vector<2x68x32xf32> to vector<2x64x32xf32>
    %58 = vector.extract_strided_slice %56 {offsets = [0, 1, 0], sizes = [2, 64, 32], strides = [1, 1, 1]} : vector<2x68x32xf32> to vector<2x64x32xf32>
    %59 = vector.extract_strided_slice %56 {offsets = [0, 2, 0], sizes = [2, 64, 32], strides = [1, 1, 1]} : vector<2x68x32xf32> to vector<2x64x32xf32>
    %60 = vector.extract_strided_slice %56 {offsets = [0, 3, 0], sizes = [2, 64, 32], strides = [1, 1, 1]} : vector<2x68x32xf32> to vector<2x64x32xf32>
    %61 = vector.extract_strided_slice %56 {offsets = [0, 4, 0], sizes = [2, 64, 32], strides = [1, 1, 1]} : vector<2x68x32xf32> to vector<2x64x32xf32>
    %62 = tpu.concatenate %57, %58, %59, %60, %61 in 2 : vector<2x64x32xf32>, vector<2x64x32xf32>, vector<2x64x32xf32>, vector<2x64x32xf32>, vector<2x64x32xf32> -> vector<2x64x160xf32>
    %63 = vector.shape_cast %62 : vector<2x64x160xf32> to vector<128x160xf32>
    %cst_16 = arith.constant dense<0.000000e+00> : vector<128x64xf32>
    %64 = tpu.matmul %63, %52, %cst_16 {dimension_numbers = #tpu.dot_dimension_numbers<[1], [0], [0], [1], [0, 0, 1, 1], [], []>} : vector<128x160xf32>, vector<160x64xf32>, vector<128x64xf32> -> vector<128x64xf32>
    %65 = vector.broadcast %53 : vector<1x64xf32> to vector<128x64xf32>
    %66 = arith.addf %64, %65 : vector<128x64xf32>
    %cst_17 = arith.constant 0.000000e+00 : f32
    %67 = vector.broadcast %cst_17 : f32 to vector<128x64xf32>
    %68 = arith.maximumf %66, %67 : vector<128x64xf32>
    %69 = vector.shape_cast %68 : vector<128x64xf32> to vector<2x64x64xf32>
    %70 = vector.shape_cast %69 : vector<2x64x64xf32> to vector<2x32x2x64xf32>
    %cst_18 = arith.constant dense<0xFF800000> : vector<2x32x64xf32>
    %71 = vector.multi_reduction <maximumf>, %70, %cst_18 [2] : vector<2x32x2x64xf32> to vector<2x32x64xf32>
    %c0_19 = arith.constant 0 : index
    %c0_20 = arith.constant 0 : index
    %72 = vector.load %arg5[%c0_19, %c0_20] : memref<1x64xf32, #tpu.memory_space<vmem>>, vector<1x64xf32>
    %73 = vector.shape_cast %72 : vector<1x64xf32> to vector<1x1x64xf32>
    %74 = vector.broadcast %73 : vector<1x1x64xf32> to vector<2x32x64xf32>
    %75 = arith.mulf %71, %74 : vector<2x32x64xf32>
    %c0_21 = arith.constant 0 : index
    %c0_22 = arith.constant 0 : index
    %76 = vector.load %arg6[%c0_21, %c0_22] : memref<1x64xf32, #tpu.memory_space<vmem>>, vector<1x64xf32>
    %77 = vector.shape_cast %76 : vector<1x64xf32> to vector<1x1x64xf32>
    %78 = vector.broadcast %77 : vector<1x1x64xf32> to vector<2x32x64xf32>
    %79 = arith.addf %75, %78 : vector<2x32x64xf32>
    %80 = vector.shape_cast %79 : vector<2x32x64xf32> to vector<2x16x2x64xf32>
    %cst_23 = arith.constant dense<0xFF800000> : vector<2x16x64xf32>
    %81 = vector.multi_reduction <maximumf>, %80, %cst_23 [2] : vector<2x16x2x64xf32> to vector<2x16x64xf32>
    %c0_24 = arith.constant 0 : index
    %c0_25 = arith.constant 0 : index
    %82 = vector.load %arg7[%c0_24, %c0_25] : memref<64x32xf32, #tpu.memory_space<vmem>>, vector<64x32xf32>
    %c0_26 = arith.constant 0 : index
    %c0_27 = arith.constant 0 : index
    %83 = vector.load %arg8[%c0_26, %c0_27] : memref<1x32xf32, #tpu.memory_space<vmem>>, vector<1x32xf32>
    %84 = vector.shape_cast %81 : vector<2x16x64xf32> to vector<32x64xf32>
    %cst_28 = arith.constant dense<0.000000e+00> : vector<32x32xf32>
    %85 = tpu.matmul %84, %82, %cst_28 {dimension_numbers = #tpu.dot_dimension_numbers<[1], [0], [0], [1], [0, 0, 1, 1], [], []>} : vector<32x64xf32>, vector<64x32xf32>, vector<32x32xf32> -> vector<32x32xf32>
    %86 = vector.broadcast %83 : vector<1x32xf32> to vector<32x32xf32>
    %87 = arith.addf %85, %86 : vector<32x32xf32>
    %88 = vector.shape_cast %87 : vector<32x32xf32> to vector<2x16x32xf32>
    %c0_29 = arith.constant 0 : index
    %c0_30 = arith.constant 0 : index
    %89 = vector.load %arg9[%c0_29, %c0_30] : memref<640x32xf32, #tpu.memory_space<vmem>>, vector<640x32xf32>
    %c0_31 = arith.constant 0 : index
    %c0_32 = arith.constant 0 : index
    %90 = vector.load %arg10[%c0_31, %c0_32] : memref<1x32xf32, #tpu.memory_space<vmem>>, vector<1x32xf32>
    %cst_33 = arith.constant 0.000000e+00 : f32
    %91 = vector.broadcast %cst_33 : f32 to vector<2x4x64xf32>
    %cst_34 = arith.constant 0.000000e+00 : f32
    %92 = vector.broadcast %cst_34 : f32 to vector<2x5x64xf32>
    %93 = tpu.concatenate %91, %79, %92 in 1 : vector<2x4x64xf32>, vector<2x32x64xf32>, vector<2x5x64xf32> -> vector<2x41x64xf32>
    %94 = vector.extract_strided_slice %93 {offsets = [0, 0, 0], sizes = [2, 32, 64], strides = [1, 1, 1]} : vector<2x41x64xf32> to vector<2x32x64xf32>
    %95 = vector.extract_strided_slice %93 {offsets = [0, 1, 0], sizes = [2, 32, 64], strides = [1, 1, 1]} : vector<2x41x64xf32> to vector<2x32x64xf32>
    %96 = vector.extract_strided_slice %93 {offsets = [0, 2, 0], sizes = [2, 32, 64], strides = [1, 1, 1]} : vector<2x41x64xf32> to vector<2x32x64xf32>
    %97 = vector.extract_strided_slice %93 {offsets = [0, 3, 0], sizes = [2, 32, 64], strides = [1, 1, 1]} : vector<2x41x64xf32> to vector<2x32x64xf32>
    %98 = vector.extract_strided_slice %93 {offsets = [0, 4, 0], sizes = [2, 32, 64], strides = [1, 1, 1]} : vector<2x41x64xf32> to vector<2x32x64xf32>
    %99 = vector.extract_strided_slice %93 {offsets = [0, 5, 0], sizes = [2, 32, 64], strides = [1, 1, 1]} : vector<2x41x64xf32> to vector<2x32x64xf32>
    %100 = vector.extract_strided_slice %93 {offsets = [0, 6, 0], sizes = [2, 32, 64], strides = [1, 1, 1]} : vector<2x41x64xf32> to vector<2x32x64xf32>
    %101 = vector.extract_strided_slice %93 {offsets = [0, 7, 0], sizes = [2, 32, 64], strides = [1, 1, 1]} : vector<2x41x64xf32> to vector<2x32x64xf32>
    %102 = vector.extract_strided_slice %93 {offsets = [0, 8, 0], sizes = [2, 32, 64], strides = [1, 1, 1]} : vector<2x41x64xf32> to vector<2x32x64xf32>
    %103 = vector.extract_strided_slice %93 {offsets = [0, 9, 0], sizes = [2, 32, 64], strides = [1, 1, 1]} : vector<2x41x64xf32> to vector<2x32x64xf32>
    %104 = tpu.concatenate %94, %95, %96, %97, %98, %99, %100, %101, %102, %103 in 2 : vector<2x32x64xf32>, vector<2x32x64xf32>, vector<2x32x64xf32>, vector<2x32x64xf32>, vector<2x32x64xf32>, vector<2x32x64xf32>, vector<2x32x64xf32>, vector<2x32x64xf32>, vector<2x32x64xf32>, vector<2x32x64xf32> -> vector<2x32x640xf32>
    %105 = vector.shape_cast %104 : vector<2x32x640xf32> to vector<64x640xf32>
    %cst_35 = arith.constant dense<0.000000e+00> : vector<64x32xf32>
    %106 = tpu.matmul %105, %89, %cst_35 {dimension_numbers = #tpu.dot_dimension_numbers<[1], [0], [0], [1], [0, 0, 1, 1], [], []>} : vector<64x640xf32>, vector<640x32xf32>, vector<64x32xf32> -> vector<64x32xf32>
    %107 = vector.broadcast %90 : vector<1x32xf32> to vector<64x32xf32>
    %108 = arith.addf %106, %107 : vector<64x32xf32>
    %cst_36 = arith.constant 0.000000e+00 : f32
    %109 = vector.broadcast %cst_36 : f32 to vector<64x32xf32>
    %110 = arith.maximumf %108, %109 : vector<64x32xf32>
    %111 = vector.shape_cast %110 : vector<64x32xf32> to vector<2x32x32xf32>
    %c0_37 = arith.constant 0 : index
    %c0_38 = arith.constant 0 : index
    %112 = vector.load %arg11[%c0_37, %c0_38] : memref<320x32xf32, #tpu.memory_space<vmem>>, vector<320x32xf32>
    %c0_39 = arith.constant 0 : index
    %c0_40 = arith.constant 0 : index
    %113 = vector.load %arg12[%c0_39, %c0_40] : memref<1x32xf32, #tpu.memory_space<vmem>>, vector<1x32xf32>
    %cst_41 = arith.constant 0.000000e+00 : f32
    %114 = vector.broadcast %cst_41 : f32 to vector<2x4x32xf32>
    %cst_42 = arith.constant 0.000000e+00 : f32
    %115 = vector.broadcast %cst_42 : f32 to vector<2x5x32xf32>
    %116 = tpu.concatenate %114, %111, %115 in 1 : vector<2x4x32xf32>, vector<2x32x32xf32>, vector<2x5x32xf32> -> vector<2x41x32xf32>
    %117 = vector.extract_strided_slice %116 {offsets = [0, 0, 0], sizes = [2, 32, 32], strides = [1, 1, 1]} : vector<2x41x32xf32> to vector<2x32x32xf32>
    %118 = vector.extract_strided_slice %116 {offsets = [0, 1, 0], sizes = [2, 32, 32], strides = [1, 1, 1]} : vector<2x41x32xf32> to vector<2x32x32xf32>
    %119 = vector.extract_strided_slice %116 {offsets = [0, 2, 0], sizes = [2, 32, 32], strides = [1, 1, 1]} : vector<2x41x32xf32> to vector<2x32x32xf32>
    %120 = vector.extract_strided_slice %116 {offsets = [0, 3, 0], sizes = [2, 32, 32], strides = [1, 1, 1]} : vector<2x41x32xf32> to vector<2x32x32xf32>
    %121 = vector.extract_strided_slice %116 {offsets = [0, 4, 0], sizes = [2, 32, 32], strides = [1, 1, 1]} : vector<2x41x32xf32> to vector<2x32x32xf32>
    %122 = vector.extract_strided_slice %116 {offsets = [0, 5, 0], sizes = [2, 32, 32], strides = [1, 1, 1]} : vector<2x41x32xf32> to vector<2x32x32xf32>
    %123 = vector.extract_strided_slice %116 {offsets = [0, 6, 0], sizes = [2, 32, 32], strides = [1, 1, 1]} : vector<2x41x32xf32> to vector<2x32x32xf32>
    %124 = vector.extract_strided_slice %116 {offsets = [0, 7, 0], sizes = [2, 32, 32], strides = [1, 1, 1]} : vector<2x41x32xf32> to vector<2x32x32xf32>
    %125 = vector.extract_strided_slice %116 {offsets = [0, 8, 0], sizes = [2, 32, 32], strides = [1, 1, 1]} : vector<2x41x32xf32> to vector<2x32x32xf32>
    %126 = vector.extract_strided_slice %116 {offsets = [0, 9, 0], sizes = [2, 32, 32], strides = [1, 1, 1]} : vector<2x41x32xf32> to vector<2x32x32xf32>
    %127 = tpu.concatenate %117, %118, %119, %120, %121, %122, %123, %124, %125, %126 in 2 : vector<2x32x32xf32>, vector<2x32x32xf32>, vector<2x32x32xf32>, vector<2x32x32xf32>, vector<2x32x32xf32>, vector<2x32x32xf32>, vector<2x32x32xf32>, vector<2x32x32xf32>, vector<2x32x32xf32>, vector<2x32x32xf32> -> vector<2x32x320xf32>
    %128 = vector.shape_cast %127 : vector<2x32x320xf32> to vector<64x320xf32>
    %cst_43 = arith.constant dense<0.000000e+00> : vector<64x32xf32>
    %129 = tpu.matmul %128, %112, %cst_43 {dimension_numbers = #tpu.dot_dimension_numbers<[1], [0], [0], [1], [0, 0, 1, 1], [], []>} : vector<64x320xf32>, vector<320x32xf32>, vector<64x32xf32> -> vector<64x32xf32>
    %130 = vector.broadcast %113 : vector<1x32xf32> to vector<64x32xf32>
    %131 = arith.addf %129, %130 : vector<64x32xf32>
    %cst_44 = arith.constant 0.000000e+00 : f32
    %132 = vector.broadcast %cst_44 : f32 to vector<64x32xf32>
    %133 = arith.maximumf %131, %132 : vector<64x32xf32>
    %134 = vector.shape_cast %133 : vector<64x32xf32> to vector<2x32x32xf32>
    %135 = vector.shape_cast %134 : vector<2x32x32xf32> to vector<2x16x2x32xf32>
    %cst_45 = arith.constant dense<0xFF800000> : vector<2x16x32xf32>
    %136 = vector.multi_reduction <maximumf>, %135, %cst_45 [2] : vector<2x16x2x32xf32> to vector<2x16x32xf32>
    %c0_46 = arith.constant 0 : index
    %c0_47 = arith.constant 0 : index
    %137 = vector.load %arg13[%c0_46, %c0_47] : memref<1x32xf32, #tpu.memory_space<vmem>>, vector<1x32xf32>
    %138 = vector.shape_cast %137 : vector<1x32xf32> to vector<1x1x32xf32>
    %139 = vector.broadcast %138 : vector<1x1x32xf32> to vector<2x16x32xf32>
    %140 = arith.mulf %136, %139 : vector<2x16x32xf32>
    %c0_48 = arith.constant 0 : index
    %c0_49 = arith.constant 0 : index
    %141 = vector.load %arg14[%c0_48, %c0_49] : memref<1x32xf32, #tpu.memory_space<vmem>>, vector<1x32xf32>
    %142 = vector.shape_cast %141 : vector<1x32xf32> to vector<1x1x32xf32>
    %143 = vector.broadcast %142 : vector<1x1x32xf32> to vector<2x16x32xf32>
    %144 = arith.addf %140, %143 : vector<2x16x32xf32>
    %145 = arith.addf %144, %88 : vector<2x16x32xf32>
    %146 = vector.shape_cast %145 : vector<2x16x32xf32> to vector<2x8x2x32xf32>
    %cst_50 = arith.constant dense<0xFF800000> : vector<2x8x32xf32>
    %147 = vector.multi_reduction <maximumf>, %146, %cst_50 [2] : vector<2x8x2x32xf32> to vector<2x8x32xf32>
    %c0_51 = arith.constant 0 : index
    %c0_52 = arith.constant 0 : index
    %148 = vector.load %arg15[%c0_51, %c0_52] : memref<32x32xf32, #tpu.memory_space<vmem>>, vector<32x32xf32>
    %c0_53 = arith.constant 0 : index
    %c0_54 = arith.constant 0 : index
    %149 = vector.load %arg16[%c0_53, %c0_54] : memref<1x32xf32, #tpu.memory_space<vmem>>, vector<1x32xf32>
    %150 = vector.shape_cast %147 : vector<2x8x32xf32> to vector<16x32xf32>
    %cst_55 = arith.constant dense<0.000000e+00> : vector<16x32xf32>
    %151 = tpu.matmul %150, %148, %cst_55 {dimension_numbers = #tpu.dot_dimension_numbers<[1], [0], [0], [1], [0, 0, 1, 1], [], []>} : vector<16x32xf32>, vector<32x32xf32>, vector<16x32xf32> -> vector<16x32xf32>
    %152 = vector.broadcast %149 : vector<1x32xf32> to vector<16x32xf32>
    %153 = arith.addf %151, %152 : vector<16x32xf32>
    %154 = vector.shape_cast %153 : vector<16x32xf32> to vector<2x8x32xf32>
    %c0_56 = arith.constant 0 : index
    %c0_57 = arith.constant 0 : index
    %155 = vector.load %arg17[%c0_56, %c0_57] : memref<320x32xf32, #tpu.memory_space<vmem>>, vector<320x32xf32>
    %c0_58 = arith.constant 0 : index
    %c0_59 = arith.constant 0 : index
    %156 = vector.load %arg18[%c0_58, %c0_59] : memref<1x32xf32, #tpu.memory_space<vmem>>, vector<1x32xf32>
    %cst_60 = arith.constant 0.000000e+00 : f32
    %157 = vector.broadcast %cst_60 : f32 to vector<2x4x32xf32>
    %cst_61 = arith.constant 0.000000e+00 : f32
    %158 = vector.broadcast %cst_61 : f32 to vector<2x5x32xf32>
    %159 = tpu.concatenate %157, %145, %158 in 1 : vector<2x4x32xf32>, vector<2x16x32xf32>, vector<2x5x32xf32> -> vector<2x25x32xf32>
    %160 = vector.extract_strided_slice %159 {offsets = [0, 0, 0], sizes = [2, 16, 32], strides = [1, 1, 1]} : vector<2x25x32xf32> to vector<2x16x32xf32>
    %161 = vector.extract_strided_slice %159 {offsets = [0, 1, 0], sizes = [2, 16, 32], strides = [1, 1, 1]} : vector<2x25x32xf32> to vector<2x16x32xf32>
    %162 = vector.extract_strided_slice %159 {offsets = [0, 2, 0], sizes = [2, 16, 32], strides = [1, 1, 1]} : vector<2x25x32xf32> to vector<2x16x32xf32>
    %163 = vector.extract_strided_slice %159 {offsets = [0, 3, 0], sizes = [2, 16, 32], strides = [1, 1, 1]} : vector<2x25x32xf32> to vector<2x16x32xf32>
    %164 = vector.extract_strided_slice %159 {offsets = [0, 4, 0], sizes = [2, 16, 32], strides = [1, 1, 1]} : vector<2x25x32xf32> to vector<2x16x32xf32>
    %165 = vector.extract_strided_slice %159 {offsets = [0, 5, 0], sizes = [2, 16, 32], strides = [1, 1, 1]} : vector<2x25x32xf32> to vector<2x16x32xf32>
    %166 = vector.extract_strided_slice %159 {offsets = [0, 6, 0], sizes = [2, 16, 32], strides = [1, 1, 1]} : vector<2x25x32xf32> to vector<2x16x32xf32>
    %167 = vector.extract_strided_slice %159 {offsets = [0, 7, 0], sizes = [2, 16, 32], strides = [1, 1, 1]} : vector<2x25x32xf32> to vector<2x16x32xf32>
    %168 = vector.extract_strided_slice %159 {offsets = [0, 8, 0], sizes = [2, 16, 32], strides = [1, 1, 1]} : vector<2x25x32xf32> to vector<2x16x32xf32>
    %169 = vector.extract_strided_slice %159 {offsets = [0, 9, 0], sizes = [2, 16, 32], strides = [1, 1, 1]} : vector<2x25x32xf32> to vector<2x16x32xf32>
    %170 = tpu.concatenate %160, %161, %162, %163, %164, %165, %166, %167, %168, %169 in 2 : vector<2x16x32xf32>, vector<2x16x32xf32>, vector<2x16x32xf32>, vector<2x16x32xf32>, vector<2x16x32xf32>, vector<2x16x32xf32>, vector<2x16x32xf32>, vector<2x16x32xf32>, vector<2x16x32xf32>, vector<2x16x32xf32> -> vector<2x16x320xf32>
    %171 = vector.shape_cast %170 : vector<2x16x320xf32> to vector<32x320xf32>
    %cst_62 = arith.constant dense<0.000000e+00> : vector<32x32xf32>
    %172 = tpu.matmul %171, %155, %cst_62 {dimension_numbers = #tpu.dot_dimension_numbers<[1], [0], [0], [1], [0, 0, 1, 1], [], []>} : vector<32x320xf32>, vector<320x32xf32>, vector<32x32xf32> -> vector<32x32xf32>
    %173 = vector.broadcast %156 : vector<1x32xf32> to vector<32x32xf32>
    %174 = arith.addf %172, %173 : vector<32x32xf32>
    %cst_63 = arith.constant 0.000000e+00 : f32
    %175 = vector.broadcast %cst_63 : f32 to vector<32x32xf32>
    %176 = arith.maximumf %174, %175 : vector<32x32xf32>
    %177 = vector.shape_cast %176 : vector<32x32xf32> to vector<2x16x32xf32>
    %c0_64 = arith.constant 0 : index
    %c0_65 = arith.constant 0 : index
    %178 = vector.load %arg19[%c0_64, %c0_65] : memref<320x32xf32, #tpu.memory_space<vmem>>, vector<320x32xf32>
    %c0_66 = arith.constant 0 : index
    %c0_67 = arith.constant 0 : index
    %179 = vector.load %arg20[%c0_66, %c0_67] : memref<1x32xf32, #tpu.memory_space<vmem>>, vector<1x32xf32>
    %cst_68 = arith.constant 0.000000e+00 : f32
    %180 = vector.broadcast %cst_68 : f32 to vector<2x4x32xf32>
    %cst_69 = arith.constant 0.000000e+00 : f32
    %181 = vector.broadcast %cst_69 : f32 to vector<2x5x32xf32>
    %182 = tpu.concatenate %180, %177, %181 in 1 : vector<2x4x32xf32>, vector<2x16x32xf32>, vector<2x5x32xf32> -> vector<2x25x32xf32>
    %183 = vector.extract_strided_slice %182 {offsets = [0, 0, 0], sizes = [2, 16, 32], strides = [1, 1, 1]} : vector<2x25x32xf32> to vector<2x16x32xf32>
    %184 = vector.extract_strided_slice %182 {offsets = [0, 1, 0], sizes = [2, 16, 32], strides = [1, 1, 1]} : vector<2x25x32xf32> to vector<2x16x32xf32>
    %185 = vector.extract_strided_slice %182 {offsets = [0, 2, 0], sizes = [2, 16, 32], strides = [1, 1, 1]} : vector<2x25x32xf32> to vector<2x16x32xf32>
    %186 = vector.extract_strided_slice %182 {offsets = [0, 3, 0], sizes = [2, 16, 32], strides = [1, 1, 1]} : vector<2x25x32xf32> to vector<2x16x32xf32>
    %187 = vector.extract_strided_slice %182 {offsets = [0, 4, 0], sizes = [2, 16, 32], strides = [1, 1, 1]} : vector<2x25x32xf32> to vector<2x16x32xf32>
    %188 = vector.extract_strided_slice %182 {offsets = [0, 5, 0], sizes = [2, 16, 32], strides = [1, 1, 1]} : vector<2x25x32xf32> to vector<2x16x32xf32>
    %189 = vector.extract_strided_slice %182 {offsets = [0, 6, 0], sizes = [2, 16, 32], strides = [1, 1, 1]} : vector<2x25x32xf32> to vector<2x16x32xf32>
    %190 = vector.extract_strided_slice %182 {offsets = [0, 7, 0], sizes = [2, 16, 32], strides = [1, 1, 1]} : vector<2x25x32xf32> to vector<2x16x32xf32>
    %191 = vector.extract_strided_slice %182 {offsets = [0, 8, 0], sizes = [2, 16, 32], strides = [1, 1, 1]} : vector<2x25x32xf32> to vector<2x16x32xf32>
    %192 = vector.extract_strided_slice %182 {offsets = [0, 9, 0], sizes = [2, 16, 32], strides = [1, 1, 1]} : vector<2x25x32xf32> to vector<2x16x32xf32>
    %193 = tpu.concatenate %183, %184, %185, %186, %187, %188, %189, %190, %191, %192 in 2 : vector<2x16x32xf32>, vector<2x16x32xf32>, vector<2x16x32xf32>, vector<2x16x32xf32>, vector<2x16x32xf32>, vector<2x16x32xf32>, vector<2x16x32xf32>, vector<2x16x32xf32>, vector<2x16x32xf32>, vector<2x16x32xf32> -> vector<2x16x320xf32>
    %194 = vector.shape_cast %193 : vector<2x16x320xf32> to vector<32x320xf32>
    %cst_70 = arith.constant dense<0.000000e+00> : vector<32x32xf32>
    %195 = tpu.matmul %194, %178, %cst_70 {dimension_numbers = #tpu.dot_dimension_numbers<[1], [0], [0], [1], [0, 0, 1, 1], [], []>} : vector<32x320xf32>, vector<320x32xf32>, vector<32x32xf32> -> vector<32x32xf32>
    %196 = vector.broadcast %179 : vector<1x32xf32> to vector<32x32xf32>
    %197 = arith.addf %195, %196 : vector<32x32xf32>
    %cst_71 = arith.constant 0.000000e+00 : f32
    %198 = vector.broadcast %cst_71 : f32 to vector<32x32xf32>
    %199 = arith.maximumf %197, %198 : vector<32x32xf32>
    %200 = vector.shape_cast %199 : vector<32x32xf32> to vector<2x16x32xf32>
    %201 = vector.shape_cast %200 : vector<2x16x32xf32> to vector<2x8x2x32xf32>
    %cst_72 = arith.constant dense<0xFF800000> : vector<2x8x32xf32>
    %202 = vector.multi_reduction <maximumf>, %201, %cst_72 [2] : vector<2x8x2x32xf32> to vector<2x8x32xf32>
    %c0_73 = arith.constant 0 : index
    %c0_74 = arith.constant 0 : index
    %203 = vector.load %arg21[%c0_73, %c0_74] : memref<1x32xf32, #tpu.memory_space<vmem>>, vector<1x32xf32>
    %204 = vector.shape_cast %203 : vector<1x32xf32> to vector<1x1x32xf32>
    %205 = vector.broadcast %204 : vector<1x1x32xf32> to vector<2x8x32xf32>
    %206 = arith.mulf %202, %205 : vector<2x8x32xf32>
    %c0_75 = arith.constant 0 : index
    %c0_76 = arith.constant 0 : index
    %207 = vector.load %arg22[%c0_75, %c0_76] : memref<1x32xf32, #tpu.memory_space<vmem>>, vector<1x32xf32>
    %208 = vector.shape_cast %207 : vector<1x32xf32> to vector<1x1x32xf32>
    %209 = vector.broadcast %208 : vector<1x1x32xf32> to vector<2x8x32xf32>
    %210 = arith.addf %206, %209 : vector<2x8x32xf32>
    %211 = arith.addf %210, %154 : vector<2x8x32xf32>
    %212 = vector.shape_cast %211 : vector<2x8x32xf32> to vector<16x32xf32>
    %c0_77 = arith.constant 0 : index
    %c0_78 = arith.constant 0 : index
    %213 = vector.load %arg23[%c0_77, %c0_78] : memref<32x512xf32, #tpu.memory_space<vmem>>, vector<32x512xf32>
    %cst_79 = arith.constant dense<0.000000e+00> : vector<16x512xf32>
    %214 = tpu.matmul %212, %213, %cst_79 {dimension_numbers = #tpu.dot_dimension_numbers<[1], [0], [0], [1], [0, 0, 1, 1], [], []>} : vector<16x32xf32>, vector<32x512xf32>, vector<16x512xf32> -> vector<16x512xf32>
    %c0_80 = arith.constant 0 : index
    %c0_81 = arith.constant 0 : index
    %215 = vector.load %arg25[%c0_80, %c0_81] : memref<1x512xf32, #tpu.memory_space<vmem>>, vector<1x512xf32>
    %216 = vector.broadcast %215 : vector<1x512xf32> to vector<16x512xf32>
    %217 = arith.addf %214, %216 : vector<16x512xf32>
    %218 = vector.shape_cast %217 : vector<16x512xf32> to vector<2x8x512xf32>
    %c0_82 = arith.constant 0 : index
    %c0_83 = arith.constant 0 : index
    %219 = vector.load %arg24[%c0_82, %c0_83] : memref<128x512xf32, #tpu.memory_space<vmem>>, vector<128x512xf32>
    %cst_84 = arith.constant 0.000000e+00 : f32
    %220 = vector.broadcast %cst_84 : f32 to vector<2x128xf32>
    %cst_85 = arith.constant 0.000000e+00 : f32
    %221 = vector.broadcast %cst_85 : f32 to vector<2x64xf32>
    %cst_86 = arith.constant 0.000000e+00 : f32
    %222 = vector.broadcast %cst_86 : f32 to vector<2x64xf32>
    %cst_87 = arith.constant 0.000000e+00 : f32
    %223 = vector.broadcast %cst_87 : f32 to vector<2x64xf32>
    %cst_88 = arith.constant 0.000000e+00 : f32
    %224 = vector.broadcast %cst_88 : f32 to vector<2x64xf32>
    %cst_89 = arith.constant dense<0.000000e+00> : vector<2x512xf32>
    %225 = tpu.matmul %220, %219, %cst_89 {dimension_numbers = #tpu.dot_dimension_numbers<[1], [0], [0], [1], [0, 0, 1, 1], [], []>} : vector<2x128xf32>, vector<128x512xf32>, vector<2x512xf32> -> vector<2x512xf32>
    %226 = vector.extract_strided_slice %225 {offsets = [0, 0], sizes = [2, 256], strides = [1, 1]} : vector<2x512xf32> to vector<2x256xf32>
    %227 = vector.extract_strided_slice %218 {offsets = [0, 0, 0], sizes = [2, 1, 256], strides = [1, 1, 1]} : vector<2x8x512xf32> to vector<2x1x256xf32>
    %228 = vector.shape_cast %227 : vector<2x1x256xf32> to vector<2x256xf32>
    %229 = arith.addf %226, %228 : vector<2x256xf32>
    %230 = vector.extract_strided_slice %225 {offsets = [0, 256], sizes = [2, 256], strides = [1, 1]} : vector<2x512xf32> to vector<2x256xf32>
    %231 = vector.extract_strided_slice %218 {offsets = [0, 7, 256], sizes = [2, 1, 256], strides = [1, 1, 1]} : vector<2x8x512xf32> to vector<2x1x256xf32>
    %232 = vector.shape_cast %231 : vector<2x1x256xf32> to vector<2x256xf32>
    %233 = arith.addf %230, %232 : vector<2x256xf32>
    %234 = vector.extract_strided_slice %229 {offsets = [0, 0], sizes = [2, 192], strides = [1, 1]} : vector<2x256xf32> to vector<2x192xf32>
    %235 = arith.negf %234 : vector<2x192xf32>
    %236 = math.exp %235 : vector<2x192xf32>
    %cst_90 = arith.constant 1.000000e+00 : f32
    %237 = vector.broadcast %cst_90 : f32 to vector<2x192xf32>
    %238 = arith.addf %237, %236 : vector<2x192xf32>
    %239 = arith.divf %237, %238 : vector<2x192xf32>
    %240 = vector.extract_strided_slice %229 {offsets = [0, 192], sizes = [2, 64], strides = [1, 1]} : vector<2x256xf32> to vector<2x64xf32>
    %241 = math.tanh %240 : vector<2x64xf32>
    %242 = vector.extract_strided_slice %239 {offsets = [0, 64], sizes = [2, 64], strides = [1, 1]} : vector<2x192xf32> to vector<2x64xf32>
    %243 = arith.mulf %242, %221 : vector<2x64xf32>
    %244 = vector.extract_strided_slice %239 {offsets = [0, 0], sizes = [2, 64], strides = [1, 1]} : vector<2x192xf32> to vector<2x64xf32>
    %245 = arith.mulf %244, %241 : vector<2x64xf32>
    %246 = arith.addf %243, %245 : vector<2x64xf32>
    %247 = vector.extract_strided_slice %239 {offsets = [0, 128], sizes = [2, 64], strides = [1, 1]} : vector<2x192xf32> to vector<2x64xf32>
    %248 = math.tanh %246 : vector<2x64xf32>
    %249 = arith.mulf %247, %248 : vector<2x64xf32>
    %250 = vector.extract_strided_slice %233 {offsets = [0, 0], sizes = [2, 192], strides = [1, 1]} : vector<2x256xf32> to vector<2x192xf32>
    %251 = arith.negf %250 : vector<2x192xf32>
    %252 = math.exp %251 : vector<2x192xf32>
    %cst_91 = arith.constant 1.000000e+00 : f32
    %253 = vector.broadcast %cst_91 : f32 to vector<2x192xf32>
    %254 = arith.addf %253, %252 : vector<2x192xf32>
    %255 = arith.divf %253, %254 : vector<2x192xf32>
    %256 = vector.extract_strided_slice %233 {offsets = [0, 192], sizes = [2, 64], strides = [1, 1]} : vector<2x256xf32> to vector<2x64xf32>
    %257 = math.tanh %256 : vector<2x64xf32>
    %258 = vector.extract_strided_slice %255 {offsets = [0, 64], sizes = [2, 64], strides = [1, 1]} : vector<2x192xf32> to vector<2x64xf32>
    %259 = arith.mulf %258, %222 : vector<2x64xf32>
    %260 = vector.extract_strided_slice %255 {offsets = [0, 0], sizes = [2, 64], strides = [1, 1]} : vector<2x192xf32> to vector<2x64xf32>
    %261 = arith.mulf %260, %257 : vector<2x64xf32>
    %262 = arith.addf %259, %261 : vector<2x64xf32>
    %263 = vector.extract_strided_slice %255 {offsets = [0, 128], sizes = [2, 64], strides = [1, 1]} : vector<2x192xf32> to vector<2x64xf32>
    %264 = math.tanh %262 : vector<2x64xf32>
    %265 = arith.mulf %263, %264 : vector<2x64xf32>
    %266 = tpu.concatenate %249, %265 in 1 : vector<2x64xf32>, vector<2x64xf32> -> vector<2x128xf32>
    %267 = arith.addf %223, %249 : vector<2x64xf32>
    %268 = arith.addf %224, %265 : vector<2x64xf32>
    %cst_92 = arith.constant dense<0.000000e+00> : vector<2x512xf32>
    %269 = tpu.matmul %266, %219, %cst_92 {dimension_numbers = #tpu.dot_dimension_numbers<[1], [0], [0], [1], [0, 0, 1, 1], [], []>} : vector<2x128xf32>, vector<128x512xf32>, vector<2x512xf32> -> vector<2x512xf32>
    %270 = vector.extract_strided_slice %269 {offsets = [0, 0], sizes = [2, 256], strides = [1, 1]} : vector<2x512xf32> to vector<2x256xf32>
    %271 = vector.extract_strided_slice %218 {offsets = [0, 1, 0], sizes = [2, 1, 256], strides = [1, 1, 1]} : vector<2x8x512xf32> to vector<2x1x256xf32>
    %272 = vector.shape_cast %271 : vector<2x1x256xf32> to vector<2x256xf32>
    %273 = arith.addf %270, %272 : vector<2x256xf32>
    %274 = vector.extract_strided_slice %269 {offsets = [0, 256], sizes = [2, 256], strides = [1, 1]} : vector<2x512xf32> to vector<2x256xf32>
    %275 = vector.extract_strided_slice %218 {offsets = [0, 6, 256], sizes = [2, 1, 256], strides = [1, 1, 1]} : vector<2x8x512xf32> to vector<2x1x256xf32>
    %276 = vector.shape_cast %275 : vector<2x1x256xf32> to vector<2x256xf32>
    %277 = arith.addf %274, %276 : vector<2x256xf32>
    %278 = vector.extract_strided_slice %273 {offsets = [0, 0], sizes = [2, 192], strides = [1, 1]} : vector<2x256xf32> to vector<2x192xf32>
    %279 = arith.negf %278 : vector<2x192xf32>
    %280 = math.exp %279 : vector<2x192xf32>
    %cst_93 = arith.constant 1.000000e+00 : f32
    %281 = vector.broadcast %cst_93 : f32 to vector<2x192xf32>
    %282 = arith.addf %281, %280 : vector<2x192xf32>
    %283 = arith.divf %281, %282 : vector<2x192xf32>
    %284 = vector.extract_strided_slice %273 {offsets = [0, 192], sizes = [2, 64], strides = [1, 1]} : vector<2x256xf32> to vector<2x64xf32>
    %285 = math.tanh %284 : vector<2x64xf32>
    %286 = vector.extract_strided_slice %283 {offsets = [0, 64], sizes = [2, 64], strides = [1, 1]} : vector<2x192xf32> to vector<2x64xf32>
    %287 = arith.mulf %286, %246 : vector<2x64xf32>
    %288 = vector.extract_strided_slice %283 {offsets = [0, 0], sizes = [2, 64], strides = [1, 1]} : vector<2x192xf32> to vector<2x64xf32>
    %289 = arith.mulf %288, %285 : vector<2x64xf32>
    %290 = arith.addf %287, %289 : vector<2x64xf32>
    %291 = vector.extract_strided_slice %283 {offsets = [0, 128], sizes = [2, 64], strides = [1, 1]} : vector<2x192xf32> to vector<2x64xf32>
    %292 = math.tanh %290 : vector<2x64xf32>
    %293 = arith.mulf %291, %292 : vector<2x64xf32>
    %294 = vector.extract_strided_slice %277 {offsets = [0, 0], sizes = [2, 192], strides = [1, 1]} : vector<2x256xf32> to vector<2x192xf32>
    %295 = arith.negf %294 : vector<2x192xf32>
    %296 = math.exp %295 : vector<2x192xf32>
    %cst_94 = arith.constant 1.000000e+00 : f32
    %297 = vector.broadcast %cst_94 : f32 to vector<2x192xf32>
    %298 = arith.addf %297, %296 : vector<2x192xf32>
    %299 = arith.divf %297, %298 : vector<2x192xf32>
    %300 = vector.extract_strided_slice %277 {offsets = [0, 192], sizes = [2, 64], strides = [1, 1]} : vector<2x256xf32> to vector<2x64xf32>
    %301 = math.tanh %300 : vector<2x64xf32>
    %302 = vector.extract_strided_slice %299 {offsets = [0, 64], sizes = [2, 64], strides = [1, 1]} : vector<2x192xf32> to vector<2x64xf32>
    %303 = arith.mulf %302, %262 : vector<2x64xf32>
    %304 = vector.extract_strided_slice %299 {offsets = [0, 0], sizes = [2, 64], strides = [1, 1]} : vector<2x192xf32> to vector<2x64xf32>
    %305 = arith.mulf %304, %301 : vector<2x64xf32>
    %306 = arith.addf %303, %305 : vector<2x64xf32>
    %307 = vector.extract_strided_slice %299 {offsets = [0, 128], sizes = [2, 64], strides = [1, 1]} : vector<2x192xf32> to vector<2x64xf32>
    %308 = math.tanh %306 : vector<2x64xf32>
    %309 = arith.mulf %307, %308 : vector<2x64xf32>
    %310 = tpu.concatenate %293, %309 in 1 : vector<2x64xf32>, vector<2x64xf32> -> vector<2x128xf32>
    %311 = arith.addf %267, %293 : vector<2x64xf32>
    %312 = arith.addf %268, %309 : vector<2x64xf32>
    %cst_95 = arith.constant dense<0.000000e+00> : vector<2x512xf32>
    %313 = tpu.matmul %310, %219, %cst_95 {dimension_numbers = #tpu.dot_dimension_numbers<[1], [0], [0], [1], [0, 0, 1, 1], [], []>} : vector<2x128xf32>, vector<128x512xf32>, vector<2x512xf32> -> vector<2x512xf32>
    %314 = vector.extract_strided_slice %313 {offsets = [0, 0], sizes = [2, 256], strides = [1, 1]} : vector<2x512xf32> to vector<2x256xf32>
    %315 = vector.extract_strided_slice %218 {offsets = [0, 2, 0], sizes = [2, 1, 256], strides = [1, 1, 1]} : vector<2x8x512xf32> to vector<2x1x256xf32>
    %316 = vector.shape_cast %315 : vector<2x1x256xf32> to vector<2x256xf32>
    %317 = arith.addf %314, %316 : vector<2x256xf32>
    %318 = vector.extract_strided_slice %313 {offsets = [0, 256], sizes = [2, 256], strides = [1, 1]} : vector<2x512xf32> to vector<2x256xf32>
    %319 = vector.extract_strided_slice %218 {offsets = [0, 5, 256], sizes = [2, 1, 256], strides = [1, 1, 1]} : vector<2x8x512xf32> to vector<2x1x256xf32>
    %320 = vector.shape_cast %319 : vector<2x1x256xf32> to vector<2x256xf32>
    %321 = arith.addf %318, %320 : vector<2x256xf32>
    %322 = vector.extract_strided_slice %317 {offsets = [0, 0], sizes = [2, 192], strides = [1, 1]} : vector<2x256xf32> to vector<2x192xf32>
    %323 = arith.negf %322 : vector<2x192xf32>
    %324 = math.exp %323 : vector<2x192xf32>
    %cst_96 = arith.constant 1.000000e+00 : f32
    %325 = vector.broadcast %cst_96 : f32 to vector<2x192xf32>
    %326 = arith.addf %325, %324 : vector<2x192xf32>
    %327 = arith.divf %325, %326 : vector<2x192xf32>
    %328 = vector.extract_strided_slice %317 {offsets = [0, 192], sizes = [2, 64], strides = [1, 1]} : vector<2x256xf32> to vector<2x64xf32>
    %329 = math.tanh %328 : vector<2x64xf32>
    %330 = vector.extract_strided_slice %327 {offsets = [0, 64], sizes = [2, 64], strides = [1, 1]} : vector<2x192xf32> to vector<2x64xf32>
    %331 = arith.mulf %330, %290 : vector<2x64xf32>
    %332 = vector.extract_strided_slice %327 {offsets = [0, 0], sizes = [2, 64], strides = [1, 1]} : vector<2x192xf32> to vector<2x64xf32>
    %333 = arith.mulf %332, %329 : vector<2x64xf32>
    %334 = arith.addf %331, %333 : vector<2x64xf32>
    %335 = vector.extract_strided_slice %327 {offsets = [0, 128], sizes = [2, 64], strides = [1, 1]} : vector<2x192xf32> to vector<2x64xf32>
    %336 = math.tanh %334 : vector<2x64xf32>
    %337 = arith.mulf %335, %336 : vector<2x64xf32>
    %338 = vector.extract_strided_slice %321 {offsets = [0, 0], sizes = [2, 192], strides = [1, 1]} : vector<2x256xf32> to vector<2x192xf32>
    %339 = arith.negf %338 : vector<2x192xf32>
    %340 = math.exp %339 : vector<2x192xf32>
    %cst_97 = arith.constant 1.000000e+00 : f32
    %341 = vector.broadcast %cst_97 : f32 to vector<2x192xf32>
    %342 = arith.addf %341, %340 : vector<2x192xf32>
    %343 = arith.divf %341, %342 : vector<2x192xf32>
    %344 = vector.extract_strided_slice %321 {offsets = [0, 192], sizes = [2, 64], strides = [1, 1]} : vector<2x256xf32> to vector<2x64xf32>
    %345 = math.tanh %344 : vector<2x64xf32>
    %346 = vector.extract_strided_slice %343 {offsets = [0, 64], sizes = [2, 64], strides = [1, 1]} : vector<2x192xf32> to vector<2x64xf32>
    %347 = arith.mulf %346, %306 : vector<2x64xf32>
    %348 = vector.extract_strided_slice %343 {offsets = [0, 0], sizes = [2, 64], strides = [1, 1]} : vector<2x192xf32> to vector<2x64xf32>
    %349 = arith.mulf %348, %345 : vector<2x64xf32>
    %350 = arith.addf %347, %349 : vector<2x64xf32>
    %351 = vector.extract_strided_slice %343 {offsets = [0, 128], sizes = [2, 64], strides = [1, 1]} : vector<2x192xf32> to vector<2x64xf32>
    %352 = math.tanh %350 : vector<2x64xf32>
    %353 = arith.mulf %351, %352 : vector<2x64xf32>
    %354 = tpu.concatenate %337, %353 in 1 : vector<2x64xf32>, vector<2x64xf32> -> vector<2x128xf32>
    %355 = arith.addf %311, %337 : vector<2x64xf32>
    %356 = arith.addf %312, %353 : vector<2x64xf32>
    %cst_98 = arith.constant dense<0.000000e+00> : vector<2x512xf32>
    %357 = tpu.matmul %354, %219, %cst_98 {dimension_numbers = #tpu.dot_dimension_numbers<[1], [0], [0], [1], [0, 0, 1, 1], [], []>} : vector<2x128xf32>, vector<128x512xf32>, vector<2x512xf32> -> vector<2x512xf32>
    %358 = vector.extract_strided_slice %357 {offsets = [0, 0], sizes = [2, 256], strides = [1, 1]} : vector<2x512xf32> to vector<2x256xf32>
    %359 = vector.extract_strided_slice %218 {offsets = [0, 3, 0], sizes = [2, 1, 256], strides = [1, 1, 1]} : vector<2x8x512xf32> to vector<2x1x256xf32>
    %360 = vector.shape_cast %359 : vector<2x1x256xf32> to vector<2x256xf32>
    %361 = arith.addf %358, %360 : vector<2x256xf32>
    %362 = vector.extract_strided_slice %357 {offsets = [0, 256], sizes = [2, 256], strides = [1, 1]} : vector<2x512xf32> to vector<2x256xf32>
    %363 = vector.extract_strided_slice %218 {offsets = [0, 4, 256], sizes = [2, 1, 256], strides = [1, 1, 1]} : vector<2x8x512xf32> to vector<2x1x256xf32>
    %364 = vector.shape_cast %363 : vector<2x1x256xf32> to vector<2x256xf32>
    %365 = arith.addf %362, %364 : vector<2x256xf32>
    %366 = vector.extract_strided_slice %361 {offsets = [0, 0], sizes = [2, 192], strides = [1, 1]} : vector<2x256xf32> to vector<2x192xf32>
    %367 = arith.negf %366 : vector<2x192xf32>
    %368 = math.exp %367 : vector<2x192xf32>
    %cst_99 = arith.constant 1.000000e+00 : f32
    %369 = vector.broadcast %cst_99 : f32 to vector<2x192xf32>
    %370 = arith.addf %369, %368 : vector<2x192xf32>
    %371 = arith.divf %369, %370 : vector<2x192xf32>
    %372 = vector.extract_strided_slice %361 {offsets = [0, 192], sizes = [2, 64], strides = [1, 1]} : vector<2x256xf32> to vector<2x64xf32>
    %373 = math.tanh %372 : vector<2x64xf32>
    %374 = vector.extract_strided_slice %371 {offsets = [0, 64], sizes = [2, 64], strides = [1, 1]} : vector<2x192xf32> to vector<2x64xf32>
    %375 = arith.mulf %374, %334 : vector<2x64xf32>
    %376 = vector.extract_strided_slice %371 {offsets = [0, 0], sizes = [2, 64], strides = [1, 1]} : vector<2x192xf32> to vector<2x64xf32>
    %377 = arith.mulf %376, %373 : vector<2x64xf32>
    %378 = arith.addf %375, %377 : vector<2x64xf32>
    %379 = vector.extract_strided_slice %371 {offsets = [0, 128], sizes = [2, 64], strides = [1, 1]} : vector<2x192xf32> to vector<2x64xf32>
    %380 = math.tanh %378 : vector<2x64xf32>
    %381 = arith.mulf %379, %380 : vector<2x64xf32>
    %382 = vector.extract_strided_slice %365 {offsets = [0, 0], sizes = [2, 192], strides = [1, 1]} : vector<2x256xf32> to vector<2x192xf32>
    %383 = arith.negf %382 : vector<2x192xf32>
    %384 = math.exp %383 : vector<2x192xf32>
    %cst_100 = arith.constant 1.000000e+00 : f32
    %385 = vector.broadcast %cst_100 : f32 to vector<2x192xf32>
    %386 = arith.addf %385, %384 : vector<2x192xf32>
    %387 = arith.divf %385, %386 : vector<2x192xf32>
    %388 = vector.extract_strided_slice %365 {offsets = [0, 192], sizes = [2, 64], strides = [1, 1]} : vector<2x256xf32> to vector<2x64xf32>
    %389 = math.tanh %388 : vector<2x64xf32>
    %390 = vector.extract_strided_slice %387 {offsets = [0, 64], sizes = [2, 64], strides = [1, 1]} : vector<2x192xf32> to vector<2x64xf32>
    %391 = arith.mulf %390, %350 : vector<2x64xf32>
    %392 = vector.extract_strided_slice %387 {offsets = [0, 0], sizes = [2, 64], strides = [1, 1]} : vector<2x192xf32> to vector<2x64xf32>
    %393 = arith.mulf %392, %389 : vector<2x64xf32>
    %394 = arith.addf %391, %393 : vector<2x64xf32>
    %395 = vector.extract_strided_slice %387 {offsets = [0, 128], sizes = [2, 64], strides = [1, 1]} : vector<2x192xf32> to vector<2x64xf32>
    %396 = math.tanh %394 : vector<2x64xf32>
    %397 = arith.mulf %395, %396 : vector<2x64xf32>
    %398 = tpu.concatenate %381, %397 in 1 : vector<2x64xf32>, vector<2x64xf32> -> vector<2x128xf32>
    %399 = arith.addf %355, %381 : vector<2x64xf32>
    %400 = arith.addf %356, %397 : vector<2x64xf32>
    %cst_101 = arith.constant dense<0.000000e+00> : vector<2x512xf32>
    %401 = tpu.matmul %398, %219, %cst_101 {dimension_numbers = #tpu.dot_dimension_numbers<[1], [0], [0], [1], [0, 0, 1, 1], [], []>} : vector<2x128xf32>, vector<128x512xf32>, vector<2x512xf32> -> vector<2x512xf32>
    %402 = vector.extract_strided_slice %401 {offsets = [0, 0], sizes = [2, 256], strides = [1, 1]} : vector<2x512xf32> to vector<2x256xf32>
    %403 = vector.extract_strided_slice %218 {offsets = [0, 4, 0], sizes = [2, 1, 256], strides = [1, 1, 1]} : vector<2x8x512xf32> to vector<2x1x256xf32>
    %404 = vector.shape_cast %403 : vector<2x1x256xf32> to vector<2x256xf32>
    %405 = arith.addf %402, %404 : vector<2x256xf32>
    %406 = vector.extract_strided_slice %401 {offsets = [0, 256], sizes = [2, 256], strides = [1, 1]} : vector<2x512xf32> to vector<2x256xf32>
    %407 = vector.extract_strided_slice %218 {offsets = [0, 3, 256], sizes = [2, 1, 256], strides = [1, 1, 1]} : vector<2x8x512xf32> to vector<2x1x256xf32>
    %408 = vector.shape_cast %407 : vector<2x1x256xf32> to vector<2x256xf32>
    %409 = arith.addf %406, %408 : vector<2x256xf32>
    %410 = vector.extract_strided_slice %405 {offsets = [0, 0], sizes = [2, 192], strides = [1, 1]} : vector<2x256xf32> to vector<2x192xf32>
    %411 = arith.negf %410 : vector<2x192xf32>
    %412 = math.exp %411 : vector<2x192xf32>
    %cst_102 = arith.constant 1.000000e+00 : f32
    %413 = vector.broadcast %cst_102 : f32 to vector<2x192xf32>
    %414 = arith.addf %413, %412 : vector<2x192xf32>
    %415 = arith.divf %413, %414 : vector<2x192xf32>
    %416 = vector.extract_strided_slice %405 {offsets = [0, 192], sizes = [2, 64], strides = [1, 1]} : vector<2x256xf32> to vector<2x64xf32>
    %417 = math.tanh %416 : vector<2x64xf32>
    %418 = vector.extract_strided_slice %415 {offsets = [0, 64], sizes = [2, 64], strides = [1, 1]} : vector<2x192xf32> to vector<2x64xf32>
    %419 = arith.mulf %418, %378 : vector<2x64xf32>
    %420 = vector.extract_strided_slice %415 {offsets = [0, 0], sizes = [2, 64], strides = [1, 1]} : vector<2x192xf32> to vector<2x64xf32>
    %421 = arith.mulf %420, %417 : vector<2x64xf32>
    %422 = arith.addf %419, %421 : vector<2x64xf32>
    %423 = vector.extract_strided_slice %415 {offsets = [0, 128], sizes = [2, 64], strides = [1, 1]} : vector<2x192xf32> to vector<2x64xf32>
    %424 = math.tanh %422 : vector<2x64xf32>
    %425 = arith.mulf %423, %424 : vector<2x64xf32>
    %426 = vector.extract_strided_slice %409 {offsets = [0, 0], sizes = [2, 192], strides = [1, 1]} : vector<2x256xf32> to vector<2x192xf32>
    %427 = arith.negf %426 : vector<2x192xf32>
    %428 = math.exp %427 : vector<2x192xf32>
    %cst_103 = arith.constant 1.000000e+00 : f32
    %429 = vector.broadcast %cst_103 : f32 to vector<2x192xf32>
    %430 = arith.addf %429, %428 : vector<2x192xf32>
    %431 = arith.divf %429, %430 : vector<2x192xf32>
    %432 = vector.extract_strided_slice %409 {offsets = [0, 192], sizes = [2, 64], strides = [1, 1]} : vector<2x256xf32> to vector<2x64xf32>
    %433 = math.tanh %432 : vector<2x64xf32>
    %434 = vector.extract_strided_slice %431 {offsets = [0, 64], sizes = [2, 64], strides = [1, 1]} : vector<2x192xf32> to vector<2x64xf32>
    %435 = arith.mulf %434, %394 : vector<2x64xf32>
    %436 = vector.extract_strided_slice %431 {offsets = [0, 0], sizes = [2, 64], strides = [1, 1]} : vector<2x192xf32> to vector<2x64xf32>
    %437 = arith.mulf %436, %433 : vector<2x64xf32>
    %438 = arith.addf %435, %437 : vector<2x64xf32>
    %439 = vector.extract_strided_slice %431 {offsets = [0, 128], sizes = [2, 64], strides = [1, 1]} : vector<2x192xf32> to vector<2x64xf32>
    %440 = math.tanh %438 : vector<2x64xf32>
    %441 = arith.mulf %439, %440 : vector<2x64xf32>
    %442 = tpu.concatenate %425, %441 in 1 : vector<2x64xf32>, vector<2x64xf32> -> vector<2x128xf32>
    %443 = arith.addf %399, %425 : vector<2x64xf32>
    %444 = arith.addf %400, %441 : vector<2x64xf32>
    %cst_104 = arith.constant dense<0.000000e+00> : vector<2x512xf32>
    %445 = tpu.matmul %442, %219, %cst_104 {dimension_numbers = #tpu.dot_dimension_numbers<[1], [0], [0], [1], [0, 0, 1, 1], [], []>} : vector<2x128xf32>, vector<128x512xf32>, vector<2x512xf32> -> vector<2x512xf32>
    %446 = vector.extract_strided_slice %445 {offsets = [0, 0], sizes = [2, 256], strides = [1, 1]} : vector<2x512xf32> to vector<2x256xf32>
    %447 = vector.extract_strided_slice %218 {offsets = [0, 5, 0], sizes = [2, 1, 256], strides = [1, 1, 1]} : vector<2x8x512xf32> to vector<2x1x256xf32>
    %448 = vector.shape_cast %447 : vector<2x1x256xf32> to vector<2x256xf32>
    %449 = arith.addf %446, %448 : vector<2x256xf32>
    %450 = vector.extract_strided_slice %445 {offsets = [0, 256], sizes = [2, 256], strides = [1, 1]} : vector<2x512xf32> to vector<2x256xf32>
    %451 = vector.extract_strided_slice %218 {offsets = [0, 2, 256], sizes = [2, 1, 256], strides = [1, 1, 1]} : vector<2x8x512xf32> to vector<2x1x256xf32>
    %452 = vector.shape_cast %451 : vector<2x1x256xf32> to vector<2x256xf32>
    %453 = arith.addf %450, %452 : vector<2x256xf32>
    %454 = vector.extract_strided_slice %449 {offsets = [0, 0], sizes = [2, 192], strides = [1, 1]} : vector<2x256xf32> to vector<2x192xf32>
    %455 = arith.negf %454 : vector<2x192xf32>
    %456 = math.exp %455 : vector<2x192xf32>
    %cst_105 = arith.constant 1.000000e+00 : f32
    %457 = vector.broadcast %cst_105 : f32 to vector<2x192xf32>
    %458 = arith.addf %457, %456 : vector<2x192xf32>
    %459 = arith.divf %457, %458 : vector<2x192xf32>
    %460 = vector.extract_strided_slice %449 {offsets = [0, 192], sizes = [2, 64], strides = [1, 1]} : vector<2x256xf32> to vector<2x64xf32>
    %461 = math.tanh %460 : vector<2x64xf32>
    %462 = vector.extract_strided_slice %459 {offsets = [0, 64], sizes = [2, 64], strides = [1, 1]} : vector<2x192xf32> to vector<2x64xf32>
    %463 = arith.mulf %462, %422 : vector<2x64xf32>
    %464 = vector.extract_strided_slice %459 {offsets = [0, 0], sizes = [2, 64], strides = [1, 1]} : vector<2x192xf32> to vector<2x64xf32>
    %465 = arith.mulf %464, %461 : vector<2x64xf32>
    %466 = arith.addf %463, %465 : vector<2x64xf32>
    %467 = vector.extract_strided_slice %459 {offsets = [0, 128], sizes = [2, 64], strides = [1, 1]} : vector<2x192xf32> to vector<2x64xf32>
    %468 = math.tanh %466 : vector<2x64xf32>
    %469 = arith.mulf %467, %468 : vector<2x64xf32>
    %470 = vector.extract_strided_slice %453 {offsets = [0, 0], sizes = [2, 192], strides = [1, 1]} : vector<2x256xf32> to vector<2x192xf32>
    %471 = arith.negf %470 : vector<2x192xf32>
    %472 = math.exp %471 : vector<2x192xf32>
    %cst_106 = arith.constant 1.000000e+00 : f32
    %473 = vector.broadcast %cst_106 : f32 to vector<2x192xf32>
    %474 = arith.addf %473, %472 : vector<2x192xf32>
    %475 = arith.divf %473, %474 : vector<2x192xf32>
    %476 = vector.extract_strided_slice %453 {offsets = [0, 192], sizes = [2, 64], strides = [1, 1]} : vector<2x256xf32> to vector<2x64xf32>
    %477 = math.tanh %476 : vector<2x64xf32>
    %478 = vector.extract_strided_slice %475 {offsets = [0, 64], sizes = [2, 64], strides = [1, 1]} : vector<2x192xf32> to vector<2x64xf32>
    %479 = arith.mulf %478, %438 : vector<2x64xf32>
    %480 = vector.extract_strided_slice %475 {offsets = [0, 0], sizes = [2, 64], strides = [1, 1]} : vector<2x192xf32> to vector<2x64xf32>
    %481 = arith.mulf %480, %477 : vector<2x64xf32>
    %482 = arith.addf %479, %481 : vector<2x64xf32>
    %483 = vector.extract_strided_slice %475 {offsets = [0, 128], sizes = [2, 64], strides = [1, 1]} : vector<2x192xf32> to vector<2x64xf32>
    %484 = math.tanh %482 : vector<2x64xf32>
    %485 = arith.mulf %483, %484 : vector<2x64xf32>
    %486 = tpu.concatenate %469, %485 in 1 : vector<2x64xf32>, vector<2x64xf32> -> vector<2x128xf32>
    %487 = arith.addf %443, %469 : vector<2x64xf32>
    %488 = arith.addf %444, %485 : vector<2x64xf32>
    %cst_107 = arith.constant dense<0.000000e+00> : vector<2x512xf32>
    %489 = tpu.matmul %486, %219, %cst_107 {dimension_numbers = #tpu.dot_dimension_numbers<[1], [0], [0], [1], [0, 0, 1, 1], [], []>} : vector<2x128xf32>, vector<128x512xf32>, vector<2x512xf32> -> vector<2x512xf32>
    %490 = vector.extract_strided_slice %489 {offsets = [0, 0], sizes = [2, 256], strides = [1, 1]} : vector<2x512xf32> to vector<2x256xf32>
    %491 = vector.extract_strided_slice %218 {offsets = [0, 6, 0], sizes = [2, 1, 256], strides = [1, 1, 1]} : vector<2x8x512xf32> to vector<2x1x256xf32>
    %492 = vector.shape_cast %491 : vector<2x1x256xf32> to vector<2x256xf32>
    %493 = arith.addf %490, %492 : vector<2x256xf32>
    %494 = vector.extract_strided_slice %489 {offsets = [0, 256], sizes = [2, 256], strides = [1, 1]} : vector<2x512xf32> to vector<2x256xf32>
    %495 = vector.extract_strided_slice %218 {offsets = [0, 1, 256], sizes = [2, 1, 256], strides = [1, 1, 1]} : vector<2x8x512xf32> to vector<2x1x256xf32>
    %496 = vector.shape_cast %495 : vector<2x1x256xf32> to vector<2x256xf32>
    %497 = arith.addf %494, %496 : vector<2x256xf32>
    %498 = vector.extract_strided_slice %493 {offsets = [0, 0], sizes = [2, 192], strides = [1, 1]} : vector<2x256xf32> to vector<2x192xf32>
    %499 = arith.negf %498 : vector<2x192xf32>
    %500 = math.exp %499 : vector<2x192xf32>
    %cst_108 = arith.constant 1.000000e+00 : f32
    %501 = vector.broadcast %cst_108 : f32 to vector<2x192xf32>
    %502 = arith.addf %501, %500 : vector<2x192xf32>
    %503 = arith.divf %501, %502 : vector<2x192xf32>
    %504 = vector.extract_strided_slice %493 {offsets = [0, 192], sizes = [2, 64], strides = [1, 1]} : vector<2x256xf32> to vector<2x64xf32>
    %505 = math.tanh %504 : vector<2x64xf32>
    %506 = vector.extract_strided_slice %503 {offsets = [0, 64], sizes = [2, 64], strides = [1, 1]} : vector<2x192xf32> to vector<2x64xf32>
    %507 = arith.mulf %506, %466 : vector<2x64xf32>
    %508 = vector.extract_strided_slice %503 {offsets = [0, 0], sizes = [2, 64], strides = [1, 1]} : vector<2x192xf32> to vector<2x64xf32>
    %509 = arith.mulf %508, %505 : vector<2x64xf32>
    %510 = arith.addf %507, %509 : vector<2x64xf32>
    %511 = vector.extract_strided_slice %503 {offsets = [0, 128], sizes = [2, 64], strides = [1, 1]} : vector<2x192xf32> to vector<2x64xf32>
    %512 = math.tanh %510 : vector<2x64xf32>
    %513 = arith.mulf %511, %512 : vector<2x64xf32>
    %514 = vector.extract_strided_slice %497 {offsets = [0, 0], sizes = [2, 192], strides = [1, 1]} : vector<2x256xf32> to vector<2x192xf32>
    %515 = arith.negf %514 : vector<2x192xf32>
    %516 = math.exp %515 : vector<2x192xf32>
    %cst_109 = arith.constant 1.000000e+00 : f32
    %517 = vector.broadcast %cst_109 : f32 to vector<2x192xf32>
    %518 = arith.addf %517, %516 : vector<2x192xf32>
    %519 = arith.divf %517, %518 : vector<2x192xf32>
    %520 = vector.extract_strided_slice %497 {offsets = [0, 192], sizes = [2, 64], strides = [1, 1]} : vector<2x256xf32> to vector<2x64xf32>
    %521 = math.tanh %520 : vector<2x64xf32>
    %522 = vector.extract_strided_slice %519 {offsets = [0, 64], sizes = [2, 64], strides = [1, 1]} : vector<2x192xf32> to vector<2x64xf32>
    %523 = arith.mulf %522, %482 : vector<2x64xf32>
    %524 = vector.extract_strided_slice %519 {offsets = [0, 0], sizes = [2, 64], strides = [1, 1]} : vector<2x192xf32> to vector<2x64xf32>
    %525 = arith.mulf %524, %521 : vector<2x64xf32>
    %526 = arith.addf %523, %525 : vector<2x64xf32>
    %527 = vector.extract_strided_slice %519 {offsets = [0, 128], sizes = [2, 64], strides = [1, 1]} : vector<2x192xf32> to vector<2x64xf32>
    %528 = math.tanh %526 : vector<2x64xf32>
    %529 = arith.mulf %527, %528 : vector<2x64xf32>
    %530 = tpu.concatenate %513, %529 in 1 : vector<2x64xf32>, vector<2x64xf32> -> vector<2x128xf32>
    %531 = arith.addf %487, %513 : vector<2x64xf32>
    %532 = arith.addf %488, %529 : vector<2x64xf32>
    %cst_110 = arith.constant dense<0.000000e+00> : vector<2x512xf32>
    %533 = tpu.matmul %530, %219, %cst_110 {dimension_numbers = #tpu.dot_dimension_numbers<[1], [0], [0], [1], [0, 0, 1, 1], [], []>} : vector<2x128xf32>, vector<128x512xf32>, vector<2x512xf32> -> vector<2x512xf32>
    %534 = vector.extract_strided_slice %533 {offsets = [0, 0], sizes = [2, 256], strides = [1, 1]} : vector<2x512xf32> to vector<2x256xf32>
    %535 = vector.extract_strided_slice %218 {offsets = [0, 7, 0], sizes = [2, 1, 256], strides = [1, 1, 1]} : vector<2x8x512xf32> to vector<2x1x256xf32>
    %536 = vector.shape_cast %535 : vector<2x1x256xf32> to vector<2x256xf32>
    %537 = arith.addf %534, %536 : vector<2x256xf32>
    %538 = vector.extract_strided_slice %533 {offsets = [0, 256], sizes = [2, 256], strides = [1, 1]} : vector<2x512xf32> to vector<2x256xf32>
    %539 = vector.extract_strided_slice %218 {offsets = [0, 0, 256], sizes = [2, 1, 256], strides = [1, 1, 1]} : vector<2x8x512xf32> to vector<2x1x256xf32>
    %540 = vector.shape_cast %539 : vector<2x1x256xf32> to vector<2x256xf32>
    %541 = arith.addf %538, %540 : vector<2x256xf32>
    %542 = vector.extract_strided_slice %537 {offsets = [0, 0], sizes = [2, 192], strides = [1, 1]} : vector<2x256xf32> to vector<2x192xf32>
    %543 = arith.negf %542 : vector<2x192xf32>
    %544 = math.exp %543 : vector<2x192xf32>
    %cst_111 = arith.constant 1.000000e+00 : f32
    %545 = vector.broadcast %cst_111 : f32 to vector<2x192xf32>
    %546 = arith.addf %545, %544 : vector<2x192xf32>
    %547 = arith.divf %545, %546 : vector<2x192xf32>
    %548 = vector.extract_strided_slice %537 {offsets = [0, 192], sizes = [2, 64], strides = [1, 1]} : vector<2x256xf32> to vector<2x64xf32>
    %549 = math.tanh %548 : vector<2x64xf32>
    %550 = vector.extract_strided_slice %547 {offsets = [0, 64], sizes = [2, 64], strides = [1, 1]} : vector<2x192xf32> to vector<2x64xf32>
    %551 = arith.mulf %550, %510 : vector<2x64xf32>
    %552 = vector.extract_strided_slice %547 {offsets = [0, 0], sizes = [2, 64], strides = [1, 1]} : vector<2x192xf32> to vector<2x64xf32>
    %553 = arith.mulf %552, %549 : vector<2x64xf32>
    %554 = arith.addf %551, %553 : vector<2x64xf32>
    %555 = vector.extract_strided_slice %547 {offsets = [0, 128], sizes = [2, 64], strides = [1, 1]} : vector<2x192xf32> to vector<2x64xf32>
    %556 = math.tanh %554 : vector<2x64xf32>
    %557 = arith.mulf %555, %556 : vector<2x64xf32>
    %558 = vector.extract_strided_slice %541 {offsets = [0, 0], sizes = [2, 192], strides = [1, 1]} : vector<2x256xf32> to vector<2x192xf32>
    %559 = arith.negf %558 : vector<2x192xf32>
    %560 = math.exp %559 : vector<2x192xf32>
    %cst_112 = arith.constant 1.000000e+00 : f32
    %561 = vector.broadcast %cst_112 : f32 to vector<2x192xf32>
    %562 = arith.addf %561, %560 : vector<2x192xf32>
    %563 = arith.divf %561, %562 : vector<2x192xf32>
    %564 = vector.extract_strided_slice %541 {offsets = [0, 192], sizes = [2, 64], strides = [1, 1]} : vector<2x256xf32> to vector<2x64xf32>
    %565 = math.tanh %564 : vector<2x64xf32>
    %566 = vector.extract_strided_slice %563 {offsets = [0, 64], sizes = [2, 64], strides = [1, 1]} : vector<2x192xf32> to vector<2x64xf32>
    %567 = arith.mulf %566, %526 : vector<2x64xf32>
    %568 = vector.extract_strided_slice %563 {offsets = [0, 0], sizes = [2, 64], strides = [1, 1]} : vector<2x192xf32> to vector<2x64xf32>
    %569 = arith.mulf %568, %565 : vector<2x64xf32>
    %570 = arith.addf %567, %569 : vector<2x64xf32>
    %571 = vector.extract_strided_slice %563 {offsets = [0, 128], sizes = [2, 64], strides = [1, 1]} : vector<2x192xf32> to vector<2x64xf32>
    %572 = math.tanh %570 : vector<2x64xf32>
    %573 = arith.mulf %571, %572 : vector<2x64xf32>
    %574 = arith.addf %531, %557 : vector<2x64xf32>
    %575 = arith.addf %532, %573 : vector<2x64xf32>
    %576 = tpu.concatenate %574, %575 in 1 : vector<2x64xf32>, vector<2x64xf32> -> vector<2x128xf32>
    %cst_113 = arith.constant 1.250000e-01 : f32
    %577 = vector.broadcast %cst_113 : f32 to vector<2x128xf32>
    %578 = arith.mulf %576, %577 : vector<2x128xf32>
    %c0_114 = arith.constant 0 : index
    %c0_115 = arith.constant 0 : index
    %579 = vector.load %arg26[%c0_114, %c0_115] : memref<128x100xf32, #tpu.memory_space<vmem>>, vector<128x100xf32>
    %cst_116 = arith.constant dense<0.000000e+00> : vector<2x100xf32>
    %580 = tpu.matmul %578, %579, %cst_116 {dimension_numbers = #tpu.dot_dimension_numbers<[1], [0], [0], [1], [0, 0, 1, 1], [], []>} : vector<2x128xf32>, vector<128x100xf32>, vector<2x100xf32> -> vector<2x100xf32>
    %c0_117 = arith.constant 0 : index
    %c0_118 = arith.constant 0 : index
    %581 = vector.load %arg27[%c0_117, %c0_118] : memref<1x100xf32, #tpu.memory_space<vmem>>, vector<1x100xf32>
    %582 = vector.broadcast %581 : vector<1x100xf32> to vector<2x100xf32>
    %583 = arith.addf %580, %582 : vector<2x100xf32>
    %cst_119 = arith.constant 0.000000e+00 : f32
    %584 = vector.broadcast %cst_119 : f32 to vector<2x100xf32>
    %585 = arith.maximumf %583, %584 : vector<2x100xf32>
    %c0_120 = arith.constant 0 : index
    %c0_121 = arith.constant 0 : index
    %586 = vector.load %arg28[%c0_120, %c0_121] : memref<100x1xf32, #tpu.memory_space<vmem>>, vector<100x1xf32>
    %cst_122 = arith.constant dense<0.000000e+00> : vector<2x1xf32>
    %587 = tpu.matmul %585, %586, %cst_122 {dimension_numbers = #tpu.dot_dimension_numbers<[1], [0], [0], [1], [0, 0, 1, 1], [], []>} : vector<2x100xf32>, vector<100x1xf32>, vector<2x1xf32> -> vector<2x1xf32>
    %c0_123 = arith.constant 0 : index
    %c0_124 = arith.constant 0 : index
    %588 = vector.load %arg29[%c0_123, %c0_124] : memref<1x1xf32, #tpu.memory_space<vmem>>, vector<1x1xf32>
    %589 = vector.broadcast %588 : vector<1x1xf32> to vector<2x1xf32>
    %590 = arith.addf %587, %589 : vector<2x1xf32>
    %c0_125 = arith.constant 0 : index
    %c0_126 = arith.constant 0 : index
    %591 = vector.load %arg30[%c0_125, %c0_126] : memref<2x1xf32, #tpu.memory_space<vmem>>, vector<2x1xf32>
    tpu.vector_store %arg30[%c0_125, %c0_126], %590 {strides = array<i32>} : memref<2x1xf32, #tpu.memory_space<vmem>>, vector<2x1xf32>,
    return
  }
}

</mosaic_0001>

<bundles_post_ra>
// kernel: ecg_forward.1
= control target key start
LH: loop header
LB: loop body
LE: loop exit
PB: predicated region body
PF: predicated region fallthrough
CT: control target
= control target key end

     0   :  { %v8193_v0 = vmov 0   ;;  %s8194_s6 = smov 1   ;;  %vm13302_vm0 = vcmask 1041408   ;;  %s8195_s10 = smov 2   ;;  %vm13315_vm1 = vcmask 1046528   ;;  %vm13316_vm2 = vcmask 1045504   ;;  %s13297_s0 = inlined_call_operand.smem [shape: u32[31], index: -1, kind: input, shape index: {}] }
   0x1   :  { %7477 = vset.pattern.permute.xlu1 %v8193_v0  ;;  %7476 = vset.pattern.permute.xlu0 %v8193_v0  ;;  %s8236_s5 = sld [smem:[%s13297_s0]]   ;;  %s8196_s14 = smov 3   ;;  %vm567_vm3 = vcmask 1044480   ;;  %vm673_vm4 = vcmask 1043456   ;;  %vm13300_vm5 = vcmask 261120   ;;  %vm1165_vm6 = vcmask 523264  }
   0x2   :  { %7478 = vset.pattern.permute.xlu2 %v8193_v0  ;;  %s8241_s9 = sld [smem:[%s13297_s0 + %s8194_s6]]   ;;  %s8197_s18 = smov 96   ;;  %vm13301_vm7 = vcmask 785408   ;;  %vm1492_vm8 = vcmask 517120   ;;  %vm2231_vm9 = vcmask 1045509   ;;  %vm2222_vm10 = vcmask 1042434  }
   0x3   :  { %s8251_s13 = sld [smem:[%s13297_s0 + %s8195_s10]]   ;;  %s8198_s19 = smov 64   ;;  %vm2219_vm11 = vcmask 1041409   ;;  %vm2225_vm12 = vcmask 1043459   ;;  %vm2228_vm13 = vcmask 1044484   ;;  %vm2234_vm14 = vcmask 1046534  }
   0x4   :  { %s8297_s17 = sld [smem:[%s13297_s0 + %s8196_s14]]   ;;  %s8199_s20 = smov 32   ;;  %vm13319_vm15 = vcmask 1047559  }
   0x5   :  { %s8200_s21 = smov 4   ;;  %s8201_s25 = smov 5  }
   0x6   :  { %s8708_s24 = sld [smem:[%s13297_s0 + %s8200_s21]]   ;;  %s8202_s29 = smov 6  }
   0x7   :  { %v129_v1 = vld [vmem:[%s8236_s5 + $0x8] sm:$0xff]  ;;  %v130_v2 = vld [vmem:[%s8236_s5 + $0x10] sm:$0xff]  ;;  %v128_v3 = vld [vmem:[%s8236_s5] sm:$0xff]  ;;  %s8714_s28 = sld [smem:[%s13297_s0 + %s8201_s25]]   ;;  %s8203_s3 = smov 7  }
   0x8   :  { %v168_v4 = vrot.slane %v129_v1, 6  ;;  %v170_v5 = vrot.slane %v130_v2, 6  ;;  %v167_v6 = vrot.slane %v128_v3, 6  ;;  %v131_v7 = vld [vmem:[%s8236_s5 + $0x18] sm:$0xff]  ;;  %v132_v8 = vld [vmem:[%s8236_s5 + $0x20] sm:$0xff]  ;;  %v133_v14 = vld [vmem:[%s8236_s5 + $0x28] sm:$0xff]  ;;  %s8726_s2 = sld [smem:[%s13297_s0 + %s8202_s29]]  }
   0x9   :  { %v172_v9 = vrot.slane %v131_v7, 6  ;;  %v174_v10 = vrot.slane %v132_v8, 6  ;;  %v176_v15 = vrot.slane %v133_v14, 6  ;;  %v134_v18 = vld [vmem:[%s8236_s5 + $0x30] sm:$0xff]  ;;  %v135_v19 = vld [vmem:[%s8236_s5 + $0x38] sm:$0xff]  ;;  %v136_v25 = vld [vmem:[%s8236_s5 + $0x40] sm:$0xff]  ;;  %s9146_s6 = sld [smem:[%s13297_s0 + %s8203_s3]]  }
   0xa   :  { %v171_v11 = vsel %vm13302_vm0, %v168_v4, %v170_v5  ;;  %v201_v12 = vsel %vm13302_vm0, 0.0, %v167_v6  ;;  %v169_v17 = vsel %vm13302_vm0, %v167_v6, %v168_v4  ;;  %v178_v21 = vrot.slane %v134_v18, 6  ;;  %v8266_v26 = vld [vmem:[%s8236_s5 + $0x48] sm:$0xff]  ;;  %v8275_v33 = vld [vmem:[%s8241_s9 + $0x1] ss:$0 sm:$0xff]  ;;  %v794_v58 = vld [vmem:[%s8297_s17 + $0x98] sm:$0xff] }
   0xb   :  { %215 = vperm.xlu1 %7477, %v171_v11   ;;  %207 = vperm.xlu0 %7476, %v201_v12   ;;  %v175_v13 = vsel %vm13302_vm0, %v172_v9, %v174_v10  ;;  %v173_v16 = vsel %vm13302_vm0, %v170_v5, %v172_v9  ;;  %v177_v20 = vsel %vm13302_vm0, %v174_v10, %v176_v15  ;;  %v180_v22 = vrot.slane %v135_v19, 6  ;;  %v8284_v37 = vld [vmem:[%s8241_s9 + $0x2] ss:$0 sm:$0xff]  ;;  %v8292_v41 = vld [vmem:[%s8241_s9] ss:$0 sm:$0xff]  ;;  %v793_v63 = vld [vmem:[%s8297_s17 + $0x90] sm:$0xff] }
   0xc   :  { %223 = vperm.xlu2 %7478, %v175_v13   ;;  %v179_v24 = vsel %vm13302_vm0, %v176_v15, %v178_v21  ;;  %v182_v28 = vrot.slane %v136_v25, 6  ;;  %v183_v29 = vrot.slane %v8266_v26, 6  ;;  %v8300_v42 = vld [vmem:[%s8241_s9 + $0x3] ss:$0 sm:$0xff]  ;;  %v8307_v45 = vld [vmem:[%s8241_s9 + $0x4] ss:$0 sm:$0xff]  ;;  %1311 = vmatpush.msra.mxu1 %v794_v58 }
   0xd   :  { %v181_v23 = vsel %vm13302_vm0, %v178_v21, %v180_v22  ;;  %v203_v27 = vsel %vm13302_vm0, %v180_v22, 0.0  ;;  %v792_v4 = vld [vmem:[%s8297_s17 + $0x88] sm:$0xff]  ;;  %v791_v5 = vld [vmem:[%s8297_s17 + $0x80] sm:$0xff]  ;;  %s8204_s7 = smov 9   ;;  %s8205_s11 = smov 8  }
   0xe   :  { %v184_v30 = vsel %vm13302_vm0, %v182_v28, %v183_v29  ;;  %v202_v31 = vsel %vm13302_vm0, 0.0, %v182_v28  ;;  %1312 = vmatpush.msra.mxu1 %v793_v63  ;;  %s9403_s10 = sld [smem:[%s13297_s0 + %s8204_s7]]   ;;  %s8206_s15 = smov 10  }
   0xf   :  { %s9467_s14 = sld [smem:[%s13297_s0 + %s8205_s11]]   ;;  %s8208_s22 = smov 11  }
  0x10   :  { %1313 = vmatpush.msra.mxu1 %v792_v4  ;;  %s10184_s21 = sld [smem:[%s13297_s0 + %s8206_s15]]   ;;  %s8209_s26 = smov 12  }
  0x11   :  { %s10354_s25 = sld [smem:[%s13297_s0 + %s8208_s22]]   ;;  %s8210_s30 = smov 13  }
  0x12   :  { %1314 = vmatpush.msra.mxu1 %v791_v5  ;;  %s10607_s29 = sld [smem:[%s13297_s0 + %s8209_s26]]   ;;  %s8211_s4 = smov 14  }
  0x13   :  { %219 = vperm.xlu1 %7477, %v173_v16   ;;  %211 = vperm.xlu0 %7476, %v169_v17   ;;  %s10647_s3 = sld [smem:[%s13297_s0 + %s8210_s30]]   ;;  %s8212_s8 = smov 15  }
  0x14   :  { %227 = vperm.xlu2 %7478, %v177_v20   ;;  %s10653_s7 = sld [smem:[%s13297_s0 + %s8211_s4]]   ;;  %s8213_s12 = smov 16  }
  0x15   :  { %s10897_s11 = sld [smem:[%s13297_s0 + %s8212_s8]]   ;;  %s8214_s16 = smov 17  }
  0x16   :  { %s11129_s15 = sld [smem:[%s13297_s0 + %s8213_s12]]   ;;  %s8215_s23 = smov 18  }
  0x17   :  { %s11221_s22 = sld [smem:[%s13297_s0 + %s8214_s16]]   ;;  %s8216_s27 = smov 19  }
  0x18   :  { %s11363_s26 = sld [smem:[%s13297_s0 + %s8215_s23]]  }
  0x19   :  { %s11451_s30 = sld [smem:[%s13297_s0 + %s8216_s27]]  }
  0x1b   :  { %235 = vperm.xlu1 %7477, %v181_v23   ;;  %231 = vperm.xlu0 %7476, %v179_v24  }
  0x1c   :  { %308 = vperm.xlu2 %7478, %v203_v27  }
  0x23   :  { %244 = vperm.xlu0 %7476, %v184_v30  }
  0x24   :  { %240 = vperm.xlu2 %7478, %v202_v31  }
  0x66   :  { %v224_v32 = vpop.permute.xlu2 %223 }
  0x67   :  { %v8278_v35 = vmul.f32 %v8275_v33, %v224_v32  ;;  %v8303_v43 = vmul.f32 %v8284_v37, %v224_v32  ;;  %v278_v44 = vmul.f32 %v8292_v41, %v224_v32  ;;  %v8320_v50 = vmul.f32 %v8300_v42, %v224_v32 }
  0x68   :  { %v8328_v55 = vmul.f32 %v8307_v45, %v224_v32 }
  0x69   :  { %v363_v38 = vrot.slane %v8278_v35, 1  ;;  %v469_v49 = vrot.slane %v8303_v43, 2  ;;  %v575_v59 = vrot.slane %v8320_v50, 3 }
  0x6a   :  { %v681_v0 = vrot.slane %v8328_v55, 4 }
  0x6e   :  { %v228_v34 = vpop.permute.xlu2 %227 }
  0x6f   :  { %v8281_v36 = vmul.f32 %v8275_v33, %v228_v34  ;;  %v8289_v40 = vmul.f32 %v8284_v37, %v228_v34  ;;  %v8316_v48 = vmul.f32 %v8300_v42, %v228_v34  ;;  %v8323_v51 = vmul.f32 %v8307_v45, %v228_v34 }
  0x70   :  { %v8356_v6 = vmul.f32 %v8292_v41, %v228_v34 }
  0x71   :  { %v365_v39 = vrot.slane %v8281_v36, 1  ;;  %v471_v47 = vrot.slane %v8289_v40, 2  ;;  %v577_v57 = vrot.slane %v8316_v48, 3  ;;  %v683_v60 = vrot.slane %v8323_v51, 4 }
  0x73   :  { %v366_v46 = vsel %vm13315_vm1, %v363_v38, %v365_v39  ;;  %v472_v56 = vsel %vm13316_vm2, %v469_v49, %v471_v47  ;;  %v578_v1 = vsel %vm567_vm3, %v575_v59, %v577_v57  ;;  %v684_v7 = vsel %vm673_vm4, %v681_v0, %v683_v60 }
  0x74   :  { %v410_v54 = vadd.f32 %v366_v46, %v278_v44 }
  0x76   :  { %v516_v61 = vadd.f32 %v472_v56, %v410_v54  ;;  %v8339_v62 = vpop.permute.xlu2 %308 }
  0x77   :  { %v8350_v2 = vmul.f32 %v8275_v33, %v8339_v62  ;;  %v8365_v8 = vmul.f32 %v8284_v37, %v8339_v62  ;;  %v8369_v12 = vmul.f32 %v8300_v42, %v8339_v62 }
  0x78   :  { %v622_v11 = vadd.f32 %v578_v1, %v516_v61 }
  0x79   :  { %v371_v17 = vrot.slane %v8350_v2, 1 }
  0x7d   :  { %v216_v52 = vpop.permute.xlu1 %215  ;;  %v8325_v53 = vpop.permute.xlu0 %207 }
  0x7e   :  { %v321_v3 = vmul.f32 %v8275_v33, %v216_v52  ;;  %v276_v15 = vmul.f32 %v8292_v41, %v216_v52  ;;  %v427_v16 = vmul.f32 %v8284_v37, %v216_v52  ;;  %v533_v20 = vmul.f32 %v8300_v42, %v216_v52 }
  0x7f   :  { %v319_v21 = vmul.f32 %v8275_v33, %v8325_v53  ;;  %v8383_v28 = vmul.f32 %v8307_v45, %v216_v52  ;;  %v274_v44 = vmul.f32 %v8292_v41, %v8325_v53  ;;  %v425_v58 = vmul.f32 %v8284_v37, %v8325_v53 }
  0x80   :  { %v359_v19 = vrot.slane %v321_v3, 1  ;;  %v465_v34 = vrot.slane %v427_v16, 2 }
  0x81   :  { %v356_v56 = vrot.slane %v319_v21, 1  ;;  %v677_v21 = vrot.slane %v8383_v28, 4 }
  0x85   :  { %v220_v9 = vpop.permute.xlu1 %219  ;;  %v212_v10 = vpop.permute.xlu0 %211 }
  0x86   :  { %v322_v13 = vmul.f32 %v8275_v33, %v220_v9  ;;  %v428_v14 = vmul.f32 %v8284_v37, %v220_v9  ;;  %v320_v18 = vmul.f32 %v8275_v33, %v212_v10  ;;  %v277_v23 = vmul.f32 %v8292_v41, %v220_v9 }
  0x87   :  { %v534_v25 = vmul.f32 %v8300_v42, %v220_v9  ;;  %v426_v32 = vmul.f32 %v8284_v37, %v212_v10  ;;  %v640_v52 = vmul.f32 %v8307_v45, %v220_v9  ;;  %v532_v1 = vmul.f32 %v8300_v42, %v212_v10 }
  0x88   :  { %v361_v22 = vrot.slane %v322_v13, 1  ;;  %v467_v24 = vrot.slane %v428_v14, 2  ;;  %v357_v27 = vrot.slane %v320_v18, 1  ;;  %v571_v14 = vrot.slane %v533_v20, 3 }
  0x89   :  { %v573_v63 = vrot.slane %v534_v25, 3  ;;  %v463_v13 = vrot.slane %v426_v32, 2  ;;  %v531_v9 = vmul.f32 %v8300_v42, %v8325_v53  ;;  %v679_v43 = vrot.slane %v640_v52, 4  ;;  %v8423_v52 = vld [vmem:[%s8251_s13] ss:$0 sm:$0xff] }
  0x8a   :  { %v362_v30 = vsel %vm13315_vm1, %v359_v19, %v361_v22  ;;  %v364_v31 = vsel %vm13315_vm1, %v361_v22, %v363_v38  ;;  %v360_v61 = vsel %vm13315_vm1, %v357_v27, %v359_v19  ;;  %v468_v35 = vsel %vm13316_vm2, %v465_v34, %v467_v24 }
  0x8b   :  { %v408_v46 = vadd.f32 %v362_v30, %v276_v15  ;;  %v409_v54 = vadd.f32 %v364_v31, %v277_v23  ;;  %v275_v38 = vmul.f32 %v8292_v41, %v212_v10  ;;  %v470_v3 = vsel %vm13316_vm2, %v467_v24, %v469_v49 }
  0x8c   :  { %v358_v5 = vsel %vm13315_vm1, %v356_v56, %v357_v27  ;;  %v728_v19 = vadd.f32 %v684_v7, %v622_v11  ;;  %v637_v22 = vmul.f32 %v8307_v45, %v8325_v53  ;;  %v574_v49 = vsel %vm567_vm3, %v571_v14, %v573_v63 }
  0x8d   :  { %v514_v4 = vadd.f32 %v468_v35, %v408_v46  ;;  %v515_v15 = vadd.f32 %v470_v3, %v409_v54  ;;  %v407_v16 = vadd.f32 %v360_v61, %v275_v38  ;;  %v236_v18 = vpop.permute.xlu1 %235  ;;  %v576_v23 = vsel %vm567_vm3, %v573_v63, %v575_v59  ;;  %v232_v28 = vpop.permute.xlu0 %231 }
  0x8e   :  { %v406_v20 = vadd.f32 %v358_v5, %v274_v44  ;;  %v638_v24 = vmul.f32 %v8307_v45, %v212_v10  ;;  %v466_v27 = vsel %vm13316_vm2, %v463_v13, %v465_v34  ;;  %v569_v7 = vrot.slane %v532_v1, 3 }
  0x8f   :  { %v620_v25 = vadd.f32 %v574_v49, %v514_v4  ;;  %v326_v11 = vmul.f32 %v8275_v33, %v236_v18  ;;  %v462_v30 = vrot.slane %v425_v58, 2  ;;  %v568_v53 = vrot.slane %v531_v9, 3 }
  0x90   :  { %v621_v31 = vadd.f32 %v576_v23, %v515_v15  ;;  %v513_v32 = vadd.f32 %v466_v27, %v407_v16  ;;  %v674_v46 = vrot.slane %v637_v22, 4  ;;  %v680_v50 = vsel %vm673_vm4, %v677_v21, %v679_v43 }
  0x91   :  { %v682_v59 = vsel %vm673_vm4, %v679_v43, %v681_v0  ;;  %v432_v10 = vmul.f32 %v8284_v37, %v236_v18  ;;  %v464_v34 = vsel %vm13316_vm2, %v462_v30, %v463_v13  ;;  %v675_v44 = vrot.slane %v638_v24, 4 }
  0x92   :  { %v369_v54 = vrot.slane %v326_v11, 1  ;;  %v325_v56 = vmul.f32 %v8275_v33, %v232_v28  ;;  %v726_v58 = vadd.f32 %v680_v50, %v620_v25  ;;  %v512_v61 = vadd.f32 %v464_v34, %v406_v20 }
  0x93   :  { %v572_v35 = vsel %vm567_vm3, %v569_v7, %v571_v14  ;;  %v431_v63 = vmul.f32 %v8284_v37, %v232_v28  ;;  %v727_v38 = vadd.f32 %v682_v59, %v621_v31  ;;  %v8428_v0 = vmul.f32 %v8300_v42, %v236_v18 }
  0x94   :  { %v619_v55 = vadd.f32 %v572_v35, %v513_v32  ;;  %v367_v1 = vrot.slane %v325_v56, 1  ;;  %v475_v3 = vrot.slane %v432_v10, 2  ;;  %v280_v4 = vmul.f32 %v8292_v41, %v232_v28 }
  0x95   :  { %v473_v5 = vrot.slane %v431_v63, 2  ;;  %v537_v13 = vmul.f32 %v8300_v42, %v232_v28  ;;  %v570_v9 = vsel %vm567_vm3, %v568_v53, %v569_v7  ;;  %v678_v15 = vsel %vm673_vm4, %v675_v44, %v677_v21 }
  0x96   :  { %v368_v14 = vsel %vm13315_vm1, %v365_v39, %v367_v1  ;;  %v370_v16 = vsel %vm13315_vm1, %v367_v1, %v369_v54  ;;  %v745_v22 = vadd.f32 %v8423_v52, %v726_v58  ;;  %v618_v43 = vadd.f32 %v570_v9, %v512_v61 }
  0x97   :  { %v411_v49 = vadd.f32 %v368_v14, %v8356_v6  ;;  %v412_v23 = vadd.f32 %v370_v16, %v280_v4  ;;  %v746_v20 = vadd.f32 %v8423_v52, %v727_v38  ;;  %v725_v24 = vadd.f32 %v678_v15, %v619_v55 }
  0x98   :  { %v581_v25 = vrot.slane %v8428_v0, 3  ;;  %v8443_v27 = vmul.f32 %v8307_v45, %v236_v18  ;;  %v474_v36 = vsel %vm13316_vm2, %v471_v47, %v473_v5  ;;  %v476_v39 = vsel %vm13316_vm2, %v473_v5, %v475_v3  ;;  %v139_v0 = vld [vmem:[%s8236_s5 + $0x58] sm:$0xff] }
  0x99   :  { %v579_v21 = vrot.slane %v537_v13, 3  ;;  %v643_v7 = vmul.f32 %v8307_v45, %v232_v28  ;;  %v477_v6 = vrot.slane %v8365_v8, 2  ;;  %v8453_v11 = vmul.f32 %v8307_v45, %v8339_v62 }
  0x9a   :  { %v517_v30 = vadd.f32 %v474_v36, %v411_v49  ;;  %v518_v53 = vadd.f32 %v476_v39, %v412_v23  ;;  %v747_v31 = vadd.f32 %v8423_v52, %v728_v19  ;;  %v676_v32 = vsel %vm673_vm4, %v674_v46, %v675_v44 }
  0x9b   :  { %v281_v40 = vmul.f32 %v8292_v41, %v236_v18  ;;  %v372_v47 = vsel %vm13315_vm1, %v369_v54, %v371_v17  ;;  %v761_v50 = vmax.f32 %v745_v22, 0.0  ;;  %v762_v28 = vmax.f32 %v746_v20, 0.0 }
  0x9c   :  { %v687_v8 = vrot.slane %v8443_v27, 4  ;;  %v724_v59 = vadd.f32 %v676_v32, %v618_v43  ;;  %v580_v62 = vsel %vm567_vm3, %v577_v57, %v579_v21  ;;  %v582_v19 = vsel %vm567_vm3, %v579_v21, %v581_v25 }
  0x9d   :  { %v685_v46 = vrot.slane %v643_v7, 4  ;;  %v744_v18 = vadd.f32 %v8423_v52, %v725_v24  ;;  %v413_v10 = vadd.f32 %v372_v47, %v281_v40  ;;  %v623_v2 = vadd.f32 %v580_v62, %v517_v30 }
  0x9e   :  { %v624_v34 = vadd.f32 %v582_v19, %v518_v53  ;;  %v743_v17 = vadd.f32 %v8423_v52, %v724_v59  ;;  %v763_v44 = vmax.f32 %v747_v31, 0.0  ;;  %v583_v54 = vrot.slane %v8369_v12, 3 }
  0x9f   :  { %v760_v56 = vmax.f32 %v744_v18, 0.0  ;;  %v689_v48 = vrot.slane %v8453_v11, 4  ;;  %v478_v57 = vsel %vm13316_vm2, %v475_v3, %v477_v6  ;;  %v815_v61 = vrot.slane %v761_v50, 6 }
  0xa0   :  { %v759_v58 = vmax.f32 %v743_v17, 0.0  ;;  %v686_v35 = vsel %vm673_vm4, %v683_v60, %v685_v46  ;;  %v688_v63 = vsel %vm673_vm4, %v685_v46, %v687_v8  ;;  %v817_v55 = vrot.slane %v762_v28, 6  ;;  %v138_v28 = vld [vmem:[%s8236_s5 + $0x50] sm:$0xff] }
  0xa1   :  { %v813_v38 = vrot.slane %v760_v56, 6  ;;  %v519_v1 = vadd.f32 %v478_v57, %v413_v10  ;;  %v729_v4 = vadd.f32 %v686_v35, %v623_v2  ;;  %v730_v12 = vadd.f32 %v688_v63, %v624_v34 }
  0xa2   :  { %v812_v5 = vrot.slane %v759_v58, 6  ;;  %v8483_v3 = vsel %vm13302_vm0, %v815_v61, %v817_v55  ;;  %v8485_v51 = vrot.slane %v763_v44, 6  ;;  %v584_v32 = vsel %vm567_vm3, %v581_v25, %v583_v54 }
  0xa3   :  { %v8480_v13 = vsel %vm13302_vm0, %v813_v38, %v815_v61  ;;  %v625_v59 = vadd.f32 %v584_v32, %v519_v1  ;;  %v955_v19 = vrot.slane %v8483_v3, 2  ;;  %v748_v18 = vadd.f32 %v8423_v52, %v729_v4 }
  0xa4   :  { %v8488_v60 = vsel %vm13302_vm0, %v812_v5, %v813_v38  ;;  %v8491_v9 = vsel %vm13302_vm0, 0.0, %v812_v5  ;;  %v1035_v15 = vrot.slane %v8480_v13, 3  ;;  %v953_v14 = vrot.slane %v8480_v13, 2 }
  0xa5   :  { %v1114_v16 = vrot.slane %v8491_v9, 4  ;;  %v1115_v22 = vrot.slane %v8488_v60, 4  ;;  %v1032_v43 = vrot.slane %v8491_v9, 3  ;;  %v1033_v49 = vrot.slane %v8488_v60, 3 }
  0xa6   :  { %v950_v23 = vrot.slane %v8491_v9, 2  ;;  %v951_v20 = vrot.slane %v8488_v60, 2  ;;  %v868_v24 = vrot.slane %v8491_v9, 1  ;;  %v869_v36 = vrot.slane %v8488_v60, 1 }
  0xa7   :  { %v1116_v39 = vsel %vm673_vm4, %v1114_v16, %v1115_v22  ;;  %v1034_v21 = vsel %vm567_vm3, %v1032_v43, %v1033_v49  ;;  %v1036_v7 = vsel %vm567_vm3, %v1033_v49, %v1035_v15  ;;  %v871_v6 = vrot.slane %v8480_v13, 1 }
  0xa8   :  { %7361 = vmatmul.msk.f32.vlgmr.msra.gmra.mxu1 %vm13300_vm5, %v1116_v39  ;;  %v7489_v11 = vpack.i.bf16 %v1036_v7, %v1034_v21  ;;  %v952_v30 = vsel %vm13316_vm2, %v950_v23, %v951_v20  ;;  %v954_v53 = vsel %vm13316_vm2, %v951_v20, %v953_v14  ;;  %v870_v31 = vsel %vm13315_vm1, %v868_v24, %v869_v36  ;;  %v8557_v23 = vld [vmem:[%s8236_s5 + $0x70] sm:$0xff] }
  0xa9   :  { %v7484_v40 = vpack.i.bf16 %v954_v53, %v952_v30  ;;  %v872_v47 = vsel %vm13315_vm1, %v869_v36, %v871_v6  ;;  %v8519_v50 = vsel %vm13302_vm0, %v817_v55, %v8485_v51  ;;  %v1117_v25 = vrot.slane %v8480_v13, 4 }
  0xaa   :  { %7490 = vrot.lane.b32.xlu2 %v7489_v11, %s8197_s18  ;;  %v7479_v62 = vpack.i.bf16 %v872_v47, %v870_v31  ;;  %v957_v46 = vrot.slane %v8519_v50, 2  ;;  %v749_v10 = vadd.f32 %v8423_v52, %v730_v12  ;;  %v185_v2 = vrot.slane %v138_v28, 6 }
  0xab   :  { %7485 = vrot.lane.b32.xlu1 %v7484_v40, %s8198_s19  ;;  %v690_v34 = vsel %vm673_vm4, %v687_v8, %v689_v48  ;;  %v956_v17 = vsel %vm13316_vm2, %v953_v14, %v955_v19  ;;  %v187_v54 = vrot.slane %v139_v0, 6  ;;  %v1118_v57 = vsel %vm673_vm4, %v1115_v22, %v1117_v25  ;;  %v140_v8 = vld [vmem:[%s8236_s5 + $0x60] sm:$0xff]  ;;  %v141_v48 = vld [vmem:[%s8236_s5 + $0x68] sm:$0xff]  ;;  %v790_v0 = vld [vmem:[%s8297_s17 + $0x78] sm:$0xff] }
  0xac   :  { %7480 = vrot.lane.b32.xlu0 %v7479_v62, %s8199_s20  ;;  %v958_v44 = vsel %vm13316_vm2, %v955_v19, %v957_v46  ;;  %v731_v56 = vadd.f32 %v690_v34, %v625_v59  ;;  %v764_v58 = vmax.f32 %v748_v18, 0.0  ;;  %v765_v61 = vmax.f32 %v749_v10, 0.0  ;;  %1234 = vmatpush.msra.mxu0 %v790_v0 }
  0xad   :  { %v7499_v35 = vpack.i.bf16 %v958_v44, %v956_v17  ;;  %v186_v27 = vsel %vm13302_vm0, %v183_v29, %v185_v2  ;;  %v188_v63 = vsel %vm13302_vm0, %v185_v2, %v187_v54  ;;  %v873_v38 = vrot.slane %v8483_v3, 1 }
  0xae   :  { %v875_v55 = vrot.slane %v8519_v50, 1  ;;  %v750_v1 = vadd.f32 %v8423_v52, %v731_v56  ;;  %v1119_v4 = vrot.slane %v8483_v3, 4  ;;  %v189_v12 = vrot.slane %v140_v8, 6 }
  0xaf   :  { %v191_v26 = vrot.slane %v141_v48, 6  ;;  %v821_v29 = vrot.slane %v764_v58, 6  ;;  %v823_v5 = vrot.slane %v765_v61, 6  ;;  %v874_v14 = vsel %vm13315_vm1, %v871_v6, %v873_v38 }
  0xb0   :  { %7362 = vmatmul.msk.f32.gmra.mxu1 %vm13300_vm5, %v1118_v57  ;;  %v876_v16 = vsel %vm13315_vm1, %v873_v38, %v875_v55  ;;  %v766_v22 = vmax.f32 %v750_v1, 0.0  ;;  %v1120_v43 = vsel %vm673_vm4, %v1117_v25, %v1119_v4  ;;  %v190_v39 = vsel %vm13302_vm0, %v187_v54, %v189_v12  ;;  %v143_v38 = vld [vmem:[%s8236_s5 + $0x78] sm:$0xff] }
  0xb1   :  { %v192_v49 = vsel %vm13302_vm0, %v189_v12, %v191_v26  ;;  %v8561_v20 = vsel %vm13302_vm0, %v8485_v51, %v821_v29  ;;  %v8564_v24 = vsel %vm13302_vm0, %v821_v29, %v823_v5  ;;  %v7494_v36 = vpack.i.bf16 %v876_v16, %v874_v14 }
  0xb2   :  { %7500 = vrot.lane.b32.xlu2 %v7499_v35, %s8198_s19  ;;  %v1037_v21 = vrot.slane %v8483_v3, 3  ;;  %v1039_v7 = vrot.slane %v8519_v50, 3  ;;  %v825_v6 = vrot.slane %v766_v22, 6  ;;  %v1121_v11 = vrot.slane %v8519_v50, 4 }
  0xb3   :  { %248 = vperm.xlu1 %7477, %v186_v27   ;;  %v193_v51 = vrot.slane %v8557_v23, 6  ;;  %v877_v30 = vrot.slane %v8561_v20, 1  ;;  %v879_v53 = vrot.slane %v8564_v24, 1  ;;  %v959_v2 = vrot.slane %v8561_v20, 2 }
  0xb4   :  { %252 = vperm.xlu0 %7476, %v188_v63   ;;  %v1038_v31 = vsel %vm567_vm3, %v1035_v15, %v1037_v21  ;;  %v1040_v32 = vsel %vm567_vm3, %v1037_v21, %v1039_v7  ;;  %v8579_v40 = vsel %vm13302_vm0, %v823_v5, %v825_v6  ;;  %v862_v47 = vsel %vm13302_vm0, %v825_v6, 0.0 }
  0xb5   :  { %v1122_v28 = vsel %vm673_vm4, %v1119_v4, %v1121_v11  ;;  %v194_v59 = vsel %vm13302_vm0, %v191_v26, %v193_v51  ;;  %v878_v62 = vsel %vm13315_vm1, %v875_v55, %v877_v30  ;;  %v880_v19 = vsel %vm13315_vm1, %v877_v30, %v879_v53  ;;  %v788_v30 = vld [vmem:[%s8297_s17 + $0x68] sm:$0xff] }
  0xb6   :  { %v7504_v25 = vpack.i.bf16 %v1040_v32, %v1038_v31  ;;  %v881_v15 = vrot.slane %v8579_v40, 1  ;;  %v883_v18 = vrot.slane %v862_v47, 1  ;;  %v7509_v10 = vpack.i.bf16 %v880_v19, %v878_v62  ;;  %v786_v31 = vld [vmem:[%s8297_s17 + $0x58] sm:$0xff]  ;;  %v785_v32 = vld [vmem:[%s8297_s17 + $0x50] sm:$0xff]  ;;  %v241_v19 = vpop.permute.xlu2 %240 }
  0xb7   :  { %v961_v34 = vrot.slane %v8564_v24, 2  ;;  %v1123_v17 = vrot.slane %v8561_v20, 4  ;;  %v1041_v44 = vrot.slane %v8561_v20, 3  ;;  %v1043_v54 = vrot.slane %v8564_v24, 3  ;;  %v782_v62 = vld [vmem:[%s8297_s17 + $0x38] sm:$0xff] }
  0xb8   :  { %7363 = vmatmul.msk.f32.gmra.mxu1 %vm13300_vm5, %v1120_v43  ;;  %v882_v56 = vsel %vm13315_vm1, %v879_v53, %v881_v15  ;;  %v884_v57 = vsel %vm13315_vm1, %v881_v15, %v883_v18  ;;  %v960_v58 = vsel %vm13316_vm2, %v957_v46, %v959_v2  ;;  %v1045_v55 = vrot.slane %v8579_v40, 3  ;;  %v787_v53 = vld [vmem:[%s8297_s17 + $0x60] sm:$0xff]  ;;  %v781_v18 = vld [vmem:[%s8297_s17 + $0x30] sm:$0xff] }
  0xb9   :  { %v962_v61 = vsel %vm13316_vm2, %v959_v2, %v961_v34  ;;  %v1124_v35 = vsel %vm673_vm4, %v1121_v11, %v1123_v17  ;;  %v1042_v27 = vsel %vm567_vm3, %v1039_v7, %v1041_v44  ;;  %v1044_v8 = vsel %vm567_vm3, %v1041_v44, %v1043_v54 }
  0xba   :  { %260 = vperm.xlu2 %7478, %v192_v49   ;;  %v7524_v48 = vpack.i.bf16 %v884_v57, %v882_v56  ;;  %v7514_v63 = vpack.i.bf16 %v962_v61, %v960_v58  ;;  %v1047_v1 = vrot.slane %v862_v47, 3  ;;  %v7519_v4 = vpack.i.bf16 %v1044_v8, %v1042_v27  ;;  %v778_v56 = vld [vmem:[%s8297_s17 + $0x18] sm:$0xff] }
  0xbb   :  { %7495 = vrot.lane.b32.xlu1 %v7494_v36, %s8199_s20  ;;  %v1125_v46 = vrot.slane %v8564_v24, 4  ;;  %v963_v12 = vrot.slane %v8579_v40, 2  ;;  %v965_v26 = vrot.slane %v862_v47, 2  ;;  %v195_v29 = vrot.slane %v143_v38, 6 }
  0xbc   :  { %256 = vperm.xlu0 %7476, %v190_v39   ;;  %v1046_v5 = vsel %vm567_vm3, %v1043_v54, %v1045_v55  ;;  %v1048_v14 = vsel %vm567_vm3, %v1045_v55, %v1047_v1  ;;  %v1127_v39 = vrot.slane %v8579_v40, 4  ;;  %v1129_v6 = vrot.slane %v862_v47, 4  ;;  %v783_v47 = vld [vmem:[%s8297_s17 + $0x40] sm:$0xff] }
  0xbd   :  { %v1126_v16 = vsel %vm673_vm4, %v1123_v17, %v1125_v46  ;;  %v964_v22 = vsel %vm13316_vm2, %v961_v34, %v963_v12  ;;  %v966_v43 = vsel %vm13316_vm2, %v963_v12, %v965_v26  ;;  %v196_v49 = vsel %vm13302_vm0, %v193_v51, %v195_v29  ;;  %v789_v51 = vld [vmem:[%s8297_s17 + $0x70] sm:$0xff]  ;;  %v779_v17 = vld [vmem:[%s8297_s17 + $0x20] sm:$0xff] }
  0xbe   :  { %v7534_v23 = vpack.i.bf16 %v1048_v14, %v1046_v5  ;;  %v7529_v36 = vpack.i.bf16 %v966_v43, %v964_v22  ;;  %v1128_v21 = vsel %vm673_vm4, %v1125_v46, %v1127_v39  ;;  %v204_v7 = vsel %vm13302_vm0, %v195_v29, 0.0  ;;  %1235 = vmatpush.msra.mxu0 %v789_v51  ;;  %v777_v14 = vld [vmem:[%s8297_s17 + $0x10] sm:$0xff]  ;;  %v775_v43 = vld [vmem:[%s8297_s17] sm:$0xff] }
  0xbf   :  { %v1130_v11 = vsel %vm673_vm4, %v1127_v39, %v1129_v6  ;;  %v434_v44 = vmul.f32 %v8284_v37, %v241_v19  ;;  %v282_v57 = vmul.f32 %v8292_v41, %v241_v19  ;;  %v540_v8 = vmul.f32 %v8300_v42, %v241_v19 }
  0xc0   :  { %7364 = vmatmul.msk.f32.gmra.mxu1 %vm13300_vm5, %v1122_v28  ;;  %1236 = vmatpush.msra.mxu0 %v788_v30  ;;  %v784_v28 = vld [vmem:[%s8297_s17 + $0x48] sm:$0xff] }
  0xc1   :  { %v479_v27 = vrot.slane %v434_v44, 2  ;;  %v585_v1 = vrot.slane %v540_v8, 3 }
  0xc2   :  { %264 = vperm.xlu2 %7478, %v194_v59   ;;  %1237 = vmatpush.msra.mxu0 %v787_v53  ;;  %v245_v59 = vpop.permute.xlu0 %244 }
  0xc3   :  { %7505 = vrot.lane.b32.xlu1 %v7504_v25, %s8197_s18  ;;  %v8637_v0 = vmul.f32 %v8275_v33, %v245_v59  ;;  %v328_v25 = vmul.f32 %v8275_v33, %v241_v19  ;;  %v8644_v34 = vmul.f32 %v8284_v37, %v245_v59  ;;  %v8655_v61 = vmul.f32 %v8300_v42, %v245_v59 }
  0xc4   :  { %7510 = vrot.lane.b32.xlu0 %v7509_v10, %s8199_s20  ;;  %1238 = vmatpush.msra.mxu0 %v786_v31  ;;  %v780_v10 = vld [vmem:[%s8297_s17 + $0x28] sm:$0xff]  ;;  %v8663_v38 = vmul.f32 %v8307_v45, %v245_v59  ;;  %v283_v31 = vmul.f32 %v8292_v41, %v245_v59 }
  0xc5   :  { %v374_v15 = vrot.slane %v8637_v0, 1  ;;  %v373_v2 = vrot.slane %v328_v25, 1  ;;  %v480_v58 = vrot.slane %v8644_v34, 2 }
  0xc6   :  { %1239 = vmatpush.msra.mxu0 %v785_v32  ;;  %v692_v26 = vrot.slane %v8663_v38, 4 }
  0xc7   :  { %v375_v54 = vsel %vm13315_vm1, %v373_v2, %v374_v15 }
  0xc8   :  { %7365 = vmatmul.msk.f32.gmra.mxu1 %vm13300_vm5, %v1124_v35  ;;  %1240 = vmatpush.msra.mxu0 %v784_v28  ;;  %v414_v35 = vadd.f32 %v375_v54, %v282_v57 }
  0xca   :  { %7525 = vrot.lane.b32.xlu2 %v7524_v48, %s8199_s20  ;;  %1241 = vmatpush.msra.mxu0 %v783_v47  ;;  %v481_v48 = vsel %vm13316_vm2, %v479_v27, %v480_v58 }
  0xcb   :  { %7515 = vrot.lane.b32.xlu1 %v7514_v63, %s8198_s19  ;;  %v586_v63 = vrot.slane %v8655_v61, 3  ;;  %v520_v55 = vadd.f32 %v481_v48, %v414_v35 }
  0xcc   :  { %7520 = vrot.lane.b32.xlu0 %v7519_v4, %s8197_s18  ;;  %1242 = vmatpush.msra.mxu0 %v782_v62  ;;  %v646_v4 = vmul.f32 %v8307_v45, %v241_v19 }
  0xcd   :  { %v587_v12 = vsel %vm567_vm3, %v585_v1, %v586_v63 }
  0xce   :  { %1243 = vmatpush.msra.mxu0 %v781_v18  ;;  %v626_v29 = vadd.f32 %v587_v12, %v520_v55  ;;  %v691_v5 = vrot.slane %v646_v4, 4 }
  0xd0   :  { %7366 = vmatmul.msk.f32.gmra.mxu1 %vm13300_vm5, %v1126_v16  ;;  %1244 = vmatpush.msra.mxu0 %v780_v10  ;;  %v776_v16 = vld [vmem:[%s8297_s17 + $0x8] sm:$0xff]  ;;  %v693_v22 = vsel %vm673_vm4, %v691_v5, %v692_v26 }
  0xd2   :  { %7535 = vrot.lane.b32.xlu2 %v7534_v23, %s8197_s18  ;;  %1245 = vmatpush.msra.mxu0 %v779_v17 }
  0xd3   :  { %268 = vperm.xlu1 %7477, %v196_v49   ;;  %v732_v49 = vadd.f32 %v693_v22, %v626_v29 }
  0xd4   :  { %7530 = vrot.lane.b32.xlu0 %v7529_v36, %s8198_s19  ;;  %1246 = vmatpush.msra.mxu0 %v778_v56 }
  0xd5   :  { %v751_v36 = vadd.f32 %v8423_v52, %v732_v49 }
  0xd6   :  { %1247 = vmatpush.msra.mxu0 %v777_v14 }
  0xd7   :  { %v767_v39 = vmax.f32 %v751_v36, 0.0 }
  0xd8   :  { %7367 = vmatmul.msk.f32.gmra.mxu1 %vm13300_vm5, %v1128_v21  ;;  %1248 = vmatpush.msra.mxu0 %v776_v16 }
  0xda   :  { %1249 = vmatpush.msra.mxu0 %v775_v43 }
  0xdb   :  { %313 = vperm.xlu1 %7477, %v204_v7   ;;  %v8681_v7 = vrot.slane %v767_v39, 6 }
  0xdd   :  { %v8685_v6 = vsel %vm13302_vm0, 0.0, %v8681_v7 }
  0xde   :  { %v1131_v28 = vrot.slane %v8685_v6, 4  ;;  %v1049_v47 = vrot.slane %v8685_v6, 3 }
  0xe0   :  { %7368 = vmatmul.msk.f32.gmra.mxu1 %vm13300_vm5, %v1130_v11 }
 0x104   :  { %v8666_v46 = vpop.permute.xlu2 %7490 }
 0x105   :  { %v7492_v17 = vunpack.i.l.bf16 %v8666_v46  ;;  %v7493_v4 = vunpack.i.h.bf16 %v8666_v46 }
 0x10c   :  { %v8678_v23 = vpop.permute.xlu2 %7500 }
 0x10d   :  { %v7502_v12 = vunpack.i.l.bf16 %v8678_v23 }
 0x114   :  { %v261_v21 = vpop.permute.xlu2 %260 }
 0x115   :  { %v8688_v11 = vmul.f32 %v8275_v33, %v261_v21  ;;  %v8718_v44 = vmul.f32 %v8284_v37, %v261_v21  ;;  %v8721_v54 = vmul.f32 %v8300_v42, %v261_v21  ;;  %v287_v8 = vmul.f32 %v8292_v41, %v261_v21 }
 0x116   :  { %v8754_v16 = vmul.f32 %v8307_v45, %v261_v21 }
 0x117   :  { %v382_v59 = vrot.slane %v8688_v11, 1  ;;  %v488_v14 = vrot.slane %v8718_v44, 2 }
 0x11c   :  { %v8690_v51 = vpop.permute.xlu2 %264 }
 0x11d   :  { %v8694_v30 = vmul.f32 %v8275_v33, %v8690_v51  ;;  %v7486_v53 = vpop.permute.xlu1 %7485  ;;  %v8702_v19 = vmul.f32 %v8284_v37, %v8690_v51  ;;  %v8735_v57 = vmul.f32 %v8300_v42, %v8690_v51  ;;  %v8739_v35 = vmul.f32 %v8307_v45, %v8690_v51 }
 0x11e   :  { %v7481_v32 = vpop.permute.xlu0 %7480  ;;  %v7487_v25 = vunpack.i.l.bf16 %v7486_v53  ;;  %v7488_v55 = vunpack.i.h.bf16 %v7486_v53 }
 0x11f   :  { %v13299_v62 = vrot.slane %v8694_v30, 1  ;;  %v7483_v10 = vunpack.i.h.bf16 %v7481_v32  ;;  %v7482_v2 = vunpack.i.l.bf16 %v7481_v32  ;;  %v13298_v48 = vrot.slane %v8702_v19, 2 }
 0x120   :  { %v596_v49 = vrot.slane %v8735_v57, 3  ;;  %v702_v46 = vrot.slane %v8739_v35, 4 }
 0x121   :  { %v385_v56 = vsel %vm13315_vm1, %v382_v59, %v13299_v62  ;;  %v1149_v27 = vsel %vm13300_vm5, %v8491_v9, %v7482_v2  ;;  %v1150_v5 = vsel %vm13300_vm5, %v8488_v60, %v7483_v10  ;;  %v594_v9 = vrot.slane %v8721_v54, 3 }
 0x122   :  { %v1166_v1 = vsel %vm1165_vm6, %v1149_v27, %v7487_v25  ;;  %v419_v22 = vadd.f32 %v385_v56, %v287_v8  ;;  %v491_v60 = vsel %vm13316_vm2, %v488_v14, %v13298_v48  ;;  %v1167_v25 = vsel %vm1165_vm6, %v1150_v5, %v7488_v55 }
 0x123   :  { %v1183_v29 = vsel %vm13301_vm7, %v1166_v1, %v7492_v17  ;;  %v700_v5 = vrot.slane %v8754_v16, 4 }
 0x124   :  { %1250 = vmatmul.f32.vlgmr.msra.gmra.mxu0 %v1183_v29  ;;  %v525_v27 = vadd.f32 %v491_v60, %v419_v22  ;;  %v1184_v22 = vsel %vm13301_vm7, %v1167_v25, %v7493_v4 }
 0x125   :  { %v249_v43 = vpop.permute.xlu1 %248  ;;  %v703_v34 = vsel %vm673_vm4, %v700_v5, %v702_v46 }
 0x126   :  { %v330_v36 = vmul.f32 %v8275_v33, %v249_v43  ;;  %v436_v39 = vmul.f32 %v8284_v37, %v249_v43  ;;  %v253_v53 = vpop.permute.xlu0 %252  ;;  %v542_v21 = vmul.f32 %v8300_v42, %v249_v43  ;;  %v648_v17 = vmul.f32 %v8307_v45, %v249_v43 }
 0x127   :  { %v331_v32 = vmul.f32 %v8275_v33, %v253_v53  ;;  %v437_v56 = vmul.f32 %v8284_v37, %v253_v53  ;;  %v284_v8 = vmul.f32 %v8292_v41, %v249_v43  ;;  %v543_v29 = vmul.f32 %v8300_v42, %v253_v53 }
 0x128   :  { %v376_v10 = vrot.slane %v330_v36, 1  ;;  %v482_v2 = vrot.slane %v436_v39, 2  ;;  %v588_v62 = vrot.slane %v542_v21, 3  ;;  %v8776_v55 = vmul.f32 %v8307_v45, %v253_v53 }
 0x129   :  { %v378_v1 = vrot.slane %v331_v32, 1  ;;  %v484_v18 = vrot.slane %v437_v56, 2  ;;  %v694_v60 = vrot.slane %v648_v17, 4  ;;  %v590_v32 = vrot.slane %v543_v29, 3 }
 0x12a   :  { %v377_v48 = vsel %vm13315_vm1, %v374_v15, %v376_v10  ;;  %v483_v43 = vsel %vm13316_vm2, %v480_v58, %v482_v2  ;;  %v597_v15 = vsel %vm567_vm3, %v594_v9, %v596_v49  ;;  %v589_v58 = vsel %vm567_vm3, %v586_v63, %v588_v62 }
 0x12b   :  { %v415_v36 = vadd.f32 %v377_v48, %v283_v31  ;;  %v379_v39 = vsel %vm13315_vm1, %v376_v10, %v378_v1  ;;  %v485_v31 = vsel %vm13316_vm2, %v482_v2, %v484_v18  ;;  %v696_v48 = vrot.slane %v8776_v55, 4 }
 0x12c   :  { %v416_v0 = vadd.f32 %v379_v39, %v284_v8  ;;  %1253 = vmatmul.f32.gmra.mxu0 %v1184_v22  ;;  %v631_v25 = vadd.f32 %v597_v15, %v525_v27  ;;  %v591_v2 = vsel %vm567_vm3, %v588_v62, %v590_v32  ;;  %v695_v27 = vsel %vm673_vm4, %v692_v26, %v694_v60 }
 0x12d   :  { %v521_v21 = vadd.f32 %v483_v43, %v415_v36  ;;  %v7496_v4 = vpop.permute.xlu1 %7495  ;;  %v697_v63 = vsel %vm673_vm4, %v694_v60, %v696_v48  ;;  %v285_v62 = vmul.f32 %v8292_v41, %v253_v53 }
 0x12e   :  { %v522_v10 = vadd.f32 %v485_v31, %v416_v0  ;;  %v257_v17 = vpop.permute.xlu0 %256  ;;  %v7497_v8 = vunpack.i.l.bf16 %v7496_v4  ;;  %v737_v31 = vadd.f32 %v703_v34, %v631_v25 }
 0x12f   :  { %v627_v56 = vadd.f32 %v589_v58, %v521_v21  ;;  %v332_v29 = vmul.f32 %v8275_v33, %v257_v17  ;;  %v438_v36 = vmul.f32 %v8284_v37, %v257_v17  ;;  %v544_v39 = vmul.f32 %v8300_v42, %v257_v17 }
 0x130   :  { %v628_v55 = vadd.f32 %v591_v2, %v522_v10  ;;  %v650_v43 = vmul.f32 %v8307_v45, %v257_v17  ;;  %v286_v33 = vmul.f32 %v8292_v41, %v257_v17  ;;  %v1151_v42 = vsel %vm13300_vm5, %v8480_v13, %v7497_v8 }
 0x131   :  { %v733_v61 = vadd.f32 %v695_v27, %v627_v56  ;;  %v380_v22 = vrot.slane %v332_v29, 1  ;;  %v486_v15 = vrot.slane %v438_v36, 2  ;;  %v592_v26 = vrot.slane %v544_v39, 3 }
 0x132   :  { %v734_v0 = vadd.f32 %v697_v63, %v628_v55  ;;  %v698_v11 = vrot.slane %v650_v43, 4  ;;  %v7498_v10 = vunpack.i.h.bf16 %v7496_v4  ;;  %v7503_v39 = vunpack.i.h.bf16 %v8678_v23 }
 0x133   :  { %v381_v38 = vsel %vm13315_vm1, %v378_v1, %v380_v22  ;;  %v383_v37 = vsel %vm13315_vm1, %v380_v22, %v382_v59  ;;  %v752_v53 = vadd.f32 %v8423_v52, %v733_v61  ;;  %v487_v41 = vsel %vm13316_vm2, %v484_v18, %v486_v15 }
 0x134   :  { %v753_v60 = vadd.f32 %v8423_v52, %v734_v0  ;;  %v417_v21 = vadd.f32 %v381_v38, %v285_v62  ;;  %v418_v45 = vadd.f32 %v383_v37, %v286_v33  ;;  %v489_v1 = vsel %vm13316_vm2, %v486_v15, %v488_v14 }
 0x135   :  { %v7506_v58 = vpop.permute.xlu1 %7505  ;;  %v593_v13 = vsel %vm567_vm3, %v590_v32, %v592_v26  ;;  %v595_v2 = vsel %vm567_vm3, %v592_v26, %v594_v9  ;;  %v1168_v18 = vsel %vm1165_vm6, %v1151_v42, %v7502_v12  ;;  %v768_v34 = vmax.f32 %v752_v53, 0.0 }
 0x136   :  { %v769_v59 = vmax.f32 %v753_v60, 0.0  ;;  %v523_v17 = vadd.f32 %v487_v41, %v417_v21  ;;  %v524_v56 = vadd.f32 %v489_v1, %v418_v45  ;;  %v7507_v8 = vunpack.i.l.bf16 %v7506_v58  ;;  %v8826_v25 = vpop.permute.xlu0 %7510 }
 0x137   :  { %v699_v4 = vsel %vm673_vm4, %v696_v48, %v698_v11  ;;  %v701_v54 = vsel %vm673_vm4, %v698_v11, %v700_v5  ;;  %v885_v32 = vrot.slane %v8685_v6, 1  ;;  %v828_v36 = vrot.slane %v768_v34, 6 }
 0x138   :  { %v629_v44 = vadd.f32 %v593_v13, %v523_v17  ;;  %v630_v14 = vadd.f32 %v595_v2, %v524_v56  ;;  %v8831_v29 = vrot.slane %v769_v59, 6  ;;  %v1185_v9 = vsel %vm13301_vm7, %v1168_v18, %v7507_v8  ;;  %v8887_v17 = vld [vmem:[%s8241_s9] ss:$0 sm:$0xff] }
 0x139   :  { %1256 = vmatmul.f32.gmra.mxu0 %v1185_v9  ;;  %v756_v12 = vadd.f32 %v8423_v52, %v737_v31  ;;  %v7508_v61 = vunpack.i.h.bf16 %v7506_v58  ;;  %v7513_v63 = vunpack.i.h.bf16 %v8826_v25  ;;  %v1152_v16 = vsel %vm13300_vm5, %v8483_v3, %v7498_v10 }
 0x13a   :  { %v735_v27 = vadd.f32 %v699_v4, %v629_v44  ;;  %v736_v55 = vadd.f32 %v701_v54, %v630_v14  ;;  %v7512_v48 = vunpack.i.l.bf16 %v8826_v25  ;;  %v8848_v22 = vsel %vm13302_vm0, %v8681_v7, %v828_v36 }
 0x13b   :  { %v8852_v43 = vsel %vm13302_vm0, %v828_v36, %v8831_v29  ;;  %v1132_v23 = vrot.slane %v8848_v22, 4  ;;  %v1050_v0 = vrot.slane %v8848_v22, 3  ;;  %v968_v33 = vrot.slane %v8848_v22, 2 }
 0x13c   :  { %v755_v5 = vadd.f32 %v8423_v52, %v736_v55  ;;  %v1052_v3 = vrot.slane %v8852_v43, 3  ;;  %v970_v15 = vrot.slane %v8852_v43, 2  ;;  %v1169_v38 = vsel %vm1165_vm6, %v1152_v16, %v7503_v39  ;;  %v8054_v55 = vld [vmem:[%s8241_s9 + $0x2] ss:$0 sm:$0xff] }
 0x13d   :  { %v8854_v62 = vpop.permute.xlu1 %7515  ;;  %v754_v7 = vadd.f32 %v8423_v52, %v735_v27  ;;  %v772_v37 = vmax.f32 %v756_v12, 0.0  ;;  %v1133_v42 = vsel %vm673_vm4, %v1131_v28, %v1132_v23  ;;  %v1051_v60 = vsel %vm567_vm3, %v1049_v47, %v1050_v0  ;;  %v8055_v12 = vld [vmem:[%s8241_s9 + $0x3] ss:$0 sm:$0xff] }
 0x13e   :  { %v771_v26 = vmax.f32 %v755_v5, 0.0  ;;  %v1186_v21 = vsel %vm13301_vm7, %v1169_v38, %v7508_v61  ;;  %7369 = vmatmul.msk.f32.gmra.mxu1 %vm13300_vm5, %v1133_v42  ;;  %v1053_v45 = vsel %vm567_vm3, %v1050_v0, %v1052_v3  ;;  %v13380_v52 = vrot.slane %v8685_v6, 2  ;;  %v8882_v41 = vpop.permute.xlu0 %7520  ;;  %v8056_v61 = vld [vmem:[%s8241_s9 + $0x4] ss:$0 sm:$0xff] }
 0x13f   :  { %v971_v28 = vsel %vm13316_vm2, %v968_v33, %v970_v15  ;;  %v886_v31 = vrot.slane %v8848_v22, 1  ;;  %v7517_v47 = vunpack.i.l.bf16 %v8854_v62  ;;  %v7549_v1 = vpack.i.bf16 %v1053_v45, %v1051_v60 }
 0x140   :  { %v969_v53 = vsel %vm13316_vm2, %v13380_v52, %v968_v33  ;;  %v888_v58 = vrot.slane %v8852_v43, 1  ;;  %v770_v10 = vmax.f32 %v754_v7, 0.0  ;;  %v288_v56 = vmul.f32 %v8887_v17, %v8690_v51 }
 0x141   :  { %v7544_v11 = vpack.i.bf16 %v971_v28, %v969_v53  ;;  %v887_v59 = vsel %vm13315_vm1, %v885_v32, %v886_v31  ;;  %1259 = vmatmul.f32.gmra.mxu0 %v1186_v21  ;;  %7550 = vrot.lane.b32.xlu2 %v7549_v1, %s8197_s18  ;;  %v1134_v2 = vrot.slane %v8852_v43, 4  ;;  %v7522_v8 = vunpack.i.l.bf16 %v8882_v41  ;;  %v8053_v32 = vld [vmem:[%s8241_s9 + $0x1] ss:$0 sm:$0xff]  ;;  %s8227_s9 = smov 30  }
 0x142   :  { %v889_v13 = vsel %vm13315_vm1, %v886_v31, %v888_v58  ;;  %v832_v18 = vrot.slane %v770_v10, 6  ;;  %v1153_v44 = vsel %vm13300_vm5, %v8519_v50, %v7512_v48  ;;  %v834_v14 = vrot.slane %v771_v26, 6  ;;  %s7360_s12 = sld [smem:[%s13297_s0 + %s8227_s9]]  }
 0x143   :  { %7545 = vrot.lane.b32.xlu1 %v7544_v11, %s8198_s19  ;;  %v7539_v25 = vpack.i.bf16 %v889_v13, %v887_v59  ;;  %v1170_v34 = vsel %vm1165_vm6, %v1153_v44, %v7517_v47  ;;  %v8899_v4 = vrot.slane %v772_v37, 6  ;;  %v1154_v54 = vsel %vm13300_vm5, %v8561_v20, %v7513_v63 }
 0x144   :  { %v7518_v9 = vunpack.i.h.bf16 %v8854_v62  ;;  %v7523_v39 = vunpack.i.h.bf16 %v8882_v41  ;;  %v1135_v20 = vsel %vm673_vm4, %v1132_v23, %v1134_v2  ;;  %v8921_v63 = vsel %vm13302_vm0, %v8831_v29, %v832_v18  ;;  %v8933_v29 = vpop.permute.xlu2 %7525 }
 0x145   :  { %v269_v51 = vpop.permute.xlu1 %268  ;;  %7540 = vrot.lane.b32.xlu0 %v7539_v25, %s8199_s20  ;;  %v1054_v62 = vrot.slane %v8921_v63, 3  ;;  %v1187_v0 = vsel %vm13301_vm7, %v1170_v34, %v7522_v8  ;;  %v8929_v38 = vsel %vm13302_vm0, %v832_v18, %v834_v14  ;;  %v972_v23 = vrot.slane %v8921_v63, 2 }
 0x146   :  { %v335_v27 = vmul.f32 %v8053_v32, %v269_v51  ;;  %v8907_v36 = vmul.f32 %v8054_v55, %v269_v51  ;;  %v8910_v50 = vmul.f32 %v8055_v12, %v269_v51  ;;  %v8914_v16 = vmul.f32 %v8056_v61, %v269_v51  ;;  %7370 = vmatmul.msk.f32.gmra.mxu1 %vm13300_vm5, %v1135_v20  ;;  %v7531_v57 = vpop.permute.xlu0 %7530 }
 0x147   :  { %v890_v7 = vrot.slane %v8921_v63, 1  ;;  %v13381_v37 = vrot.slane %v8694_v30, 1  ;;  %v1055_v42 = vsel %vm567_vm3, %v1052_v3, %v1054_v62  ;;  %v8945_v60 = vsel %vm13302_vm0, %v834_v14, %v8899_v4 }
 0x148   :  { %v386_v5 = vrot.slane %v335_v27, 1  ;;  %v492_v48 = vrot.slane %v8907_v36, 2  ;;  %v598_v33 = vrot.slane %v8910_v50, 3  ;;  %v1171_v21 = vsel %vm1165_vm6, %v1154_v54, %v7518_v9 }
 0x149   :  { %1262 = vmatmul.f32.gmra.mxu0 %v1187_v0  ;;  %v704_v52 = vrot.slane %v8914_v16, 4  ;;  %1086 = vrot.lane.b32.xlu2 %v1055_v42, %s8197_s18  ;;  %v973_v30 = vsel %vm13316_vm2, %v970_v15, %v972_v23  ;;  %v974_v53 = vrot.slane %v8929_v38, 2  ;;  %v13382_v3 = vrot.slane %v8702_v19, 2  ;;  %v8057_v16 = vld [vmem:[%s8251_s13] ss:$0 sm:$0xff] }
 0x14a   :  { %v387_v26 = vsel %vm13315_vm1, %v13381_v37, %v386_v5  ;;  %v891_v31 = vsel %vm13315_vm1, %v888_v58, %v890_v7  ;;  %v892_v47 = vrot.slane %v8929_v38, 1  ;;  %v1136_v41 = vrot.slane %v8921_v63, 4 }
 0x14b   :  { %v420_v45 = vadd.f32 %v387_v26, %v288_v56  ;;  %v493_v28 = vsel %vm13316_vm2, %v13382_v3, %v492_v48  ;;  %v599_v11 = vsel %vm567_vm3, %v596_v49, %v598_v33  ;;  %v975_v59 = vsel %vm13316_vm2, %v972_v23, %v974_v53 }
 0x14c   :  { %v976_v10 = vrot.slane %v8945_v60, 2  ;;  %v7559_v56 = vpack.i.bf16 %v975_v59, %v973_v30  ;;  %v893_v19 = vsel %vm13315_vm1, %v890_v7, %v892_v47  ;;  %v705_v25 = vsel %vm673_vm4, %v702_v46, %v704_v52 }
 0x14d   :  { %v526_v1 = vadd.f32 %v493_v28, %v420_v45  ;;  %v314_v15 = vpop.permute.xlu1 %313  ;;  %v7554_v18 = vpack.i.bf16 %v893_v19, %v891_v31  ;;  %v1137_v54 = vsel %vm673_vm4, %v1134_v2, %v1136_v41  ;;  %v7527_v9 = vunpack.i.l.bf16 %v8933_v29 }
 0x14e   :  { %v336_v58 = vmul.f32 %v8053_v32, %v314_v15  ;;  %v442_v13 = vmul.f32 %v8054_v55, %v314_v15  ;;  %v548_v49 = vmul.f32 %v8055_v12, %v314_v15  ;;  %7560 = vrot.lane.b32.xlu1 %v7559_v56, %s8198_s19  ;;  %v654_v34 = vmul.f32 %v8056_v61, %v314_v15 }
 0x14f   :  { %v632_v8 = vadd.f32 %v599_v11, %v526_v1  ;;  %v289_v32 = vmul.f32 %v8887_v17, %v269_v51  ;;  %7555 = vrot.lane.b32.xlu0 %v7554_v18, %s8199_s20  ;;  %7371 = vmatmul.msk.f32.gmra.mxu1 %vm13300_vm5, %v1137_v54  ;;  %v1188_v35 = vsel %vm13301_vm7, %v1171_v21, %v7523_v39  ;;  %v7532_v46 = vunpack.i.l.bf16 %v7531_v57  ;;  %v7536_v51 = vpop.permute.xlu2 %7535 }
 0x150   :  { %v388_v44 = vrot.slane %v336_v58, 1  ;;  %v494_v14 = vrot.slane %v442_v13, 2  ;;  %v600_v36 = vrot.slane %v548_v49, 3  ;;  %v977_v2 = vsel %vm13316_vm2, %v974_v53, %v976_v10 }
 0x151   :  { %v738_v27 = vadd.f32 %v705_v25, %v632_v8  ;;  %1265 = vmatmul.f32.gmra.mxu0 %v1188_v35  ;;  %1008 = vrot.lane.b32.xlu2 %v977_v2, %s8198_s19  ;;  %v1056_v17 = vrot.slane %v8929_v38, 3  ;;  %v706_v61 = vrot.slane %v654_v34, 4  ;;  %v1138_v39 = vrot.slane %v8929_v38, 4 }
 0x152   :  { %v389_v55 = vsel %vm13315_vm1, %v386_v5, %v388_v44  ;;  %v495_v50 = vsel %vm13316_vm2, %v492_v48, %v494_v14  ;;  %v1155_v0 = vsel %vm13300_vm5, %v8564_v24, %v7527_v9  ;;  %v601_v23 = vsel %vm567_vm3, %v598_v33, %v600_v36 }
 0x153   :  { %v421_v12 = vadd.f32 %v389_v55, %v289_v32  ;;  %v757_v20 = vadd.f32 %v8057_v16, %v738_v27  ;;  %v1172_v7 = vsel %vm1165_vm6, %v1155_v0, %v7532_v46  ;;  %v7528_v26 = vunpack.i.h.bf16 %v8933_v29 }
 0x154   :  { %v7537_v42 = vunpack.i.l.bf16 %v7536_v51  ;;  %v707_v48 = vsel %vm673_vm4, %v704_v52, %v706_v61  ;;  %v1057_v45 = vsel %vm567_vm3, %v1054_v62, %v1056_v17  ;;  %v1139_v30 = vsel %vm673_vm4, %v1136_v41, %v1138_v39 }
 0x155   :  { %v527_v5 = vadd.f32 %v495_v50, %v421_v12  ;;  %v773_v37 = vmax.f32 %v757_v20, 0.0  ;;  %v894_v33 = vrot.slane %v8945_v60, 1  ;;  %v7533_v29 = vunpack.i.h.bf16 %v7531_v57  ;;  %v1316_v20 = vpop.f32.mrf.mxu1 }
 0x156   :  { %v1189_v24 = vsel %vm13301_vm7, %v1172_v7, %v7537_v42  ;;  %v1058_v62 = vrot.slane %v8945_v60, 3  ;;  %v1140_v1 = vrot.slane %v8945_v60, 4  ;;  %v1156_v11 = vsel %vm13300_vm5, %v8579_v40, %v7528_v26 }
 0x157   :  { %v633_v21 = vadd.f32 %v601_v23, %v527_v5  ;;  %v838_v53 = vrot.slane %v773_v37, 6  ;;  %1088 = vrot.lane.b32.xlu0 %v1057_v45, %s8197_s18  ;;  %7372 = vmatmul.msk.f32.gmra.mxu1 %vm13300_vm5, %v1139_v30  ;;  %v1173_v58 = vsel %vm1165_vm6, %v1156_v11, %v7533_v29  ;;  %v7538_v13 = vunpack.i.h.bf16 %v7536_v51 }
 0x158   :  { %v1059_v25 = vsel %vm567_vm3, %v1056_v17, %v1058_v62  ;;  %v1141_v40 = vsel %vm673_vm4, %v1138_v39, %v1140_v1 }
 0x159   :  { %v739_v3 = vadd.f32 %v707_v48, %v633_v21  ;;  %1268 = vmatmul.f32.gmra.mxu0 %v1189_v24  ;;  %v9005_v52 = vsel %vm13302_vm0, %v8899_v4, %v838_v53  ;;  %v895_v4 = vsel %vm13315_vm1, %v892_v47, %v894_v33  ;;  %v1190_v47 = vsel %vm13301_vm7, %v1173_v58, %v7538_v13 }
 0x15a   :  { %v1060_v31 = vrot.slane %v9005_v52, 3  ;;  %v896_v41 = vrot.slane %v9005_v52, 1  ;;  %v978_v44 = vrot.slane %v9005_v52, 2  ;;  %v1142_v14 = vrot.slane %v9005_v52, 4 }
 0x15b   :  { %v758_v28 = vadd.f32 %v8057_v16, %v739_v3  ;;  %v9059_v16 = vld [vmem:[%s8708_s24] ss:$0 sm:$0xff] }
 0x15c   :  { %v1061_v15 = vsel %vm567_vm3, %v1058_v62, %v1060_v31  ;;  %v897_v56 = vsel %vm13315_vm1, %v894_v33, %v896_v41  ;;  %v979_v32 = vsel %vm13316_vm2, %v976_v10, %v978_v44  ;;  %v1143_v27 = vsel %vm673_vm4, %v1140_v1, %v1142_v14 }
 0x15d   :  { %v774_v59 = vmax.f32 %v758_v28, 0.0  ;;  %1092 = vrot.lane.b32.xlu2 %v1061_v15, %s8197_s18  ;;  %v7564_v19 = vpack.i.bf16 %v897_v56, %v895_v4  ;;  %v1319_v33 = vpop.f32.mrf.mxu1 }
 0x15f   :  { %v840_v8 = vrot.slane %v774_v59, 6  ;;  %7565 = vrot.lane.b32.xlu1 %v7564_v19, %s8199_s20  ;;  %1090 = vrot.lane.b32.xlu0 %v1059_v25, %s8197_s18 }
 0x160   :  { %7373 = vmatmul.msk.f32.gmra.mxu1 %vm13300_vm5, %v1141_v40 }
 0x161   :  { %v9027_v57 = vsel %vm13302_vm0, %v838_v53, %v840_v8  ;;  %1271 = vmatmul.f32.gmra.mxu0 %v1190_v47  ;;  %v863_v9 = vsel %vm13302_vm0, %v840_v8, 0.0  ;;  %vm2796_vm0 = vcmask 1040384  }
 0x162   :  { %v1062_v18 = vrot.slane %v9027_v57, 3  ;;  %v898_v49 = vrot.slane %v9027_v57, 1  ;;  %v1064_v35 = vrot.slane %v863_v9, 3  ;;  %v980_v46 = vrot.slane %v9027_v57, 2 }
 0x163   :  { %v1144_v55 = vrot.slane %v9027_v57, 4  ;;  %v900_v36 = vrot.slane %v863_v9, 1  ;;  %v982_v51 = vrot.slane %v863_v9, 2  ;;  %v1146_v50 = vrot.slane %v863_v9, 4  ;;  %v9072_v9 = vld [vmem:[%s8714_s28] ss:$0 sm:$0xff] }
 0x164   :  { %v1063_v34 = vsel %vm567_vm3, %v1060_v31, %v1062_v18  ;;  %v899_v54 = vsel %vm13315_vm1, %v896_v41, %v898_v49  ;;  %v1065_v2 = vsel %vm567_vm3, %v1062_v18, %v1064_v35  ;;  %v981_v10 = vsel %vm13316_vm2, %v978_v44, %v980_v46 }
 0x165   :  { %1094 = vrot.lane.b32.xlu2 %v1063_v34, %s8197_s18  ;;  %v1145_v12 = vsel %vm673_vm4, %v1142_v14, %v1144_v55  ;;  %v901_v17 = vsel %vm13315_vm1, %v898_v49, %v900_v36  ;;  %v983_v61 = vsel %vm13316_vm2, %v980_v46, %v982_v51  ;;  %v1147_v39 = vsel %vm673_vm4, %v1144_v55, %v1146_v50 }
 0x167   :  { %1010 = vrot.lane.b32.xlu1 %v979_v32, %s8198_s19  ;;  %930 = vrot.lane.b32.xlu0 %v899_v54, %s8199_s20 }
 0x168   :  { %7374 = vmatmul.msk.f32.gmra.mxu1 %vm13300_vm5, %v1143_v27 }
 0x16d   :  { %1096 = vrot.lane.b32.xlu2 %v1065_v2, %s8197_s18 }
 0x16f   :  { %1012 = vrot.lane.b32.xlu1 %v981_v10, %s8198_s19  ;;  %932 = vrot.lane.b32.xlu0 %v901_v17, %s8199_s20 }
 0x170   :  { %7375 = vmatmul.msk.f32.gmra.mxu1 %vm13300_vm5, %v1145_v12  ;;  %v9078_v12 = vld [vmem:[%s8726_s2] ss:$0 sm:$0xff] }
 0x177   :  { %1014 = vrot.lane.b32.xlu1 %v983_v61, %s8198_s19 }
 0x178   :  { %7376 = vmatmul.msk.f32.gmra.mxu1 %vm13300_vm5, %v1147_v39 }
 0x19b   :  { %v9067_v29 = vpop.permute.xlu2 %7550 }
 0x19c   :  { %v7553_v56 = vunpack.i.h.bf16 %v9067_v29 }
 0x1a1   :  { %v1251_v5 = vpop.f32.mrf.mxu0 }
 0x1a2   :  { %v1252_v0 = vadd.f32 %v9059_v16, %v1251_v5 }
 0x1a4   :  { %v1317_v23 = vadd.f32 %v1316_v20, %v1252_v0 }
 0x1a6   :  { %v1364_v7 = vmax.f32 %v1317_v23, 0.0  ;;  %v1322_v23 = vpop.f32.mrf.mxu1 }
 0x1a8   :  { %v1396_v37 = vrot.slane %v1364_v7, 2  ;;  %v1397_v26 = vrot.slane %v1364_v7, 4  ;;  %v1398_v42 = vrot.slane %v1364_v7, 6  ;;  %v1493_v21 = vsel %vm1492_vm8, %v1364_v7, -inf }
 0x1a9   :  { %v1494_v48 = vrot.slane %v1493_v21, 4  ;;  %v1254_v45 = vpop.f32.mrf.mxu0 }
 0x1aa   :  { %v1500_v30 = vsel %vm1492_vm8, %v1396_v37, -inf  ;;  %v1507_v53 = vsel %vm1492_vm8, %v1397_v26, -inf  ;;  %v1514_v3 = vsel %vm1492_vm8, %v1398_v42, -inf  ;;  %v1255_v24 = vadd.f32 %v9059_v16, %v1254_v45 }
 0x1ab   :  { %v1495_v28 = vmax.f32 %v1493_v21, %v1494_v48  ;;  %v1501_v62 = vrot.slane %v1500_v30, 4  ;;  %v1508_v31 = vrot.slane %v1507_v53, 4  ;;  %v1515_v41 = vrot.slane %v1514_v3, 4 }
 0x1ac   :  { %v1320_v1 = vadd.f32 %v1319_v33, %v1255_v24 }
 0x1ad   :  { %v1496_v11 = vrot.slane %v1495_v28, 2  ;;  %v1502_v59 = vmax.f32 %v1500_v30, %v1501_v62  ;;  %v1509_v15 = vmax.f32 %v1507_v53, %v1508_v31  ;;  %v1516_v4 = vmax.f32 %v1514_v3, %v1515_v41 }
 0x1ae   :  { %v1365_v19 = vmax.f32 %v1320_v1, 0.0  ;;  %v7552_v41 = vunpack.i.l.bf16 %v9067_v29 }
 0x1af   :  { %v1497_v58 = vmax.f32 %v1495_v28, %v1496_v11  ;;  %v1503_v13 = vrot.slane %v1502_v59, 2  ;;  %v1510_v8 = vrot.slane %v1509_v15, 2  ;;  %v1517_v25 = vrot.slane %v1516_v4, 2 }
 0x1b0   :  { %v1399_v40 = vrot.slane %v1365_v19, 2  ;;  %v1400_v47 = vrot.slane %v1365_v19, 4  ;;  %v1401_v18 = vrot.slane %v1365_v19, 6  ;;  %v1521_v49 = vsel %vm1492_vm8, %v1365_v19, -inf }
 0x1b1   :  { %v1498_v44 = vrot.slane %v1497_v58, 1  ;;  %v1504_v14 = vmax.f32 %v1502_v59, %v1503_v13  ;;  %v1511_v34 = vmax.f32 %v1509_v15, %v1510_v8  ;;  %v1518_v54 = vmax.f32 %v1516_v4, %v1517_v25 }
 0x1b2   :  { %v1522_v32 = vrot.slane %v1521_v49, 4  ;;  %v1528_v27 = vsel %vm1492_vm8, %v1399_v40, -inf  ;;  %v1535_v35 = vsel %vm1492_vm8, %v1400_v47, -inf  ;;  %v1542_v46 = vsel %vm1492_vm8, %v1401_v18, -inf }
 0x1b3   :  { %v1499_v55 = vmax.f32 %v1497_v58, %v1498_v44  ;;  %v1505_v36 = vrot.slane %v1504_v14, 1  ;;  %v1512_v2 = vrot.slane %v1511_v34, 1  ;;  %v1519_v10 = vrot.slane %v1518_v54, 1 }
 0x1b4   :  { %v1523_v17 = vmax.f32 %v1521_v49, %v1522_v32  ;;  %v1529_v51 = vrot.slane %v1528_v27, 4  ;;  %v1536_v50 = vrot.slane %v1535_v35, 4  ;;  %v1543_v61 = vrot.slane %v1542_v46, 4 }
 0x1b5   :  { %v1506_v39 = vmax.f32 %v1504_v14, %v1505_v36  ;;  %v1513_v20 = vmax.f32 %v1511_v34, %v1512_v2  ;;  %v1520_v5 = vmax.f32 %v1518_v54, %v1519_v10  ;;  %v1945_v0 = vmul.f32 %v9072_v9, %v1499_v55  ;;  %v9087_v3 = vpop.permute.xlu1 %7545 }
 0x1b6   :  { %v1524_v7 = vrot.slane %v1523_v17, 2  ;;  %v1530_v37 = vmax.f32 %v1528_v27, %v1529_v51  ;;  %v1537_v26 = vmax.f32 %v1535_v35, %v1536_v50  ;;  %v1544_v42 = vmax.f32 %v1542_v46, %v1543_v61  ;;  %v1257_v21 = vpop.f32.mrf.mxu0  ;;  %v1325_v50 = vpop.f32.mrf.mxu1 }
 0x1b7   :  { %v1946_v48 = vmul.f32 %v9072_v9, %v1506_v39  ;;  %v1947_v45 = vmul.f32 %v9072_v9, %v1513_v20  ;;  %v1948_v30 = vmul.f32 %v9072_v9, %v1520_v5  ;;  %v9085_v53 = vadd.f32 %v9078_v12, %v1945_v0  ;;  %v7541_v31 = vpop.permute.xlu0 %7540 }
 0x1b8   :  { %v1525_v24 = vmax.f32 %v1523_v17, %v1524_v7  ;;  %v1531_v33 = vrot.slane %v1530_v37, 2  ;;  %v1538_v28 = vrot.slane %v1537_v26, 2  ;;  %v1545_v62 = vrot.slane %v1544_v42, 2 }
 0x1b9   :  { %v9091_v1 = vadd.f32 %v9078_v12, %v1946_v48  ;;  %v9094_v11 = vadd.f32 %v9078_v12, %v1947_v45  ;;  %v9097_v59 = vadd.f32 %v9078_v12, %v1948_v30  ;;  %v2463_v13 = vrot.slane %v9085_v53, 4 }
 0x1ba   :  { %v1526_v15 = vrot.slane %v1525_v24, 1  ;;  %v1532_v4 = vmax.f32 %v1530_v37, %v1531_v33  ;;  %v1539_v19 = vmax.f32 %v1537_v26, %v1538_v28  ;;  %v1546_v58 = vmax.f32 %v1544_v42, %v1545_v62 }
 0x1bb   :  { %v2464_v8 = vrot.slane %v9091_v1, 3  ;;  %v2466_v25 = vrot.slane %v9094_v11, 2  ;;  %v2468_v40 = vrot.slane %v9097_v59, 1  ;;  %v7548_v14 = vunpack.i.h.bf16 %v9087_v3 }
 0x1bc   :  { %v1527_v47 = vmax.f32 %v1525_v24, %v1526_v15  ;;  %v1533_v18 = vrot.slane %v1532_v4, 1  ;;  %v1540_v49 = vrot.slane %v1539_v19, 1  ;;  %v1547_v44 = vrot.slane %v1546_v58, 1 }
 0x1bd   :  { %v7547_v34 = vunpack.i.l.bf16 %v9087_v3  ;;  %v7543_v54 = vunpack.i.h.bf16 %v7541_v31  ;;  %v7542_v32 = vunpack.i.l.bf16 %v7541_v31  ;;  %v9107_v2 = vsel %vm2231_vm9, %v2464_v8, %v2463_v13 }
 0x1be   :  { %v1534_v27 = vmax.f32 %v1532_v4, %v1533_v18  ;;  %v1541_v35 = vmax.f32 %v1539_v19, %v1540_v49  ;;  %v1548_v46 = vmax.f32 %v1546_v58, %v1547_v44  ;;  %v1949_v55 = vmul.f32 %v9072_v9, %v1527_v47  ;;  %v1260_v36 = vpop.f32.mrf.mxu0 }
 0x1bf   :  { %v1258_v10 = vadd.f32 %v9059_v16, %v1257_v21  ;;  %v1157_v17 = vsel %vm13300_vm5, %v8685_v6, %v7542_v32  ;;  %v1261_v51 = vadd.f32 %v9059_v16, %v1260_v36  ;;  %v1158_v6 = vsel %vm13300_vm5, %v8848_v22, %v7543_v54 }
 0x1c0   :  { %v1950_v61 = vmul.f32 %v9072_v9, %v1534_v27  ;;  %v1951_v39 = vmul.f32 %v9072_v9, %v1541_v35  ;;  %v1952_v20 = vmul.f32 %v9072_v9, %v1548_v46  ;;  %v9117_v5 = vadd.f32 %v9078_v12, %v1949_v55  ;;  %v9120_v37 = vpop.permute.xlu1 %7560 }
 0x1c1   :  { %v1323_v0 = vadd.f32 %v1322_v23, %v1258_v10  ;;  %v1174_v7 = vsel %vm1165_vm6, %v1157_v17, %v7547_v34  ;;  %v1326_v26 = vadd.f32 %v1325_v50, %v1261_v51  ;;  %v9134_v23 = vpop.permute.xlu0 %7555  ;;  %v7563_v3 = vunpack.i.h.bf16 %v9120_v37 }
 0x1c2   :  { %v9125_v42 = vadd.f32 %v9078_v12, %v1950_v61  ;;  %v9128_v21 = vadd.f32 %v9078_v12, %v1951_v39  ;;  %v9131_v48 = vadd.f32 %v9078_v12, %v1952_v20  ;;  %v1191_v45 = vsel %vm13301_vm7, %v1174_v7, %v7552_v41 }
 0x1c3   :  { %v1366_v30 = vmax.f32 %v1323_v0, 0.0  ;;  %1274 = vmatmul.f32.gmra.mxu0 %v1191_v45  ;;  %v7562_v24 = vunpack.i.l.bf16 %v9120_v37  ;;  %v7558_v22 = vunpack.i.h.bf16 %v9134_v23  ;;  %v7557_v31 = vunpack.i.l.bf16 %v9134_v23 }
 0x1c4   :  { %v2470_v33 = vrot.slane %v9125_v42, 7  ;;  %v2472_v28 = vrot.slane %v9128_v21, 6  ;;  %v2474_v62 = vrot.slane %v9131_v48, 5  ;;  %v1367_v8 = vmax.f32 %v1326_v26, 0.0  ;;  %v1328_v26 = vpop.f32.mrf.mxu1 }
 0x1c5   :  { %v1402_v41 = vrot.slane %v1366_v30, 2  ;;  %v1403_v15 = vrot.slane %v1366_v30, 4  ;;  %v1404_v4 = vrot.slane %v1366_v30, 6  ;;  %v1549_v19 = vsel %vm1492_vm8, %v1366_v30, -inf }
 0x1c6   :  { %v2471_v58 = vsel %vm2219_vm11, %v2470_v33, %v9117_v5  ;;  %v1550_v13 = vrot.slane %v1549_v19, 4  ;;  %v9152_v47 = vsel %vm1165_vm6, %v1158_v6, %v7548_v14  ;;  %v1263_v46 = vpop.f32.mrf.mxu0  ;;  %v1405_v36 = vrot.slane %v1367_v8, 2 }
 0x1c7   :  { %v2473_v18 = vsel %vm2222_vm10, %v2472_v28, %v2471_v58  ;;  %v1556_v49 = vsel %vm1492_vm8, %v1402_v41, -inf  ;;  %v1563_v44 = vsel %vm1492_vm8, %v1403_v15, -inf  ;;  %v1570_v34 = vsel %vm1492_vm8, %v1404_v4, -inf  ;;  %v2181_v28 = vld [vmem:[%s9146_s6 + $0x38] sm:$0xff] }
 0x1c8   :  { %v9159_v54 = vsel %vm2225_vm12, %v2474_v62, %v2473_v18  ;;  %v1551_v32 = vmax.f32 %v1549_v19, %v1550_v13  ;;  %v1557_v27 = vrot.slane %v1556_v49, 4  ;;  %v1564_v35 = vrot.slane %v1563_v44, 4  ;;  %2297 = vmatpush.msra.mxu3 %v2181_v28  ;;  %v2180_v18 = vld [vmem:[%s9146_s6 + $0x30] sm:$0xff] }
 0x1c9   :  { %v1571_v55 = vrot.slane %v1570_v34, 4  ;;  %v1406_v14 = vrot.slane %v1367_v8, 4  ;;  %v1407_v10 = vrot.slane %v1367_v8, 6  ;;  %v1577_v61 = vsel %vm1492_vm8, %v1367_v8, -inf }
 0x1ca   :  { %v1552_v17 = vrot.slane %v1551_v32, 2  ;;  %v1558_v51 = vmax.f32 %v1556_v49, %v1557_v27  ;;  %v1565_v50 = vmax.f32 %v1563_v44, %v1564_v35  ;;  %v1578_v20 = vrot.slane %v1577_v61, 4  ;;  %2298 = vmatpush.msra.mxu3 %v2180_v18 }
 0x1cb   :  { %v1572_v39 = vmax.f32 %v1570_v34, %v1571_v55  ;;  %v1584_v0 = vsel %vm1492_vm8, %v1405_v36, -inf  ;;  %v1591_v7 = vsel %vm1492_vm8, %v1406_v14, -inf  ;;  %v1598_v4 = vsel %vm1492_vm8, %v1407_v10, -inf  ;;  %v2179_v14 = vld [vmem:[%s9146_s6 + $0x28] sm:$0xff] }
 0x1cc   :  { %v1553_v6 = vmax.f32 %v1551_v32, %v1552_v17  ;;  %v1559_v45 = vrot.slane %v1558_v51, 2  ;;  %v1566_v30 = vrot.slane %v1565_v50, 2  ;;  %v1585_v33 = vrot.slane %v1584_v0, 4  ;;  %2299 = vmatpush.msra.mxu3 %v2179_v14 }
 0x1cd   :  { %v1573_v62 = vrot.slane %v1572_v39, 2  ;;  %v1579_v41 = vmax.f32 %v1577_v61, %v1578_v20  ;;  %v1592_v15 = vrot.slane %v1591_v7, 4  ;;  %v1599_v32 = vrot.slane %v1598_v4, 4 }
 0x1ce   :  { %v1554_v19 = vrot.slane %v1553_v6, 1  ;;  %v1560_v58 = vmax.f32 %v1558_v51, %v1559_v45  ;;  %v1567_v13 = vmax.f32 %v1565_v50, %v1566_v30  ;;  %v1586_v8 = vmax.f32 %v1584_v0, %v1585_v33 }
 0x1cf   :  { %v1574_v49 = vmax.f32 %v1572_v39, %v1573_v62  ;;  %v1580_v44 = vrot.slane %v1579_v41, 2  ;;  %v9167_v34 = vmax.f32 %v1591_v7, %v1592_v15  ;;  %v9173_v50 = vmax.f32 %v1598_v4, %v1599_v32  ;;  %v1266_v7 = vpop.f32.mrf.mxu0  ;;  %v1089_v4 = vpop.permute.xlu0 %1088  ;;  %v2176_v32 = vld [vmem:[%s9146_s6 + $0x10] sm:$0xff] }
 0x1d0   :  { %v1555_v27 = vmax.f32 %v1553_v6, %v1554_v19  ;;  %v1561_v35 = vrot.slane %v1560_v58, 1  ;;  %v1568_v55 = vrot.slane %v1567_v13, 1  ;;  %v1587_v36 = vrot.slane %v1586_v8, 2  ;;  %v2178_v6 = vld [vmem:[%s9146_s6 + $0x20] sm:$0xff] }
 0x1d1   :  { %v1575_v10 = vrot.slane %v1574_v49, 1  ;;  %v9170_v17 = vmax.f32 %v1579_v41, %v1580_v44  ;;  %v1192_v28 = vsel %vm13301_vm7, %v9152_v47, %v7553_v56  ;;  %2300 = vmatpush.msra.mxu3 %v2178_v6  ;;  %v1264_v19 = vadd.f32 %v9059_v16, %v1263_v46 }
 0x1d2   :  { %v1562_v61 = vmax.f32 %v1560_v58, %v1561_v35  ;;  %v1569_v39 = vmax.f32 %v1567_v13, %v1568_v55  ;;  %v1953_v20 = vmul.f32 %v9072_v9, %v1555_v27  ;;  %v9176_v0 = vmax.f32 %v1586_v8, %v1587_v36  ;;  %1277 = vmatmul.f32.gmra.mxu0 %v1192_v28  ;;  %v2177_v58 = vld [vmem:[%s9146_s6 + $0x18] sm:$0xff]  ;;  %v1331_v8 = vpop.f32.mrf.mxu1 }
 0x1d3   :  { %v1576_v45 = vmax.f32 %v1574_v49, %v1575_v10  ;;  %v1159_v29 = vsel %vm13300_vm5, %v8852_v43, %v7557_v31  ;;  %v1267_v56 = vadd.f32 %v9059_v16, %v1266_v7  ;;  %v1160_v47 = vsel %vm13300_vm5, %v8921_v63, %v7558_v22  ;;  %2301 = vmatpush.msra.mxu3 %v2177_v58  ;;  %v1087_v31 = vpop.permute.xlu2 %1086 }
 0x1d4   :  { %v1954_v62 = vmul.f32 %v9072_v9, %v1562_v61  ;;  %v1955_v41 = vmul.f32 %v9072_v9, %v1569_v39  ;;  %v9188_v15 = vadd.f32 %v9078_v12, %v1953_v20  ;;  %v1329_v44 = vadd.f32 %v1328_v26, %v1264_v19 }
 0x1d5   :  { %v1956_v13 = vmul.f32 %v9072_v9, %v1576_v45  ;;  %v1176_v23 = vsel %vm1165_vm6, %v1159_v29, %v7562_v24  ;;  %v1332_v63 = vadd.f32 %v1331_v8, %v1267_v56  ;;  %v1177_v22 = vsel %vm1165_vm6, %v1160_v47, %v7563_v3  ;;  %2302 = vmatpush.msra.mxu3 %v2176_v32 }
 0x1d6   :  { %v9203_v18 = vadd.f32 %v9078_v12, %v1954_v62  ;;  %v9206_v46 = vadd.f32 %v9078_v12, %v1955_v41  ;;  %v2476_v49 = vrot.slane %v9188_v15, 4  ;;  %v1368_v55 = vmax.f32 %v1329_v44, 0.0 }
 0x1d7   :  { %v9211_v43 = vadd.f32 %v9078_v12, %v1956_v13  ;;  %v1193_v14 = vsel %vm13301_vm7, %v1176_v23, %v1087_v31  ;;  %v1369_v24 = vmax.f32 %v1332_v63, 0.0  ;;  %v1194_v10 = vsel %vm13301_vm7, %v1177_v22, %v1089_v4  ;;  %v9234_v56 = vpop.permute.xlu0 %1090 }
 0x1d8   :  { %v2477_v27 = vsel %vm2228_vm13, %v2476_v49, %v9159_v54  ;;  %v2478_v26 = vrot.slane %v9203_v18, 3  ;;  %v2480_v35 = vrot.slane %v9206_v46, 2  ;;  %v1408_v3 = vrot.slane %v1368_v55, 2 }
 0x1d9   :  { %v2482_v36 = vrot.slane %v9211_v43, 1  ;;  %v1409_v61 = vrot.slane %v1368_v55, 4  ;;  %v1410_v39 = vrot.slane %v1368_v55, 6  ;;  %v1605_v54 = vsel %vm1492_vm8, %v1368_v55, -inf }
 0x1da   :  { %v9227_v37 = vsel %vm2231_vm9, %v2478_v26, %v2477_v27  ;;  %v1411_v20 = vrot.slane %v1369_v24, 2  ;;  %v1412_v7 = vrot.slane %v1369_v24, 4  ;;  %v1413_v6 = vrot.slane %v1369_v24, 6  ;;  %1280 = vmatmul.f32.gmra.mxu0 %v1193_v14 }
 0x1db   :  { %v1606_v45 = vrot.slane %v1605_v54, 4  ;;  %v1612_v28 = vsel %vm1492_vm8, %v1408_v3, -inf  ;;  %v1619_v62 = vsel %vm1492_vm8, %v1409_v61, -inf  ;;  %v1626_v41 = vsel %vm1492_vm8, %v1410_v39, -inf }
 0x1dc   :  { %v1613_v4 = vrot.slane %v1612_v28, 4  ;;  %v1620_v19 = vrot.slane %v1619_v62, 4  ;;  %v1627_v58 = vrot.slane %v1626_v41, 4  ;;  %v1633_v13 = vsel %vm1492_vm8, %v1369_v24, -inf }
 0x1dd   :  { %v1607_v29 = vmax.f32 %v1605_v54, %v1606_v45  ;;  %v1634_v47 = vrot.slane %v1633_v13, 4  ;;  %v1640_v8 = vsel %vm1492_vm8, %v1411_v20, -inf  ;;  %v1647_v49 = vsel %vm1492_vm8, %v1412_v7, -inf }
 0x1de   :  { %v1614_v44 = vmax.f32 %v1612_v28, %v1613_v4  ;;  %v1621_v32 = vmax.f32 %v1619_v62, %v1620_v19  ;;  %v1628_v23 = vmax.f32 %v1626_v41, %v1627_v58  ;;  %v1641_v63 = vrot.slane %v1640_v8, 4  ;;  %v7566_v58 = vpop.permute.xlu1 %7565 }
 0x1df   :  { %v1608_v22 = vrot.slane %v1607_v29, 2  ;;  %v1635_v31 = vmax.f32 %v1633_v13, %v1634_v47  ;;  %v1648_v27 = vrot.slane %v1647_v49, 4  ;;  %v1654_v26 = vsel %vm1492_vm8, %v1413_v6, -inf }
 0x1e0   :  { %v1615_v55 = vrot.slane %v1614_v44, 2  ;;  %v1622_v14 = vrot.slane %v1621_v32, 2  ;;  %v1629_v24 = vrot.slane %v1628_v23, 2  ;;  %v1642_v3 = vmax.f32 %v1640_v8, %v1641_v63 }
 0x1e1   :  { %v1609_v61 = vmax.f32 %v1607_v29, %v1608_v22  ;;  %v1636_v39 = vrot.slane %v1635_v31, 2  ;;  %v1649_v54 = vmax.f32 %v1647_v49, %v1648_v27  ;;  %v1655_v45 = vrot.slane %v1654_v26, 4 }
 0x1e2   :  { %v1616_v20 = vmax.f32 %v1614_v44, %v1615_v55  ;;  %v1623_v33 = vmax.f32 %v1621_v32, %v1622_v14  ;;  %v1630_v7 = vmax.f32 %v1628_v23, %v1629_v24  ;;  %v1643_v28 = vrot.slane %v1642_v3, 2  ;;  %1283 = vmatmul.f32.gmra.mxu0 %v1194_v10  ;;  %v1269_v44 = vpop.f32.mrf.mxu0  ;;  %v931_v32 = vpop.permute.xlu0 %930 }
 0x1e3   :  { %v1610_v62 = vrot.slane %v1609_v61, 1  ;;  %v1637_v41 = vmax.f32 %v1635_v31, %v1636_v39  ;;  %v1650_v4 = vrot.slane %v1649_v54, 2  ;;  %v1656_v19 = vmax.f32 %v1654_v26, %v1655_v45  ;;  %v2175_v39 = vld [vmem:[%s9146_s6 + $0x8] sm:$0xff]  ;;  %v1334_v45 = vpop.f32.mrf.mxu1 }
 0x1e4   :  { %v1617_v13 = vrot.slane %v1616_v20, 1  ;;  %v1624_v6 = vrot.slane %v1623_v33, 1  ;;  %v1631_v47 = vrot.slane %v1630_v7, 1  ;;  %v1644_v51 = vmax.f32 %v1642_v3, %v1643_v28  ;;  %2303 = vmatpush.msra.mxu3 %v2175_v39 }
 0x1e5   :  { %v1611_v30 = vmax.f32 %v1609_v61, %v1610_v62  ;;  %v1638_v8 = vrot.slane %v1637_v41, 1  ;;  %v1651_v29 = vmax.f32 %v1649_v54, %v1650_v4  ;;  %v1657_v49 = vrot.slane %v1656_v19, 2  ;;  %v2174_v54 = vld [vmem:[%s9146_s6] sm:$0xff] }
 0x1e6   :  { %v1618_v23 = vmax.f32 %v1616_v20, %v1617_v13  ;;  %v1625_v63 = vmax.f32 %v1623_v33, %v1624_v6  ;;  %v1632_v22 = vmax.f32 %v1630_v7, %v1631_v47  ;;  %v1645_v31 = vrot.slane %v1644_v51, 1  ;;  %2304 = vmatpush.msra.mxu3 %v2174_v54 }
 0x1e7   :  { %v1961_v27 = vmul.f32 %v9072_v9, %v1611_v30  ;;  %v1639_v10 = vmax.f32 %v1637_v41, %v1638_v8  ;;  %v1652_v26 = vrot.slane %v1651_v29, 1  ;;  %v1658_v55 = vmax.f32 %v1656_v19, %v1657_v49 }
 0x1e8   :  { %v1962_v14 = vmul.f32 %v9072_v9, %v1618_v23  ;;  %v1963_v24 = vmul.f32 %v9072_v9, %v1625_v63  ;;  %v1964_v3 = vmul.f32 %v9072_v9, %v1632_v22  ;;  %v1646_v61 = vmax.f32 %v1644_v51, %v1645_v31 }
 0x1e9   :  { %v9246_v20 = vadd.f32 %v9078_v12, %v1961_v27  ;;  %v1653_v33 = vmax.f32 %v1651_v29, %v1652_v26  ;;  %v1659_v7 = vrot.slane %v1658_v55, 1  ;;  %v1965_v30 = vmul.f32 %v9072_v9, %v1639_v10  ;;  %v1011_v27 = vpop.permute.xlu1 %1010  ;;  %v1009_v10 = vpop.permute.xlu2 %1008 }
 0x1ea   :  { %v9250_v28 = vadd.f32 %v9078_v12, %v1962_v14  ;;  %v9253_v62 = vadd.f32 %v9078_v12, %v1963_v24  ;;  %v9256_v41 = vadd.f32 %v9078_v12, %v1964_v3  ;;  %v1966_v51 = vmul.f32 %v9072_v9, %v1646_v61  ;;  %v933_v3 = vpop.permute.xlu0 %932 }
 0x1eb   :  { %v1660_v4 = vmax.f32 %v1658_v55, %v1659_v7  ;;  %v1967_v19 = vmul.f32 %v9072_v9, %v1653_v33  ;;  %v9261_v13 = vadd.f32 %v9078_v12, %v1965_v30  ;;  %v7568_v6 = vunpack.i.h.bf16 %v7566_v58 }
 0x1ec   :  { %v2494_v47 = vrot.slane %v9253_v62, 2  ;;  %v2496_v8 = vrot.slane %v9256_v41, 1  ;;  %v9266_v29 = vadd.f32 %v9078_v12, %v1966_v51  ;;  %v7567_v49 = vunpack.i.l.bf16 %v7566_v58 }
 0x1ed   :  { %v1968_v23 = vmul.f32 %v9072_v9, %v1660_v4  ;;  %v9270_v63 = vadd.f32 %v9078_v12, %v1967_v19  ;;  %v1270_v22 = vadd.f32 %v9059_v16, %v1269_v44  ;;  %v9275_v31 = vsel %vm13300_vm5, %v9005_v52, %v931_v32  ;;  %v1272_v32 = vpop.f32.mrf.mxu0  ;;  %v1337_v4 = vpop.f32.mrf.mxu1 }
 0x1ee   :  { %v2498_v26 = vrot.slane %v9266_v29, 7  ;;  %v1161_v55 = vsel %vm13300_vm5, %v8929_v38, %v7567_v49  ;;  %v1162_v58 = vsel %vm13300_vm5, %v8945_v60, %v7568_v6  ;;  %v1273_v30 = vadd.f32 %v9059_v16, %v1272_v32 }
 0x1ef   :  { %v9283_v14 = vadd.f32 %v9078_v12, %v1968_v23  ;;  %v2500_v44 = vrot.slane %v9270_v63, 6  ;;  %v1335_v24 = vadd.f32 %v1334_v45, %v1270_v22  ;;  %v1178_v52 = vsel %vm1165_vm6, %v1161_v55, %v1009_v10 }
 0x1f0   :  { %v2499_v61 = vsel %vm2219_vm11, %v2498_v26, %v9261_v13  ;;  %v1195_v38 = vsel %vm13301_vm7, %v1178_v52, %v9234_v56  ;;  %v1179_v39 = vsel %vm1165_vm6, %v1162_v58, %v1011_v27  ;;  %v2467_v45 = vsel %vm2234_vm14, %v2466_v25, %v9107_v2 }
 0x1f1   :  { %v2501_v60 = vsel %vm2222_vm10, %v2500_v44, %v2499_v61  ;;  %v2502_v54 = vrot.slane %v9283_v14, 5  ;;  %v1370_v33 = vmax.f32 %v1335_v24, 0.0  ;;  %1286 = vmatmul.f32.gmra.mxu0 %v1195_v38  ;;  %v2469_v7 = vsel %vm13319_vm15, %v2468_v40, %v2467_v45  ;;  %v1093_v52 = vpop.permute.xlu2 %1092 }
 0x1f2   :  { %v2481_v56 = vsel %vm2234_vm14, %v2480_v35, %v9227_v37  ;;  %v9308_v51 = vsel %vm13300_vm5, %v9027_v57, %v933_v3  ;;  %v9320_v16 = vsel %vm673_vm4, 0.0, %v2469_v7  ;;  %v1338_v35 = vadd.f32 %v1337_v4, %v1273_v30 }
 0x1f3   :  { %v9311_v19 = vsel %vm2225_vm12, %v2502_v54, %v2501_v60  ;;  %v1414_v25 = vrot.slane %v1370_v33, 2  ;;  %v1415_v2 = vrot.slane %v1370_v33, 4  ;;  %v1416_v6 = vrot.slane %v1370_v33, 6  ;;  %13383 = vst [vmem:[#allocation3_spill] sm:$0xff] %v9320_v16 }
 0x1f4   :  { %v1661_v40 = vsel %vm1492_vm8, %v1370_v33, -inf  ;;  %v9317_v49 = vsel %vm13319_vm15, %v2482_v36, %v2481_v56  ;;  %v2591_v55 = vrot.slane %v9320_v16, 1  ;;  %v2659_v44 = vrot.slane %v9320_v16, 3 }
 0x1f5   :  { %v1662_v57 = vrot.slane %v1661_v40, 4  ;;  %v1668_v37 = vsel %vm1492_vm8, %v1414_v25, -inf  ;;  %v1675_v23 = vsel %vm1492_vm8, %v1415_v2, -inf  ;;  %v1682_v22 = vsel %vm1492_vm8, %v1416_v6, -inf }
 0x1f6   :  { %v1669_v27 = vrot.slane %v1668_v37, 4  ;;  %v1676_v10 = vrot.slane %v1675_v23, 4  ;;  %v1683_v26 = vrot.slane %v1682_v22, 4  ;;  %v2592_v36 = vrot.slane %v9317_v49, 1 }
 0x1f7   :  { %v1663_v58 = vmax.f32 %v1661_v40, %v1662_v57  ;;  %v2660_v24 = vrot.slane %v9317_v49, 3  ;;  %v1371_v38 = vmax.f32 %v1338_v35, 0.0  ;;  %v1196_v45 = vsel %vm13301_vm7, %v1179_v39, %v1093_v52 }
 0x1f8   :  { %v1670_v32 = vmax.f32 %v1668_v37, %v1669_v27  ;;  %v1677_v3 = vmax.f32 %v1675_v23, %v1676_v10  ;;  %v1684_v61 = vmax.f32 %v1682_v22, %v1683_v26  ;;  %v2593_v54 = vsel %vm13315_vm1, %v2591_v55, %v2592_v36 }
 0x1f9   :  { %v1664_v60 = vrot.slane %v1663_v58, 2  ;;  %v2661_v33 = vsel %vm567_vm3, %v2659_v44, %v2660_v24  ;;  %1289 = vmatmul.f32.gmra.mxu0 %v1196_v45  ;;  %v1417_v2 = vrot.slane %v1371_v38, 2  ;;  %v1418_v6 = vrot.slane %v1371_v38, 4 }
 0x1fa   :  { %v1671_v7 = vrot.slane %v1670_v32, 2  ;;  %v1678_v56 = vrot.slane %v1677_v3, 2  ;;  %v1685_v30 = vrot.slane %v1684_v61, 2  ;;  %v7569_v4 = vpack.i.bf16 %v2661_v33, %v2593_v54 }
 0x1fb   :  { %v1665_v25 = vmax.f32 %v1663_v58, %v1664_v60  ;;  %v1419_v40 = vrot.slane %v1371_v38, 6  ;;  %v1689_v23 = vsel %vm1492_vm8, %v1371_v38, -inf  ;;  %v1696_v39 = vsel %vm1492_vm8, %v1417_v2, -inf }
 0x1fc   :  { %v1672_v35 = vmax.f32 %v1670_v32, %v1671_v7  ;;  %v1679_v57 = vmax.f32 %v1677_v3, %v1678_v56  ;;  %v1686_v37 = vmax.f32 %v1684_v61, %v1685_v30  ;;  %7570 = vrot.lane.b32.xlu0 %v7569_v4, %s8198_s19  ;;  %v1690_v27 = vrot.slane %v1689_v23, 4 }
 0x1fd   :  { %v1666_v22 = vrot.slane %v1665_v25, 1  ;;  %v1703_v10 = vsel %vm1492_vm8, %v1418_v6, -inf  ;;  %v1697_v58 = vrot.slane %v1696_v39, 4  ;;  %v1710_v32 = vsel %vm1492_vm8, %v1419_v40, -inf }
 0x1fe   :  { %v1673_v26 = vrot.slane %v1672_v35, 1  ;;  %v1680_v55 = vrot.slane %v1679_v57, 1  ;;  %v1687_v44 = vrot.slane %v1686_v37, 1  ;;  %v1691_v60 = vmax.f32 %v1689_v23, %v1690_v27 }
 0x1ff   :  { %v1667_v52 = vmax.f32 %v1665_v25, %v1666_v22  ;;  %v1704_v54 = vrot.slane %v1703_v10, 4  ;;  %v1698_v45 = vmax.f32 %v1696_v39, %v1697_v58  ;;  %v1711_v30 = vrot.slane %v1710_v32, 4 }
 0x200   :  { %v1674_v3 = vmax.f32 %v1672_v35, %v1673_v26  ;;  %v1681_v61 = vmax.f32 %v1679_v57, %v1680_v55  ;;  %v1688_v33 = vmax.f32 %v1686_v37, %v1687_v44  ;;  %v1692_v7 = vrot.slane %v1691_v60, 2 }
 0x201   :  { %v1969_v38 = vmul.f32 %v9072_v9, %v1667_v52  ;;  %v9342_v56 = vmax.f32 %v1703_v10, %v1704_v54  ;;  %v1699_v6 = vrot.slane %v1698_v45, 2  ;;  %v9353_v57 = vmax.f32 %v1710_v32, %v1711_v30 }
 0x202   :  { %v1970_v4 = vmul.f32 %v9072_v9, %v1674_v3  ;;  %v1971_v2 = vmul.f32 %v9072_v9, %v1681_v61  ;;  %v1972_v25 = vmul.f32 %v9072_v9, %v1688_v33  ;;  %v9350_v40 = vmax.f32 %v1691_v60, %v1692_v7 }
 0x203   :  { %v9348_v23 = vadd.f32 %v9078_v12, %v1969_v38  ;;  %v1706_v35 = vrot.slane %v9342_v56, 2  ;;  %v9364_v39 = vmax.f32 %v1698_v45, %v1699_v6  ;;  %v1713_v55 = vrot.slane %v9353_v57, 2  ;;  %v1013_v6 = vpop.permute.xlu1 %1012 }
 0x204   :  { %v9356_v37 = vadd.f32 %v9078_v12, %v1970_v4  ;;  %v9359_v22 = vadd.f32 %v9078_v12, %v1971_v2  ;;  %v9362_v27 = vadd.f32 %v9078_v12, %v1972_v25  ;;  %v1694_v26 = vrot.slane %v9350_v40, 1 }
 0x205   :  { %v2504_v10 = vrot.slane %v9348_v23, 4  ;;  %v13384_v44 = vrot.slane %v9170_v17, 1  ;;  %v1589_v32 = vrot.slane %v9176_v0, 1  ;;  %v13385_v61 = vrot.slane %v9167_v34, 2 }
 0x206   :  { %v2506_v52 = vrot.slane %v9356_v37, 3  ;;  %v2508_v60 = vrot.slane %v9359_v22, 2  ;;  %v2510_v54 = vrot.slane %v9362_v27, 1  ;;  %v13386_v45 = vrot.slane %v9173_v50, 2 }
 0x207   :  { %v1583_v58 = vmax.f32 %v9170_v17, %v13384_v44  ;;  %v2505_v3 = vsel %vm2228_vm13, %v2504_v10, %v9311_v19  ;;  %v1595_v33 = vmax.f32 %v9167_v34, %v13385_v61  ;;  %v1590_v30 = vmax.f32 %v9176_v0, %v1589_v32 }
 0x208   :  { %v1602_v38 = vmax.f32 %v9173_v50, %v13386_v45  ;;  %v9386_v7 = vsel %vm2231_vm9, %v2506_v52, %v2505_v3  ;;  %vm2077_vm5 = vcmask 516096   ;;  %v2490_v4 = vrot.slane %v9246_v20, 4  ;;  %v1095_v3 = vpop.permute.xlu2 %1094 }
 0x209   :  { %v1957_v17 = vmul.f32 %v9072_v9, %v1583_v58  ;;  %v1596_v2 = vrot.slane %v1595_v33, 1  ;;  %v2078_v34 = vsel %vm2077_vm5, %v9085_v53, -inf  ;;  %v1958_v50 = vmul.f32 %v9072_v9, %v1590_v30 }
 0x20a   :  { %v1603_v19 = vrot.slane %v1602_v38, 1  ;;  %v2079_v10 = vsel %vm2077_vm5, %v9091_v1, -inf  ;;  %v2081_v44 = vsel %vm2077_vm5, %v9094_v11, -inf  ;;  %v2082_v0 = vsel %vm2077_vm5, %v9097_v59, -inf }
 0x20b   :  { %v2025_v25 = vadd.f32 %v9078_v12, %v1957_v17  ;;  %v1597_v58 = vmax.f32 %v1595_v33, %v1596_v2  ;;  %v2080_v52 = vmax.f32 %v2078_v34, %v2079_v10  ;;  %v2083_v32 = vmax.f32 %v2081_v44, %v2082_v0 }
 0x20c   :  { %v1604_v53 = vmax.f32 %v1602_v38, %v1603_v19  ;;  %v2026_v61 = vadd.f32 %v9078_v12, %v1958_v50  ;;  %v2084_v1 = vsel %vm2077_vm5, %v9117_v5, -inf  ;;  %v2085_v11 = vsel %vm2077_vm5, %v9125_v42, -inf }
 0x20d   :  { %v2087_v59 = vsel %vm2077_vm5, %v9128_v21, -inf  ;;  %v1959_v45 = vmul.f32 %v9072_v9, %v1597_v58  ;;  %v2086_v33 = vmax.f32 %v2084_v1, %v2085_v11  ;;  %v2088_v38 = vsel %vm2077_vm5, %v9131_v48, -inf }
 0x20e   :  { %v1960_v17 = vmul.f32 %v9072_v9, %v1604_v53  ;;  %v2089_v30 = vmax.f32 %v2087_v59, %v2088_v38  ;;  %v2090_v2 = vsel %vm2077_vm5, %v9188_v15, -inf  ;;  %v2091_v5 = vsel %vm2077_vm5, %v9203_v18, -inf }
 0x20f   :  { %v2093_v42 = vsel %vm2077_vm5, %v9206_v46, -inf  ;;  %v2027_v21 = vadd.f32 %v9078_v12, %v1959_v45  ;;  %v2092_v34 = vmax.f32 %v2090_v2, %v2091_v5  ;;  %v2094_v48 = vsel %vm2077_vm5, %v9211_v43, -inf  ;;  %v2349_v45 = vld [vmem:[%s9403_s10 + $0xf8] sm:$0xff] }
 0x210   :  { %v2028_v19 = vadd.f32 %v9078_v12, %v1960_v17  ;;  %v2095_v50 = vmax.f32 %v2093_v42, %v2094_v48  ;;  %v2096_v10 = vsel %vm2077_vm5, %v2025_v25, -inf  ;;  %v2097_v15 = vsel %vm2077_vm5, %v2026_v61, -inf  ;;  %v2348_v17 = vld [vmem:[%s9403_s10 + $0xf0] sm:$0xff]  ;;  %v1015_v42 = vpop.permute.xlu1 %1014  ;;  %2927 = vmatpush.msra.mxu2 %v2349_v45 }
 0x211   :  { %v2218_v44 = vrot.slane %v2083_v32, 7  ;;  %v2098_v18 = vmax.f32 %v2096_v10, %v2097_v15  ;;  %v2099_v0 = vsel %vm2077_vm5, %v2027_v21, -inf  ;;  %v2221_v58 = vrot.slane %v2086_v33, 6 }
 0x212   :  { %v2100_v46 = vsel %vm2077_vm5, %v2028_v19, -inf  ;;  %v2224_v11 = vrot.slane %v2089_v30, 5  ;;  %v2227_v59 = vrot.slane %v2092_v34, 4  ;;  %v2230_v38 = vrot.slane %v2095_v50, 3  ;;  %2928 = vmatpush.msra.mxu2 %v2348_v17  ;;  %v1097_v50 = vpop.permute.xlu2 %1096 }
 0x213   :  { %v2101_v53 = vmax.f32 %v2099_v0, %v2100_v46  ;;  %v2220_v1 = vsel %vm2219_vm11, %v2218_v44, %v2080_v52  ;;  %v2233_v2 = vrot.slane %v2098_v18, 2  ;;  %v2484_v5 = vrot.slane %v2026_v61, 7 }
 0x214   :  { %v2223_v43 = vsel %vm2222_vm10, %v2221_v58, %v2220_v1  ;;  %v2486_v10 = vrot.slane %v2027_v21, 6  ;;  %v2488_v15 = vrot.slane %v2028_v19, 5  ;;  %v2492_v30 = vrot.slane %v9250_v28, 3 }
 0x215   :  { %v2226_v32 = vsel %vm2225_vm12, %v2224_v11, %v2223_v43  ;;  %v2236_v48 = vrot.slane %v2101_v53, 1  ;;  %v2485_v52 = vsel %vm2219_vm11, %v2484_v5, %v2025_v25  ;;  %v1180_v34 = vsel %vm1165_vm6, %v9275_v31, %v1013_v6 }
 0x216   :  { %v2229_v33 = vsel %vm2228_vm13, %v2227_v59, %v2226_v32  ;;  %v2487_v44 = vsel %vm2222_vm10, %v2486_v10, %v2485_v52  ;;  %v1197_v18 = vsel %vm13301_vm7, %v1180_v34, %v1095_v3  ;;  %v1181_v21 = vsel %vm1165_vm6, %v9308_v51, %v1015_v42 }
 0x217   :  { %v2232_v61 = vsel %vm2231_vm9, %v2230_v38, %v2229_v33  ;;  %v2489_v25 = vsel %vm2225_vm12, %v2488_v15, %v2487_v44  ;;  %1292 = vmatmul.f32.gmra.mxu0 %v1197_v18  ;;  %v1198_v0 = vsel %vm13301_vm7, %v1181_v21, %v1097_v50  ;;  %v2509_v31 = vsel %vm2234_vm14, %v2508_v60, %v9386_v7 }
 0x218   :  { %v2235_v19 = vsel %vm2234_vm14, %v2233_v2, %v2232_v61  ;;  %v2491_v3 = vsel %vm2228_vm13, %v2490_v4, %v2489_v25  ;;  %v9459_v51 = vsel %vm13319_vm15, %v2510_v54, %v2509_v31  ;;  %v1695_v46 = vmax.f32 %v9350_v40, %v1694_v26 }
 0x219   :  { %v2238_v6 = vsel %vm13319_vm15, %v2236_v48, %v2235_v19  ;;  %v2493_v60 = vsel %vm2231_vm9, %v2492_v30, %v2491_v3  ;;  %v2596_v7 = vrot.slane %v9459_v51, 1  ;;  %v2664_v4 = vrot.slane %v9459_v51, 3  ;;  %v9522_v48 = vld [vmem:[%s8714_s28] ss:$0 sm:$0xff] }
 0x21a   :  { %7377 = vmatmul.msk.f32.vlgmr.msra.gmra.mxu3 %vm1165_vm6, %v2238_v6  ;;  %v1701_v54 = vrot.slane %v9364_v39, 1  ;;  %v2495_v40 = vsel %vm2234_vm14, %v2494_v47, %v2493_v60  ;;  %v1707_v26 = vmax.f32 %v9342_v56, %v1706_v35  ;;  %v1714_v58 = vmax.f32 %v9353_v57, %v1713_v55  ;;  %v9535_v30 = vld [vmem:[%s8726_s2] ss:$0 sm:$0xff] }
 0x21b   :  { %v1973_v53 = vmul.f32 %v9072_v9, %v1695_v46  ;;  %v9487_v1 = vsel %vm13319_vm15, %v2496_v8, %v2495_v40  ;;  %v2102_v47 = vsel %vm2077_vm5, %v9246_v20, -inf  ;;  %v2103_v59 = vsel %vm2077_vm5, %v9250_v28, -inf }
 0x21c   :  { %v1702_v11 = vmax.f32 %v9364_v39, %v1701_v54  ;;  %v2594_v56 = vrot.slane %v9487_v1, 1  ;;  %v2662_v35 = vrot.slane %v9487_v1, 3  ;;  %v1708_v57 = vrot.slane %v1707_v26, 1 }
 0x21d   :  { %v1715_v55 = vrot.slane %v1714_v58, 1  ;;  %v2041_v17 = vadd.f32 %v9078_v12, %v1973_v53  ;;  %v2104_v8 = vmax.f32 %v2102_v47, %v2103_v59  ;;  %v2105_v39 = vsel %vm2077_vm5, %v9253_v62, -inf }
 0x21e   :  { %v1974_v45 = vmul.f32 %v9072_v9, %v1702_v11  ;;  %v2595_v20 = vsel %vm13315_vm1, %v2592_v36, %v2594_v56  ;;  %v2663_v28 = vsel %vm567_vm3, %v2660_v24, %v2662_v35  ;;  %v2597_v43 = vsel %vm13315_vm1, %v2594_v56, %v2596_v7 }
 0x21f   :  { %v2665_v9 = vsel %vm567_vm3, %v2662_v35, %v2664_v4  ;;  %v7574_v38 = vpack.i.bf16 %v2663_v28, %v2595_v20  ;;  %1295 = vmatmul.f32.gmra.mxu0 %v1198_v0  ;;  %v1709_v2 = vmax.f32 %v1707_v26, %v1708_v57  ;;  %v1716_v5 = vmax.f32 %v1714_v58, %v1715_v55 }
 0x220   :  { %v7579_v62 = vpack.i.bf16 %v2665_v9, %v2597_v43  ;;  %v2042_v36 = vadd.f32 %v9078_v12, %v1974_v45  ;;  %v2106_v42 = vsel %vm2077_vm5, %v9256_v41, -inf  ;;  %v2108_v24 = vsel %vm2077_vm5, %v9261_v13, -inf  ;;  %v2347_v9 = vld [vmem:[%s9403_s10 + $0xe8] sm:$0xff] }
 0x221   :  { %v2109_v32 = vsel %vm2077_vm5, %v9266_v29, -inf  ;;  %7575 = vrot.lane.b32.xlu1 %v7574_v38, %s8198_s19  ;;  %v1975_v10 = vmul.f32 %v9522_v48, %v1709_v2  ;;  %v1976_v15 = vmul.f32 %v9522_v48, %v1716_v5  ;;  %v2107_v12 = vmax.f32 %v2105_v39, %v2106_v42  ;;  %v2346_v38 = vld [vmem:[%s9403_s10 + $0xe0] sm:$0xff]  ;;  %2929 = vmatpush.msra.mxu2 %v2347_v9  ;;  %v2344_v5 = vld [vmem:[%s9403_s10 + $0xd0] sm:$0xff] }
 0x222   :  { %7580 = vrot.lane.b32.xlu2 %v7579_v62, %s8198_s19  ;;  %v2111_v41 = vsel %vm2077_vm5, %v9270_v63, -inf  ;;  %v2110_v33 = vmax.f32 %v2108_v24, %v2109_v32  ;;  %v2112_v13 = vsel %vm2077_vm5, %v9283_v14, -inf  ;;  %v2114_v29 = vsel %vm2077_vm5, %v9348_v23, -inf  ;;  %v2345_v62 = vld [vmem:[%s9403_s10 + $0xd8] sm:$0xff] }
 0x223   :  { %v2115_v52 = vsel %vm2077_vm5, %v9356_v37, -inf  ;;  %v2043_v34 = vadd.f32 %v9535_v30, %v1975_v10  ;;  %v2044_v50 = vadd.f32 %v9535_v30, %v1976_v15  ;;  %v2113_v61 = vmax.f32 %v2111_v41, %v2112_v13  ;;  %2930 = vmatpush.msra.mxu2 %v2346_v38 }
 0x224   :  { %v2116_v44 = vmax.f32 %v2114_v29, %v2115_v52  ;;  %v2117_v63 = vsel %vm2077_vm5, %v9359_v22, -inf  ;;  %v2118_v14 = vsel %vm2077_vm5, %v9362_v27, -inf  ;;  %v2120_v18 = vsel %vm2077_vm5, %v2041_v17, -inf }
 0x225   :  { %v2121_v23 = vsel %vm2077_vm5, %v2042_v36, -inf  ;;  %v2119_v21 = vmax.f32 %v2117_v63, %v2118_v14  ;;  %v2123_v19 = vsel %vm2077_vm5, %v2043_v34, -inf  ;;  %v2124_v25 = vsel %vm2077_vm5, %v2044_v50, -inf  ;;  %2931 = vmatpush.msra.mxu2 %v2345_v62 }
 0x226   :  { %v2122_v37 = vmax.f32 %v2120_v18, %v2121_v23  ;;  %v2125_v0 = vmax.f32 %v2123_v19, %v2124_v25  ;;  %v2239_v31 = vrot.slane %v2107_v12, 7  ;;  %v2241_v6 = vrot.slane %v2110_v33, 6 }
 0x227   :  { %v2243_v3 = vrot.slane %v2113_v61, 5  ;;  %v2245_v46 = vrot.slane %v2116_v44, 4  ;;  %v2512_v60 = vrot.slane %v2042_v36, 7  ;;  %v2247_v54 = vrot.slane %v2119_v21, 3  ;;  %v9577_v36 = vld [vmem:[%s8708_s24] ss:$0 sm:$0xff]  ;;  %2932 = vmatpush.msra.mxu2 %v2344_v5 }
 0x228   :  { %v2240_v22 = vsel %vm2219_vm11, %v2239_v31, %v2104_v8  ;;  %v2514_v27 = vrot.slane %v2043_v34, 6  ;;  %v2249_v26 = vrot.slane %v2122_v37, 2  ;;  %v2516_v53 = vrot.slane %v2044_v50, 5  ;;  %v2343_v21 = vld [vmem:[%s9403_s10 + $0xc8] sm:$0xff]  ;;  %v2342_v37 = vld [vmem:[%s9403_s10 + $0xc0] sm:$0xff]  ;;  %v2396_v31 = vld [vmem:[%s9403_s10 + $0x270] sm:$0xff] }
 0x229   :  { %v2242_v40 = vsel %vm2222_vm10, %v2241_v6, %v2240_v22  ;;  %v2513_v58 = vsel %vm2219_vm11, %v2512_v60, %v2041_v17  ;;  %v2251_v47 = vrot.slane %v2125_v0, 1  ;;  %vm13314_vm7 = vcmask 1042432   ;;  %2933 = vmatpush.msra.mxu2 %v2343_v21  ;;  %v2397_v0 = vld [vmem:[%s9403_s10 + $0x278] sm:$0xff]  ;;  %v2395_v5 = vld [vmem:[%s9403_s10 + $0x268] sm:$0xff] }
 0x22a   :  { %v2244_v11 = vsel %vm2225_vm12, %v2243_v3, %v2242_v40  ;;  %v2515_v59 = vsel %vm2222_vm10, %v2514_v27, %v2513_v58  ;;  %v2729_v19 = vrot.slane %v9317_v49, 5  ;;  %v2728_v6 = vrot.slane %v9320_v16, 5  ;;  %3050 = vmatpush.msrb.mxu1 %v2397_v0 }
 0x22b   :  { %v2246_v56 = vsel %vm2228_vm13, %v2245_v46, %v2244_v11  ;;  %v2517_v35 = vsel %vm2225_vm12, %v2516_v53, %v2515_v59  ;;  %v2798_v3 = vrot.slane %v9317_v49, 7  ;;  %v13305_v46 = vrot.slane %v9487_v1, 5  ;;  %2934 = vmatpush.msra.mxu2 %v2342_v37 }
 0x22c   :  { %v2248_v57 = vsel %vm2231_vm9, %v2247_v54, %v2246_v56  ;;  %v9556_v55 = vsel %vm673_vm4, %v2517_v35, 0.0  ;;  %v13304_v60 = vrot.slane %v9487_v1, 7  ;;  %v2634_v53 = vrot.slane %v9317_v49, 2  ;;  %v2340_v56 = vld [vmem:[%s9403_s10 + $0xb0] sm:$0xff]  ;;  %3051 = vmatpush.msrb.mxu1 %v2396_v31 }
 0x22d   :  { %v2250_v45 = vsel %vm2234_vm14, %v2249_v26, %v2248_v57  ;;  %v13303_v17 = vrot.slane %v9556_v55, 1  ;;  %v2666_v8 = vrot.slane %v9556_v55, 3  ;;  %v2341_v26 = vld [vmem:[%s9403_s10 + $0xb8] sm:$0xff]  ;;  %v2636_v11 = vrot.slane %v9487_v1, 2 }
 0x22e   :  { %v2252_v39 = vsel %vm13319_vm15, %v2251_v47, %v2250_v45  ;;  %v2797_v47 = vrot.slane %v9320_v16, 7  ;;  %v2633_v35 = vrot.slane %v9320_v16, 2  ;;  %v2638_v57 = vrot.slane %v9459_v51, 2  ;;  %2935 = vmatpush.msra.mxu2 %v2341_v26  ;;  %3052 = vmatpush.msrb.mxu1 %v2395_v5 }
 0x22f   :  { %7378 = vmatmul.msk.f32.gmra.mxu3 %vm1165_vm6, %v2252_v39  ;;  %v2599_v20 = vsel %vm13315_vm1, %v2596_v7, %v13303_v17  ;;  %v2667_v28 = vsel %vm567_vm3, %v2664_v4, %v2666_v8  ;;  %v1340_v7 = vpop.f32.mrf.mxu1  ;;  %v9602_v45 = vsel %vm13314_vm7, %v2728_v6, %v2729_v19  ;;  %v2640_v26 = vrot.slane %v9556_v55, 2 }
 0x230   :  { %v7584_v43 = vpack.i.bf16 %v2667_v28, %v2599_v20  ;;  %13387 = vst [vmem:[#allocation4_spill] sm:$0xff] %v9602_v45  ;;  %v9605_v39 = vsel %vm2796_vm0, %v2797_v47, %v2798_v3  ;;  %v9610_v20 = vsel %vm13314_vm7, %v2729_v19, %v13305_v46  ;;  %v9615_v28 = vsel %vm2796_vm0, %v2798_v3, %v13304_v60  ;;  %v2392_v19 = vld [vmem:[%s9403_s10 + $0x250] sm:$0xff] }
 0x231   :  { %13388 = vst [vmem:[#allocation5_spill] sm:$0xff] %v9610_v20  ;;  %2936 = vmatpush.msra.mxu2 %v2340_v56  ;;  %v2335_v56 = vld [vmem:[%s9403_s10 + $0x88] sm:$0xff] }
 0x232   :  { %7585 = vrot.lane.b32.xlu0 %v7584_v43, %s8198_s19  ;;  %13389 = vst [vmem:[#allocation6_spill] sm:$0xff] %v9615_v28 }
 0x237   :  { %v1343_v22 = vpop.f32.mrf.mxu1 }
 0x240   :  { %v1275_v2 = vpop.f32.mrf.mxu0 }
 0x241   :  { %v1276_v42 = vadd.f32 %v9577_v36, %v1275_v2  ;;  %v2339_v2 = vld [vmem:[%s9403_s10 + $0xa8] sm:$0xff] }
 0x242   :  { %2937 = vmatpush.msra.mxu2 %v2339_v2  ;;  %v2390_v2 = vld [vmem:[%s9403_s10 + $0x240] sm:$0xff] }
 0x243   :  { %v1341_v24 = vadd.f32 %v1340_v7, %v1276_v42  ;;  %v9620_v42 = vsel %vm13316_vm2, %v2633_v35, %v2634_v53  ;;  %v9623_v7 = vsel %vm13316_vm2, %v2634_v53, %v2636_v11 }
 0x245   :  { %v1372_v32 = vmax.f32 %v1341_v24, 0.0 }
 0x247   :  { %v1420_v4 = vrot.slane %v1372_v32, 2  ;;  %v1421_v10 = vrot.slane %v1372_v32, 4  ;;  %v1422_v15 = vrot.slane %v1372_v32, 6  ;;  %v1717_v12 = vsel %vm1492_vm8, %v1372_v32, -inf  ;;  %v2338_v32 = vld [vmem:[%s9403_s10 + $0xa0] sm:$0xff] }
 0x248   :  { %v1718_v41 = vrot.slane %v1717_v12, 4  ;;  %2938 = vmatpush.msra.mxu2 %v2338_v32 }
 0x249   :  { %v1724_v33 = vsel %vm1492_vm8, %v1420_v4, -inf  ;;  %v1731_v13 = vsel %vm1492_vm8, %v1421_v10, -inf  ;;  %v1738_v29 = vsel %vm1492_vm8, %v1422_v15, -inf  ;;  %v2394_v4 = vld [vmem:[%s9403_s10 + $0x260] sm:$0xff]  ;;  %v9630_v10 = vsel %vm13316_vm2, %v2636_v11, %v2638_v57 }
 0x24a   :  { %v1719_v52 = vmax.f32 %v1717_v12, %v1718_v41  ;;  %v1725_v34 = vrot.slane %v1724_v33, 4  ;;  %v1732_v50 = vrot.slane %v1731_v13, 4  ;;  %v1739_v61 = vrot.slane %v1738_v29, 4  ;;  %3053 = vmatpush.msrb.mxu1 %v2394_v4  ;;  %v2334_v4 = vld [vmem:[%s9403_s10 + $0x80] sm:$0xff] }
 0x24c   :  { %v1726_v44 = vmax.f32 %v1724_v33, %v1725_v34  ;;  %v1720_v63 = vrot.slane %v1719_v52, 2  ;;  %v1733_v14 = vmax.f32 %v1731_v13, %v1732_v50  ;;  %v1740_v18 = vmax.f32 %v1738_v29, %v1739_v61  ;;  %v2393_v34 = vld [vmem:[%s9403_s10 + $0x258] sm:$0xff] }
 0x24d   :  { %3054 = vmatpush.msrb.mxu1 %v2393_v34 }
 0x24e   :  { %v1727_v23 = vrot.slane %v1726_v44, 2  ;;  %v1721_v54 = vmax.f32 %v1719_v52, %v1720_v63  ;;  %v1734_v27 = vrot.slane %v1733_v14, 2  ;;  %v1741_v40 = vrot.slane %v1740_v18, 2 }
 0x24f   :  { %v1278_v25 = vpop.f32.mrf.mxu0  ;;  %3055 = vmatpush.msrb.mxu1 %v2392_v19 }
 0x250   :  { %v1279_v58 = vadd.f32 %v9577_v36, %v1278_v25  ;;  %v1728_v59 = vmax.f32 %v1726_v44, %v1727_v23  ;;  %v1722_v43 = vrot.slane %v1721_v54, 1  ;;  %v1735_v9 = vmax.f32 %v1733_v14, %v1734_v27  ;;  %v2337_v14 = vld [vmem:[%s9403_s10 + $0x98] sm:$0xff]  ;;  %v1346_v25 = vpop.f32.mrf.mxu1 }
 0x251   :  { %v1742_v38 = vmax.f32 %v1740_v18, %v1741_v40  ;;  %2939 = vmatpush.msra.mxu2 %v2337_v14  ;;  %v2391_v40 = vld [vmem:[%s9403_s10 + $0x248] sm:$0xff] }
 0x252   :  { %v1344_v8 = vadd.f32 %v1343_v22, %v1279_v58  ;;  %v1729_v24 = vrot.slane %v1728_v59, 1  ;;  %v1723_v50 = vmax.f32 %v1721_v54, %v1722_v43  ;;  %v1736_v61 = vrot.slane %v1735_v9, 1  ;;  %v2336_v22 = vld [vmem:[%s9403_s10 + $0x90] sm:$0xff]  ;;  %3056 = vmatpush.msrb.mxu1 %v2391_v40 }
 0x253   :  { %v1743_v44 = vrot.slane %v1742_v38, 1  ;;  %2940 = vmatpush.msra.mxu2 %v2336_v22 }
 0x254   :  { %v1373_v62 = vmax.f32 %v1344_v8, 0.0  ;;  %v1730_v0 = vmax.f32 %v1728_v59, %v1729_v24  ;;  %v1737_v53 = vmax.f32 %v1735_v9, %v1736_v61  ;;  %v9650_v8 = vmul.f32 %v9522_v48, %v1723_v50  ;;  %3057 = vmatpush.msrb.mxu1 %v2390_v2 }
 0x255   :  { %v1744_v35 = vmax.f32 %v1742_v38, %v1743_v44  ;;  %2941 = vmatpush.msra.mxu2 %v2335_v56 }
 0x256   :  { %v1423_v41 = vrot.slane %v1373_v62, 2  ;;  %v1424_v33 = vrot.slane %v1373_v62, 4  ;;  %v1425_v13 = vrot.slane %v1373_v62, 6  ;;  %v1745_v29 = vsel %vm1492_vm8, %v1373_v62, -inf }
 0x257   :  { %v1281_v52 = vpop.f32.mrf.mxu0  ;;  %v1746_v63 = vrot.slane %v1745_v29, 4  ;;  %v9654_v5 = vmul.f32 %v9522_v48, %v1730_v0  ;;  %2942 = vmatpush.msra.mxu2 %v2334_v4 }
 0x258   :  { %v1752_v18 = vsel %vm1492_vm8, %v1423_v41, -inf  ;;  %v1759_v23 = vsel %vm1492_vm8, %v1424_v33, -inf  ;;  %v1766_v21 = vsel %vm1492_vm8, %v1425_v13, -inf  ;;  %v1282_v37 = vadd.f32 %v9577_v36, %v1281_v52 }
 0x259   :  { %v1747_v31 = vmax.f32 %v1745_v29, %v1746_v63  ;;  %v1753_v6 = vrot.slane %v1752_v18, 4  ;;  %v1760_v3 = vrot.slane %v1759_v23, 4  ;;  %v1767_v54 = vrot.slane %v1766_v21, 4  ;;  %v2389_v29 = vld [vmem:[%s9403_s10 + $0x238] sm:$0xff] }
 0x25a   :  { %v1347_v27 = vadd.f32 %v1346_v25, %v1282_v37  ;;  %3058 = vmatpush.msrb.mxu1 %v2389_v29 }
 0x25b   :  { %v1748_v11 = vrot.slane %v1747_v31, 2  ;;  %v1754_v47 = vmax.f32 %v1752_v18, %v1753_v6  ;;  %v1761_v59 = vmax.f32 %v1759_v23, %v1760_v3  ;;  %v1768_v43 = vmax.f32 %v1766_v21, %v1767_v54  ;;  %v2388_v23 = vld [vmem:[%s9403_s10 + $0x230] sm:$0xff]  ;;  %v1349_v54 = vpop.f32.mrf.mxu1 }
 0x25c   :  { %v1374_v62 = vmax.f32 %v1347_v27, 0.0  ;;  %v9664_v27 = vmul.f32 %v9522_v48, %v1737_v53  ;;  %3059 = vmatpush.msrb.mxu1 %v2388_v23 }
 0x25d   :  { %v1749_v24 = vmax.f32 %v1747_v31, %v1748_v11  ;;  %v1755_v9 = vrot.slane %v1754_v47, 2  ;;  %v1762_v32 = vrot.slane %v1761_v59, 2  ;;  %v1769_v41 = vrot.slane %v1768_v43, 2 }
 0x25e   :  { %v1426_v33 = vrot.slane %v1374_v62, 2  ;;  %v1427_v38 = vrot.slane %v1374_v62, 4  ;;  %v1428_v13 = vrot.slane %v1374_v62, 6  ;;  %v1773_v61 = vsel %vm1492_vm8, %v1374_v62, -inf }
 0x25f   :  { %v1750_v52 = vrot.slane %v1749_v24, 1  ;;  %v1756_v34 = vmax.f32 %v1754_v47, %v1755_v9  ;;  %v1763_v50 = vmax.f32 %v1761_v59, %v1762_v32  ;;  %v1770_v44 = vmax.f32 %v1768_v43, %v1769_v41  ;;  %v1284_v22 = vpop.f32.mrf.mxu0 }
 0x260   :  { %v1774_v63 = vrot.slane %v1773_v61, 4  ;;  %v1780_v14 = vsel %vm1492_vm8, %v1426_v33, -inf  ;;  %v1787_v18 = vsel %vm1492_vm8, %v1427_v38, -inf  ;;  %v1794_v3 = vsel %vm1492_vm8, %v1428_v13, -inf }
 0x261   :  { %v1751_v21 = vmax.f32 %v1749_v24, %v1750_v52  ;;  %v1757_v37 = vrot.slane %v1756_v34, 1  ;;  %v1764_v19 = vrot.slane %v1763_v50, 1  ;;  %v1781_v25 = vrot.slane %v1780_v14, 4 }
 0x262   :  { %v1771_v0 = vrot.slane %v1770_v44, 1  ;;  %v1775_v31 = vmax.f32 %v1773_v61, %v1774_v63  ;;  %v1788_v6 = vrot.slane %v1787_v18, 4  ;;  %v1795_v62 = vrot.slane %v1794_v3, 4 }
 0x263   :  { %v1758_v40 = vmax.f32 %v1756_v34, %v1757_v37  ;;  %v1765_v11 = vmax.f32 %v1763_v50, %v1764_v19  ;;  %v1782_v47 = vmax.f32 %v1780_v14, %v1781_v25  ;;  %v1981_v2 = vmul.f32 %v9522_v48, %v1751_v21 }
 0x264   :  { %v1772_v59 = vmax.f32 %v1770_v44, %v1771_v0  ;;  %v1776_v56 = vrot.slane %v1775_v31, 2  ;;  %v1789_v43 = vmax.f32 %v1787_v18, %v1788_v6  ;;  %v1796_v33 = vmax.f32 %v1794_v3, %v1795_v62 }
 0x265   :  { %v1982_v24 = vmul.f32 %v9522_v48, %v1758_v40  ;;  %v1983_v9 = vmul.f32 %v9522_v48, %v1765_v11  ;;  %v1783_v32 = vrot.slane %v1782_v47, 2  ;;  %v1285_v52 = vadd.f32 %v9577_v36, %v1284_v22 }
 0x266   :  { %v1984_v4 = vmul.f32 %v9522_v48, %v1772_v59  ;;  %v1777_v41 = vmax.f32 %v1775_v31, %v1776_v56  ;;  %v1790_v53 = vrot.slane %v1789_v43, 2  ;;  %v1980_v34 = vmul.f32 %v9522_v48, %v1744_v35 }
 0x267   :  { %v9671_v38 = vadd.f32 %v9535_v30, %v1982_v24  ;;  %v9674_v13 = vadd.f32 %v9535_v30, %v1983_v9  ;;  %v1784_v29 = vmax.f32 %v1782_v47, %v1783_v32  ;;  %v1797_v44 = vrot.slane %v1796_v33, 2  ;;  %v1352_v47 = vpop.f32.mrf.mxu1  ;;  %v2387_v32 = vld [vmem:[%s9403_s10 + $0x228] sm:$0xff] }
 0x268   :  { %v1778_v50 = vrot.slane %v1777_v41, 1  ;;  %v1791_v61 = vmax.f32 %v1789_v43, %v1790_v53  ;;  %v9679_v63 = vadd.f32 %v9535_v30, %v1981_v2  ;;  %v1350_v23 = vadd.f32 %v1349_v54, %v1285_v52  ;;  %3060 = vmatpush.msrb.mxu1 %v2387_v32 }
 0x269   :  { %v2525_v14 = vrot.slane %v9671_v38, 7  ;;  %v1785_v18 = vrot.slane %v1784_v29, 1  ;;  %v9683_v21 = vadd.f32 %v9535_v30, %v1984_v4  ;;  %v1798_v25 = vmax.f32 %v1796_v33, %v1797_v44  ;;  %v2386_v4 = vld [vmem:[%s9403_s10 + $0x220] sm:$0xff]  ;;  %v2385_v44 = vld [vmem:[%s9403_s10 + $0x218] sm:$0xff] }
 0x26a   :  { %v1779_v37 = vmax.f32 %v1777_v41, %v1778_v50  ;;  %v1792_v19 = vrot.slane %v1791_v61, 1  ;;  %v9687_v0 = vadd.f32 %v9535_v30, %v9650_v8  ;;  %v2527_v35 = vrot.slane %v9674_v13, 6  ;;  %3061 = vmatpush.msrb.mxu1 %v2386_v4 }
 0x26b   :  { %v1786_v31 = vmax.f32 %v1784_v29, %v1785_v18  ;;  %v1375_v6 = vmax.f32 %v1350_v23, 0.0  ;;  %v2526_v3 = vsel %vm2219_vm11, %v2525_v14, %v9679_v63  ;;  %v1799_v54 = vrot.slane %v1798_v25, 1 }
 0x26c   :  { %v1793_v22 = vmax.f32 %v1791_v61, %v1792_v19  ;;  %v1985_v40 = vmul.f32 %v9522_v48, %v1779_v37  ;;  %v9695_v59 = vadd.f32 %v9535_v30, %v9654_v5  ;;  %v2529_v62 = vrot.slane %v9683_v21, 5  ;;  %3062 = vmatpush.msrb.mxu1 %v2385_v44 }
 0x26d   :  { %v1986_v8 = vmul.f32 %v9522_v48, %v1786_v31  ;;  %v1429_v56 = vrot.slane %v1375_v6, 2  ;;  %v1430_v43 = vrot.slane %v1375_v6, 4  ;;  %v1800_v2 = vmax.f32 %v1798_v25, %v1799_v54 }
 0x26e   :  { %v1287_v11 = vpop.f32.mrf.mxu0  ;;  %v9700_v24 = vadd.f32 %v9535_v30, %v1985_v40  ;;  %v1431_v9 = vrot.slane %v1375_v6, 6  ;;  %v2528_v41 = vsel %vm2222_vm10, %v2527_v35, %v2526_v3  ;;  %v1801_v53 = vsel %vm1492_vm8, %v1375_v6, -inf  ;;  %v9716_v19 = vpop.permute.xlu0 %7570  ;;  %v2384_v3 = vld [vmem:[%s9403_s10 + $0x210] sm:$0xff] }
 0x26f   :  { %v1808_v5 = vsel %vm1492_vm8, %v1429_v56, -inf  ;;  %v1815_v33 = vsel %vm1492_vm8, %v1430_v43, -inf  ;;  %v1987_v29 = vmul.f32 %v9522_v48, %v1793_v22  ;;  %v1988_v52 = vmul.f32 %v9522_v48, %v1800_v2  ;;  %13390 = vst [vmem:[#allocation7_spill] sm:$0xff] %v9716_v19  ;;  %3063 = vmatpush.msrb.mxu1 %v2384_v3  ;;  %v1355_v44 = vpop.f32.mrf.mxu1 }
 0x270   :  { %v9711_v50 = vadd.f32 %v9535_v30, %v1986_v8  ;;  %v1802_v61 = vrot.slane %v1801_v53, 4  ;;  %v2531_v14 = vrot.slane %v9700_v24, 4  ;;  %v1809_v18 = vrot.slane %v1808_v5, 4 }
 0x271   :  { %v1816_v23 = vrot.slane %v1815_v33, 4  ;;  %v1822_v37 = vsel %vm1492_vm8, %v1431_v9, -inf  ;;  %v9720_v25 = vadd.f32 %v9535_v30, %v9664_v27  ;;  %v9723_v35 = vadd.f32 %v9535_v30, %v1980_v34 }
 0x272   :  { %v2518_v31 = vrot.slane %v9687_v0, 4  ;;  %v1803_v6 = vmax.f32 %v1801_v53, %v1802_v61  ;;  %v2519_v22 = vrot.slane %v9695_v59, 3  ;;  %v2530_v54 = vsel %vm2225_vm12, %v2529_v62, %v2528_v41  ;;  %v2383_v41 = vld [vmem:[%s9403_s10 + $0x208] sm:$0xff]  ;;  %v2382_v61 = vld [vmem:[%s9403_s10 + $0x200] sm:$0xff] }
 0x273   :  { %v1810_v40 = vmax.f32 %v1808_v5, %v1809_v18  ;;  %v1823_v8 = vrot.slane %v1822_v37, 4  ;;  %v9730_v56 = vadd.f32 %v9535_v30, %v1987_v29  ;;  %v9733_v27 = vadd.f32 %v9535_v30, %v1988_v52  ;;  %3064 = vmatpush.msrb.mxu1 %v2383_v41 }
 0x274   :  { %v2533_v34 = vrot.slane %v9711_v50, 3  ;;  %v7573_v43 = vunpack.i.h.bf16 %v9716_v19  ;;  %v2532_v2 = vsel %vm2228_vm13, %v2531_v14, %v2530_v54  ;;  %v1804_v9 = vrot.slane %v1803_v6, 2 }
 0x275   :  { %v9738_v32 = vmax.f32 %v1815_v33, %v1816_v23  ;;  %v1288_v62 = vadd.f32 %v9577_v36, %v1287_v11  ;;  %v1811_v53 = vrot.slane %v1810_v40, 2  ;;  %v9742_v5 = vmax.f32 %v1822_v37, %v1823_v8  ;;  %3065 = vmatpush.msrb.mxu1 %v2382_v61 }
 0x276   :  { %v1290_v4 = vpop.f32.mrf.mxu0  ;;  %v2857_v29 = vsel %vm1165_vm6, %v9620_v42, %v7573_v43  ;;  %v9754_v11 = vsel %vm13316_vm2, %v2638_v57, %v2640_v26  ;;  %v9758_v42 = vsel %vm2231_vm9, %v2519_v22, %v2518_v31  ;;  %v9767_v57 = vmax.f32 %v1803_v6, %v1804_v9 }
 0x277   :  { %v1291_v52 = vadd.f32 %v9577_v36, %v1290_v4  ;;  %2943 = vmatmul.f32.vlgmr.msra.gmra.mxu2 %v2857_v29  ;;  %v1353_v33 = vadd.f32 %v1352_v47, %v1288_v62  ;;  %v9763_v47 = vsel %vm2231_vm9, %v2533_v34, %v2532_v2  ;;  %v9769_v26 = vmax.f32 %v1810_v40, %v1811_v53 }
 0x279   :  { %v1356_v3 = vadd.f32 %v1355_v44, %v1291_v52  ;;  %v1376_v43 = vmax.f32 %v1353_v33, 0.0 }
 0x27b   :  { %v1377_v22 = vmax.f32 %v1356_v3, 0.0  ;;  %v1432_v62 = vrot.slane %v1376_v43, 2  ;;  %v1433_v4 = vrot.slane %v1376_v43, 4  ;;  %v1434_v41 = vrot.slane %v1376_v43, 6 }
 0x27c   :  { %v1829_v29 = vsel %vm1492_vm8, %v1376_v43, -inf }
 0x27d   :  { %v1830_v34 = vrot.slane %v1829_v29, 4  ;;  %v1435_v2 = vrot.slane %v1377_v22, 2  ;;  %v1436_v52 = vrot.slane %v1377_v22, 4  ;;  %v1437_v44 = vrot.slane %v1377_v22, 6 }
 0x27e   :  { %v1836_v17 = vsel %vm1492_vm8, %v1432_v62, -inf  ;;  %v1843_v61 = vsel %vm1492_vm8, %v1433_v4, -inf  ;;  %v1850_v6 = vsel %vm1492_vm8, %v1434_v41, -inf  ;;  %v1857_v40 = vsel %vm1492_vm8, %v1377_v22, -inf }
 0x27f   :  { %v1831_v9 = vmax.f32 %v1829_v29, %v1830_v34  ;;  %v1837_v53 = vrot.slane %v1836_v17, 4  ;;  %v1844_v33 = vrot.slane %v1843_v61, 4  ;;  %v1851_v3 = vrot.slane %v1850_v6, 4 }
 0x280   :  { %v1858_v60 = vrot.slane %v1857_v40, 4  ;;  %v1864_v46 = vsel %vm1492_vm8, %v1435_v2, -inf  ;;  %v1871_v43 = vsel %vm1492_vm8, %v1436_v52, -inf  ;;  %v1878_v58 = vsel %vm1492_vm8, %v1437_v44, -inf }
 0x281   :  { %v1832_v18 = vrot.slane %v1831_v9, 2  ;;  %v1838_v12 = vmax.f32 %v1836_v17, %v1837_v53  ;;  %v1845_v62 = vmax.f32 %v1843_v61, %v1844_v33  ;;  %v1852_v15 = vmax.f32 %v1850_v6, %v1851_v3 }
 0x282   :  { %v1859_v4 = vmax.f32 %v1857_v40, %v1858_v60  ;;  %v1865_v31 = vrot.slane %v1864_v46, 4  ;;  %v1872_v41 = vrot.slane %v1871_v43, 4  ;;  %v1879_v8 = vrot.slane %v1878_v58, 4 }
 0x283   :  { %v1833_v22 = vmax.f32 %v1831_v9, %v1832_v18  ;;  %v1839_v29 = vrot.slane %v1838_v12, 2  ;;  %v1846_v34 = vrot.slane %v1845_v62, 2  ;;  %v1853_v54 = vrot.slane %v1852_v15, 2 }
 0x284   :  { %v1860_v23 = vrot.slane %v1859_v4, 2  ;;  %v1866_v37 = vmax.f32 %v1864_v46, %v1865_v31  ;;  %v1873_v14 = vmax.f32 %v1871_v43, %v1872_v41  ;;  %v1880_v2 = vmax.f32 %v1878_v58, %v1879_v8 }
 0x285   :  { %v1834_v16 = vrot.slane %v1833_v22, 1  ;;  %v1840_v52 = vmax.f32 %v1838_v12, %v1839_v29  ;;  %v1847_v19 = vmax.f32 %v1845_v62, %v1846_v34  ;;  %v1854_v44 = vmax.f32 %v1852_v15, %v1853_v54  ;;  %v7581_v12 = vpop.permute.xlu2 %7580 }
 0x286   :  { %v1861_v20 = vmax.f32 %v1859_v4, %v1860_v23  ;;  %v1867_v17 = vrot.slane %v1866_v37, 2  ;;  %v1874_v61 = vrot.slane %v1873_v14, 2  ;;  %v1881_v6 = vrot.slane %v1880_v2, 2 }
 0x287   :  { %v1835_v60 = vmax.f32 %v1833_v22, %v1834_v16  ;;  %v1841_v40 = vrot.slane %v1840_v52, 1  ;;  %v1848_v53 = vrot.slane %v1847_v19, 1  ;;  %v1855_v33 = vrot.slane %v1854_v44, 1 }
 0x288   :  { %v1862_v18 = vrot.slane %v1861_v20, 1  ;;  %v1868_v9 = vmax.f32 %v1866_v37, %v1867_v17  ;;  %v1875_v3 = vmax.f32 %v1873_v14, %v1874_v61  ;;  %v1882_v28 = vmax.f32 %v1880_v2, %v1881_v6 }
 0x289   :  { %v1842_v45 = vmax.f32 %v1840_v52, %v1841_v40  ;;  %v1849_v46 = vmax.f32 %v1847_v19, %v1848_v53  ;;  %v1856_v31 = vmax.f32 %v1854_v44, %v1855_v33  ;;  %v1993_v58 = vmul.f32 %v9522_v48, %v1835_v60 }
 0x28a   :  { %v1863_v8 = vmax.f32 %v1861_v20, %v1862_v18  ;;  %v1869_v15 = vrot.slane %v1868_v9, 1  ;;  %v1876_v23 = vrot.slane %v1875_v3, 1  ;;  %v1883_v54 = vrot.slane %v1882_v28, 1 }
 0x28b   :  { %v1806_v43 = vrot.slane %v9767_v57, 1  ;;  %v1994_v16 = vmul.f32 %v9522_v48, %v1842_v45  ;;  %v1995_v62 = vmul.f32 %v9522_v48, %v1849_v46  ;;  %v1996_v37 = vmul.f32 %v9522_v48, %v1856_v31 }
 0x28c   :  { %v1870_v14 = vmax.f32 %v1868_v9, %v1869_v15  ;;  %v1877_v4 = vmax.f32 %v1875_v3, %v1876_v23  ;;  %v1884_v41 = vmax.f32 %v1882_v28, %v1883_v54  ;;  %v1997_v19 = vmul.f32 %v9522_v48, %v1863_v8 }
 0x28d   :  { %v9787_v22 = vadd.f32 %v9535_v30, %v1993_v58  ;;  %v9790_v20 = vadd.f32 %v9535_v30, %v1995_v62  ;;  %v7583_v29 = vunpack.i.h.bf16 %v7581_v12  ;;  %v7582_v34 = vunpack.i.l.bf16 %v7581_v12 }
 0x28e   :  { %v9793_v2 = vadd.f32 %v9535_v30, %v1994_v16  ;;  %v1998_v45 = vmul.f32 %v9522_v48, %v1870_v14  ;;  %v1999_v52 = vmul.f32 %v9522_v48, %v1877_v4  ;;  %v2000_v44 = vmul.f32 %v9522_v48, %v1884_v41 }
 0x28f   :  { %v9799_v28 = vadd.f32 %v9535_v30, %v1996_v37  ;;  %v9802_v17 = vadd.f32 %v9535_v30, %v1997_v19  ;;  %v13391_v61 = vrot.slane %v9720_v25, 2  ;;  %v13392_v60 = vrot.slane %v9730_v56, 2 }
 0x290   :  { %v2549_v53 = vrot.slane %v9790_v20, 2  ;;  %v9814_v33 = vadd.f32 %v9535_v30, %v1998_v45  ;;  %v9817_v18 = vadd.f32 %v9535_v30, %v1999_v52  ;;  %v13393_v9 = vrot.slane %v9723_v35, 1  ;;  %v1358_v45 = vpop.f32.mrf.mxu1 }
 0x291   :  { %v2522_v6 = vsel %vm2234_vm14, %v13391_v61, %v9758_v42  ;;  %v2536_v40 = vsel %vm2234_vm14, %v13392_v60, %v9763_v47  ;;  %v9823_v46 = vadd.f32 %v9535_v30, %v2000_v44  ;;  %v13394_v42 = vrot.slane %v9733_v27, 1 }
 0x292   :  { %v2524_v3 = vsel %vm13319_vm15, %v13393_v9, %v2522_v6  ;;  %v2859_v58 = vsel %vm1165_vm6, %v9630_v10, %v7583_v29  ;;  %v2553_v12 = vrot.slane %v9814_v33, 7  ;;  %v2555_v8 = vrot.slane %v9817_v18, 6 }
 0x293   :  { %v9828_v31 = vsel %vm13319_vm15, %v13394_v42, %v2536_v40  ;;  %v9831_v47 = vsel %vm673_vm4, 0.0, %v2524_v3  ;;  %v7576_v15 = vpop.permute.xlu1 %7575  ;;  %v9840_v54 = vsel %vm1165_vm6, %v9487_v1, %v7582_v34  ;;  %v1807_v29 = vmax.f32 %v9767_v57, %v1806_v43 }
 0x294   :  { %v2600_v23 = vrot.slane %v9831_v47, 1  ;;  %v7578_v16 = vunpack.i.h.bf16 %v7576_v15  ;;  %v7577_v62 = vunpack.i.l.bf16 %v7576_v15  ;;  %v1293_v37 = vpop.f32.mrf.mxu0  ;;  %v13313_v14 = vrot.slane %v9828_v31, 1 }
 0x295   :  { %v2668_v4 = vrot.slane %v9831_v47, 3  ;;  %v2554_v10 = vsel %vm2219_vm11, %v2553_v12, %v9802_v17  ;;  %v1294_v41 = vadd.f32 %v9577_v36, %v1293_v37  ;;  %v13312_v19 = vrot.slane %v9828_v31, 3 }
 0x296   :  { %v2556_v34 = vsel %vm2222_vm10, %v2555_v8, %v2554_v10  ;;  %v2858_v52 = vsel %vm1165_vm6, %v9623_v7, %v7578_v16  ;;  %v9854_v44 = vsel %vm1165_vm6, %v9317_v49, %v7577_v62  ;;  %v2602_v61 = vsel %vm13315_vm1, %v2600_v23, %v13313_v14 }
 0x297   :  { %v2557_v6 = vrot.slane %v9823_v46, 5  ;;  %2946 = vmatmul.f32.gmra.mxu2 %v2858_v52  ;;  %3066 = vmatmul.f32.vlgmr.msrb.gmra.mxu1 %v9854_v44  ;;  %v1359_v57 = vadd.f32 %v1358_v45, %v1294_v41  ;;  %v2670_v43 = vsel %vm567_vm3, %v2668_v4, %v13312_v19  ;;  %v1813_v7 = vrot.slane %v9769_v26, 1 }
 0x298   :  { %v7589_v60 = vpack.i.bf16 %v2670_v43, %v2602_v61  ;;  %v13395_v40 = vrot.slane %v9738_v32, 2  ;;  %v13396_v3 = vrot.slane %v9742_v5, 2  ;;  %v1989_v12 = vmul.f32 %v9522_v48, %v1807_v29  ;;  %v2333_v43 = vld [vmem:[%s9403_s10 + $0x78] sm:$0xff] }
 0x299   :  { %v9873_v8 = vsel %vm2225_vm12, %v2557_v6, %v2556_v34  ;;  %v1378_v15 = vmax.f32 %v1359_v57, 0.0  ;;  %v1814_v23 = vmax.f32 %v9769_v26, %v1813_v7  ;;  %v9878_v16 = vsel %vm2077_vm5, %v9695_v59, -inf  ;;  %v2332_v7 = vld [vmem:[%s9403_s10 + $0x70] sm:$0xff]  ;;  %2886 = vmatpush.msrb.mxu3 %v2333_v43  ;;  %v2331_v43 = vld [vmem:[%s9403_s10 + $0x68] sm:$0xff] }
 0x29a   :  { %v1819_v9 = vmax.f32 %v9738_v32, %v13395_v40  ;;  %v1826_v42 = vmax.f32 %v9742_v5, %v13396_v3  ;;  %7590 = vrot.lane.b32.xlu1 %v7589_v60, %s8198_s19  ;;  %v9882_v37 = vadd.f32 %v9535_v30, %v1989_v12  ;;  %v9886_v5 = vsel %vm2077_vm5, %v9687_v0, -inf }
 0x29b   :  { %v1438_v4 = vrot.slane %v1378_v15, 2  ;;  %v1439_v10 = vrot.slane %v1378_v15, 4  ;;  %v1440_v26 = vrot.slane %v1378_v15, 6  ;;  %v1885_v41 = vsel %vm1492_vm8, %v1378_v15, -inf  ;;  %2887 = vmatpush.msrb.mxu3 %v2332_v7 }
 0x29c   :  { %v1820_v62 = vrot.slane %v1819_v9, 1  ;;  %v1827_v32 = vrot.slane %v1826_v42, 1  ;;  %v1886_v59 = vrot.slane %v1885_v41, 4  ;;  %v1296_v29 = vpop.f32.mrf.mxu0  ;;  %v2128_v52 = vmax.f32 %v9886_v5, %v9878_v16 }
 0x29d   :  { %v1892_v61 = vsel %vm1492_vm8, %v1438_v4, -inf  ;;  %v1899_v6 = vsel %vm1492_vm8, %v1439_v10, -inf  ;;  %v1906_v57 = vsel %vm1492_vm8, %v1440_v26, -inf  ;;  %v1990_v0 = vmul.f32 %v9522_v48, %v1814_v23  ;;  %2888 = vmatpush.msrb.mxu3 %v2331_v43  ;;  %v9932_v43 = vld [vmem:[%s8714_s28] ss:$0 sm:$0xff] }
 0x29e   :  { %v1821_v45 = vmax.f32 %v1819_v9, %v1820_v62  ;;  %v1828_v34 = vmax.f32 %v1826_v42, %v1827_v32  ;;  %v1887_v60 = vmax.f32 %v1885_v41, %v1886_v59  ;;  %v1893_v40 = vrot.slane %v1892_v61, 4  ;;  %v1361_v32 = vpop.f32.mrf.mxu1 }
 0x29f   :  { %v1900_v3 = vrot.slane %v1899_v6, 4  ;;  %v1907_v12 = vrot.slane %v1906_v57, 4  ;;  %v2551_v9 = vrot.slane %v9799_v28, 1  ;;  %2949 = vmatmul.f32.gmra.mxu2 %v2859_v58  ;;  %3069 = vmatmul.f32.gmra.mxu1 %v9840_v54  ;;  %v1297_v42 = vadd.f32 %v9577_v36, %v1296_v29 }
 0x2a0   :  { %v1991_v15 = vmul.f32 %v9522_v48, %v1821_v45  ;;  %v1992_v62 = vmul.f32 %v9522_v48, %v1828_v34  ;;  %v1888_v23 = vrot.slane %v1887_v60, 2  ;;  %v1894_v4 = vmax.f32 %v1892_v61, %v1893_v40 }
 0x2a1   :  { %v1901_v10 = vmax.f32 %v1899_v6, %v1900_v3  ;;  %v1908_v26 = vmax.f32 %v1906_v57, %v1907_v12  ;;  %v1362_v41 = vadd.f32 %v1361_v32, %v1297_v42  ;;  %v9903_v59 = vadd.f32 %v9535_v30, %v1990_v0 }
 0x2a2   :  { %v9906_v58 = vadd.f32 %v9535_v30, %v1991_v15  ;;  %v9910_v36 = vsel %vm2077_vm5, %v9720_v25, -inf  ;;  %v1889_v48 = vmax.f32 %v1887_v60, %v1888_v23  ;;  %v1895_v29 = vrot.slane %v1894_v4, 2  ;;  %v2330_v25 = vld [vmem:[%s9403_s10 + $0x60] sm:$0xff] }
 0x2a3   :  { %v1902_v45 = vrot.slane %v1901_v10, 2  ;;  %v1909_v34 = vrot.slane %v1908_v26, 2  ;;  %v1379_v61 = vmax.f32 %v1362_v41, 0.0  ;;  %v9913_v6 = vadd.f32 %v9535_v30, %v1992_v62  ;;  %2889 = vmatpush.msrb.mxu3 %v2330_v25 }
 0x2a4   :  { %v9917_v57 = vsel %vm2077_vm5, %v9723_v35, -inf  ;;  %v9921_v0 = vsel %vm2077_vm5, %v9679_v63, -inf  ;;  %v1890_v7 = vrot.slane %v1889_v48, 1  ;;  %v1896_v60 = vmax.f32 %v1894_v4, %v1895_v29  ;;  %v2329_v35 = vld [vmem:[%s9403_s10 + $0x58] sm:$0xff] }
 0x2a5   :  { %v1903_v40 = vmax.f32 %v1901_v10, %v1902_v45  ;;  %v1910_v3 = vmax.f32 %v1908_v26, %v1909_v34  ;;  %v1441_v12 = vrot.slane %v1379_v61, 2  ;;  %v1442_v42 = vrot.slane %v1379_v61, 4  ;;  %v2328_v26 = vld [vmem:[%s9403_s10 + $0x50] sm:$0xff]  ;;  %2890 = vmatpush.msrb.mxu3 %v2329_v35 }
 0x2a6   :  { %v1443_v30 = vrot.slane %v1379_v61, 6  ;;  %v1913_v15 = vsel %vm1492_vm8, %v1379_v61, -inf  ;;  %v1891_v62 = vmax.f32 %v1889_v48, %v1890_v7  ;;  %v1897_v32 = vrot.slane %v1896_v60, 1 }
 0x2a7   :  { %v1904_v23 = vrot.slane %v1903_v40, 1  ;;  %v1911_v63 = vrot.slane %v1910_v3, 1  ;;  %v1914_v41 = vrot.slane %v1913_v15, 4  ;;  %v1920_v19 = vsel %vm1492_vm8, %v1441_v12, -inf  ;;  %2891 = vmatpush.msrb.mxu3 %v2328_v26 }
 0x2a8   :  { %v1927_v4 = vsel %vm1492_vm8, %v1442_v42, -inf  ;;  %v1934_v10 = vsel %vm1492_vm8, %v1443_v30, -inf  ;;  %v1898_v29 = vmax.f32 %v1896_v60, %v1897_v32  ;;  %v2001_v48 = vmul.f32 %v9932_v43, %v1891_v62  ;;  %v9939_v60 = vld [vmem:[%s8726_s2] ss:$0 sm:$0xff]  ;;  %v2327_v32 = vld [vmem:[%s9403_s10 + $0x48] sm:$0xff] }
 0x2a9   :  { %v1905_v45 = vmax.f32 %v1903_v40, %v1904_v23  ;;  %v1912_v34 = vmax.f32 %v1910_v3, %v1911_v63  ;;  %v1915_v61 = vmax.f32 %v1913_v15, %v1914_v41  ;;  %v1921_v25 = vrot.slane %v1920_v19, 4  ;;  %v2326_v23 = vld [vmem:[%s9403_s10 + $0x40] sm:$0xff]  ;;  %2892 = vmatpush.msrb.mxu3 %v2327_v32 }
 0x2aa   :  { %v1928_v7 = vrot.slane %v1927_v4, 4  ;;  %v1935_v12 = vrot.slane %v1934_v10, 4  ;;  %v2002_v42 = vmul.f32 %v9932_v43, %v1898_v29  ;;  %v9942_v40 = vadd.f32 %v9939_v60, %v2001_v48 }
 0x2ab   :  { %v2003_v14 = vmul.f32 %v9932_v43, %v1905_v45  ;;  %v2004_v30 = vmul.f32 %v9932_v43, %v1912_v34  ;;  %v1916_v3 = vrot.slane %v1915_v61, 2  ;;  %v1922_v35 = vmax.f32 %v1920_v19, %v1921_v25  ;;  %v2325_v34 = vld [vmem:[%s9403_s10 + $0x38] sm:$0xff]  ;;  %2893 = vmatpush.msrb.mxu3 %v2326_v23 }
 0x2ac   :  { %v9944_v62 = vmax.f32 %v1927_v4, %v1928_v7  ;;  %v9946_v15 = vmax.f32 %v1934_v10, %v1935_v12  ;;  %v9951_v63 = vadd.f32 %v9939_v60, %v2002_v42  ;;  %v2559_v29 = vrot.slane %v9942_v40, 4 }
 0x2ad   :  { %v9954_v41 = vadd.f32 %v9939_v60, %v2003_v14  ;;  %v2133_v26 = vsel %vm2077_vm5, %v9671_v38, -inf  ;;  %v9960_v19 = vadd.f32 %v9939_v60, %v2004_v30  ;;  %v9962_v4 = vmax.f32 %v1915_v61, %v1916_v3  ;;  %v2324_v30 = vld [vmem:[%s9403_s10 + $0x30] sm:$0xff]  ;;  %2894 = vmatpush.msrb.mxu3 %v2325_v34  ;;  %v2323_v34 = vld [vmem:[%s9403_s10 + $0x28] sm:$0xff] }
 0x2ae   :  { %v1923_v10 = vrot.slane %v1922_v35, 2  ;;  %v1930_v45 = vrot.slane %v9944_v62, 2  ;;  %v2560_v14 = vsel %vm2228_vm13, %v2559_v29, %v9873_v8  ;;  %v2561_v48 = vrot.slane %v9951_v63, 3 }
 0x2af   :  { %v2563_v25 = vrot.slane %v9954_v41, 2  ;;  %v1937_v38 = vrot.slane %v9946_v15, 2  ;;  %v1918_v7 = vrot.slane %v9962_v4, 1  ;;  %v2131_v61 = vmax.f32 %v9910_v36, %v9917_v57  ;;  %2895 = vmatpush.msrb.mxu3 %v2324_v30 }
 0x2b0   :  { %v9972_v12 = vmax.f32 %v1922_v35, %v1923_v10  ;;  %v2134_v42 = vmax.f32 %v9921_v0, %v2133_v26  ;;  %v2562_v3 = vsel %vm2231_vm9, %v2561_v48, %v2560_v14  ;;  %v2135_v8 = vsel %vm2077_vm5, %v9674_v13, -inf }
 0x2b1   :  { %v2136_v32 = vsel %vm2077_vm5, %v9683_v21, -inf  ;;  %v2138_v23 = vsel %vm2077_vm5, %v9700_v24, -inf  ;;  %v2139_v36 = vsel %vm2077_vm5, %v9711_v50, -inf  ;;  %v2141_v57 = vsel %vm2077_vm5, %v9730_v56, -inf  ;;  %2896 = vmatpush.msrb.mxu3 %v2323_v34 }
 0x2b2   :  { %v2137_v35 = vmax.f32 %v2135_v8, %v2136_v32  ;;  %v2142_v0 = vsel %vm2077_vm5, %v9733_v27, -inf  ;;  %v2140_v13 = vmax.f32 %v2138_v23, %v2139_v36  ;;  %v2144_v21 = vsel %vm2077_vm5, %v9882_v37, -inf  ;;  %v2322_v27 = vld [vmem:[%s9403_s10 + $0x20] sm:$0xff] }
 0x2b3   :  { %v2143_v29 = vmax.f32 %v2141_v57, %v2142_v0  ;;  %v2145_v24 = vsel %vm2077_vm5, %v9903_v59, -inf  ;;  %v2147_v50 = vsel %vm2077_vm5, %v9906_v58, -inf  ;;  %v2148_v56 = vsel %vm2077_vm5, %v9913_v6, -inf  ;;  %v7586_v0 = vpop.permute.xlu0 %7585  ;;  %2897 = vmatpush.msrb.mxu3 %v2322_v27 }
 0x2b4   :  { %v2146_v26 = vmax.f32 %v2144_v21, %v2145_v24  ;;  %v2253_v10 = vrot.slane %v2131_v61, 7  ;;  %v2149_v14 = vmax.f32 %v2147_v50, %v2148_v56  ;;  %v2255_v48 = vrot.slane %v2134_v42, 6  ;;  %v2321_v21 = vld [vmem:[%s9403_s10 + $0x18] sm:$0xff] }
 0x2b5   :  { %v2257_v8 = vrot.slane %v2137_v35, 5  ;;  %v2259_v32 = vrot.slane %v2140_v13, 4  ;;  %v2261_v23 = vrot.slane %v2143_v29, 3  ;;  %v2539_v57 = vrot.slane %v9903_v59, 7  ;;  %v2320_v59 = vld [vmem:[%s9403_s10 + $0x10] sm:$0xff]  ;;  %2898 = vmatpush.msrb.mxu3 %v2321_v21 }
 0x2b6   :  { %v2254_v30 = vsel %vm2219_vm11, %v2253_v10, %v2128_v52  ;;  %v2263_v36 = vrot.slane %v2146_v26, 2  ;;  %v2265_v24 = vrot.slane %v2149_v14, 1  ;;  %v2541_v42 = vrot.slane %v9906_v58, 6 }
 0x2b7   :  { %v2256_v61 = vsel %vm2222_vm10, %v2255_v48, %v2254_v30  ;;  %v2543_v35 = vrot.slane %v9913_v6, 5  ;;  %v2540_v16 = vsel %vm2219_vm11, %v2539_v57, %v9882_v37  ;;  %v2545_v5 = vrot.slane %v9787_v22, 4  ;;  %2899 = vmatpush.msrb.mxu3 %v2320_v59  ;;  %v2319_v30 = vld [vmem:[%s9403_s10 + $0x8] sm:$0xff] }
 0x2b8   :  { %v2258_v13 = vsel %vm2225_vm12, %v2257_v8, %v2256_v61  ;;  %v2547_v52 = vrot.slane %v9793_v2, 3  ;;  %v2542_v26 = vsel %vm2222_vm10, %v2541_v42, %v2540_v16  ;;  %v7588_v50 = vunpack.i.h.bf16 %v7586_v0 }
 0x2b9   :  { %v2260_v29 = vsel %vm2228_vm13, %v2259_v32, %v2258_v13  ;;  %v7587_v56 = vunpack.i.l.bf16 %v7586_v0  ;;  %v2565_v58 = vrot.slane %v9960_v19, 1  ;;  %v2544_v10 = vsel %vm2225_vm12, %v2543_v35, %v2542_v26  ;;  %v2318_v0 = vld [vmem:[%s9403_s10] sm:$0xff]  ;;  %2900 = vmatpush.msrb.mxu3 %v2319_v30 }
 0x2ba   :  { %v2262_v6 = vsel %vm2231_vm9, %v2261_v23, %v2260_v29  ;;  %v2564_v37 = vsel %vm2234_vm14, %v2563_v25, %v2562_v3  ;;  %v2546_v27 = vsel %vm2228_vm13, %v2545_v5, %v2544_v10  ;;  %v2860_v14 = vsel %vm1165_vm6, %v9754_v11, %v7588_v50 }
 0x2bb   :  { %v2264_v34 = vsel %vm2234_vm14, %v2263_v36, %v2262_v6  ;;  %v10028_v48 = vsel %vm1165_vm6, %v9459_v51, %v7587_v56  ;;  %v2548_v32 = vsel %vm2231_vm9, %v2547_v52, %v2546_v27  ;;  %2952 = vmatmul.f32.gmra.mxu2 %v2860_v14  ;;  %v10034_v25 = vsel %vm13319_vm15, %v2565_v58, %v2564_v37 }
 0x2bc   :  { %v2266_v8 = vsel %vm13319_vm15, %v2265_v24, %v2264_v34  ;;  %3072 = vmatmul.f32.gmra.mxu1 %v10028_v48  ;;  %v1925_v3 = vrot.slane %v9972_v12, 1  ;;  %v2550_v11 = vsel %vm2234_vm14, %v2549_v53, %v2548_v32  ;;  %v2605_v23 = vrot.slane %v10034_v25, 1  ;;  %2901 = vmatpush.msrb.mxu3 %v2318_v0 }
 0x2bd   :  { %7379 = vmatmul.msk.f32.gmra.mxu3 %vm1165_vm6, %v2266_v8  ;;  %v2673_v36 = vrot.slane %v10034_v25, 3  ;;  %v1919_v57 = vmax.f32 %v9962_v4, %v1918_v7  ;;  %v10051_v21 = vsel %vm13319_vm15, %v2551_v9, %v2550_v11  ;;  %v1931_v53 = vmax.f32 %v9944_v62, %v1930_v45 }
 0x2be   :  { %v1926_v61 = vmax.f32 %v9972_v12, %v1925_v3  ;;  %v1938_v24 = vmax.f32 %v9946_v15, %v1937_v38  ;;  %v2603_v42 = vrot.slane %v10051_v21, 1  ;;  %v2671_v4 = vrot.slane %v10051_v21, 3 }
 0x2bf   :  { %v2005_v7 = vmul.f32 %v9932_v43, %v1919_v57  ;;  %v2150_v9 = vsel %vm2077_vm5, %v9787_v22, -inf  ;;  %v1932_v35 = vrot.slane %v1931_v53, 1  ;;  %v2151_v62 = vsel %vm2077_vm5, %v9793_v2, -inf }
 0x2c0   :  { %v1939_v12 = vrot.slane %v1938_v24, 1  ;;  %v2006_v13 = vmul.f32 %v9932_v43, %v1926_v61  ;;  %v13397_v15 = vrot.slane %v9828_v31, 1  ;;  %v13398_v38 = vrot.slane %v9828_v31, 3 }
 0x2c1   :  { %v2606_v22 = vsel %vm13315_vm1, %v2603_v42, %v2605_v23  ;;  %v2674_v5 = vsel %vm567_vm3, %v2671_v4, %v2673_v36  ;;  %v1933_v2 = vmax.f32 %v1931_v53, %v1932_v35  ;;  %v2073_v26 = vadd.f32 %v9939_v60, %v2005_v7  ;;  %v13399_v35 = vld [vmem:[#allocation4_spill] sm:$0xff] }
 0x2c2   :  { %v2604_v45 = vsel %vm13315_vm1, %v13397_v15, %v2603_v42  ;;  %v2672_v16 = vsel %vm567_vm3, %v13398_v38, %v2671_v4  ;;  %v7599_v59 = vpack.i.bf16 %v2674_v5, %v2606_v22  ;;  %v1940_v29 = vmax.f32 %v1938_v24, %v1939_v12  ;;  %v13401_v38 = vld [vmem:[#allocation6_spill] sm:$0xff] }
 0x2c3   :  { %v7594_v52 = vpack.i.bf16 %v2672_v16, %v2604_v45  ;;  %v2074_v50 = vadd.f32 %v9939_v60, %v2006_v13  ;;  %v2152_v56 = vmax.f32 %v2150_v9, %v2151_v62  ;;  %v2153_v58 = vsel %vm2077_vm5, %v9790_v20, -inf  ;;  %v13402_v16 = vld [vmem:[#allocation5_spill] sm:$0xff] }
 0x2c4   :  { %7600 = vrot.lane.b32.xlu0 %v7599_v59, %s8198_s19  ;;  %v2007_v6 = vmul.f32 %v9932_v43, %v1933_v2  ;;  %v2008_v10 = vmul.f32 %v9932_v43, %v1940_v29  ;;  %v2154_v37 = vsel %vm2077_vm5, %v9799_v28, -inf  ;;  %v2156_v34 = vsel %vm2077_vm5, %v9802_v17, -inf }
 0x2c5   :  { %7595 = vrot.lane.b32.xlu2 %v7594_v52, %s8198_s19  ;;  %v2155_v27 = vmax.f32 %v2153_v58, %v2154_v37  ;;  %v2157_v14 = vsel %vm2077_vm5, %v9814_v33, -inf  ;;  %v2159_v20 = vsel %vm2077_vm5, %v9817_v18, -inf  ;;  %v2160_v8 = vsel %vm2077_vm5, %v9823_v46, -inf }
 0x2c6   :  { %v2075_v32 = vadd.f32 %v9939_v60, %v2007_v6  ;;  %v2076_v43 = vadd.f32 %v9939_v60, %v2008_v10  ;;  %v2158_v3 = vmax.f32 %v2156_v34, %v2157_v14  ;;  %v2161_v30 = vmax.f32 %v2159_v20, %v2160_v8 }
 0x2c7   :  { %v2162_v28 = vsel %vm2077_vm5, %v9942_v40, -inf  ;;  %v2163_v17 = vsel %vm2077_vm5, %v9951_v63, -inf  ;;  %v2165_v33 = vsel %vm2077_vm5, %v9954_v41, -inf  ;;  %v2166_v18 = vsel %vm2077_vm5, %v9960_v19, -inf }
 0x2c8   :  { %v2164_v11 = vmax.f32 %v2162_v28, %v2163_v17  ;;  %v2167_v46 = vmax.f32 %v2165_v33, %v2166_v18  ;;  %v2168_v57 = vsel %vm2077_vm5, %v2073_v26, -inf  ;;  %v2169_v60 = vsel %vm2077_vm5, %v2074_v50, -inf  ;;  %v2365_v17 = vld [vmem:[%s9403_s10 + $0x178] sm:$0xff] }
 0x2c9   :  { %v2170_v0 = vmax.f32 %v2168_v57, %v2169_v60  ;;  %v2171_v61 = vsel %vm2077_vm5, %v2075_v32, -inf  ;;  %v2172_v40 = vsel %vm2077_vm5, %v2076_v43, -inf  ;;  %v2267_v53 = vrot.slane %v2155_v27, 7  ;;  %v2381_v33 = vld [vmem:[%s9403_s10 + $0x1f8] sm:$0xff]  ;;  %2968 = vmatpush.msra.mxu3 %v2365_v17 }
 0x2ca   :  { %v2173_v24 = vmax.f32 %v2171_v61, %v2172_v40  ;;  %v2269_v63 = vrot.slane %v2158_v3, 6  ;;  %v2271_v42 = vrot.slane %v2161_v30, 5  ;;  %v2273_v4 = vrot.slane %v2164_v11, 4  ;;  %3009 = vmatpush.msrb.mxu2 %v2381_v33  ;;  %v13406_v61 = vld [vmem:[#allocation7_spill] sm:$0xff] }
 0x2cb   :  { %v2804_v41 = vrot.slane %v9556_v55, 7  ;;  %v2268_v19 = vsel %vm2219_vm11, %v2267_v53, %v2152_v56  ;;  %v2275_v7 = vrot.slane %v2167_v46, 3  ;;  %v2567_v9 = vrot.slane %v2074_v50, 7  ;;  %v2375_v33 = vld [vmem:[%s9403_s10 + $0x1c8] sm:$0xff] }
 0x2cc   :  { %v13400_v12 = vpack.i.bf16 %v9605_v39, %v13399_v35  ;;  %v2802_v13 = vrot.slane %v9459_v51, 7  ;;  %v2270_v62 = vsel %vm2222_vm10, %v2269_v63, %v2268_v19  ;;  %v2277_v15 = vrot.slane %v2170_v0, 2 }
 0x2cd   :  { %v2569_v45 = vrot.slane %v2075_v32, 6  ;;  %v13403_v22 = vpack.i.bf16 %v13401_v38, %v13402_v16  ;;  %v2272_v5 = vsel %vm2225_vm12, %v2271_v42, %v2270_v62  ;;  %v2279_v52 = vrot.slane %v2173_v24, 1  ;;  %v13407_v42 = vld [vmem:[#allocation3_spill] sm:$0xff] }
 0x2ce   :  { %7610 = vrot.lane.b32.xlu2 %v13400_v12, %s8198_s19  ;;  %v2568_v59 = vsel %vm2219_vm11, %v2567_v9, %v2073_v26  ;;  %v2571_v2 = vrot.slane %v2076_v43, 5  ;;  %v2274_v39 = vsel %vm2228_vm13, %v2273_v4, %v2272_v5  ;;  %v2738_v50 = vrot.slane %v9828_v31, 5 }
 0x2cf   :  { %7615 = vrot.lane.b32.xlu0 %v13403_v22, %s8198_s19  ;;  %v2570_v29 = vsel %vm2222_vm10, %v2569_v45, %v2568_v59  ;;  %v13404_v56 = vrot.slane %v9556_v55, 5  ;;  %v13405_v58 = vrot.slane %v9459_v51, 5  ;;  %v2805_v10 = vsel %vm2796_vm0, %v2802_v13, %v2804_v41 }
 0x2d0   :  { %v2276_v37 = vsel %vm2231_vm9, %v2275_v7, %v2274_v39  ;;  %v2572_v26 = vsel %vm2225_vm12, %v2571_v2, %v2570_v29  ;;  %v2807_v14 = vrot.slane %v9828_v31, 7  ;;  %v2737_v20 = vrot.slane %v9831_v47, 5 }
 0x2d1   :  { %v2736_v6 = vsel %vm13314_vm7, %v13405_v58, %v13404_v56  ;;  %v2278_v34 = vsel %vm2234_vm14, %v2277_v15, %v2276_v37  ;;  %v10139_v27 = vsel %vm673_vm4, %v2572_v26, 0.0  ;;  %v2806_v28 = vrot.slane %v9831_v47, 7  ;;  %v2380_v56 = vld [vmem:[%s9403_s10 + $0x1f0] sm:$0xff]  ;;  %v2378_v37 = vld [vmem:[%s9403_s10 + $0x1e0] sm:$0xff]  ;;  %v2377_v26 = vld [vmem:[%s9403_s10 + $0x1d8] sm:$0xff] }
 0x2d2   :  { %v2280_v8 = vsel %vm13319_vm15, %v2279_v52, %v2278_v34  ;;  %v2607_v32 = vrot.slane %v10139_v27, 1  ;;  %v2675_v43 = vrot.slane %v10139_v27, 3  ;;  %v7624_v3 = vpack.i.bf16 %v2805_v10, %v2736_v6  ;;  %3010 = vmatpush.msrb.mxu2 %v2380_v56  ;;  %v2379_v6 = vld [vmem:[%s9403_s10 + $0x1e8] sm:$0xff]  ;;  %v2362_v10 = vld [vmem:[%s9403_s10 + $0x160] sm:$0xff] }
 0x2d3   :  { %7380 = vmatmul.msk.f32.gmra.mxu3 %vm1165_vm6, %v2280_v8  ;;  %v2739_v30 = vsel %vm13314_vm7, %v2737_v20, %v2738_v50  ;;  %v2740_v18 = vrot.slane %v10051_v21, 5  ;;  %v2809_v11 = vrot.slane %v10051_v21, 7  ;;  %v2808_v0 = vsel %vm2796_vm0, %v2806_v28, %v2807_v14 }
 0x2d4   :  { %v2608_v46 = vsel %vm13315_vm1, %v2605_v23, %v2607_v32  ;;  %v2676_v57 = vsel %vm567_vm3, %v2673_v36, %v2675_v43  ;;  %v7572_v40 = vunpack.i.l.bf16 %v13406_v61  ;;  %v7629_v53 = vpack.i.bf16 %v2808_v0, %v2739_v30  ;;  %3011 = vmatpush.msrb.mxu2 %v2379_v6  ;;  %v2360_v43 = vld [vmem:[%s9403_s10 + $0x150] sm:$0xff]  ;;  %v2359_v30 = vld [vmem:[%s9403_s10 + $0x148] sm:$0xff] }
 0x2d5   :  { %v7604_v60 = vpack.i.bf16 %v2676_v57, %v2608_v46  ;;  %v2742_v24 = vrot.slane %v10034_v25, 5  ;;  %v2811_v23 = vrot.slane %v10034_v25, 7  ;;  %v2741_v63 = vsel %vm13314_vm7, %v2738_v50, %v2740_v18  ;;  %v2364_v50 = vld [vmem:[%s9403_s10 + $0x170] sm:$0xff]  ;;  %v2357_v46 = vld [vmem:[%s9403_s10 + $0x138] sm:$0xff] }
 0x2d6   :  { %7625 = vrot.lane.b32.xlu2 %v7624_v3, %s8198_s19  ;;  %v2810_v36 = vsel %vm2796_vm0, %v2807_v14, %v2809_v11  ;;  %v2849_v4 = vsel %vm1165_vm6, %v13407_v42, %v7572_v40  ;;  %v13408_v41 = vmov %v13405_v58  ;;  %v13409_v19 = vrot.slane %v9487_v1, 5  ;;  %v2363_v58 = vld [vmem:[%s9403_s10 + $0x168] sm:$0xff]  ;;  %2969 = vmatpush.msra.mxu3 %v2364_v50  ;;  %v2376_v3 = vld [vmem:[%s9403_s10 + $0x1d0] sm:$0xff] }
 0x2d7   :  { %7605 = vrot.lane.b32.xlu1 %v7604_v60, %s8198_s19  ;;  %7630 = vrot.lane.b32.xlu0 %v7629_v53, %s8198_s19  ;;  %v13410_v9 = vrot.slane %v9487_v1, 7  ;;  %v7634_v12 = vpack.i.bf16 %v2810_v36, %v2741_v63  ;;  %v2743_v62 = vsel %vm13314_vm7, %v2740_v18, %v2742_v24  ;;  %v2812_v15 = vsel %vm2796_vm0, %v2809_v11, %v2811_v23  ;;  %v2358_v18 = vld [vmem:[%s9403_s10 + $0x140] sm:$0xff]  ;;  %v2356_v63 = vld [vmem:[%s9403_s10 + $0x130] sm:$0xff] }
 0x2d8   :  { %v2734_v7 = vsel %vm13314_vm7, %v13409_v19, %v13408_v41  ;;  %v7639_v38 = vpack.i.bf16 %v2812_v15, %v2743_v62  ;;  %v13411_v5 = vrot.slane %v9556_v55, 1  ;;  %v2744_v59 = vrot.slane %v10139_v27, 5  ;;  %2970 = vmatpush.msra.mxu3 %v2363_v58  ;;  %3012 = vmatpush.msrb.mxu2 %v2378_v37  ;;  %v2374_v11 = vld [vmem:[%s9403_s10 + $0x1c0] sm:$0xff]  ;;  %v2372_v36 = vld [vmem:[%s9403_s10 + $0x1b0] sm:$0xff]  ;;  %v2371_v41 = vld [vmem:[%s9403_s10 + $0x1a8] sm:$0xff] }
 0x2d9   :  { %v2803_v35 = vsel %vm2796_vm0, %v13410_v9, %v2802_v13  ;;  %v13317_v13 = vmov 0.0   ;;  %v2813_v2 = vrot.slane %v10139_v27, 7  ;;  %v2642_v14 = vrot.slane %v9831_v47, 2  ;;  %v2354_v19 = vld [vmem:[%s9403_s10 + $0x120] sm:$0xff]  ;;  %v2353_v9 = vld [vmem:[%s9403_s10 + $0x118] sm:$0xff]  ;;  %v2368_v62 = vld [vmem:[%s9403_s10 + $0x190] sm:$0xff] }
 0x2da   :  { %v7619_v45 = vpack.i.bf16 %v2803_v35, %v2734_v7  ;;  %v10189_v16 = vrot.slane %v13317_v13, 1  ;;  %2971 = vmatpush.msra.mxu3 %v2362_v10  ;;  %3013 = vmatpush.msrb.mxu2 %v2377_v26  ;;  %v2645_v57 = vrot.slane %v10051_v21, 2  ;;  %v2370_v7 = vld [vmem:[%s9403_s10 + $0x1a0] sm:$0xff]  ;;  %v2369_v35 = vld [vmem:[%s9403_s10 + $0x198] sm:$0xff]  ;;  %v2351_v15 = vld [vmem:[%s9403_s10 + $0x108] sm:$0xff]  ;;  %v2649_v50 = vrot.slane %v10139_v27, 2 }
 0x2db   :  { %2902 = vmatmul.f32.vlgmr.msrb.gmra.mxu3 %v2849_v4  ;;  %v2814_v39 = vsel %vm2796_vm0, %v2811_v23, %v2813_v2  ;;  %v2373_v23 = vld [vmem:[%s9403_s10 + $0x1b8] sm:$0xff]  ;;  %v2355_v4 = vld [vmem:[%s9403_s10 + $0x128] sm:$0xff]  ;;  %vm13412_vm5 = vcmask 1041408  }
 0x2dc   :  { %v2842_v22 = vsel %vm13315_vm1, %v2607_v32, %v10189_v16  ;;  %v2841_v52 = vsel %vm13315_vm1, %v13411_v5, %v10189_v16  ;;  %3014 = vmatpush.msrb.mxu2 %v2376_v3  ;;  %v2647_v5 = vrot.slane %v10034_v25, 2  ;;  %vm13413_vm8 = vmmov %vm13412_vm5 }
 0x2de   :  { %7635 = vrot.lane.b32.xlu2 %v7634_v12, %s8198_s19  ;;  %3015 = vmatpush.msrb.mxu2 %v2375_v33  ;;  %v2352_v12 = vld [vmem:[%s9403_s10 + $0x110] sm:$0xff]  ;;  %v2650_v10 = vsel %vm13316_vm2, %v2647_v5, %v2649_v50 }
 0x2df   :  { %7620 = vrot.lane.b32.xlu1 %v7619_v45, %s8198_s19  ;;  %7640 = vrot.lane.b32.xlu0 %v7639_v38, %s8198_s19  ;;  %v2367_v45 = vld [vmem:[%s9403_s10 + $0x188] sm:$0xff]  ;;  %v2350_v38 = vld [vmem:[%s9403_s10 + $0x100] sm:$0xff] }
 0x2e0   :  { %3016 = vmatpush.msrb.mxu2 %v2374_v11 }
 0x2e2   :  { %3017 = vmatpush.msrb.mxu2 %v2373_v23 }
 0x2e3   :  { %2905 = vmatmul.f32.gmra.mxu3 %v9854_v44  ;;  %v2745_v44 = vsel %vm13314_vm7, %v2742_v24, %v2744_v59 }
 0x2e4   :  { %v7644_v29 = vpack.i.bf16 %v2814_v39, %v2745_v44  ;;  %3018 = vmatpush.msrb.mxu2 %v2372_v36  ;;  %v2648_v44 = vsel %vm13316_vm2, %v2645_v57, %v2647_v5 }
 0x2e6   :  { %2845 = vrot.lane.b32.xlu2 %v2842_v22, %s8198_s19  ;;  %3019 = vmatpush.msrb.mxu2 %v2371_v41  ;;  %v2366_v22 = vld [vmem:[%s9403_s10 + $0x180] sm:$0xff] }
 0x2e7   :  { %2843 = vrot.lane.b32.xlu1 %v2841_v52, %s8198_s19 }
 0x2e8   :  { %3020 = vmatpush.msrb.mxu2 %v2370_v7 }
 0x2ea   :  { %3021 = vmatpush.msrb.mxu2 %v2369_v35  ;;  %v2777_v35 = vrot.slane %v9556_v55, 6 }
 0x2eb   :  { %2908 = vmatmul.f32.gmra.mxu3 %v9840_v54  ;;  %v2361_v54 = vld [vmem:[%s9403_s10 + $0x158] sm:$0xff] }
 0x2ec   :  { %2972 = vmatpush.msra.mxu3 %v2361_v54  ;;  %3022 = vmatpush.msrb.mxu2 %v2368_v62 }
 0x2ee   :  { %2973 = vmatpush.msra.mxu3 %v2360_v43  ;;  %3023 = vmatpush.msrb.mxu2 %v2367_v45  ;;  %v2770_v43 = vrot.slane %v13407_v42, 6 }
 0x2ef   :  { %7645 = vrot.lane.b32.xlu1 %v7644_v29, %s8198_s19 }
 0x2f0   :  { %2974 = vmatpush.msra.mxu3 %v2359_v30  ;;  %3024 = vmatpush.msrb.mxu2 %v2366_v22 }
 0x2f2   :  { %2975 = vmatpush.msra.mxu3 %v2358_v18  ;;  %v2773_v18 = vrot.slane %v9487_v1, 6 }
 0x2f3   :  { %2911 = vmatmul.f32.gmra.mxu3 %v10028_v48  ;;  %v2643_v48 = vrot.slane %v9828_v31, 2 }
 0x2f4   :  { %2976 = vmatpush.msra.mxu3 %v2357_v46 }
 0x2f5   :  { %v2644_v32 = vsel %vm13316_vm2, %v2642_v14, %v2643_v48  ;;  %v2646_v40 = vsel %vm13316_vm2, %v2643_v48, %v2645_v57  ;;  %v2702_v48 = vrot.slane %v9317_v49, 4 }
 0x2f6   :  { %2977 = vmatpush.msra.mxu3 %v2356_v63 }
 0x2f8   :  { %2978 = vmatpush.msra.mxu3 %v2355_v4 }
 0x2fa   :  { %2979 = vmatpush.msra.mxu3 %v2354_v19 }
 0x2fc   :  { %2980 = vmatpush.msra.mxu3 %v2353_v9  ;;  %v2708_v9 = vrot.slane %v9556_v55, 4 }
 0x2fe   :  { %2981 = vmatpush.msra.mxu3 %v2352_v12 }
 0x300   :  { %2982 = vmatpush.msra.mxu3 %v2351_v15  ;;  %v10291_v15 = vpop.f32.mrf.mxu3 }
 0x302   :  { %2983 = vmatpush.msra.mxu3 %v2350_v38 }
 0x30c   :  { %v7591_v34 = vpop.permute.xlu1 %7590 }
 0x30d   :  { %v7593_v20 = vunpack.i.h.bf16 %v7591_v34  ;;  %v7592_v8 = vunpack.i.l.bf16 %v7591_v34  ;;  %v2771_v34 = vrot.slane %v9317_v49, 6  ;;  %v2704_v49 = vrot.slane %v9487_v1, 4 }
 0x30e   :  { %v2775_v1 = vrot.slane %v9459_v51, 6 }
 0x30f   :  { %v2853_v28 = vsel %vm1165_vm6, %v9831_v47, %v7592_v8  ;;  %v2861_v17 = vsel %vm1165_vm6, %v2644_v32, %v7593_v20  ;;  %v2701_v32 = vrot.slane %v13407_v42, 4  ;;  %v2772_v30 = vsel %vm13412_vm5, %v2770_v43, %v2771_v34 }
 0x310   :  { %2914 = vmatmul.f32.gmra.mxu3 %v2853_v28  ;;  %2955 = vmatmul.f32.gmra.mxu2 %v2861_v17  ;;  %v2776_v41 = vsel %vm13412_vm5, %v2773_v18, %v2775_v1  ;;  %v2784_v43 = vrot.slane %v10034_v25, 6 }
 0x311   :  { %v2703_v3 = vsel %vm673_vm4, %v2701_v32, %v2702_v48 }
 0x31f   :  { %v7596_v60 = vpop.permute.xlu2 %7595 }
 0x320   :  { %v7598_v0 = vunpack.i.h.bf16 %v7596_v60  ;;  %v7597_v61 = vunpack.i.l.bf16 %v7596_v60  ;;  %v2705_v60 = vsel %vm673_vm4, %v2702_v48, %v2704_v49 }
 0x322   :  { %v10232_v53 = vsel %vm1165_vm6, %v9828_v31, %v7597_v61  ;;  %v2862_v24 = vsel %vm1165_vm6, %v2646_v40, %v7598_v0  ;;  %v2774_v0 = vsel %vm13413_vm8, %v2771_v34, %v2773_v18  ;;  %vm13414_vm8 = vmmov %vm13412_vm5 }
 0x323   :  { %2917 = vmatmul.f32.gmra.mxu3 %v10232_v53  ;;  %2958 = vmatmul.f32.gmra.mxu2 %v2862_v24  ;;  %v2706_v24 = vrot.slane %v9459_v51, 4 }
 0x325   :  { %v2707_v4 = vsel %vm673_vm4, %v2704_v49, %v2706_v24  ;;  %v2709_v62 = vsel %vm673_vm4, %v2706_v24, %v2708_v9 }
 0x328   :  { %v7611_v26 = vpop.permute.xlu2 %7610 }
 0x329   :  { %v7613_v14 = vunpack.i.h.bf16 %v7611_v26  ;;  %v7612_v20 = vunpack.i.l.bf16 %v7611_v26 }
 0x32b   :  { %v2865_v28 = vsel %vm1165_vm6, %v2703_v3, %v7612_v20  ;;  %v2873_v17 = vsel %vm1165_vm6, %v2772_v30, %v7613_v14 }
 0x330   :  { %v7626_v36 = vpop.permute.xlu2 %7625 }
 0x331   :  { %v7628_v51 = vunpack.i.h.bf16 %v7626_v36  ;;  %v7627_v12 = vunpack.i.l.bf16 %v7626_v36 }
 0x333   :  { %v2868_v45 = vsel %vm1165_vm6, %v2709_v62, %v7627_v12  ;;  %v10343_v62 = vld [vmem:[%s10184_s21] ss:$0 sm:$0xff] }
 0x336   :  { %v7601_v52 = vpop.permute.xlu0 %7600 }
 0x337   :  { %v7603_v59 = vunpack.i.h.bf16 %v7601_v52  ;;  %v7602_v2 = vunpack.i.l.bf16 %v7601_v52  ;;  %v2711_v52 = vrot.slane %v9828_v31, 4 }
 0x338   :  { %v7636_v22 = vpop.permute.xlu2 %7635 }
 0x339   :  { %v2855_v39 = vsel %vm1165_vm6, %v10051_v21, %v7602_v2  ;;  %v2863_v29 = vsel %vm1165_vm6, %v2648_v44, %v7603_v59  ;;  %v2710_v44 = vrot.slane %v9831_v47, 4  ;;  %v7637_v26 = vunpack.i.l.bf16 %v7636_v22 }
 0x33a   :  { %2920 = vmatmul.f32.gmra.mxu3 %v2855_v39  ;;  %2961 = vmatmul.f32.gmra.mxu2 %v2863_v29 }
 0x33b   :  { %v2712_v29 = vsel %vm673_vm4, %v2710_v44, %v2711_v52 }
 0x341   :  { %v7616_v33 = vpop.permute.xlu0 %7615 }
 0x342   :  { %v7618_v11 = vunpack.i.h.bf16 %v7616_v33  ;;  %v7617_v46 = vunpack.i.l.bf16 %v7616_v33 }
 0x344   :  { %v2866_v61 = vsel %vm1165_vm6, %v2705_v60, %v7617_v46  ;;  %v2874_v40 = vsel %vm1165_vm6, %v2774_v0, %v7618_v11  ;;  %v2717_v46 = vrot.slane %v10139_v27, 4 }
 0x349   :  { %v7606_v56 = vpop.permute.xlu1 %7605  ;;  %v7631_v5 = vpop.permute.xlu0 %7630 }
 0x34a   :  { %v7608_v58 = vunpack.i.h.bf16 %v7606_v56  ;;  %v7607_v6 = vunpack.i.l.bf16 %v7606_v56  ;;  %v7633_v59 = vunpack.i.h.bf16 %v7631_v5  ;;  %v7632_v2 = vunpack.i.l.bf16 %v7631_v5  ;;  %v10302_v56 = vpop.f32.mrf.mxu3 }
 0x34c   :  { %v10260_v37 = vsel %vm1165_vm6, %v10034_v25, %v7607_v6  ;;  %v2864_v54 = vsel %vm1165_vm6, %v2650_v10, %v7608_v58  ;;  %v2869_v58 = vsel %vm1165_vm6, %v2712_v29, %v7632_v2  ;;  %v2713_v10 = vrot.slane %v10051_v21, 4 }
 0x34d   :  { %2923 = vmatmul.f32.gmra.mxu3 %v10260_v37  ;;  %2964 = vmatmul.f32.gmra.mxu2 %v2864_v54  ;;  %v2782_v54 = vrot.slane %v10051_v21, 6  ;;  %v2715_v21 = vrot.slane %v10034_v25, 4 }
 0x34e   :  { %v2714_v48 = vsel %vm673_vm4, %v2711_v52, %v2713_v10 }
 0x34f   :  { %v2870_v20 = vsel %vm1165_vm6, %v2714_v48, %v7637_v26  ;;  %v2718_v60 = vsel %vm673_vm4, %v2715_v21, %v2717_v46  ;;  %v3114_v48 = vld [vmem:[%s10354_s25 + $0x78] sm:$0xff] }
 0x350   :  { %3543 = vmatpush.msrb.mxu0 %v3114_v48 }
 0x351   :  { %v7621_v8 = vpop.permute.xlu1 %7620  ;;  %v7641_v32 = vpop.permute.xlu0 %7640 }
 0x352   :  { %v7623_v23 = vunpack.i.h.bf16 %v7621_v8  ;;  %v7622_v63 = vunpack.i.l.bf16 %v7621_v8  ;;  %v10312_v14 = vpop.f32.mrf.mxu3  ;;  %v7643_v3 = vunpack.i.h.bf16 %v7641_v32  ;;  %v7642_v30 = vunpack.i.l.bf16 %v7641_v32 }
 0x354   :  { %v2867_v19 = vsel %vm1165_vm6, %v2707_v4, %v7622_v63  ;;  %v2875_v7 = vsel %vm1165_vm6, %v2776_v41, %v7623_v23 }
 0x355   :  { %2984 = vmatmul.f32.vlgmr.msra.gmra.mxu3 %v2865_v28  ;;  %3025 = vmatmul.f32.vlgmr.msrb.gmra.mxu2 %v2873_v17  ;;  %v2716_v28 = vsel %vm673_vm4, %v2713_v10, %v2715_v21  ;;  %v2785_v17 = vsel %vm13412_vm5, %v2782_v54, %v2784_v43 }
 0x356   :  { %v2871_v49 = vsel %vm1165_vm6, %v2716_v28, %v7642_v30  ;;  %v2879_v18 = vsel %vm1165_vm6, %v2785_v17, %v7643_v3 }
 0x359   :  { %v2844_v57 = vpop.permute.xlu1 %2843 }
 0x35a   :  { %v2881_v42 = vsel %vm1165_vm6, %v9556_v55, %v2844_v57  ;;  %v2780_v55 = vrot.slane %v9828_v31, 6  ;;  %v2846_v31 = vpop.permute.xlu2 %2845  ;;  %v10320_v33 = vpop.f32.mrf.mxu3  ;;  %v2786_v57 = vrot.slane %v10139_v27, 6 }
 0x35b   :  { %3075 = vmatmul.f32.gmra.mxu1 %v2881_v42 }
 0x35d   :  { %2987 = vmatmul.f32.gmra.mxu3 %v2866_v61  ;;  %3028 = vmatmul.f32.gmra.mxu2 %v2874_v40 }
 0x361   :  { %v7646_v11 = vpop.permute.xlu1 %7645 }
 0x362   :  { %v7648_v25 = vunpack.i.h.bf16 %v7646_v11  ;;  %v7647_v42 = vunpack.i.l.bf16 %v7646_v11  ;;  %v2903_v24 = vpop.f32.mrf.mxu3 }
 0x363   :  { %3078 = vmatmul.f32.gmra.mxu1 %v10232_v53  ;;  %v2778_v53 = vsel %vm13414_vm8, %v2775_v1, %v2777_v35  ;;  %vm13415_vm8 = vmmov %vm13412_vm5  ;;  %v2944_v1 = vpop.f32.mrf.mxu2 }
 0x364   :  { %v2876_v38 = vsel %vm1165_vm6, %v2778_v53, %v7628_v51  ;;  %v2783_v34 = vsel %vm13415_vm8, %v2780_v55, %v2782_v54  ;;  %vm13416_vm8 = vmmov %vm13412_vm5  ;;  %v2872_v61 = vsel %vm1165_vm6, %v2718_v60, %v7647_v42 }
 0x365   :  { %2990 = vmatmul.f32.gmra.mxu3 %v2867_v19  ;;  %3031 = vmatmul.f32.gmra.mxu2 %v2875_v7  ;;  %v2787_v0 = vsel %vm13416_vm8, %v2784_v43, %v2786_v57  ;;  %vm13417_vm8 = vmmov %vm13412_vm5 }
 0x366   :  { %v2880_v40 = vsel %vm1165_vm6, %v2787_v0, %v7648_v25  ;;  %v3113_v0 = vld [vmem:[%s10354_s25 + $0x70] sm:$0xff] }
 0x367   :  { %3544 = vmatpush.msrb.mxu0 %v3113_v0  ;;  %v3110_v0 = vld [vmem:[%s10354_s25 + $0x58] sm:$0xff] }
 0x36a   :  { %v2906_v23 = vpop.f32.mrf.mxu3 }
 0x36b   :  { %3081 = vmatmul.f32.gmra.mxu1 %v2855_v39  ;;  %v2779_v39 = vrot.slane %v9831_v47, 6  ;;  %v7638_v47 = vunpack.i.h.bf16 %v7636_v22  ;;  %v2947_v63 = vpop.f32.mrf.mxu2  ;;  %v2904_v22 = vadd.f32 %v10343_v62, %v2903_v24  ;;  %v2907_v44 = vadd.f32 %v10343_v62, %v2906_v23 }
 0x36d   :  { %2993 = vmatmul.f32.gmra.mxu3 %v2868_v45  ;;  %3034 = vmatmul.f32.gmra.mxu2 %v2876_v38  ;;  %v2781_v50 = vsel %vm13412_vm5, %v2779_v39, %v2780_v55  ;;  %v2878_v8 = vsel %vm1165_vm6, %v2783_v34, %v7638_v47  ;;  %v3067_v38 = vpop.f32.mrf.mxu1  ;;  %v2945_v5 = vadd.f32 %v2944_v1, %v2904_v22 }
 0x36e   :  { %v2877_v6 = vsel %vm1165_vm6, %v2781_v50, %v7633_v59 }
 0x372   :  { %v2909_v36 = vpop.f32.mrf.mxu3 }
 0x373   :  { %3084 = vmatmul.f32.gmra.mxu1 %v10260_v37  ;;  %v2882_v37 = vsel %vm1165_vm6, %v10139_v27, %v2846_v31  ;;  %v2950_v4 = vpop.f32.mrf.mxu2  ;;  %v2910_v47 = vadd.f32 %v10343_v62, %v2909_v36 }
 0x375   :  { %2996 = vmatmul.f32.gmra.mxu3 %v2869_v58  ;;  %3037 = vmatmul.f32.gmra.mxu2 %v2877_v6  ;;  %v3070_v2 = vpop.f32.mrf.mxu1  ;;  %v2948_v58 = vadd.f32 %v2947_v63, %v2907_v44  ;;  %v2951_v21 = vadd.f32 %v2950_v4, %v2910_v47 }
 0x37a   :  { %v2912_v41 = vpop.f32.mrf.mxu3 }
 0x37b   :  { %3087 = vmatmul.f32.gmra.mxu1 %v2882_v37  ;;  %v2953_v27 = vpop.f32.mrf.mxu2 }
 0x37d   :  { %2999 = vmatmul.f32.gmra.mxu3 %v2870_v20  ;;  %3040 = vmatmul.f32.gmra.mxu2 %v2878_v8  ;;  %v3073_v54 = vpop.f32.mrf.mxu1  ;;  %v2913_v20 = vadd.f32 %v10343_v62, %v2912_v41 }
 0x37f   :  { %v2954_v17 = vadd.f32 %v2953_v27, %v2913_v20 }
 0x385   :  { %3002 = vmatmul.f32.gmra.mxu3 %v2871_v49  ;;  %3043 = vmatmul.f32.gmra.mxu2 %v2879_v18 }
 0x38d   :  { %3005 = vmatmul.f32.gmra.mxu3 %v2872_v61  ;;  %3046 = vmatmul.f32.gmra.mxu2 %v2880_v40 }
 0x393   :  { %v10330_v19 = vpop.f32.mrf.mxu3  ;;  %v10332_v7 = vpop.f32.mrf.mxu2 }
 0x3a6   :  { %v10334_v9 = vpop.f32.mrf.mxu3  ;;  %v10336_v35 = vpop.f32.mrf.mxu2 }
 0x3bd   :  { %v10338_v51 = vpop.f32.mrf.mxu3  ;;  %v10340_v12 = vpop.f32.mrf.mxu2 }
 0x3d0   :  { %v10345_v53 = vpop.f32.mrf.mxu3  ;;  %v10347_v45 = vpop.f32.mrf.mxu2 }
 0x3d8   :  { %v2985_v52 = vpop.f32.mrf.mxu3  ;;  %v3026_v55 = vpop.f32.mrf.mxu2 }
 0x3d9   :  { %v2986_v59 = vadd.f32 %v2985_v52, %v2945_v5  ;;  %v3076_v46 = vpop.f32.mrf.mxu1 }
 0x3db   :  { %v3027_v39 = vadd.f32 %v3026_v55, %v2986_v59 }
 0x3dd   :  { %v3068_v29 = vadd.f32 %v3067_v38, %v3027_v39 }
 0x3df   :  { %v3091_v50 = vmax.f32 %v3068_v29, 0.0 }
 0x3e0   :  { %v2988_v6 = vpop.f32.mrf.mxu3  ;;  %v3029_v31 = vpop.f32.mrf.mxu2 }
 0x3e1   :  { %v2989_v10 = vadd.f32 %v2988_v6, %v2948_v58  ;;  %v3148_v26 = vrot.slane %v3091_v50, 4  ;;  %v2916_v6 = vadd.f32 %v10343_v62, %v10330_v19 }
 0x3e3   :  { %v3030_v37 = vadd.f32 %v3029_v31, %v2989_v10  ;;  %v10360_v8 = vsel %vm673_vm4, 0.0, %v3148_v26 }
 0x3e4   :  { %v3264_v49 = vrot.slane %v10360_v8, 3  ;;  %v3416_v18 = vrot.slane %v10360_v8, 7  ;;  %v3222_v11 = vrot.slane %v10360_v8, 2  ;;  %v3374_v42 = vrot.slane %v10360_v8, 6 }
 0x3e5   :  { %v3071_v34 = vadd.f32 %v3070_v2, %v3030_v37  ;;  %v3180_v60 = vrot.slane %v10360_v8, 1  ;;  %v3332_v36 = vrot.slane %v10360_v8, 5  ;;  %v3079_v37 = vpop.f32.mrf.mxu1 }
 0x3e7   :  { %v3092_v32 = vmax.f32 %v3071_v34, 0.0 }
 0x3e8   :  { %v2991_v43 = vpop.f32.mrf.mxu3  ;;  %v3032_v3 = vpop.f32.mrf.mxu2 }
 0x3e9   :  { %v3149_v30 = vrot.slane %v3092_v32, 4  ;;  %v2992_v28 = vadd.f32 %v2991_v43, %v2951_v21  ;;  %v2957_v32 = vadd.f32 %v10332_v7, %v2916_v6  ;;  %v2919_v7 = vadd.f32 %v10343_v62, %v10334_v9  ;;  %v3109_v6 = vld [vmem:[%s10354_s25 + $0x50] sm:$0xff] }
 0x3eb   :  { %v10366_v57 = vsel %vm673_vm4, %v3148_v26, %v3149_v30  ;;  %v3033_v25 = vadd.f32 %v3032_v3, %v2992_v28 }
 0x3ec   :  { %v3265_v61 = vrot.slane %v10366_v57, 3  ;;  %v3417_v40 = vrot.slane %v10366_v57, 7  ;;  %v3223_v24 = vrot.slane %v10366_v57, 2  ;;  %v3375_v1 = vrot.slane %v10366_v57, 6 }
 0x3ed   :  { %v3074_v23 = vadd.f32 %v3073_v54, %v3033_v25  ;;  %v3181_v63 = vrot.slane %v10366_v57, 1  ;;  %v3333_v4 = vrot.slane %v10366_v57, 5  ;;  %v3112_v54 = vld [vmem:[%s10354_s25 + $0x68] sm:$0xff] }
 0x3ee   :  { %v3266_v27 = vsel %vm567_vm3, %v3264_v49, %v3265_v61  ;;  %v3418_v41 = vsel %vm2796_vm0, %v3416_v18, %v3417_v40  ;;  %v3224_v38 = vsel %vm13316_vm2, %v3222_v11, %v3223_v24  ;;  %v3376_v22 = vsel %vm13412_vm5, %v3374_v42, %v3375_v1  ;;  %3545 = vmatpush.msrb.mxu0 %v3112_v54 }
 0x3ef   :  { %v3093_v5 = vmax.f32 %v3074_v23, 0.0  ;;  %v7659_v52 = vpack.i.bf16 %v3266_v27, %v3418_v41  ;;  %v7654_v55 = vpack.i.bf16 %v3224_v38, %v3376_v22  ;;  %v3182_v59 = vsel %vm13315_vm1, %v3180_v60, %v3181_v63  ;;  %v3111_v60 = vld [vmem:[%s10354_s25 + $0x60] sm:$0xff] }
 0x3f0   :  { %v2994_v2 = vpop.f32.mrf.mxu3  ;;  %v3035_v44 = vpop.f32.mrf.mxu2  ;;  %v3334_v39 = vsel %vm13314_vm7, %v3332_v36, %v3333_v4  ;;  %3546 = vmatpush.msrb.mxu0 %v3111_v60 }
 0x3f1   :  { %v3151_v29 = vrot.slane %v3093_v5, 4  ;;  %v2995_v50 = vadd.f32 %v2994_v2, %v2954_v17  ;;  %7660 = vrot.lane.b32.xlu2 %v7659_v52, %s8197_s18  ;;  %7655 = vrot.lane.b32.xlu1 %v7654_v55, %s8198_s19  ;;  %v7649_v58 = vpack.i.bf16 %v3182_v59, %v3334_v39  ;;  %v3082_v5 = vpop.f32.mrf.mxu1 }
 0x3f2   :  { %3547 = vmatpush.msrb.mxu0 %v3110_v0 }
 0x3f3   :  { %v10393_v31 = vsel %vm673_vm4, %v3149_v30, %v3151_v29  ;;  %v3036_v10 = vadd.f32 %v3035_v44, %v2995_v50  ;;  %7650 = vrot.lane.b32.xlu0 %v7649_v58, %s8199_s20  ;;  %v2922_v50 = vadd.f32 %v10343_v62, %v10338_v51 }
 0x3f4   :  { %v3225_v47 = vrot.slane %v10393_v31, 2  ;;  %v3377_v26 = vrot.slane %v10393_v31, 6  ;;  %v3183_v19 = vrot.slane %v10393_v31, 1  ;;  %v3335_v49 = vrot.slane %v10393_v31, 5  ;;  %3548 = vmatpush.msrb.mxu0 %v3109_v6 }
 0x3f5   :  { %v3077_v48 = vadd.f32 %v3076_v46, %v3036_v10  ;;  %v3267_v18 = vrot.slane %v10393_v31, 3  ;;  %v3419_v46 = vrot.slane %v10393_v31, 7  ;;  %v2963_v51 = vadd.f32 %v10340_v12, %v2922_v50 }
 0x3f6   :  { %v3226_v34 = vsel %vm13316_vm2, %v3223_v24, %v3225_v47  ;;  %v3378_v20 = vsel %vm13417_vm8, %v3375_v1, %v3377_v26  ;;  %v3184_v11 = vsel %vm13315_vm1, %v3181_v63, %v3183_v19  ;;  %v3336_v36 = vsel %vm13314_vm7, %v3333_v4, %v3335_v49  ;;  %vm13418_vm8 = vmmov %vm13412_vm5 }
 0x3f7   :  { %v3094_v21 = vmax.f32 %v3077_v48, 0.0  ;;  %v7664_v43 = vpack.i.bf16 %v3226_v34, %v3378_v20  ;;  %v3268_v9 = vsel %vm567_vm3, %v3265_v61, %v3267_v18  ;;  %v3420_v22 = vsel %vm2796_vm0, %v3417_v40, %v3419_v46 }
 0x3f8   :  { %v2997_v3 = vpop.f32.mrf.mxu3  ;;  %v3038_v30 = vpop.f32.mrf.mxu2  ;;  %v2960_v4 = vadd.f32 %v10336_v35, %v2919_v7 }
 0x3f9   :  { %v3153_v28 = vrot.slane %v3094_v21, 4  ;;  %v2998_v17 = vadd.f32 %v2997_v3, %v2957_v32  ;;  %7665 = vrot.lane.b32.xlu2 %v7664_v43, %s8198_s19  ;;  %v3085_v12 = vpop.f32.mrf.mxu1 }
 0x3fb   :  { %v10411_v25 = vsel %vm673_vm4, %v3151_v29, %v3153_v28  ;;  %v3039_v42 = vadd.f32 %v3038_v30, %v2998_v17  ;;  %3200 = vrot.lane.b32.xlu0 %v3184_v11, %s8199_s20  ;;  %v10435_v2 = vsel %vm673_vm4, %v3153_v28, 0.0  ;;  %v7669_v29 = vpack.i.bf16 %v3268_v9, %v3420_v22 }
 0x3fc   :  { %v3227_v24 = vrot.slane %v10411_v25, 2  ;;  %v3379_v1 = vrot.slane %v10411_v25, 6  ;;  %v3337_v23 = vrot.slane %v10411_v25, 5  ;;  %v3269_v40 = vrot.slane %v10411_v25, 3 }
 0x3fd   :  { %v3080_v63 = vadd.f32 %v3079_v37, %v3039_v42  ;;  %v3421_v35 = vrot.slane %v10411_v25, 7  ;;  %v3187_v10 = vrot.slane %v10435_v2, 1  ;;  %v3185_v54 = vrot.slane %v10411_v25, 1  ;;  %v3108_v42 = vld [vmem:[%s10354_s25 + $0x48] sm:$0xff] }
 0x3fe   :  { %v3228_v27 = vsel %vm13316_vm2, %v3225_v47, %v3227_v24  ;;  %v3380_v41 = vsel %vm13412_vm5, %v3377_v26, %v3379_v1  ;;  %v3338_v38 = vsel %vm13314_vm7, %v3335_v49, %v3337_v23  ;;  %v3270_v37 = vsel %vm567_vm3, %v3267_v18, %v3269_v40  ;;  %3549 = vmatpush.msrb.mxu0 %v3108_v42  ;;  %v3106_v42 = vld [vmem:[%s10354_s25 + $0x38] sm:$0xff] }
 0x3ff   :  { %v7679_v61 = vpack.i.bf16 %v3228_v27, %v3380_v41  ;;  %v7674_v52 = vpack.i.bf16 %v3338_v38, %v3336_v36  ;;  %v3095_v44 = vmax.f32 %v3080_v63, 0.0  ;;  %v3422_v48 = vsel %vm2796_vm0, %v3419_v46, %v3421_v35 }
 0x400   :  { %v3000_v55 = vpop.f32.mrf.mxu3  ;;  %v3041_v59 = vpop.f32.mrf.mxu2  ;;  %v3458_v21 = vsel %vm13315_vm1, %v3187_v10, %v10189_v16  ;;  %v3186_v43 = vsel %vm13315_vm1, %v3183_v19, %v3185_v54  ;;  %v7684_v17 = vpack.i.bf16 %v3270_v37, %v3422_v48  ;;  %v3339_v49 = vrot.slane %v10435_v2, 5 }
 0x401   :  { %v3001_v39 = vadd.f32 %v3000_v55, %v2960_v4  ;;  %7680 = vrot.lane.b32.xlu2 %v7679_v61, %s8198_s19  ;;  %7675 = vrot.lane.b32.xlu1 %v7674_v52, %s8199_s20  ;;  %v3155_v47 = vrot.slane %v3095_v44, 4  ;;  %v3229_v18 = vrot.slane %v10435_v2, 2  ;;  %v3381_v11 = vrot.slane %v10435_v2, 6  ;;  %v3088_v6 = vpop.f32.mrf.mxu1 }
 0x402   :  { %v2925_v19 = vadd.f32 %v10343_v62, %v10345_v53  ;;  %v3340_v36 = vsel %vm13314_vm7, %v3337_v23, %v3339_v49  ;;  %v3271_v22 = vrot.slane %v10435_v2, 3  ;;  %v3423_v23 = vrot.slane %v10435_v2, 7 }
 0x403   :  { %v3042_v58 = vadd.f32 %v3041_v59, %v3001_v39  ;;  %7670 = vrot.lane.b32.xlu0 %v7669_v29, %s8197_s18  ;;  %v10458_v3 = vsel %vm673_vm4, 0.0, %v3155_v47  ;;  %v3230_v62 = vsel %vm13316_vm2, %v3227_v24, %v3229_v18  ;;  %v3382_v53 = vsel %vm13418_vm8, %v3379_v1, %v3381_v11  ;;  %vm13419_vm8 = vmmov %vm13412_vm5 }
 0x404   :  { %v3341_v60 = vrot.slane %v10458_v3, 5  ;;  %v2966_v27 = vadd.f32 %v10347_v45, %v2925_v19  ;;  %v7689_v24 = vpack.i.bf16 %v3230_v62, %v3382_v53  ;;  %v3189_v29 = vrot.slane %v10458_v3, 1  ;;  %v3130_v19 = vld [vmem:[%s10354_s25 + $0xf8] sm:$0xff] }
 0x405   :  { %v3083_v26 = vadd.f32 %v3082_v5, %v3042_v58  ;;  %v3188_v5 = vsel %vm13315_vm1, %v3185_v54, %v3187_v10  ;;  %v3272_v50 = vsel %vm567_vm3, %v3269_v40, %v3271_v22  ;;  %v3107_v58 = vld [vmem:[%s10354_s25 + $0x40] sm:$0xff]  ;;  %v3424_v54 = vsel %vm2796_vm0, %v3421_v35, %v3423_v23  ;;  %3584 = vmatpush.msrb.mxu3 %v3130_v19  ;;  %v3137_v23 = vld [vmem:[%s10354_s25 + $0x130] sm:$0xff] }
 0x406   :  { %3550 = vmatpush.msrb.mxu0 %v3107_v58  ;;  %v3273_v49 = vrot.slane %v10458_v3, 3  ;;  %v3425_v18 = vrot.slane %v10458_v3, 7 }
 0x407   :  { %v3096_v34 = vmax.f32 %v3083_v26, 0.0  ;;  %v3383_v26 = vrot.slane %v10458_v3, 6 }
 0x408   :  { %v3003_v20 = vpop.f32.mrf.mxu3  ;;  %v3044_v32 = vpop.f32.mrf.mxu2  ;;  %3551 = vmatpush.msrb.mxu0 %v3106_v42  ;;  %v3135_v42 = vld [vmem:[%s10354_s25 + $0x120] sm:$0xff] }
 0x409   :  { %v3156_v30 = vrot.slane %v3096_v34, 4  ;;  %v3004_v28 = vadd.f32 %v3003_v20, %v2963_v51  ;;  %3460 = vrot.lane.b32.xlu2 %v3458_v21, %s8199_s20  ;;  %3202 = vrot.lane.b32.xlu1 %v3186_v43, %s8199_s20 }
 0x40b   :  { %v10468_v46 = vsel %vm673_vm4, %v3155_v47, %v3156_v30  ;;  %v3045_v7 = vadd.f32 %v3044_v32, %v3004_v28  ;;  %7685 = vrot.lane.b32.xlu0 %v7684_v17, %s8197_s18  ;;  %v3231_v47 = vrot.slane %v10458_v3, 2  ;;  %v7694_v32 = vpack.i.bf16 %v3272_v50, %v3424_v54 }
 0x40c   :  { %v3342_v0 = vrot.slane %v10468_v46, 5  ;;  %v3190_v45 = vrot.slane %v10468_v46, 1  ;;  %v3232_v55 = vrot.slane %v10468_v46, 2  ;;  %v3384_v59 = vrot.slane %v10468_v46, 6 }
 0x40d   :  { %v3086_v63 = vadd.f32 %v3085_v12, %v3045_v7  ;;  %v3274_v21 = vrot.slane %v10468_v46, 3  ;;  %v3138_v7 = vld [vmem:[%s10354_s25 + $0x138] sm:$0xff] }
 0x40e   :  { %v3343_v9 = vsel %vm13314_vm7, %v3341_v60, %v3342_v0  ;;  %v3191_v48 = vsel %vm13315_vm1, %v3189_v29, %v3190_v45  ;;  %v3233_v51 = vsel %vm13316_vm2, %v3231_v47, %v3232_v55  ;;  %v3385_v35 = vsel %vm13412_vm5, %v3383_v26, %v3384_v59  ;;  %3633 = vmatpush.msra.mxu2 %v3138_v7 }
 0x40f   :  { %v3097_v41 = vmax.f32 %v3086_v63, 0.0  ;;  %v7699_v38 = vpack.i.bf16 %v3343_v9, %v3340_v36  ;;  %v7704_v12 = vpack.i.bf16 %v3233_v51, %v3385_v35  ;;  %v3275_v11 = vsel %vm567_vm3, %v3273_v49, %v3274_v21  ;;  %v3129_v36 = vld [vmem:[%s10354_s25 + $0xf0] sm:$0xff] }
 0x410   :  { %v3006_v4 = vpop.f32.mrf.mxu3  ;;  %v3047_v1 = vpop.f32.mrf.mxu2  ;;  %3585 = vmatpush.msrb.mxu3 %v3129_v36  ;;  %3634 = vmatpush.msra.mxu2 %v3137_v23  ;;  %v3118_v23 = vld [vmem:[%s10354_s25 + $0x98] sm:$0xff] }
 0x411   :  { %v3158_v61 = vrot.slane %v3097_v41, 4  ;;  %v3007_v52 = vadd.f32 %v3006_v4, %v2966_v27  ;;  %7700 = vrot.lane.b32.xlu2 %v7699_v38, %s8199_s20  ;;  %3204 = vrot.lane.b32.xlu1 %v3188_v5, %s8199_s20  ;;  %v3128_v5 = vld [vmem:[%s10354_s25 + $0xe8] sm:$0xff] }
 0x412   :  { %3586 = vmatpush.msrb.mxu3 %v3128_v5 }
 0x413   :  { %v10492_v44 = vsel %vm673_vm4, %v3156_v30, %v3158_v61  ;;  %v3048_v39 = vadd.f32 %v3047_v1, %v3007_v52  ;;  %7690 = vrot.lane.b32.xlu0 %v7689_v24, %s8198_s19  ;;  %v3426_v30 = vrot.slane %v10468_v46, 7  ;;  %v3105_v52 = vld [vmem:[%s10354_s25 + $0x30] sm:$0xff]  ;;  %v3127_v24 = vld [vmem:[%s10354_s25 + $0xe0] sm:$0xff] }
 0x414   :  { %v3344_v10 = vrot.slane %v10492_v44, 5  ;;  %v3276_v43 = vrot.slane %v10492_v44, 3  ;;  %v3428_v28 = vrot.slane %v10492_v44, 7  ;;  %v3192_v62 = vrot.slane %v10492_v44, 1  ;;  %3552 = vmatpush.msrb.mxu0 %v3105_v52  ;;  %3587 = vmatpush.msrb.mxu3 %v3127_v24  ;;  %v3117_v52 = vld [vmem:[%s10354_s25 + $0x90] sm:$0xff] }
 0x415   :  { %v3089_v37 = vadd.f32 %v3088_v6, %v3048_v39  ;;  %v3427_v63 = vsel %vm2796_vm0, %v3425_v18, %v3426_v30  ;;  %v3234_v41 = vrot.slane %v10492_v44, 2  ;;  %v3386_v22 = vrot.slane %v10492_v44, 6  ;;  %v3126_v39 = vld [vmem:[%s10354_s25 + $0xd8] sm:$0xff]  ;;  %v3133_v24 = vld [vmem:[%s10354_s25 + $0x110] sm:$0xff] }
 0x416   :  { %v3345_v40 = vsel %vm13314_vm7, %v3342_v0, %v3344_v10  ;;  %v3277_v60 = vsel %vm567_vm3, %v3274_v21, %v3276_v43  ;;  %v3429_v0 = vsel %vm2796_vm0, %v3426_v30, %v3428_v28  ;;  %v7709_v27 = vpack.i.bf16 %v3275_v11, %v3427_v63  ;;  %3588 = vmatpush.msrb.mxu3 %v3126_v39  ;;  %v3136_v21 = vld [vmem:[%s10354_s25 + $0x128] sm:$0xff] }
 0x417   :  { %v3098_v34 = vmax.f32 %v3089_v37, 0.0  ;;  %v7714_v20 = vpack.i.bf16 %v3345_v40, %v3191_v48  ;;  %v7724_v53 = vpack.i.bf16 %v3277_v60, %v3429_v0  ;;  %v3235_v1 = vsel %vm13316_vm2, %v3232_v55, %v3234_v41  ;;  %v3104_v30 = vld [vmem:[%s10354_s25 + $0x28] sm:$0xff]  ;;  %3635 = vmatpush.msra.mxu2 %v3136_v21  ;;  %v3103_v60 = vld [vmem:[%s10354_s25 + $0x20] sm:$0xff]  ;;  %v3122_v0 = vld [vmem:[%s10354_s25 + $0xb8] sm:$0xff] }
 0x418   :  { %v3387_v58 = vsel %vm13412_vm5, %v3384_v59, %v3386_v22  ;;  %3553 = vmatpush.msrb.mxu0 %v3104_v30  ;;  %v3116_v39 = vld [vmem:[%s10354_s25 + $0x88] sm:$0xff] }
 0x419   :  { %v3160_v17 = vrot.slane %v3098_v34, 4  ;;  %7715 = vrot.lane.b32.xlu2 %v7714_v20, %s8199_s20  ;;  %7695 = vrot.lane.b32.xlu1 %v7694_v32, %s8197_s18  ;;  %v7719_v55 = vpack.i.bf16 %v3235_v1, %v3387_v58  ;;  %v3100_v1 = vld [vmem:[%s10354_s25 + $0x8] sm:$0xff] }
 0x41a   :  { %3636 = vmatpush.msra.mxu2 %v3135_v42  ;;  %3554 = vmatpush.msrb.mxu0 %v3103_v60  ;;  %v3132_v58 = vld [vmem:[%s10354_s25 + $0x108] sm:$0xff] }
 0x41b   :  { %7705 = vrot.lane.b32.xlu0 %v7704_v12, %s8198_s19  ;;  %v10538_v9 = vsel %vm673_vm4, %v3158_v61, %v3160_v17  ;;  %v3193_v61 = vsel %vm13315_vm1, %v3190_v45, %v3192_v62  ;;  %v10563_v45 = vsel %vm673_vm4, %v3160_v17, 0.0  ;;  %v3125_v17 = vld [vmem:[%s10354_s25 + $0xd0] sm:$0xff]  ;;  %v3124_v12 = vld [vmem:[%s10354_s25 + $0xc8] sm:$0xff] }
 0x41c   :  { %v3236_v38 = vrot.slane %v10538_v9, 2  ;;  %v3388_v4 = vrot.slane %v10538_v9, 6  ;;  %v3194_v6 = vrot.slane %v10538_v9, 1  ;;  %v3238_v47 = vrot.slane %v10563_v45, 2  ;;  %3589 = vmatpush.msrb.mxu3 %v3125_v17 }
 0x41d   :  { %v3390_v26 = vrot.slane %v10563_v45, 6  ;;  %v3346_v37 = vrot.slane %v10538_v9, 5  ;;  %v3348_v59 = vrot.slane %v10563_v45, 5  ;;  %v3278_v40 = vrot.slane %v10538_v9, 3 }
 0x41e   :  { %v3237_v29 = vsel %vm13316_vm2, %v3234_v41, %v3236_v38  ;;  %v3389_v50 = vsel %vm13419_vm8, %v3386_v22, %v3388_v4  ;;  %v3195_v48 = vsel %vm13315_vm1, %v3192_v62, %v3194_v6  ;;  %v3430_v51 = vrot.slane %v10538_v9, 7  ;;  %vm13420_vm8 = vmmov %vm13412_vm5  ;;  %3590 = vmatpush.msrb.mxu3 %v3124_v12  ;;  %v3134_v41 = vld [vmem:[%s10354_s25 + $0x118] sm:$0xff] }
 0x41f   :  { %v7734_v54 = vpack.i.bf16 %v3237_v29, %v3389_v50  ;;  %v3239_v35 = vsel %vm13316_vm2, %v3236_v38, %v3238_v47  ;;  %v3391_v34 = vsel %vm13420_vm8, %v3388_v4, %v3390_v26  ;;  %v3347_v20 = vsel %vm13314_vm7, %v3344_v10, %v3346_v37  ;;  %v3120_v38 = vld [vmem:[%s10354_s25 + $0xa8] sm:$0xff]  ;;  %3637 = vmatpush.msra.mxu2 %v3134_v41  ;;  %v3102_v22 = vld [vmem:[%s10354_s25 + $0x18] sm:$0xff]  ;;  %v3119_v4 = vld [vmem:[%s10354_s25 + $0xa0] sm:$0xff] }
 0x420   :  { %v3349_v32 = vsel %vm13314_vm7, %v3346_v37, %v3348_v59  ;;  %v3279_v49 = vsel %vm567_vm3, %v3276_v43, %v3278_v40  ;;  %v3431_v18 = vsel %vm2796_vm0, %v3428_v28, %v3430_v51  ;;  %v7744_v10 = vpack.i.bf16 %v3239_v35, %v3391_v34  ;;  %v3123_v28 = vld [vmem:[%s10354_s25 + $0xc0] sm:$0xff]  ;;  %3555 = vmatpush.msrb.mxu0 %v3102_v22 }
 0x421   :  { %7725 = vrot.lane.b32.xlu2 %v7724_v53, %s8197_s18  ;;  %7710 = vrot.lane.b32.xlu1 %v7709_v27, %s8197_s18  ;;  %v7729_v11 = vpack.i.bf16 %v3349_v32, %v3347_v20  ;;  %v7739_v19 = vpack.i.bf16 %v3279_v49, %v3431_v18  ;;  %v3280_v7 = vrot.slane %v10563_v45, 3  ;;  %v3196_v43 = vrot.slane %v10563_v45, 1  ;;  %v3121_v27 = vld [vmem:[%s10354_s25 + $0xb0] sm:$0xff]  ;;  %v3099_v29 = vld [vmem:[%s10354_s25] sm:$0xff] }
 0x422   :  { %v3432_v63 = vrot.slane %v10563_v45, 7  ;;  %3591 = vmatpush.msrb.mxu3 %v3123_v28  ;;  %3638 = vmatpush.msra.mxu2 %v3133_v24  ;;  %v3115_v50 = vld [vmem:[%s10354_s25 + $0x80] sm:$0xff]  ;;  %v3307_v26 = vrot.slane %v10366_v57, 4  ;;  %vm13421_vm5 = vcmask 261120   ;;  %vm13423_vm7 = vcmask 785408  }
 0x423   :  { %3208 = vrot.lane.b32.xlu0 %v3193_v61, %s8199_s20  ;;  %v3281_v36 = vsel %vm567_vm3, %v3278_v40, %v3280_v7  ;;  %v3197_v62 = vsel %vm13315_vm1, %v3194_v6, %v3196_v43  ;;  %v3459_v5 = vsel %vm13315_vm1, %v3196_v43, %v10189_v16  ;;  %v3101_v61 = vld [vmem:[%s10354_s25 + $0x10] sm:$0xff]  ;;  %v3131_v6 = vld [vmem:[%s10354_s25 + $0x100] sm:$0xff]  ;;  %vm13422_vm8 = vmmov %vm13421_vm5  ;;  %v3309_v7 = vrot.slane %v10393_v31, 4 }
 0x424   :  { %3592 = vmatpush.msrb.mxu3 %v3122_v0  ;;  %v3433_v53 = vsel %vm2796_vm0, %v3430_v51, %v3432_v63  ;;  %3556 = vmatpush.msrb.mxu0 %v3101_v61  ;;  %vm13424_vm1 = vmmov %vm13423_vm7  ;;  %v3311_v41 = vrot.slane %v10411_v25, 4 }
 0x425   :  { %3639 = vmatpush.msra.mxu2 %v3132_v58  ;;  %vm13425_vm2 = vmmov %vm13421_vm5  ;;  %v3310_v0 = vsel %vm673_vm4, %v3307_v26, %v3309_v7 }
 0x426   :  { %3593 = vmatpush.msrb.mxu3 %v3121_v27  ;;  %3557 = vmatpush.msrb.mxu0 %v3100_v1 }
 0x427   :  { %3640 = vmatpush.msra.mxu2 %v3131_v6 }
 0x428   :  { %3594 = vmatpush.msrb.mxu3 %v3120_v38  ;;  %3558 = vmatpush.msrb.mxu0 %v3099_v29 }
 0x429   :  { %7735 = vrot.lane.b32.xlu2 %v7734_v54, %s8198_s19  ;;  %7720 = vrot.lane.b32.xlu1 %v7719_v55, %s8198_s19 }
 0x42a   :  { %3595 = vmatpush.msrb.mxu3 %v3119_v4 }
 0x42b   :  { %3210 = vrot.lane.b32.xlu0 %v3195_v48, %s8199_s20  ;;  %v3306_v48 = vrot.slane %v10360_v8, 4 }
 0x42c   :  { %3596 = vmatpush.msrb.mxu3 %v3118_v23 }
 0x42d   :  { %v3308_v20 = vsel %vm673_vm4, %v3306_v48, %v3307_v26  ;;  %v3313_v48 = vrot.slane %v10435_v2, 4 }
 0x42e   :  { %3597 = vmatpush.msrb.mxu3 %v3117_v52  ;;  %v3312_v52 = vsel %vm673_vm4, %v3309_v7, %v3311_v41 }
 0x430   :  { %3598 = vmatpush.msrb.mxu3 %v3116_v39 }
 0x431   :  { %7745 = vrot.lane.b32.xlu2 %v7744_v10, %s8198_s19  ;;  %7730 = vrot.lane.b32.xlu1 %v7729_v11, %s8199_s20 }
 0x432   :  { %3599 = vmatpush.msrb.mxu3 %v3115_v50 }
 0x433   :  { %7740 = vrot.lane.b32.xlu0 %v7739_v19, %s8197_s18 }
 0x439   :  { %3296 = vrot.lane.b32.xlu2 %v3281_v36, %s8197_s18  ;;  %3212 = vrot.lane.b32.xlu1 %v3197_v62, %s8199_s20 }
 0x43b   :  { %3448 = vrot.lane.b32.xlu0 %v3433_v53, %s8197_s18 }
 0x441   :  { %3462 = vrot.lane.b32.xlu1 %v3459_v5, %s8199_s20 }
 0x44b   :  { %v7661_v54 = vpop.permute.xlu2 %7660 }
 0x44c   :  { %v7663_v32 = vunpack.i.h.bf16 %v7661_v54  ;;  %v7662_v21 = vunpack.i.l.bf16 %v7661_v54 }
 0x453   :  { %v7666_v55 = vpop.permute.xlu2 %7665 }
 0x454   :  { %v7667_v60 = vunpack.i.l.bf16 %v7666_v55 }
 0x45b   :  { %v7681_v34 = vpop.permute.xlu2 %7680 }
 0x45c   :  { %v7683_v5 = vunpack.i.h.bf16 %v7681_v34  ;;  %v7682_v39 = vunpack.i.l.bf16 %v7681_v34 }
 0x463   :  { %v7656_v47 = vpop.permute.xlu1 %7655 }
 0x464   :  { %v7658_v37 = vunpack.i.h.bf16 %v7656_v47  ;;  %v7657_v59 = vunpack.i.l.bf16 %v7656_v47 }
 0x465   :  { %v7651_v40 = vpop.permute.xlu0 %7650 }
 0x466   :  { %v7653_v51 = vunpack.i.h.bf16 %v7651_v40  ;;  %v7652_v35 = vunpack.i.l.bf16 %v7651_v40 }
 0x468   :  { %v3490_v30 = vsel %vm13421_vm5, %v3308_v20, %v7652_v35  ;;  %v3466_v17 = vsel %vm13422_vm8, %v10360_v8, %v7653_v51  ;;  %v3461_v8 = vpop.permute.xlu2 %3460  ;;  %v3314_v20 = vsel %vm673_vm4, %v3311_v41, %v3313_v48 }
 0x469   :  { %v3474_v12 = vsel %vm1165_vm6, %v3466_v17, %v7658_v37  ;;  %v3498_v49 = vsel %vm1165_vm6, %v3490_v30, %v7657_v59 }
 0x46a   :  { %v3482_v18 = vsel %vm13423_vm7, %v3474_v12, %v7663_v32  ;;  %v3506_v10 = vsel %vm13424_vm1, %v3498_v49, %v7662_v21  ;;  %vm13426_vm1 = vmmov %vm13425_vm2 }
 0x46b   :  { %3559 = vmatmul.f32.vlgmr.msrb.gmra.mxu0 %v3482_v18  ;;  %3600 = vmatmul.f32.vlgmr.msrb.gmra.mxu3 %v3506_v10  ;;  %vm13429_vm5 = vmmov %vm13426_vm1 }
 0x46c   :  { %vm13430_vm8 = vmmov %vm13426_vm1  ;;  %v3514_v30 = vsel %vm13429_vm5, %v10435_v2, %v3461_v8 }
 0x46d   :  { %v3201_v11 = vpop.permute.xlu0 %3200 }
 0x46e   :  { %v3467_v19 = vsel %vm13425_vm2, %v10366_v57, %v3201_v11  ;;  %v7668_v57 = vunpack.i.h.bf16 %v7666_v55  ;;  %vm13427_vm2 = vmmov %vm13423_vm7 }
 0x46f   :  { %7381 = vmatmul.msk.f32.vlgmr.msra.gmra.mxu2 %vm1165_vm6, %v3467_v19  ;;  %vm13428_vm7 = vmmov %vm13427_vm2 }
 0x470   :  { %v3475_v53 = vsel %vm1165_vm6, %v3467_v19, %v7668_v57  ;;  %v7701_v23 = vpop.permute.xlu2 %7700  ;;  %v3316_v19 = vrot.slane %v10468_v46, 4 }
 0x471   :  { %v7702_v40 = vunpack.i.l.bf16 %v7701_v23  ;;  %v7703_v7 = vunpack.i.h.bf16 %v7701_v23 }
 0x473   :  { %v7676_v43 = vpop.permute.xlu1 %7675 }
 0x474   :  { %v7677_v42 = vunpack.i.l.bf16 %v7676_v43  ;;  %v7678_v38 = vunpack.i.h.bf16 %v7676_v43 }
 0x475   :  { %v7671_v28 = vpop.permute.xlu0 %7670 }
 0x476   :  { %v7673_v63 = vunpack.i.h.bf16 %v7671_v28  ;;  %v7672_v36 = vunpack.i.l.bf16 %v7671_v28  ;;  %v3491_v62 = vsel %vm13426_vm1, %v3310_v0, %v7677_v42  ;;  %v3492_v1 = vsel %vm13430_vm8, %v3312_v52, %v7678_v38  ;;  %vm13431_vm1 = vmmov %vm13427_vm2 }
 0x477   :  { %v3499_v27 = vsel %vm1165_vm6, %v3491_v62, %v7667_v60  ;;  %v3500_v54 = vsel %vm1165_vm6, %v3492_v1, %v7682_v39  ;;  %vm13434_vm8 = vmmov %vm13429_vm5  ;;  %v3315_v42 = vrot.slane %v10458_v3, 4 }
 0x478   :  { %v3483_v22 = vsel %vm13427_vm2, %v3475_v53, %v7673_v63  ;;  %v3507_v4 = vsel %vm13428_vm7, %v3499_v27, %v7672_v36  ;;  %vm13432_vm2 = vmmov %vm13431_vm1  ;;  %v7716_v37 = vpop.permute.xlu2 %7715  ;;  %v3493_v17 = vsel %vm13434_vm8, %v3314_v20, %v7702_v40 }
 0x479   :  { %3562 = vmatmul.f32.gmra.mxu0 %v3483_v22  ;;  %3603 = vmatmul.f32.gmra.mxu3 %v3507_v4  ;;  %vm13433_vm7 = vmmov %vm13429_vm5  ;;  %v7717_v2 = vunpack.i.l.bf16 %v7716_v37  ;;  %v3317_v60 = vsel %vm673_vm4, %v3315_v42, %v3316_v19  ;;  %v7718_v4 = vunpack.i.h.bf16 %v7716_v37 }
 0x47a   :  { %v3494_v36 = vsel %vm13429_vm5, %v3317_v60, %v7703_v7  ;;  %vm13437_vm8 = vmmov %vm13429_vm5 }
 0x47b   :  { %v3203_v61 = vpop.permute.xlu1 %3202 }
 0x47c   :  { %v3468_v24 = vsel %vm13429_vm5, %v10393_v31, %v3203_v61 }
 0x47d   :  { %v7686_v29 = vpop.permute.xlu0 %7685  ;;  %7382 = vmatmul.msk.f32.gmra.mxu2 %vm1165_vm6, %v3468_v24  ;;  %v3476_v50 = vsel %vm1165_vm6, %v3468_v24, %v7683_v5 }
 0x47e   :  { %v7688_v58 = vunpack.i.h.bf16 %v7686_v29  ;;  %v7687_v6 = vunpack.i.l.bf16 %v7686_v29 }
 0x480   :  { %v3484_v55 = vsel %vm13431_vm1, %v3476_v50, %v7688_v58  ;;  %v3508_v47 = vsel %vm13432_vm2, %v3500_v54, %v7687_v6  ;;  %vm13435_vm2 = vmmov %vm13431_vm1  ;;  %v7726_v11 = vpop.permute.xlu2 %7725 }
 0x481   :  { %3565 = vmatmul.f32.gmra.mxu0 %v3484_v55  ;;  %3606 = vmatmul.f32.gmra.mxu3 %v3508_v47  ;;  %v7728_v1 = vunpack.i.h.bf16 %v7726_v11  ;;  %v7727_v39 = vunpack.i.l.bf16 %v7726_v11  ;;  %v3320_v47 = vrot.slane %v10538_v9, 4 }
 0x483   :  { %v3205_v26 = vpop.permute.xlu1 %3204 }
 0x484   :  { %v3469_v31 = vsel %vm13433_vm7, %v10411_v25, %v3205_v26  ;;  %vm13436_vm7 = vmmov %vm13429_vm5 }
 0x485   :  { %v7691_v59 = vpop.permute.xlu0 %7690  ;;  %7383 = vmatmul.msk.f32.gmra.mxu2 %vm1165_vm6, %v3469_v31  ;;  %v3470_v63 = vsel %vm13436_vm7, %v10458_v3, %v7717_v2  ;;  %v3318_v3 = vrot.slane %v10492_v44, 4  ;;  %vm13439_vm7 = vmmov %vm13429_vm5 }
 0x486   :  { %v7693_v51 = vunpack.i.h.bf16 %v7691_v59  ;;  %v7692_v35 = vunpack.i.l.bf16 %v7691_v59 }
 0x487   :  { %v3319_v24 = vsel %vm673_vm4, %v3316_v19, %v3318_v3  ;;  %v3321_v40 = vsel %vm673_vm4, %v3318_v3, %v3320_v47 }
 0x488   :  { %v3477_v12 = vsel %vm1165_vm6, %v3469_v31, %v7693_v51  ;;  %v3501_v49 = vsel %vm1165_vm6, %v3493_v17, %v7692_v35  ;;  %v7736_v5 = vpop.permute.xlu2 %7735  ;;  %v3495_v29 = vsel %vm13439_vm7, %v3319_v24, %v7718_v4  ;;  %vm13442_vm7 = vmmov %vm13431_vm1 }
 0x489   :  { %v7738_v59 = vunpack.i.h.bf16 %v7736_v5  ;;  %v7737_v48 = vunpack.i.l.bf16 %v7736_v5 }
 0x48b   :  { %v7696_v34 = vpop.permute.xlu1 %7695 }
 0x48c   :  { %v7698_v32 = vunpack.i.h.bf16 %v7696_v34  ;;  %v7697_v21 = vunpack.i.l.bf16 %v7696_v34 }
 0x48d   :  { %v7706_v25 = vpop.permute.xlu0 %7705  ;;  %7384 = vmatmul.msk.f32.gmra.mxu2 %vm1165_vm6, %v3514_v30 }
 0x48e   :  { %v3485_v18 = vsel %vm13431_vm1, %v3477_v12, %v7698_v32  ;;  %v3509_v10 = vsel %vm13435_vm2, %v3501_v49, %v7697_v21  ;;  %v7708_v8 = vunpack.i.h.bf16 %v7706_v25  ;;  %v7707_v43 = vunpack.i.l.bf16 %v7706_v25  ;;  %vm13438_vm2 = vmmov %vm13431_vm1 }
 0x48f   :  { %3568 = vmatmul.f32.gmra.mxu0 %v3485_v18  ;;  %3609 = vmatmul.f32.gmra.mxu3 %v3509_v10  ;;  %v3322_v21 = vrot.slane %v10563_v45, 4 }
 0x490   :  { %v3478_v53 = vsel %vm1165_vm6, %v3470_v63, %v7708_v8  ;;  %v3502_v27 = vsel %vm1165_vm6, %v3494_v36, %v7707_v43  ;;  %v7746_v26 = vpop.permute.xlu2 %7745  ;;  %v7848_v63 = vld [vmem:[%s9467_s14] ss:$0 sm:$0xff] }
 0x491   :  { %v7748_v12 = vunpack.i.h.bf16 %v7746_v26  ;;  %v3323_v18 = vsel %vm673_vm4, %v3320_v47, %v3322_v21  ;;  %v7747_v19 = vunpack.i.l.bf16 %v7746_v26  ;;  %v10759_v21 = vadd.f32 %v7848_v63, %v10320_v33 }
 0x493   :  { %v7711_v57 = vpop.permute.xlu1 %7710 }
 0x494   :  { %v7713_v28 = vunpack.i.h.bf16 %v7711_v57  ;;  %v7712_v0 = vunpack.i.l.bf16 %v7711_v57 }
 0x495   :  { %v3209_v62 = vpop.permute.xlu0 %3208 }
 0x496   :  { %v3471_v41 = vsel %vm13437_vm8, %v10468_v46, %v3209_v62  ;;  %v3486_v38 = vsel %vm13431_vm1, %v3478_v53, %v7713_v28  ;;  %v3510_v22 = vsel %vm13438_vm2, %v3502_v27, %v7712_v0  ;;  %vm13440_vm8 = vmmov %vm13431_vm1  ;;  %v10728_v28 = vld [vmem:[%s10607_s29] ss:$0 sm:$0xff]  ;;  %v10733_v53 = vadd.f32 %v7848_v63, %v10291_v15 }
 0x497   :  { %7385 = vmatmul.msk.f32.gmra.mxu2 %vm1165_vm6, %v3471_v41  ;;  %3571 = vmatmul.f32.gmra.mxu0 %v3486_v38  ;;  %vm13441_vm2 = vmmov %vm13429_vm5 }
 0x498   :  { %3612 = vmatmul.f32.gmra.mxu3 %v3510_v22  ;;  %v3297_v7 = vpop.permute.xlu2 %3296  ;;  %v10736_v22 = vadd.f32 %v7848_v63, %v10302_v56  ;;  %v4031_v3 = vrot.slane %v10733_v53, 1  ;;  %v4032_v4 = vrot.slane %v10733_v53, 2  ;;  %v4033_v5 = vrot.slane %v10733_v53, 3 }
 0x499   :  { %v4036_v15 = vrot.slane %v10733_v53, 6 }
 0x49b   :  { %v7721_v23 = vpop.permute.xlu1 %7720 }
 0x49c   :  { %v7723_v61 = vunpack.i.h.bf16 %v7721_v23  ;;  %v7722_v52 = vunpack.i.l.bf16 %v7721_v23  ;;  %v4034_v23 = vrot.slane %v10733_v53, 4 }
 0x49d   :  { %v3211_v46 = vpop.permute.xlu0 %3210 }
 0x49e   :  { %v3472_v50 = vsel %vm13429_vm5, %v10492_v44, %v3211_v46  ;;  %v3479_v58 = vsel %vm1165_vm6, %v3471_v41, %v7723_v61  ;;  %v3503_v6 = vsel %vm1165_vm6, %v3495_v29, %v7722_v52  ;;  %vm13443_vm5 = vmmov %vm13431_vm1  ;;  %v4035_v61 = vrot.slane %v10733_v53, 5 }
 0x49f   :  { %7386 = vmatmul.msk.f32.gmra.mxu2 %vm1165_vm6, %v3472_v50  ;;  %v3487_v54 = vsel %vm13440_vm8, %v3479_v58, %v7728_v1  ;;  %v3511_v55 = vsel %vm13431_vm1, %v3503_v6, %v7727_v39  ;;  %v3480_v20 = vsel %vm1165_vm6, %v3472_v50, %v7738_v59  ;;  %vm13444_vm8 = vmmov %vm13441_vm2  ;;  %v4037_v46 = vrot.slane %v10733_v53, 7 }
 0x4a0   :  { %3574 = vmatmul.f32.gmra.mxu0 %v3487_v54  ;;  %3615 = vmatmul.f32.gmra.mxu3 %v3511_v55  ;;  %vm13445_vm1 = vmmov %vm13441_vm2  ;;  %v4038_v29 = vrot.slane %v10736_v22, 1  ;;  %v4039_v50 = vrot.slane %v10736_v22, 2  ;;  %v10749_v58 = vadd.f32 %v7848_v63, %v10312_v14 }
 0x4a2   :  { %v4048_v33 = vrot.slane %v10749_v58, 4 }
 0x4a3   :  { %v7731_v31 = vpop.permute.xlu1 %7730 }
 0x4a4   :  { %v7732_v37 = vunpack.i.l.bf16 %v7731_v31  ;;  %v7733_v30 = vunpack.i.h.bf16 %v7731_v31 }
 0x4a5   :  { %v7741_v44 = vpop.permute.xlu0 %7740 }
 0x4a6   :  { %v7743_v51 = vunpack.i.h.bf16 %v7741_v44  ;;  %v7742_v35 = vunpack.i.l.bf16 %v7741_v44  ;;  %v3496_v34 = vsel %vm13441_vm2, %v3321_v40, %v7732_v37  ;;  %v3497_v11 = vsel %vm13445_vm1, %v3323_v18, %v7733_v30  ;;  %vm13446_vm2 = vmmov %vm13443_vm5 }
 0x4a7   :  { %v3504_v32 = vsel %vm1165_vm6, %v3496_v34, %v7737_v48  ;;  %v3505_v42 = vsel %vm1165_vm6, %v3497_v11, %v7747_v19  ;;  %v4040_v48 = vrot.slane %v10736_v22, 3  ;;  %v4046_v19 = vrot.slane %v10749_v58, 2 }
 0x4a8   :  { %v3488_v17 = vsel %vm13442_vm7, %v3480_v20, %v7743_v51  ;;  %v3512_v25 = vsel %vm13443_vm5, %v3504_v32, %v7742_v35  ;;  %vm13447_vm7 = vmmov %vm13446_vm2 }
 0x4a9   :  { %3577 = vmatmul.f32.gmra.mxu0 %v3488_v17  ;;  %3618 = vmatmul.f32.gmra.mxu3 %v3512_v25  ;;  %vm13448_vm5 = vmmov %vm13445_vm1  ;;  %v4045_v17 = vrot.slane %v10749_v58, 1  ;;  %vm4123_vm1 = vcmask 253952  }
 0x4ab   :  { %v3213_v49 = vpop.permute.xlu1 %3212 }
 0x4ac   :  { %v3473_v10 = vsel %vm13444_vm8, %v10538_v9, %v3213_v49  ;;  %vm3730_vm8 = vcmask 254976  }
 0x4ad   :  { %v3449_v2 = vpop.permute.xlu0 %3448  ;;  %7387 = vmatmul.msk.f32.gmra.mxu2 %vm1165_vm6, %v3473_v10  ;;  %v3481_v8 = vsel %vm1165_vm6, %v3473_v10, %v7748_v12 }
 0x4ae   :  { %v3489_v43 = vsel %vm13446_vm2, %v3481_v8, %v3297_v7  ;;  %v3513_v57 = vsel %vm13447_vm7, %v3505_v42, %v3449_v2  ;;  %v4047_v7 = vrot.slane %v10749_v58, 3  ;;  %vm13451_vm2 = vcmask 1045504  }
 0x4af   :  { %vm13452_vm7 = vcmask 1041408  }
 0x4b1   :  { %3580 = vmatmul.f32.gmra.mxu0 %v3489_v43  ;;  %3621 = vmatmul.f32.gmra.mxu3 %v3513_v57  ;;  %v10768_v57 = vld [vmem:[%s10647_s3] ss:$0 sm:$0xff] }
 0x4b3   :  { %v3463_v60 = vpop.permute.xlu1 %3462 }
 0x4b4   :  { %v3515_v9 = vsel %vm13448_vm5, %v10563_v45, %v3463_v60  ;;  %vm13453_vm5 = vcmask 1046528  }
 0x4b5   :  { %7388 = vmatmul.msk.f32.gmra.mxu2 %vm1165_vm6, %v3515_v9 }
 0x4e8   :  { %v3560_v0 = vpop.f32.mrf.mxu0 }
 0x4e9   :  { %v3561_v62 = vadd.f32 %v10728_v28, %v3560_v0  ;;  %v4049_v0 = vrot.slane %v10749_v58, 5 }
 0x4ee   :  { %v3601_v36 = vpop.f32.mrf.mxu3 }
 0x4ef   :  { %v3602_v27 = vadd.f32 %v3601_v36, %v3561_v62 }
 0x4f2   :  { %v3642_v41 = vpop.f32.mrf.mxu2 }
 0x4f3   :  { %v3643_v38 = vadd.f32 %v3642_v41, %v3602_v27 }
 0x4f5   :  { %v3666_v45 = vmax.f32 %v3643_v38, 0.0 }
 0x4f6   :  { %v3563_v59 = vpop.f32.mrf.mxu0 }
 0x4f7   :  { %v3682_v52 = vrot.slane %v3666_v45, 2  ;;  %v3683_v24 = vrot.slane %v3666_v45, 4  ;;  %v3684_v1 = vrot.slane %v3666_v45, 6  ;;  %v3731_v56 = vsel %vm3730_vm8, %v3666_v45, -inf  ;;  %v10774_v45 = vld [vmem:[%s10653_s7] ss:$0 sm:$0xff] }
 0x4f8   :  { %v3732_v39 = vrot.slane %v3731_v56, 4  ;;  %v3564_v30 = vadd.f32 %v10728_v28, %v3563_v59 }
 0x4f9   :  { %v3738_v6 = vsel %vm3730_vm8, %v3682_v52, -inf  ;;  %v3745_v54 = vsel %vm3730_vm8, %v3683_v24, -inf  ;;  %v3752_v55 = vsel %vm3730_vm8, %v3684_v1, -inf }
 0x4fa   :  { %v3733_v47 = vmax.f32 %v3731_v56, %v3732_v39  ;;  %v3739_v26 = vrot.slane %v3738_v6, 4  ;;  %v3746_v31 = vrot.slane %v3745_v54, 4  ;;  %v3753_v37 = vrot.slane %v3752_v55, 4 }
 0x4fc   :  { %v3734_v51 = vrot.slane %v3733_v47, 2  ;;  %v3740_v35 = vmax.f32 %v3738_v6, %v3739_v26  ;;  %v3747_v34 = vmax.f32 %v3745_v54, %v3746_v31  ;;  %v3754_v20 = vmax.f32 %v3752_v55, %v3753_v37  ;;  %v3604_v32 = vpop.f32.mrf.mxu3 }
 0x4fd   :  { %v3605_v11 = vadd.f32 %v3604_v32, %v3564_v30 }
 0x4fe   :  { %v3735_v12 = vmax.f32 %v3733_v47, %v3734_v51  ;;  %v3741_v49 = vrot.slane %v3740_v35, 2  ;;  %v3748_v18 = vrot.slane %v3747_v34, 2  ;;  %v3755_v10 = vrot.slane %v3754_v20, 2 }
 0x500   :  { %v3736_v2 = vrot.slane %v3735_v12, 1  ;;  %v3742_v8 = vmax.f32 %v3740_v35, %v3741_v49  ;;  %v3749_v43 = vmax.f32 %v3747_v34, %v3748_v18  ;;  %v3756_v42 = vmax.f32 %v3754_v20, %v3755_v10  ;;  %v3645_v60 = vpop.f32.mrf.mxu2  ;;  %v3566_v20 = vpop.f32.mrf.mxu0 }
 0x501   :  { %v3646_v9 = vadd.f32 %v3645_v60, %v3605_v11 }
 0x502   :  { %v3737_v62 = vmax.f32 %v3735_v12, %v3736_v2  ;;  %v3743_v27 = vrot.slane %v3742_v8, 1  ;;  %v3750_v41 = vrot.slane %v3749_v43, 1  ;;  %v3757_v38 = vrot.slane %v3756_v42, 1 }
 0x503   :  { %v3667_v52 = vmax.f32 %v3646_v9, 0.0 }
 0x504   :  { %v3744_v39 = vmax.f32 %v3742_v8, %v3743_v27  ;;  %v3751_v6 = vmax.f32 %v3749_v43, %v3750_v41  ;;  %v3758_v54 = vmax.f32 %v3756_v42, %v3757_v38  ;;  %v3959_v55 = vmul.f32 %v10768_v57, %v3737_v62  ;;  %v3607_v41 = vpop.f32.mrf.mxu3 }
 0x505   :  { %v3685_v47 = vrot.slane %v3667_v52, 2  ;;  %v3686_v26 = vrot.slane %v3667_v52, 4  ;;  %v3687_v31 = vrot.slane %v3667_v52, 6  ;;  %v3759_v37 = vsel %vm3730_vm8, %v3667_v52, -inf }
 0x506   :  { %v3960_v59 = vmul.f32 %v10768_v57, %v3744_v39  ;;  %v3961_v51 = vmul.f32 %v10768_v57, %v3751_v6  ;;  %v3962_v35 = vmul.f32 %v10768_v57, %v3758_v54  ;;  %v3995_v34 = vadd.f32 %v10774_v45, %v3959_v55 }
 0x507   :  { %v3760_v32 = vrot.slane %v3759_v37, 4  ;;  %v3766_v30 = vsel %vm3730_vm8, %v3685_v47, -inf  ;;  %v3773_v12 = vsel %vm3730_vm8, %v3686_v26, -inf  ;;  %v3780_v2 = vsel %vm3730_vm8, %v3687_v31, -inf }
 0x508   :  { %v3996_v18 = vadd.f32 %v10774_v45, %v3960_v59  ;;  %v3997_v10 = vadd.f32 %v10774_v45, %v3961_v51  ;;  %v3998_v11 = vadd.f32 %v10774_v45, %v3962_v35  ;;  %v4091_v8 = vadd.f32 %v3995_v34, %v10733_v53  ;;  %v3648_v34 = vpop.f32.mrf.mxu2 }
 0x509   :  { %v3761_v43 = vmax.f32 %v3759_v37, %v3760_v32  ;;  %v3767_v42 = vrot.slane %v3766_v30, 4  ;;  %v3774_v60 = vrot.slane %v3773_v12, 4  ;;  %v3781_v6 = vrot.slane %v3780_v2, 4 }
 0x50a   :  { %v4092_v9 = vadd.f32 %v4031_v3, %v3996_v18  ;;  %v10797_v62 = vadd.f32 %v4032_v4, %v3997_v10  ;;  %v10801_v27 = vadd.f32 %v4033_v5, %v3998_v11  ;;  %v10810_v47 = vsel %vm4123_vm1, %v4091_v8, -inf }
 0x50b   :  { %v3762_v38 = vrot.slane %v3761_v43, 2  ;;  %v3768_v52 = vmax.f32 %v3766_v30, %v3767_v42  ;;  %v3775_v39 = vmax.f32 %v3773_v12, %v3774_v60  ;;  %v3567_v26 = vadd.f32 %v10728_v28, %v3566_v20 }
 0x50c   :  { %v4127_v54 = vsel %vm4123_vm1, %v10797_v62, -inf  ;;  %v4128_v3 = vsel %vm4123_vm1, %v10801_v27, -inf  ;;  %v10813_v5 = vsel %vm4123_vm1, %v4092_v9, -inf  ;;  %v4324_v37 = vrot.slane %v4091_v8, 4  ;;  %v3569_v10 = vpop.f32.mrf.mxu0 }
 0x50d   :  { %v3763_v59 = vmax.f32 %v3761_v43, %v3762_v38  ;;  %v3769_v51 = vrot.slane %v3768_v52, 2  ;;  %v3776_v35 = vrot.slane %v3775_v39, 2  ;;  %v4129_v32 = vmax.f32 %v4127_v54, %v4128_v3 }
 0x50e   :  { %v4325_v30 = vrot.slane %v4092_v9, 3  ;;  %v3782_v12 = vmax.f32 %v3780_v2, %v3781_v6  ;;  %v3608_v18 = vadd.f32 %v3607_v41, %v3567_v26  ;;  %v4327_v20 = vrot.slane %v10797_v62, 2 }
 0x50f   :  { %v3764_v42 = vrot.slane %v3763_v59, 1  ;;  %v3770_v60 = vmax.f32 %v3768_v52, %v3769_v51  ;;  %v3777_v13 = vmax.f32 %v3775_v39, %v3776_v35  ;;  %v4329_v31 = vrot.slane %v10801_v27, 1 }
 0x510   :  { %v3783_v8 = vrot.slane %v3782_v12, 2  ;;  %v3649_v43 = vadd.f32 %v3648_v34, %v3608_v18  ;;  %v3570_v9 = vadd.f32 %v10728_v28, %v3569_v10  ;;  %v10822_v41 = vrot.slane %v4129_v32, 7 }
 0x511   :  { %v3765_v38 = vmax.f32 %v3763_v59, %v3764_v42  ;;  %v3771_v4 = vrot.slane %v3770_v60, 1  ;;  %v3778_v55 = vrot.slane %v3777_v13, 1  ;;  %v4326_v6 = vsel %vm2231_vm9, %v4325_v30, %v4324_v37 }
 0x512   :  { %v3610_v2 = vpop.f32.mrf.mxu3  ;;  %v3784_v54 = vmax.f32 %v3782_v12, %v3783_v8  ;;  %v3668_v3 = vmax.f32 %v3649_v43, 0.0 }
 0x513   :  { %v3772_v52 = vmax.f32 %v3770_v60, %v3771_v4  ;;  %v3779_v39 = vmax.f32 %v3777_v13, %v3778_v55  ;;  %v3963_v62 = vmul.f32 %v10768_v57, %v3765_v38  ;;  %v3611_v26 = vadd.f32 %v3610_v2, %v3570_v9 }
 0x514   :  { %v3785_v51 = vrot.slane %v3784_v54, 1  ;;  %v3688_v35 = vrot.slane %v3668_v3, 2  ;;  %v3689_v34 = vrot.slane %v3668_v3, 4  ;;  %v3690_v59 = vrot.slane %v3668_v3, 6 }
 0x515   :  { %v3964_v18 = vmul.f32 %v10768_v57, %v3772_v52  ;;  %v3965_v10 = vmul.f32 %v10768_v57, %v3779_v39  ;;  %v3999_v32 = vadd.f32 %v10774_v45, %v3963_v62  ;;  %v3787_v42 = vsel %vm3730_vm8, %v3668_v3, -inf }
 0x516   :  { %v3786_v37 = vmax.f32 %v3784_v54, %v3785_v51  ;;  %v3788_v30 = vrot.slane %v3787_v42, 4  ;;  %v3794_v4 = vsel %vm3730_vm8, %v3688_v35, -inf  ;;  %v3801_v13 = vsel %vm3730_vm8, %v3689_v34, -inf }
 0x517   :  { %v4000_v55 = vadd.f32 %v10774_v45, %v3964_v18  ;;  %v4001_v12 = vadd.f32 %v10774_v45, %v3965_v10  ;;  %v4095_v60 = vadd.f32 %v4034_v23, %v3999_v32  ;;  %v3795_v8 = vrot.slane %v3794_v4, 4 }
 0x518   :  { %v3966_v43 = vmul.f32 %v10768_v57, %v3786_v37  ;;  %v3789_v38 = vmax.f32 %v3787_v42, %v3788_v30  ;;  %v3802_v9 = vrot.slane %v3801_v13, 4  ;;  %v3808_v2 = vsel %vm3730_vm8, %v3690_v59, -inf  ;;  %v3651_v37 = vpop.f32.mrf.mxu2 }
 0x519   :  { %v4096_v54 = vadd.f32 %v4035_v61, %v4000_v55  ;;  %v10842_v3 = vadd.f32 %v4036_v15, %v4001_v12  ;;  %v4130_v52 = vsel %vm4123_vm1, %v4095_v60, -inf  ;;  %v3796_v39 = vmax.f32 %v3794_v4, %v3795_v8  ;;  %v3572_v12 = vpop.f32.mrf.mxu0 }
 0x51a   :  { %v4002_v62 = vadd.f32 %v10774_v45, %v3966_v43  ;;  %v3790_v23 = vrot.slane %v3789_v38, 2  ;;  %v3803_v51 = vmax.f32 %v3801_v13, %v3802_v9  ;;  %v3809_v35 = vrot.slane %v3808_v2, 4 }
 0x51b   :  { %v4131_v34 = vsel %vm4123_vm1, %v4096_v54, -inf  ;;  %v4331_v18 = vrot.slane %v4096_v54, 7  ;;  %v4333_v59 = vrot.slane %v10842_v3, 6  ;;  %v3797_v10 = vrot.slane %v3796_v39, 2 }
 0x51c   :  { %v10850_v61 = vadd.f32 %v4037_v46, %v4002_v62  ;;  %v4132_v15 = vmax.f32 %v4130_v52, %v4131_v34  ;;  %v3791_v32 = vmax.f32 %v3789_v38, %v3790_v23  ;;  %v3804_v42 = vrot.slane %v3803_v51, 2 }
 0x51d   :  { %v4332_v30 = vsel %vm2219_vm11, %v4331_v18, %v4095_v60  ;;  %v3798_v4 = vmax.f32 %v3796_v39, %v3797_v10  ;;  %v3810_v55 = vmax.f32 %v3808_v2, %v3809_v35  ;;  %v3652_v13 = vadd.f32 %v3651_v37, %v3611_v26 }
 0x51e   :  { %v10854_v8 = vsel %vm2234_vm14, %v4327_v20, %v4326_v6  ;;  %v4334_v43 = vsel %vm2222_vm10, %v4333_v59, %v4332_v30  ;;  %v4335_v9 = vrot.slane %v10850_v61, 5  ;;  %v3792_v53 = vrot.slane %v3791_v32, 1 }
 0x51f   :  { %v3799_v46 = vrot.slane %v3798_v4, 1  ;;  %v3805_v54 = vmax.f32 %v3803_v51, %v3804_v42  ;;  %v3811_v52 = vrot.slane %v3810_v55, 2  ;;  %v3669_v38 = vmax.f32 %v3652_v13, 0.0  ;;  %v3613_v51 = vpop.f32.mrf.mxu3 }
 0x520   :  { %v10858_v62 = vrot.slane %v4132_v15, 6  ;;  %v4336_v60 = vsel %vm2225_vm12, %v4335_v9, %v4334_v43  ;;  %v3793_v39 = vmax.f32 %v3791_v32, %v3792_v53  ;;  %v3573_v26 = vadd.f32 %v10728_v28, %v3572_v12 }
 0x521   :  { %v3800_v2 = vmax.f32 %v3798_v4, %v3799_v46  ;;  %v3806_v23 = vrot.slane %v3805_v54, 1  ;;  %v3812_v20 = vmax.f32 %v3810_v55, %v3811_v52  ;;  %v3691_v6 = vrot.slane %v3669_v38, 2 }
 0x522   :  { %v3967_v35 = vmul.f32 %v10768_v57, %v3793_v39  ;;  %v3692_v34 = vrot.slane %v3669_v38, 4  ;;  %v3693_v18 = vrot.slane %v3669_v38, 6  ;;  %v3815_v59 = vsel %vm3730_vm8, %v3669_v38, -inf  ;;  %v3654_v38 = vpop.f32.mrf.mxu2 }
 0x523   :  { %v3807_v10 = vmax.f32 %v3805_v54, %v3806_v23  ;;  %v3813_v42 = vrot.slane %v3812_v20, 1  ;;  %v3968_v15 = vmul.f32 %v10768_v57, %v3800_v2  ;;  %v3816_v37 = vrot.slane %v3815_v59, 4 }
 0x524   :  { %v4003_v32 = vadd.f32 %v10774_v45, %v3967_v35  ;;  %v3822_v30 = vsel %vm3730_vm8, %v3691_v6, -inf  ;;  %v3829_v4 = vsel %vm3730_vm8, %v3692_v34, -inf  ;;  %v3836_v55 = vsel %vm3730_vm8, %v3693_v18, -inf }
 0x525   :  { %v3814_v13 = vmax.f32 %v3812_v20, %v3813_v42  ;;  %v3969_v12 = vmul.f32 %v10768_v57, %v3807_v10  ;;  %v4004_v43 = vadd.f32 %v10774_v45, %v3968_v15  ;;  %v3817_v9 = vmax.f32 %v3815_v59, %v3816_v37  ;;  %v3575_v37 = vpop.f32.mrf.mxu0 }
 0x526   :  { %v10872_v53 = vadd.f32 %v4003_v32, %v10736_v22  ;;  %v3823_v46 = vrot.slane %v3822_v30, 4  ;;  %v3830_v54 = vrot.slane %v3829_v4, 4  ;;  %v3837_v52 = vrot.slane %v3836_v55, 4 }
 0x527   :  { %v3970_v39 = vmul.f32 %v10768_v57, %v3814_v13  ;;  %v4005_v2 = vadd.f32 %v10774_v45, %v3969_v12  ;;  %v10878_v23 = vadd.f32 %v4038_v29, %v4004_v43  ;;  %v3818_v20 = vrot.slane %v3817_v9, 2 }
 0x528   :  { %v4337_v6 = vrot.slane %v10872_v53, 4  ;;  %v3824_v35 = vmax.f32 %v3822_v30, %v3823_v46  ;;  %v3831_v34 = vmax.f32 %v3829_v4, %v3830_v54  ;;  %v3838_v18 = vmax.f32 %v3836_v55, %v3837_v52 }
 0x529   :  { %v4006_v59 = vadd.f32 %v10774_v45, %v3970_v39  ;;  %v10884_v10 = vadd.f32 %v4039_v50, %v4005_v2  ;;  %v4339_v42 = vrot.slane %v10878_v23, 3  ;;  %v3819_v15 = vmax.f32 %v3817_v9, %v3818_v20  ;;  %v3616_v9 = vpop.f32.mrf.mxu3 }
 0x52a   :  { %v4338_v32 = vsel %vm2228_vm13, %v4337_v6, %v4336_v60  ;;  %v3825_v29 = vrot.slane %v3824_v35, 2  ;;  %v3832_v13 = vrot.slane %v3831_v34, 2  ;;  %v3839_v12 = vrot.slane %v3838_v18, 2 }
 0x52b   :  { %v10890_v30 = vadd.f32 %v4040_v48, %v4006_v59  ;;  %v4340_v4 = vsel %vm2231_vm9, %v4339_v42, %v4338_v32  ;;  %v4341_v55 = vrot.slane %v10884_v10, 2  ;;  %v3820_v43 = vrot.slane %v3819_v15, 1 }
 0x52c   :  { %v3826_v50 = vmax.f32 %v3824_v35, %v3825_v29  ;;  %v3833_v46 = vmax.f32 %v3831_v34, %v3832_v13  ;;  %v3840_v54 = vmax.f32 %v3838_v18, %v3839_v12  ;;  %v3614_v52 = vadd.f32 %v3613_v51, %v3573_v26  ;;  %v3657_v29 = vpop.f32.mrf.mxu2 }
 0x52d   :  { %v4343_v60 = vrot.slane %v10890_v30, 1  ;;  %v3821_v48 = vmax.f32 %v3819_v15, %v3820_v43  ;;  %v3576_v39 = vadd.f32 %v10728_v28, %v3575_v37  ;;  %v4330_v2 = vsel %vm13319_vm15, %v4329_v31, %v10854_v8  ;;  %v3578_v8 = vpop.f32.mrf.mxu0 }
 0x52e   :  { %v3827_v20 = vrot.slane %v3826_v50, 1  ;;  %v3834_v6 = vrot.slane %v3833_v46, 1  ;;  %v3841_v26 = vrot.slane %v3840_v54, 1  ;;  %v3655_v51 = vadd.f32 %v3654_v38, %v3614_v52 }
 0x52f   :  { %v3971_v35 = vmul.f32 %v10768_v57, %v3821_v48  ;;  %v3617_v34 = vadd.f32 %v3616_v9, %v3576_v39  ;;  %v4342_v18 = vsel %vm2234_vm14, %v4341_v55, %v4340_v4  ;;  %v10908_v59 = vsel %vm673_vm4, 0.0, %v4330_v2  ;;  %v4175_v2 = vld [vmem:[%s10897_s11 + $0x18] sm:$0xff] }
 0x530   :  { %v3828_v42 = vmax.f32 %v3826_v50, %v3827_v20  ;;  %v3835_v15 = vmax.f32 %v3833_v46, %v3834_v6  ;;  %v3842_v37 = vmax.f32 %v3840_v54, %v3841_v26  ;;  %v3670_v32 = vmax.f32 %v3655_v51, 0.0  ;;  %4240 = vmatpush.msra.mxu1 %v4175_v2 }
 0x531   :  { %v10911_v27 = vadd.f32 %v10774_v45, %v3971_v35  ;;  %v3658_v31 = vadd.f32 %v3657_v29, %v3617_v34  ;;  %v10914_v38 = vsel %vm13319_vm15, %v4343_v60, %v4342_v18  ;;  %v4436_v13 = vrot.slane %v10908_v59, 3 }
 0x532   :  { %v10918_v12 = vmul.f32 %v10768_v57, %v3828_v42  ;;  %v10921_v4 = vmul.f32 %v10768_v57, %v3835_v15  ;;  %v10924_v55 = vmul.f32 %v10768_v57, %v3842_v37  ;;  %v3694_v43 = vrot.slane %v3670_v32, 2 }
 0x533   :  { %v3695_v50 = vrot.slane %v3670_v32, 4  ;;  %v3696_v46 = vrot.slane %v3670_v32, 6  ;;  %v3843_v54 = vsel %vm3730_vm8, %v3670_v32, -inf  ;;  %v3671_v52 = vmax.f32 %v3658_v31, 0.0 }
 0x534   :  { %v3844_v9 = vrot.slane %v3843_v54, 4  ;;  %v3850_v60 = vsel %vm3730_vm8, %v3694_v43, -inf  ;;  %v10929_v48 = vadd.f32 %v10728_v28, %v3578_v8  ;;  %v4437_v39 = vrot.slane %v10914_v38, 3 }
 0x535   :  { %v3851_v20 = vrot.slane %v3850_v60, 4  ;;  %v3857_v6 = vsel %vm3730_vm8, %v3695_v50, -inf  ;;  %v3864_v26 = vsel %vm3730_vm8, %v3696_v46, -inf  ;;  %v3697_v51 = vrot.slane %v3671_v52, 2 }
 0x536   :  { %v3845_v35 = vmax.f32 %v3843_v54, %v3844_v9  ;;  %v3858_v34 = vrot.slane %v3857_v6, 4  ;;  %v3865_v18 = vrot.slane %v3864_v26, 4  ;;  %v3698_v42 = vrot.slane %v3671_v52, 4 }
 0x537   :  { %v3852_v15 = vmax.f32 %v3850_v60, %v3851_v20  ;;  %v3699_v37 = vrot.slane %v3671_v52, 6  ;;  %v3871_v32 = vsel %vm3730_vm8, %v3671_v52, -inf  ;;  %v3878_v29 = vsel %vm3730_vm8, %v3697_v51, -inf }
 0x538   :  { %v3846_v31 = vrot.slane %v3845_v35, 2  ;;  %v3859_v8 = vmax.f32 %v3857_v6, %v3858_v34  ;;  %v3866_v43 = vmax.f32 %v3864_v26, %v3865_v18  ;;  %v3872_v49 = vrot.slane %v3871_v32, 4 }
 0x539   :  { %v3853_v56 = vrot.slane %v3852_v15, 2  ;;  %v3879_v50 = vrot.slane %v3878_v29, 4  ;;  %v3885_v46 = vsel %vm3730_vm8, %v3698_v42, -inf  ;;  %v3892_v2 = vsel %vm3730_vm8, %v3699_v37, -inf }
 0x53a   :  { %v3847_v54 = vmax.f32 %v3845_v35, %v3846_v31  ;;  %v3860_v9 = vrot.slane %v3859_v8, 2  ;;  %v3867_v1 = vrot.slane %v3866_v43, 2  ;;  %v3873_v24 = vmax.f32 %v3871_v32, %v3872_v49 }
 0x53b   :  { %v3854_v60 = vmax.f32 %v3852_v15, %v3853_v56  ;;  %v3880_v20 = vmax.f32 %v3878_v29, %v3879_v50  ;;  %v3886_v11 = vrot.slane %v3885_v46, 4  ;;  %v3893_v52 = vrot.slane %v3892_v2, 4 }
 0x53c   :  { %v3848_v25 = vrot.slane %v3847_v54, 1  ;;  %v3861_v51 = vmax.f32 %v3859_v8, %v3860_v9  ;;  %v3868_v14 = vmax.f32 %v3866_v43, %v3867_v1  ;;  %v3874_v6 = vrot.slane %v3873_v24, 2 }
 0x53d   :  { %v3855_v26 = vrot.slane %v3854_v60, 1  ;;  %v3881_v34 = vrot.slane %v3880_v20, 2  ;;  %v3887_v18 = vmax.f32 %v3885_v46, %v3886_v11  ;;  %v3894_v40 = vmax.f32 %v3892_v2, %v3893_v52 }
 0x53e   :  { %v3849_v44 = vmax.f32 %v3847_v54, %v3848_v25  ;;  %v3862_v42 = vrot.slane %v3861_v51, 1  ;;  %v3869_v36 = vrot.slane %v3868_v14, 1  ;;  %v3875_v37 = vmax.f32 %v3873_v24, %v3874_v6 }
 0x53f   :  { %v3856_v35 = vmax.f32 %v3854_v60, %v3855_v26  ;;  %v3882_v31 = vmax.f32 %v3880_v20, %v3881_v34  ;;  %v3888_v63 = vrot.slane %v3887_v18, 2  ;;  %v3895_v49 = vrot.slane %v3894_v40, 2 }
 0x540   :  { %v3863_v56 = vmax.f32 %v3861_v51, %v3862_v42  ;;  %v3870_v15 = vmax.f32 %v3868_v14, %v3869_v36  ;;  %v3975_v32 = vmul.f32 %v10768_v57, %v3849_v44  ;;  %v3876_v29 = vrot.slane %v3875_v37, 1 }
 0x541   :  { %v3976_v1 = vmul.f32 %v10768_v57, %v3856_v35  ;;  %v3883_v8 = vrot.slane %v3882_v31, 1  ;;  %v3889_v43 = vmax.f32 %v3887_v18, %v3888_v63  ;;  %v3896_v50 = vmax.f32 %v3894_v40, %v3895_v49  ;;  %v3619_v63 = vpop.f32.mrf.mxu3 }
 0x542   :  { %v3977_v11 = vmul.f32 %v10768_v57, %v3863_v56  ;;  %v3978_v25 = vmul.f32 %v10768_v57, %v3870_v15  ;;  %v4011_v24 = vadd.f32 %v10774_v45, %v3975_v32  ;;  %v3877_v46 = vmax.f32 %v3875_v37, %v3876_v29 }
 0x543   :  { %v4012_v2 = vadd.f32 %v10774_v45, %v3976_v1  ;;  %v3884_v54 = vmax.f32 %v3882_v31, %v3883_v8  ;;  %v3890_v9 = vrot.slane %v3889_v43, 1  ;;  %v3897_v14 = vrot.slane %v3896_v50, 1 }
 0x544   :  { %v4013_v44 = vadd.f32 %v10774_v45, %v3977_v11  ;;  %v4014_v36 = vadd.f32 %v10774_v45, %v3978_v25  ;;  %v10948_v60 = vadd.f32 %v4011_v24, %v10749_v58  ;;  %v3979_v40 = vmul.f32 %v10768_v57, %v3877_v46 }
 0x545   :  { %v10953_v20 = vadd.f32 %v4045_v17, %v4012_v2  ;;  %v3891_v52 = vmax.f32 %v3889_v43, %v3890_v9  ;;  %v3898_v51 = vmax.f32 %v3896_v50, %v3897_v14  ;;  %v3980_v6 = vmul.f32 %v10768_v57, %v3884_v54  ;;  %v4173_v2 = vld [vmem:[%s10897_s11 + $0x8] sm:$0xff] }
 0x546   :  { %v10958_v26 = vadd.f32 %v4046_v19, %v4013_v44  ;;  %v10962_v34 = vadd.f32 %v4047_v7, %v4014_v36  ;;  %v4351_v18 = vrot.slane %v10948_v60, 4  ;;  %v4015_v42 = vadd.f32 %v10774_v45, %v3979_v40 }
 0x547   :  { %v4352_v37 = vrot.slane %v10953_v20, 3  ;;  %v3981_v17 = vmul.f32 %v10768_v57, %v3891_v52  ;;  %v3982_v35 = vmul.f32 %v10768_v57, %v3898_v51  ;;  %v4016_v31 = vadd.f32 %v10774_v45, %v3980_v6  ;;  %v3660_v51 = vpop.f32.mrf.mxu2  ;;  %v4172_v6 = vld [vmem:[%s10897_s11] sm:$0xff] }
 0x548   :  { %v4354_v49 = vrot.slane %v10958_v26, 2  ;;  %v4356_v19 = vrot.slane %v10962_v34, 1  ;;  %v10974_v7 = vadd.f32 %v4048_v33, %v4015_v42  ;;  %v3620_v56 = vadd.f32 %v3619_v63, %v10929_v48 }
 0x549   :  { %v10978_v15 = vsel %vm2231_vm9, %v4352_v37, %v4351_v18  ;;  %v4017_v32 = vadd.f32 %v10774_v45, %v3981_v17  ;;  %v4018_v29 = vadd.f32 %v10774_v45, %v3982_v35  ;;  %v10984_v1 = vadd.f32 %v4049_v0, %v4016_v31  ;;  %v3622_v35 = vpop.f32.mrf.mxu3 }
 0x54a   :  { %v4438_v33 = vsel %vm567_vm3, %v4436_v13, %v4437_v39  ;;  %v4516_v8 = vrot.slane %v10908_v59, 7  ;;  %v4517_v48 = vrot.slane %v10914_v38, 7  ;;  %v4414_v43 = vrot.slane %v10908_v59, 2  ;;  %v4174_v13 = vld [vmem:[%s10897_s11 + $0x10] sm:$0xff]  ;;  %s8220_s11 = smov 23  }
 0x54b   :  { %v13449_v50 = vrot.slane %v10749_v58, 6  ;;  %v13450_v25 = vrot.slane %v10749_v58, 7  ;;  %v4358_v24 = vrot.slane %v10984_v1, 7  ;;  %v4415_v46 = vrot.slane %v10914_v38, 2  ;;  %v3581_v58 = vpop.f32.mrf.mxu0  ;;  %4241 = vmatpush.msra.mxu1 %v4174_v13  ;;  %s11646_s14 = sld [smem:[%s13297_s0 + %s8220_s11]]  }
 0x54c   :  { %v4518_v54 = vsel %vm2796_vm0, %v4516_v8, %v4517_v48  ;;  %v4494_v9 = vrot.slane %v10908_v59, 6  ;;  %v4495_v14 = vrot.slane %v10914_v38, 6  ;;  %v4392_v44 = vrot.slane %v10908_v59, 1 }
 0x54d   :  { %v10996_v11 = vadd.f32 %v13449_v50, %v4017_v32  ;;  %v11000_v0 = vadd.f32 %v13450_v25, %v4018_v29  ;;  %v4359_v36 = vsel %vm2219_vm11, %v4358_v24, %v10974_v7  ;;  %v7759_v52 = vpack.i.bf16 %v4438_v33, %v4518_v54  ;;  %4242 = vmatpush.msra.mxu1 %v4173_v2 }
 0x54e   :  { %v4416_v18 = vsel %vm13451_vm2, %v4414_v43, %v4415_v46  ;;  %v4496_v42 = vsel %vm13452_vm7, %v4494_v9, %v4495_v14  ;;  %v4393_v37 = vrot.slane %v10914_v38, 1  ;;  %v4472_v17 = vrot.slane %v10908_v59, 5 }
 0x54f   :  { %v4360_v40 = vrot.slane %v10996_v11, 6  ;;  %v4362_v63 = vrot.slane %v11000_v0, 5  ;;  %7760 = vrot.lane.b32.xlu2 %v7759_v52, %s8197_s18  ;;  %v7754_v32 = vpack.i.bf16 %v4416_v18, %v4496_v42  ;;  %v4473_v29 = vrot.slane %v10914_v38, 5  ;;  %4243 = vmatpush.msra.mxu1 %v4172_v6 }
 0x550   :  { %v3582_v33 = vadd.f32 %v10728_v28, %v3581_v58  ;;  %v4394_v8 = vsel %vm13453_vm5, %v4392_v44, %v4393_v37  ;;  %v3661_v43 = vadd.f32 %v3660_v51, %v3620_v56  ;;  %v4008_v25 = vadd.f32 %v10774_v45, %v10918_v12 }
 0x551   :  { %v4361_v31 = vsel %vm2222_vm10, %v4360_v40, %v4359_v36  ;;  %7755 = vrot.lane.b32.xlu1 %v7754_v32, %s8198_s19  ;;  %vm13454_vm2 = vcmask 1042432   ;;  %v4009_v28 = vadd.f32 %v10774_v45, %v10921_v4  ;;  %v4010_v56 = vadd.f32 %v10774_v45, %v10924_v55 }
 0x552   :  { %v11033_v50 = vsel %vm2225_vm12, %v4362_v63, %v4361_v31  ;;  %v4474_v24 = vsel %vm13454_vm2, %v4472_v17, %v4473_v29  ;;  %v11041_v13 = vadd.f32 %v3622_v35, %v3582_v33  ;;  %v3672_v54 = vmax.f32 %v3661_v43, 0.0 }
 0x553   :  { %v7749_v2 = vpack.i.bf16 %v4394_v8, %v4474_v24  ;;  %v13455_v9 = vrot.slane %v10736_v22, 4  ;;  %v13456_v44 = vrot.slane %v10736_v22, 5  ;;  %v13457_v36 = vrot.slane %v10736_v22, 6 }
 0x554   :  { %v13458_v4 = vrot.slane %v10736_v22, 7  ;;  %v4133_v55 = vsel %vm4123_vm1, %v10842_v3, -inf  ;;  %v4134_v52 = vsel %vm4123_vm1, %v10850_v61, -inf  ;;  %v3701_v51 = vrot.slane %v3672_v54, 4 }
 0x555   :  { %v11050_v12 = vadd.f32 %v13455_v9, %v10911_v27  ;;  %v11054_v58 = vadd.f32 %v13456_v44, %v4008_v25  ;;  %v11058_v40 = vadd.f32 %v13457_v36, %v4009_v28  ;;  %7750 = vrot.lane.b32.xlu0 %v7749_v2, %s8199_s20  ;;  %v3700_v27 = vrot.slane %v3672_v54, 2 }
 0x556   :  { %v11062_v63 = vadd.f32 %v13458_v4, %v4010_v56  ;;  %v3702_v6 = vrot.slane %v3672_v54, 6  ;;  %v3899_v18 = vsel %vm3730_vm8, %v3672_v54, -inf  ;;  %v4135_v17 = vmax.f32 %v4133_v55, %v4134_v52 }
 0x557   :  { %v3900_v42 = vrot.slane %v3899_v18, 4  ;;  %v4136_v22 = vsel %vm4123_vm1, %v10872_v53, -inf  ;;  %v4137_v35 = vsel %vm4123_vm1, %v10878_v23, -inf  ;;  %v3906_v3 = vsel %vm3730_vm8, %v3700_v27, -inf }
 0x558   :  { %v3913_v31 = vsel %vm3730_vm8, %v3701_v51, -inf  ;;  %v3920_v61 = vsel %vm3730_vm8, %v3702_v6, -inf  ;;  %v4138_v32 = vmax.f32 %v4136_v22, %v4137_v35  ;;  %v3907_v8 = vrot.slane %v3906_v3, 4 }
 0x559   :  { %v3901_v33 = vmax.f32 %v3899_v18, %v3900_v42  ;;  %v3914_v43 = vrot.slane %v3913_v31, 4  ;;  %v3921_v25 = vrot.slane %v3920_v61, 4  ;;  %v4139_v24 = vsel %vm4123_vm1, %v10884_v10, -inf }
 0x55a   :  { %v4140_v53 = vsel %vm4123_vm1, %v10890_v30, -inf  ;;  %v4142_v23 = vsel %vm4123_vm1, %v11050_v12, -inf  ;;  %v4143_v28 = vsel %vm4123_vm1, %v11054_v58, -inf  ;;  %v3908_v2 = vmax.f32 %v3906_v3, %v3907_v8 }
 0x55b   :  { %v3902_v56 = vrot.slane %v3901_v33, 2  ;;  %v3915_v54 = vmax.f32 %v3913_v31, %v3914_v43  ;;  %v3922_v9 = vmax.f32 %v3920_v61, %v3921_v25  ;;  %v4141_v44 = vmax.f32 %v4139_v24, %v4140_v53 }
 0x55c   :  { %v4144_v36 = vmax.f32 %v4142_v23, %v4143_v28  ;;  %v4145_v4 = vsel %vm4123_vm1, %v11058_v40, -inf  ;;  %v4146_v10 = vsel %vm4123_vm1, %v11062_v63, -inf  ;;  %v3909_v30 = vrot.slane %v3908_v2, 2 }
 0x55d   :  { %v3903_v55 = vmax.f32 %v3901_v33, %v3902_v56  ;;  %v3916_v52 = vrot.slane %v3915_v54, 2  ;;  %v3923_v27 = vrot.slane %v3922_v9, 2  ;;  %v4147_v51 = vmax.f32 %v4145_v4, %v4146_v10 }
 0x55e   :  { %v13459_v6 = vmax.f32 %v10810_v47, %v10813_v5  ;;  %v4200_v42 = vrot.slane %v4135_v17, 5  ;;  %v4202_v22 = vrot.slane %v4138_v32, 4  ;;  %v3910_v3 = vmax.f32 %v3908_v2, %v3909_v30  ;;  %v3663_v47 = vpop.f32.mrf.mxu2 }
 0x55f   :  { %v3904_v35 = vrot.slane %v3903_v55, 1  ;;  %v3917_v31 = vmax.f32 %v3915_v54, %v3916_v52  ;;  %v3924_v61 = vmax.f32 %v3922_v9, %v3923_v27  ;;  %v4204_v33 = vrot.slane %v4141_v44, 3 }
 0x560   :  { %v4197_v18 = vsel %vm2219_vm11, %v10822_v41, %v13459_v6  ;;  %v4206_v43 = vrot.slane %v4144_v36, 2  ;;  %v4208_v25 = vrot.slane %v4147_v51, 1  ;;  %v3911_v53 = vrot.slane %v3910_v3, 1 }
 0x561   :  { %v4199_v8 = vsel %vm2222_vm10, %v10858_v62, %v4197_v18  ;;  %v3905_v24 = vmax.f32 %v3903_v55, %v3904_v35  ;;  %v3918_v23 = vrot.slane %v3917_v31, 1  ;;  %v3925_v28 = vrot.slane %v3924_v61, 1 }
 0x562   :  { %v4201_v5 = vsel %vm2225_vm12, %v4200_v42, %v4199_v8  ;;  %v4345_v41 = vrot.slane %v11054_v58, 7  ;;  %v4347_v17 = vrot.slane %v11058_v40, 6  ;;  %v4349_v32 = vrot.slane %v11062_v63, 5 }
 0x563   :  { %v3912_v56 = vmax.f32 %v3910_v3, %v3911_v53  ;;  %v3919_v2 = vmax.f32 %v3917_v31, %v3918_v23  ;;  %v3926_v54 = vmax.f32 %v3924_v61, %v3925_v28  ;;  %v3983_v62 = vmul.f32 %v10768_v57, %v3905_v24 }
 0x564   :  { %v4203_v9 = vsel %vm2228_vm13, %v4202_v22, %v4201_v5  ;;  %v4346_v44 = vsel %vm2219_vm11, %v4345_v41, %v11050_v12  ;;  %v3664_v36 = vadd.f32 %v3663_v47, %v11041_v13  ;;  %v4355_v58 = vsel %vm2234_vm14, %v4354_v49, %v10978_v15 }
 0x565   :  { %v3984_v40 = vmul.f32 %v10768_v57, %v3912_v56  ;;  %v3985_v63 = vmul.f32 %v10768_v57, %v3919_v2  ;;  %v3986_v4 = vmul.f32 %v10768_v57, %v3926_v54  ;;  %v4019_v10 = vadd.f32 %v10774_v45, %v3983_v62 }
 0x566   :  { %v4205_v55 = vsel %vm2231_vm9, %v4204_v33, %v4203_v9  ;;  %v4348_v30 = vsel %vm2222_vm10, %v4347_v17, %v4346_v44  ;;  %v3673_v12 = vmax.f32 %v3664_v36, 0.0  ;;  %v4357_v13 = vsel %vm13319_vm15, %v4356_v19, %v4355_v58 }
 0x567   :  { %v4020_v52 = vadd.f32 %v10774_v45, %v3984_v40  ;;  %v4021_v49 = vadd.f32 %v10774_v45, %v3985_v63  ;;  %v4022_v15 = vadd.f32 %v10774_v45, %v3986_v4  ;;  %v11122_v27 = vadd.f32 %v4019_v10, %v10759_v21 }
 0x568   :  { %v4207_v57 = vsel %vm2234_vm14, %v4206_v43, %v4205_v55  ;;  %v4350_v51 = vsel %vm2225_vm12, %v4349_v32, %v4348_v30  ;;  %v3703_v6 = vrot.slane %v3673_v12, 2  ;;  %v3704_v18 = vrot.slane %v3673_v12, 4 }
 0x569   :  { %v13460_v19 = vrot.slane %v10759_v21, 1  ;;  %v13461_v45 = vrot.slane %v10759_v21, 2  ;;  %v13462_v35 = vrot.slane %v10759_v21, 3  ;;  %v4364_v31 = vrot.slane %v11122_v27, 4 }
 0x56a   :  { %v4209_v61 = vsel %vm13319_vm15, %v4208_v25, %v4207_v57  ;;  %v11146_v8 = vsel %vm673_vm4, %v4350_v51, 0.0  ;;  %v3705_v33 = vrot.slane %v3673_v12, 6  ;;  %v3927_v43 = vsel %vm3730_vm8, %v3673_v12, -inf }
 0x56b   :  { %v11133_v42 = vadd.f32 %v13460_v19, %v4020_v52  ;;  %v11137_v22 = vadd.f32 %v13461_v45, %v4021_v49  ;;  %v11141_v3 = vadd.f32 %v13462_v35, %v4022_v15  ;;  %v4365_v24 = vsel %vm2228_vm13, %v4364_v31, %v11033_v50 }
 0x56c   :  { %vm13463_vm7 = vcmask 261120   ;;  %v4395_v47 = vrot.slane %v11146_v8, 1  ;;  %v3928_v25 = vrot.slane %v3927_v43, 4  ;;  %v3934_v5 = vsel %vm3730_vm8, %v3703_v6, -inf }
 0x56d   :  { %v4366_v53 = vrot.slane %v11133_v42, 3  ;;  %v4368_v23 = vrot.slane %v11137_v22, 2  ;;  %v4370_v28 = vrot.slane %v11141_v3, 1  ;;  %7389 = vmatmul.msk.f32.vlgmr.msra.gmra.mxu1 %vm13463_vm7, %v4209_v61  ;;  %v3941_v41 = vsel %vm3730_vm8, %v3704_v18, -inf }
 0x56e   :  { %v3935_v32 = vrot.slane %v3934_v5, 4  ;;  %v3942_v56 = vrot.slane %v3941_v41, 4  ;;  %v3948_v50 = vsel %vm3730_vm8, %v3705_v33, -inf  ;;  %v4396_v2 = vsel %vm13453_vm5, %v4393_v37, %v4395_v47 }
 0x56f   :  { %v4367_v17 = vsel %vm2231_vm9, %v4366_v53, %v4365_v24  ;;  %v3929_v54 = vmax.f32 %v3927_v43, %v3928_v25  ;;  %v3949_v62 = vrot.slane %v3948_v50, 4  ;;  %v4417_v9 = vrot.slane %v11146_v8, 2  ;;  %4404 = vrot.lane.b32.xlu2 %v4396_v2, %s8199_s20 }
 0x570   :  { %v3936_v44 = vmax.f32 %v3934_v5, %v3935_v32  ;;  %v3943_v36 = vmax.f32 %v3941_v41, %v3942_v56  ;;  %v4497_v58 = vrot.slane %v11146_v8, 6  ;;  %v4369_v40 = vsel %vm2234_vm14, %v4368_v23, %v4367_v17  ;;  %v8063_v56 = vld [vmem:[%s10647_s3] ss:$0 sm:$0xff]  ;;  %s8218_s3 = smov 21  }
 0x571   :  { %v3930_v63 = vrot.slane %v3929_v54, 2  ;;  %v3950_v4 = vmax.f32 %v3948_v50, %v3949_v62  ;;  %vm13464_vm2 = vcmask 1045504   ;;  %v11173_v37 = vsel %vm13319_vm15, %v4370_v28, %v4369_v40  ;;  %s11585_s6 = sld [smem:[%s13297_s0 + %s8218_s3]]  }
 0x572   :  { %v4418_v10 = vsel %vm13464_vm2, %v4415_v46, %v4417_v9  ;;  %v3937_v55 = vrot.slane %v3936_v44, 2  ;;  %v3944_v30 = vrot.slane %v3943_v36, 2  ;;  %vm13465_vm7 = vcmask 1041408   ;;  %vm13466_vm5 = vmmov %vm13464_vm2 }
 0x573   :  { %v4498_v12 = vsel %vm13465_vm7, %v4495_v14, %v4497_v58  ;;  %v11179_v52 = vsel %vm673_vm4, 0.0, %v4357_v13  ;;  %v3931_v49 = vmax.f32 %v3929_v54, %v3930_v63  ;;  %v3951_v15 = vrot.slane %v3950_v4, 2  ;;  %vm13467_vm2 = vmmov %vm13465_vm7 }
 0x574   :  { %v7764_v57 = vpack.i.bf16 %v4418_v10, %v4498_v12  ;;  %v4441_v51 = vrot.slane %v11179_v52, 3  ;;  %v3938_v6 = vmax.f32 %v3936_v44, %v3937_v55  ;;  %v3945_v18 = vmax.f32 %v3943_v36, %v3944_v30 }
 0x575   :  { %v4442_v46 = vrot.slane %v11173_v37, 3  ;;  %v4521_v19 = vrot.slane %v11179_v52, 7  ;;  %v3932_v45 = vrot.slane %v3931_v49, 1  ;;  %v3952_v35 = vmax.f32 %v3950_v4, %v3951_v15  ;;  %v8064_v4 = vld [vmem:[%s10653_s7] ss:$0 sm:$0xff]  ;;  %s8219_s7 = smov 22  }
 0x576   :  { %7765 = vrot.lane.b32.xlu1 %v7764_v57, %s8198_s19  ;;  %v4522_v14 = vrot.slane %v11173_v37, 7  ;;  %v4419_v13 = vrot.slane %v11179_v52, 2  ;;  %v3939_v31 = vrot.slane %v3938_v6, 1  ;;  %v3946_v61 = vrot.slane %v3945_v18, 1  ;;  %s11592_s10 = sld [smem:[%s13297_s0 + %s8219_s7]]  }
 0x577   :  { %v4443_v33 = vsel %vm567_vm3, %v4441_v51, %v4442_v46  ;;  %v4420_v43 = vrot.slane %v11173_v37, 2  ;;  %v3933_v24 = vmax.f32 %v3931_v49, %v3932_v45  ;;  %v3953_v53 = vrot.slane %v3952_v35, 1 }
 0x578   :  { %v4523_v23 = vsel %vm2796_vm0, %v4521_v19, %v4522_v14  ;;  %v4499_v28 = vrot.slane %v11179_v52, 6  ;;  %v3940_v25 = vmax.f32 %v3938_v6, %v3939_v31  ;;  %v3947_v5 = vmax.f32 %v3945_v18, %v3946_v61 }
 0x579   :  { %v7784_v41 = vpack.i.bf16 %v4443_v33, %v4523_v23  ;;  %v4421_v17 = vsel %vm13466_vm5, %v4419_v13, %v4420_v43  ;;  %v3954_v32 = vmax.f32 %v3952_v35, %v3953_v53  ;;  %v3987_v50 = vmul.f32 %v8063_v56, %v3933_v24 }
 0x57a   :  { %v4500_v2 = vrot.slane %v11173_v37, 6  ;;  %v4475_v54 = vrot.slane %v11146_v8, 5  ;;  %v4477_v62 = vrot.slane %v11179_v52, 5  ;;  %v4478_v9 = vrot.slane %v11173_v37, 5 }
 0x57b   :  { %7785 = vrot.lane.b32.xlu2 %v7784_v41, %s8197_s18  ;;  %v3988_v44 = vmul.f32 %v8063_v56, %v3940_v25  ;;  %v3989_v36 = vmul.f32 %v8063_v56, %v3947_v5  ;;  %vm13468_vm7 = vcmask 1042432   ;;  %v3990_v63 = vmul.f32 %v8063_v56, %v3954_v32 }
 0x57c   :  { %v4501_v58 = vsel %vm13467_vm2, %v4499_v28, %v4500_v2  ;;  %v4476_v40 = vsel %vm13468_vm7, %v4473_v29, %v4475_v54  ;;  %v4023_v10 = vadd.f32 %v8064_v4, %v3987_v50  ;;  %vm13469_vm5 = vmmov %vm13468_vm7  ;;  %v13470_v51 = vrot.slane %v10759_v21, 4 }
 0x57d   :  { %v7779_v55 = vpack.i.bf16 %v4421_v17, %v4501_v58  ;;  %v4479_v30 = vsel %vm13469_vm5, %v4477_v62, %v4478_v9  ;;  %v4024_v12 = vadd.f32 %v8064_v4, %v3988_v44  ;;  %v4025_v49 = vadd.f32 %v8064_v4, %v3989_v36  ;;  %v4290_v36 = vld [vmem:[%s11221_s22 + $0x138] sm:$0xff] }
 0x57e   :  { %v7769_v15 = vpack.i.bf16 %v4479_v30, %v4476_v40  ;;  %v4026_v57 = vadd.f32 %v8064_v4, %v3990_v63  ;;  %v4119_v6 = vadd.f32 %v13470_v51, %v4023_v10  ;;  %v4148_v18 = vsel %vm4123_vm1, %v10948_v60, -inf  ;;  %4653 = vmatpush.msrb.mxu1 %v4290_v36  ;;  %v4282_v10 = vld [vmem:[%s11221_s22 + $0xf8] sm:$0xff] }
 0x57f   :  { %7780 = vrot.lane.b32.xlu1 %v7779_v55, %s8198_s19  ;;  %v13471_v29 = vrot.slane %v10759_v21, 5  ;;  %v13472_v45 = vrot.slane %v10759_v21, 6  ;;  %v4149_v13 = vsel %vm4123_vm1, %v10953_v20, -inf  ;;  %v4151_v60 = vsel %vm4123_vm1, %v10958_v26, -inf  ;;  %v4289_v55 = vld [vmem:[%s11221_s22 + $0x130] sm:$0xff]  ;;  %4616 = vmatpush.msra.mxu3 %v4282_v10  ;;  %v4258_v10 = vld [vmem:[%s11221_s22 + $0x38] sm:$0xff] }
 0x580   :  { %7770 = vrot.lane.b32.xlu0 %v7769_v15, %s8199_s20  ;;  %v13473_v31 = vrot.slane %v10759_v21, 7  ;;  %v4150_v33 = vmax.f32 %v4148_v18, %v4149_v13  ;;  %v4152_v24 = vsel %vm4123_vm1, %v10962_v34, -inf  ;;  %v4154_v53 = vsel %vm4123_vm1, %v10974_v7, -inf  ;;  %4654 = vmatpush.msrb.mxu1 %v4289_v55  ;;  %v4274_v55 = vld [vmem:[%s11221_s22 + $0xb8] sm:$0xff] }
 0x581   :  { %v4120_v19 = vadd.f32 %v13471_v29, %v4024_v12  ;;  %v4121_v35 = vadd.f32 %v13472_v45, %v4025_v49  ;;  %v4153_v23 = vmax.f32 %v4151_v60, %v4152_v24  ;;  %v4155_v28 = vsel %vm4123_vm1, %v10984_v1, -inf }
 0x582   :  { %v4122_v61 = vadd.f32 %v13473_v31, %v4026_v57  ;;  %v4157_v20 = vsel %vm4123_vm1, %v10996_v11, -inf  ;;  %v4158_v26 = vsel %vm4123_vm1, %v11000_v0, -inf  ;;  %v4156_v25 = vmax.f32 %v4154_v53, %v4155_v28 }
 0x583   :  { %v4159_v21 = vmax.f32 %v4157_v20, %v4158_v26  ;;  %v4160_v5 = vsel %vm4123_vm1, %v11122_v27, -inf  ;;  %v4161_v34 = vsel %vm4123_vm1, %v11133_v42, -inf  ;;  %v4163_v1 = vsel %vm4123_vm1, %v11137_v22, -inf  ;;  %v4265_v26 = vld [vmem:[%s11221_s22 + $0x70] sm:$0xff] }
 0x584   :  { %v4162_v7 = vmax.f32 %v4160_v5, %v4161_v34  ;;  %v4164_v11 = vsel %vm4123_vm1, %v11141_v3, -inf  ;;  %v4166_v41 = vsel %vm4123_vm1, %v4119_v6, -inf  ;;  %v4167_v17 = vsel %vm4123_vm1, %v4120_v19, -inf  ;;  %v4266_v3 = vld [vmem:[%s11221_s22 + $0x78] sm:$0xff] }
 0x585   :  { %v4165_v0 = vmax.f32 %v4163_v1, %v4164_v11  ;;  %v4169_v32 = vsel %vm4123_vm1, %v4121_v35, -inf  ;;  %v4170_v27 = vsel %vm4123_vm1, %v4122_v61, -inf  ;;  %v4168_v42 = vmax.f32 %v4166_v41, %v4167_v17  ;;  %4587 = vmatpush.msra.mxu0 %v4266_v3  ;;  %v4280_v1 = vld [vmem:[%s11221_s22 + $0xe8] sm:$0xff]  ;;  %v4263_v41 = vld [vmem:[%s11221_s22 + $0x60] sm:$0xff]  ;;  %v4262_v17 = vld [vmem:[%s11221_s22 + $0x58] sm:$0xff] }
 0x586   :  { %v4171_v56 = vmax.f32 %v4169_v32, %v4170_v27  ;;  %v4210_v50 = vrot.slane %v4153_v23, 7  ;;  %v4212_v54 = vrot.slane %v4156_v25, 6  ;;  %v4214_v62 = vrot.slane %v4159_v21, 5  ;;  %v4281_v25 = vld [vmem:[%s11221_s22 + $0xf0] sm:$0xff]  ;;  %v4288_v21 = vld [vmem:[%s11221_s22 + $0x128] sm:$0xff]  ;;  %v4278_v32 = vld [vmem:[%s11221_s22 + $0xd8] sm:$0xff] }
 0x587   :  { %v4216_v22 = vrot.slane %v4162_v7, 4  ;;  %v4372_v44 = vrot.slane %v4120_v19, 7  ;;  %v4218_v40 = vrot.slane %v4165_v0, 3  ;;  %v4220_v63 = vrot.slane %v4168_v42, 2  ;;  %4588 = vmatpush.msra.mxu0 %v4265_v26  ;;  %4617 = vmatpush.msra.mxu3 %v4281_v25  ;;  %v4279_v0 = vld [vmem:[%s11221_s22 + $0xe0] sm:$0xff]  ;;  %v4285_v42 = vld [vmem:[%s11221_s22 + $0x110] sm:$0xff] }
 0x588   :  { %v4211_v58 = vsel %vm2219_vm11, %v4210_v50, %v4150_v33  ;;  %v4374_v4 = vrot.slane %v4121_v35, 6  ;;  %v4376_v49 = vrot.slane %v4122_v61, 5  ;;  %v4439_v15 = vrot.slane %v11146_v8, 3  ;;  %4655 = vmatpush.msrb.mxu1 %v4288_v21 }
 0x589   :  { %v4213_v30 = vsel %vm2222_vm10, %v4212_v54, %v4211_v58  ;;  %v4373_v12 = vsel %vm2219_vm11, %v4372_v44, %v4119_v6  ;;  %v4222_v51 = vrot.slane %v4171_v56, 1  ;;  %v4519_v29 = vrot.slane %v11146_v8, 7  ;;  %4618 = vmatpush.msra.mxu3 %v4280_v1  ;;  %v4261_v56 = vld [vmem:[%s11221_s22 + $0x50] sm:$0xff]  ;;  %v4260_v44 = vld [vmem:[%s11221_s22 + $0x48] sm:$0xff] }
 0x58a   :  { %v4215_v57 = vsel %vm2225_vm12, %v4214_v62, %v4213_v30  ;;  %v4375_v18 = vsel %vm2222_vm10, %v4374_v4, %v4373_v12  ;;  %v4440_v6 = vsel %vm567_vm3, %v4437_v39, %v4439_v15  ;;  %v4398_v31 = vrot.slane %v11173_v37, 1  ;;  %v4277_v62 = vld [vmem:[%s11221_s22 + $0xd0] sm:$0xff]  ;;  %v4275_v4 = vld [vmem:[%s11221_s22 + $0xc0] sm:$0xff]  ;;  %v4272_v15 = vld [vmem:[%s11221_s22 + $0xa8] sm:$0xff] }
 0x58b   :  { %v4217_v19 = vsel %vm2228_vm13, %v4216_v22, %v4215_v57  ;;  %v4377_v45 = vsel %vm2225_vm12, %v4376_v49, %v4375_v18  ;;  %v4520_v60 = vsel %vm2796_vm0, %v4517_v48, %v4519_v29  ;;  %v4397_v23 = vrot.slane %v11179_v52, 1  ;;  %4619 = vmatpush.msra.mxu3 %v4279_v0  ;;  %v4284_v22 = vld [vmem:[%s11221_s22 + $0x108] sm:$0xff]  ;;  %v4257_v30 = vld [vmem:[%s11221_s22 + $0x30] sm:$0xff]  ;;  %v4255_v57 = vld [vmem:[%s11221_s22 + $0x20] sm:$0xff] }
 0x58c   :  { %v4219_v35 = vsel %vm2231_vm9, %v4218_v40, %v4217_v19  ;;  %v11275_v13 = vsel %vm673_vm4, %v4377_v45, 0.0  ;;  %v7774_v33 = vpack.i.bf16 %v4440_v6, %v4520_v60  ;;  %vm13474_vm1 = vcmask 261120   ;;  %v4273_v12 = vld [vmem:[%s11221_s22 + $0xb0] sm:$0xff]  ;;  %v4256_v49 = vld [vmem:[%s11221_s22 + $0x28] sm:$0xff]  ;;  %v4254_v18 = vld [vmem:[%s11221_s22 + $0x18] sm:$0xff] }
 0x58d   :  { %v4221_v61 = vsel %vm2234_vm14, %v4220_v63, %v4219_v35  ;;  %v4422_v24 = vrot.slane %v11275_v13, 2  ;;  %v4502_v39 = vrot.slane %v11275_v13, 6  ;;  %v4480_v28 = vrot.slane %v11275_v13, 5  ;;  %4620 = vmatpush.msra.mxu3 %v4278_v32  ;;  %v4259_v63 = vld [vmem:[%s11221_s22 + $0x40] sm:$0xff]  ;;  %v4270_v29 = vld [vmem:[%s11221_s22 + $0x98] sm:$0xff]  ;;  %v4253_v19 = vld [vmem:[%s11221_s22 + $0x10] sm:$0xff] }
 0x58e   :  { %v4223_v53 = vsel %vm13319_vm15, %v4222_v51, %v4221_v61  ;;  %7775 = vrot.lane.b32.xlu0 %v7774_v33, %s8197_s18  ;;  %vm13475_vm2 = vcmask 1045504   ;;  %vm13476_vm7 = vcmask 1041408   ;;  %vm13477_vm5 = vcmask 1046528   ;;  %v4271_v51 = vld [vmem:[%s11221_s22 + $0xa0] sm:$0xff]  ;;  %v4269_v45 = vld [vmem:[%s11221_s22 + $0x90] sm:$0xff]  ;;  %v4252_v6 = vld [vmem:[%s11221_s22 + $0x8] sm:$0xff] }
 0x58f   :  { %7390 = vmatmul.msk.f32.gmra.mxu1 %vm13474_vm1, %v4223_v53  ;;  %v4423_v48 = vsel %vm13475_vm2, %v4420_v43, %v4422_v24  ;;  %v4503_v20 = vsel %vm13476_vm7, %v4500_v2, %v4502_v39  ;;  %v4399_v34 = vsel %vm13477_vm5, %v4397_v23, %v4398_v31  ;;  %vm13478_vm1 = vcmask 1042432   ;;  %v4264_v43 = vld [vmem:[%s11221_s22 + $0x68] sm:$0xff]  ;;  %v4287_v2 = vld [vmem:[%s11221_s22 + $0x120] sm:$0xff]  ;;  %vm13479_vm2 = vmmov %vm13477_vm5  ;;  %4621 = vmatpush.msra.mxu3 %v4277_v62 }
 0x590   :  { %v7794_v5 = vpack.i.bf16 %v4423_v48, %v4503_v20  ;;  %v4481_v7 = vsel %vm13478_vm1, %v4478_v9, %v4480_v28  ;;  %4589 = vmatpush.msra.mxu0 %v4264_v43  ;;  %v4286_v9 = vld [vmem:[%s11221_s22 + $0x118] sm:$0xff]  ;;  %4656 = vmatpush.msrb.mxu1 %v4287_v2  ;;  %v4444_v27 = vrot.slane %v11275_v13, 3  ;;  %v4538_v50 = vsel %vm13479_vm2, %v4395_v47, %v10189_v16  ;;  %v4276_v47 = vld [vmem:[%s11221_s22 + $0xc8] sm:$0xff]  ;;  %vm13480_vm7 = vmmov %vm13479_vm2 }
 0x591   :  { %v7789_v11 = vpack.i.bf16 %v4481_v7, %v4399_v34  ;;  %v4524_v54 = vrot.slane %v11275_v13, 7  ;;  %v4400_v58 = vrot.slane %v11275_v13, 1  ;;  %4622 = vmatpush.msra.mxu3 %v4276_v47  ;;  %vm13481_vm5 = vmmov %vm13479_vm2  ;;  %v4268_v35 = vld [vmem:[%s11221_s22 + $0x88] sm:$0xff]  ;;  %v4251_v60 = vld [vmem:[%s11221_s22] sm:$0xff]  ;;  %v4459_v24 = vrot.slane %v10914_v38, 4 }
 0x592   :  { %7795 = vrot.lane.b32.xlu2 %v7794_v5, %s8198_s19  ;;  %4590 = vmatpush.msra.mxu0 %v4263_v41  ;;  %v4445_v36 = vsel %vm567_vm3, %v4442_v46, %v4444_v27  ;;  %v4458_v23 = vrot.slane %v10908_v59, 4  ;;  %vm13482_vm1 = vcmask 261120   ;;  %v4464_v62 = vrot.slane %v11173_v37, 4 }
 0x593   :  { %7790 = vrot.lane.b32.xlu1 %v7789_v11, %s8199_s20  ;;  %4657 = vmatpush.msrb.mxu1 %v4286_v9  ;;  %v4525_v3 = vsel %vm2796_vm0, %v4522_v14, %v4524_v54  ;;  %v4401_v46 = vsel %vm13480_vm7, %v4398_v31, %v4400_v58  ;;  %v4539_v40 = vsel %vm13481_vm5, %v4400_v58, %v10189_v16  ;;  %v4283_v14 = vld [vmem:[%s11221_s22 + $0x100] sm:$0xff]  ;;  %vm13483_vm2 = vmmov %vm13482_vm1  ;;  %vm13485_vm5 = vcmask 785408  }
 0x594   :  { %4591 = vmatpush.msra.mxu0 %v4262_v17  ;;  %4623 = vmatpush.msra.mxu3 %v4275_v4  ;;  %v4267_v31 = vld [vmem:[%s11221_s22 + $0x80] sm:$0xff]  ;;  %v4460_v21 = vsel %vm673_vm4, %v4458_v23, %v4459_v24  ;;  %vm13484_vm7 = vmmov %vm13482_vm1  ;;  %v4461_v17 = vrot.slane %v11146_v8, 4  ;;  %v4463_v58 = vrot.slane %v11179_v52, 4  ;;  %s8222_s22 = smov 25  }
 0x595   :  { %4658 = vmatpush.msrb.mxu1 %v4285_v42  ;;  %vm13486_vm15 = vmmov %vm13485_vm5  ;;  %s7355_s25 = sld [smem:[%s13297_s0 + %s8222_s22]]  }
 0x596   :  { %4540 = vrot.lane.b32.xlu0 %v4538_v50, %s8199_s20  ;;  %4592 = vmatpush.msra.mxu0 %v4261_v56  ;;  %v4462_v42 = vsel %vm673_vm4, %v4459_v24, %v4461_v17  ;;  %v4465_v4 = vsel %vm673_vm4, %v4463_v58, %v4464_v62 }
 0x597   :  { %4659 = vmatpush.msrb.mxu1 %v4284_v22  ;;  %4624 = vmatpush.msra.mxu3 %v4274_v55 }
 0x598   :  { %4593 = vmatpush.msra.mxu0 %v4260_v44 }
 0x599   :  { %4660 = vmatpush.msrb.mxu1 %v4283_v14  ;;  %4625 = vmatpush.msra.mxu3 %v4273_v12 }
 0x59a   :  { %4452 = vrot.lane.b32.xlu2 %v4445_v36, %s8197_s18  ;;  %4594 = vmatpush.msra.mxu0 %v4259_v63 }
 0x59b   :  { %4532 = vrot.lane.b32.xlu1 %v4525_v3, %s8197_s18  ;;  %4626 = vmatpush.msra.mxu3 %v4272_v15 }
 0x59c   :  { %4595 = vmatpush.msra.mxu0 %v4258_v10 }
 0x59d   :  { %4627 = vmatpush.msra.mxu3 %v4271_v51 }
 0x59e   :  { %4408 = vrot.lane.b32.xlu0 %v4401_v46, %s8199_s20  ;;  %4596 = vmatpush.msra.mxu0 %v4257_v30 }
 0x59f   :  { %4628 = vmatpush.msra.mxu3 %v4270_v29 }
 0x5a0   :  { %4597 = vmatpush.msra.mxu0 %v4256_v49 }
 0x5a1   :  { %4629 = vmatpush.msra.mxu3 %v4269_v45  ;;  %v4466_v45 = vrot.slane %v11275_v13, 4 }
 0x5a2   :  { %4598 = vmatpush.msra.mxu0 %v4255_v57 }
 0x5a3   :  { %4630 = vmatpush.msra.mxu3 %v4268_v35 }
 0x5a4   :  { %4599 = vmatpush.msra.mxu0 %v4254_v18 }
 0x5a5   :  { %4631 = vmatpush.msra.mxu3 %v4267_v31 }
 0x5a6   :  { %4542 = vrot.lane.b32.xlu0 %v4539_v40, %s8199_s20  ;;  %4600 = vmatpush.msra.mxu0 %v4253_v19 }
 0x5a8   :  { %4601 = vmatpush.msra.mxu0 %v4252_v6 }
 0x5a9   :  { %v7761_v61 = vpop.permute.xlu2 %7760 }
 0x5aa   :  { %4602 = vmatpush.msra.mxu0 %v4251_v60  ;;  %v7763_v5 = vunpack.i.h.bf16 %v7761_v61  ;;  %v7762_v34 = vunpack.i.l.bf16 %v7761_v61  ;;  %v4467_v60 = vsel %vm673_vm4, %v4464_v62, %v4466_v45 }
 0x5c3   :  { %v7756_v33 = vpop.permute.xlu1 %7755 }
 0x5c4   :  { %v7758_v39 = vunpack.i.h.bf16 %v7756_v33  ;;  %v7757_v53 = vunpack.i.l.bf16 %v7756_v33 }
 0x5c7   :  { %v7751_v28 = vpop.permute.xlu0 %7750 }
 0x5c8   :  { %v7753_v20 = vunpack.i.h.bf16 %v7751_v28  ;;  %v7752_v26 = vunpack.i.l.bf16 %v7751_v28 }
 0x5c9   :  { %v4405_v48 = vpop.permute.xlu2 %4404 }
 0x5ca   :  { %v4547_v25 = vsel %vm13482_vm1, %v10914_v38, %v4405_v48  ;;  %v4546_v7 = vsel %vm13483_vm2, %v10908_v59, %v7753_v20  ;;  %v4558_v43 = vsel %vm13484_vm7, %v4460_v21, %v7752_v26  ;;  %vm13488_vm2 = vmmov %vm13485_vm5  ;;  %v7854_v21 = vld [vmem:[%s11363_s26] ss:$0 sm:$0xff]  ;;  %s8223_s26 = smov 26  }
 0x5cb   :  { %7391 = vmatmul.msk.f32.vlgmr.msrb.gmra.mxu1 %vm1165_vm6, %v4547_v25  ;;  %v4550_v1 = vsel %vm1165_vm6, %v4546_v7, %v7758_v39  ;;  %v4562_v11 = vsel %vm1165_vm6, %v4558_v43, %v7757_v53  ;;  %vm13489_vm7 = vmmov %vm13482_vm1  ;;  %s13237_s29 = sld [smem:[%s13297_s0 + %s8223_s26]]  }
 0x5cc   :  { %v4554_v2 = vsel %vm13485_vm5, %v4550_v1, %v7763_v5  ;;  %v4566_v41 = vsel %vm13486_vm15, %v4562_v11, %v7762_v34  ;;  %vm13487_vm15 = vmmov %vm13485_vm5 }
 0x5cd   :  { %4603 = vmatmul.f32.vlgmr.msra.gmra.mxu0 %v4554_v2  ;;  %4632 = vmatmul.f32.vlgmr.msra.gmra.mxu3 %v4566_v41  ;;  %vm13490_vm5 = vmmov %vm13482_vm1 }
 0x5d5   :  { %v7786_v59 = vpop.permute.xlu2 %7785 }
 0x5d6   :  { %v7788_v18 = vunpack.i.h.bf16 %v7786_v59  ;;  %v7787_v29 = vunpack.i.l.bf16 %v7786_v59 }
 0x5e8   :  { %v7766_v38 = vpop.permute.xlu1 %7765 }
 0x5e9   :  { %v7768_v27 = vunpack.i.h.bf16 %v7766_v38  ;;  %v7767_v50 = vunpack.i.l.bf16 %v7766_v38 }
 0x5eb   :  { %v4551_v47 = vsel %vm1165_vm6, %v4547_v25, %v7768_v27 }
 0x5ec   :  { %v7796_v49 = vpop.permute.xlu2 %7795 }
 0x5ed   :  { %v7798_v61 = vunpack.i.h.bf16 %v7796_v49  ;;  %v7797_v33 = vunpack.i.l.bf16 %v7796_v49 }
 0x5f1   :  { %v7781_v9 = vpop.permute.xlu1 %7780 }
 0x5f2   :  { %v7771_v0 = vpop.permute.xlu0 %7770  ;;  %v7782_v14 = vunpack.i.l.bf16 %v7781_v9  ;;  %v7783_v30 = vunpack.i.h.bf16 %v7781_v9 }
 0x5f3   :  { %v7772_v32 = vunpack.i.l.bf16 %v7771_v0  ;;  %v7773_v22 = vunpack.i.h.bf16 %v7771_v0 }
 0x5f4   :  { %v4453_v53 = vpop.permute.xlu2 %4452 }
 0x5f5   :  { %v4559_v56 = vsel %vm13482_vm1, %v4462_v42, %v7772_v32  ;;  %v4560_v55 = vsel %vm13489_vm7, %v4465_v4, %v7773_v22  ;;  %vm13492_vm7 = vmmov %vm13482_vm1 }
 0x5f6   :  { %v4563_v3 = vsel %vm1165_vm6, %v4559_v56, %v7767_v50  ;;  %v4564_v51 = vsel %vm1165_vm6, %v4560_v55, %v7782_v14 }
 0x600   :  { %v7776_v54 = vpop.permute.xlu0 %7775 }
 0x601   :  { %v7778_v44 = vunpack.i.h.bf16 %v7776_v54  ;;  %v7777_v36 = vunpack.i.l.bf16 %v7776_v54 }
 0x603   :  { %v4555_v46 = vsel %vm13487_vm15, %v4551_v47, %v7778_v44  ;;  %v4567_v40 = vsel %vm13488_vm2, %v4563_v3, %v7777_v36  ;;  %vm13491_vm15 = vmmov %vm13488_vm2 }
 0x604   :  { %4606 = vmatmul.f32.gmra.mxu0 %v4555_v46  ;;  %4635 = vmatmul.f32.gmra.mxu3 %v4567_v40 }
 0x605   :  { %v7791_v63 = vpop.permute.xlu1 %7790 }
 0x606   :  { %v7792_v10 = vunpack.i.l.bf16 %v7791_v63  ;;  %v7793_v6 = vunpack.i.h.bf16 %v7791_v63 }
 0x608   :  { %v4548_v12 = vsel %vm13490_vm5, %v11179_v52, %v7792_v10  ;;  %v4541_v15 = vpop.permute.xlu0 %4540  ;;  %v4568_v52 = vsel %vm13488_vm2, %v4564_v51, %v7787_v29  ;;  %v4561_v31 = vsel %vm13492_vm7, %v4467_v60, %v7793_v6  ;;  %vm13493_vm5 = vmmov %vm13482_vm1  ;;  %vm13497_vm7 = vcmask 1045504  }
 0x609   :  { %v4552_v57 = vsel %vm1165_vm6, %v4548_v12, %v7783_v30  ;;  %v4570_v19 = vsel %vm13482_vm1, %v11146_v8, %v4541_v15  ;;  %v4565_v28 = vsel %vm1165_vm6, %v4561_v31, %v7797_v33  ;;  %vm13494_vm1 = vmmov %vm13488_vm2 }
 0x60a   :  { %7392 = vmatmul.msk.f32.gmra.mxu1 %vm1165_vm6, %v4570_v19  ;;  %v4556_v35 = vsel %vm13491_vm15, %v4552_v57, %v7788_v18  ;;  %vm13495_vm15 = vmmov %vm13494_vm1 }
 0x60b   :  { %vm13496_vm2 = vmmov %vm13493_vm5 }
 0x60c   :  { %4609 = vmatmul.f32.gmra.mxu0 %v4556_v35  ;;  %4638 = vmatmul.f32.gmra.mxu3 %v4568_v52 }
 0x60d   :  { %v4533_v24 = vpop.permute.xlu1 %4532 }
 0x60e   :  { %v4569_v20 = vsel %vm13495_vm15, %v4565_v28, %v4533_v24  ;;  %vm13500_vm15 = vcmask 1042432  }
 0x610   :  { %v4409_v8 = vpop.permute.xlu0 %4408 }
 0x611   :  { %v4549_v39 = vsel %vm13493_vm5, %v11173_v37, %v4409_v8  ;;  %v11409_v37 = vpop.f32.mrf.mxu1  ;;  %vm13498_vm5 = vmmov %vm13497_vm7 }
 0x612   :  { %7393 = vmatmul.msk.f32.gmra.mxu1 %vm1165_vm6, %v4549_v39  ;;  %v4553_v23 = vsel %vm1165_vm6, %v4549_v39, %v7798_v61 }
 0x613   :  { %v4557_v48 = vsel %vm13494_vm1, %v4553_v23, %v4453_v53  ;;  %vm13499_vm1 = vcmask 1046528  }
 0x614   :  { %4612 = vmatmul.f32.gmra.mxu0 %v4557_v48  ;;  %4641 = vmatmul.f32.gmra.mxu3 %v4569_v20 }
 0x618   :  { %v4543_v26 = vpop.permute.xlu0 %4542 }
 0x619   :  { %v4571_v25 = vsel %vm13496_vm2, %v11275_v13, %v4543_v26  ;;  %v11412_v5 = vpop.f32.mrf.mxu1  ;;  %vm13501_vm2 = vmmov %vm13499_vm1 }
 0x61a   :  { %7394 = vmatmul.msk.f32.gmra.mxu1 %vm1165_vm6, %v4571_v25 }
 0x648   :  { %v4662_v11 = vpop.f32.mrf.mxu1 }
 0x64a   :  { %v4604_v34 = vpop.f32.mrf.mxu0 }
 0x64b   :  { %v4605_v43 = vadd.f32 %v7854_v21, %v4604_v34 }
 0x650   :  { %v4633_v7 = vpop.f32.mrf.mxu3 }
 0x651   :  { %v4634_v1 = vadd.f32 %v4633_v7, %v4605_v43 }
 0x653   :  { %v4663_v2 = vadd.f32 %v4662_v11, %v4634_v1 }
 0x655   :  { %v4674_v38 = vmax.f32 %v4663_v2, 0.0 }
 0x657   :  { %v4723_v32 = vrot.slane %v4674_v38, 4 }
 0x659   :  { %v11415_v42 = vsel %vm673_vm4, 0.0, %v4723_v32 }
 0x65a   :  { %v4787_v44 = vrot.slane %v11415_v42, 3  ;;  %v4765_v36 = vrot.slane %v11415_v42, 2  ;;  %v4743_v46 = vrot.slane %v11415_v42, 1  ;;  %v4823_v30 = vrot.slane %v11415_v42, 5 }
 0x65b   :  { %v4867_v25 = vrot.slane %v11415_v42, 7  ;;  %v4845_v1 = vrot.slane %v11415_v42, 6 }
 0x681   :  { %v4607_v41 = vpop.f32.mrf.mxu0 }
 0x682   :  { %v4608_v0 = vadd.f32 %v7854_v21, %v4607_v41 }
 0x687   :  { %v4636_v9 = vpop.f32.mrf.mxu3  ;;  %v4665_v17 = vpop.f32.mrf.mxu1 }
 0x688   :  { %v4637_v13 = vadd.f32 %v4636_v9, %v4608_v0 }
 0x689   :  { %v4610_v27 = vpop.f32.mrf.mxu0 }
 0x68a   :  { %v4666_v59 = vadd.f32 %v4665_v17, %v4637_v13  ;;  %v4611_v54 = vadd.f32 %v7854_v21, %v4610_v27 }
 0x68c   :  { %v4675_v56 = vmax.f32 %v4666_v59, 0.0 }
 0x68e   :  { %v4724_v50 = vrot.slane %v4675_v56, 4 }
 0x68f   :  { %v4639_v62 = vpop.f32.mrf.mxu3  ;;  %v4668_v22 = vpop.f32.mrf.mxu1 }
 0x690   :  { %v11420_v47 = vsel %vm673_vm4, %v4723_v32, %v4724_v50  ;;  %v11423_v3 = vsel %vm673_vm4, %v4724_v50, 0.0  ;;  %v4640_v58 = vadd.f32 %v4639_v62, %v4611_v54 }
 0x691   :  { %v4788_v40 = vrot.slane %v11420_v47, 3  ;;  %v4790_v14 = vrot.slane %v11423_v3, 3  ;;  %v4766_v63 = vrot.slane %v11420_v47, 2  ;;  %v4768_v4 = vrot.slane %v11423_v3, 2  ;;  %v4613_v49 = vpop.f32.mrf.mxu0 }
 0x692   :  { %v4669_v10 = vadd.f32 %v4668_v22, %v4640_v58  ;;  %v4744_v55 = vrot.slane %v11420_v47, 1  ;;  %v4824_v12 = vrot.slane %v11420_v47, 5  ;;  %v4614_v52 = vadd.f32 %v7854_v21, %v4613_v49  ;;  %v4693_v22 = vld [vmem:[%s11451_s30 + $0x78] sm:$0xff]  ;;  %v4691_v58 = vld [vmem:[%s11451_s30 + $0x68] sm:$0xff] }
 0x693   :  { %v4789_v15 = vsel %vm567_vm3, %v4787_v44, %v4788_v40  ;;  %v4791_v57 = vsel %vm567_vm3, %v4788_v40, %v4790_v14  ;;  %v4767_v51 = vsel %vm13497_vm7, %v4765_v36, %v4766_v63  ;;  %v4769_v18 = vsel %vm13498_vm5, %v4766_v63, %v4768_v4  ;;  %v4692_v44 = vld [vmem:[%s11451_s30 + $0x70] sm:$0xff]  ;;  %4938 = vmatpush.msrb.mxu2 %v4693_v22  ;;  %v4690_v14 = vld [vmem:[%s11451_s30 + $0x60] sm:$0xff]  ;;  %v4687_v49 = vld [vmem:[%s11451_s30 + $0x48] sm:$0xff] }
 0x694   :  { %v7809_v29 = vpack.i.bf16 %v4791_v57, %v4789_v15  ;;  %v7804_v19 = vpack.i.bf16 %v4769_v18, %v4767_v51  ;;  %v4745_v45 = vsel %vm13499_vm1, %v4743_v46, %v4744_v55  ;;  %v4676_v6 = vmax.f32 %v4669_v10, 0.0  ;;  %v4689_v10 = vld [vmem:[%s11451_s30 + $0x58] sm:$0xff]  ;;  %v4678_v22 = vld [vmem:[%s11451_s30] sm:$0xff] }
 0x695   :  { %v4825_v35 = vsel %vm13500_vm15, %v4823_v30, %v4824_v12  ;;  %v4746_v39 = vrot.slane %v11423_v3, 1  ;;  %v4868_v48 = vrot.slane %v11420_v47, 7  ;;  %v4846_v20 = vrot.slane %v11420_v47, 6  ;;  %4939 = vmatpush.msrb.mxu2 %v4692_v44  ;;  %v4688_v30 = vld [vmem:[%s11451_s30 + $0x50] sm:$0xff]  ;;  %v4701_v44 = vld [vmem:[%s11451_s30 + $0xb8] sm:$0xff] }
 0x696   :  { %7810 = vrot.lane.b32.xlu0 %v7809_v29, %s8197_s18  ;;  %7805 = vrot.lane.b32.xlu2 %v7804_v19, %s8198_s19  ;;  %v7799_v60 = vpack.i.bf16 %v4825_v35, %v4745_v45  ;;  %v4726_v33 = vrot.slane %v4676_v6, 4  ;;  %v4826_v21 = vrot.slane %v11423_v3, 5  ;;  %vm13502_vm7 = vcmask 1041408  }
 0x697   :  { %v4642_v31 = vpop.f32.mrf.mxu3  ;;  %v4671_v24 = vpop.f32.mrf.mxu1  ;;  %v4747_v26 = vsel %vm13501_vm2, %v4744_v55, %v4746_v39  ;;  %v4869_v9 = vsel %vm2796_vm0, %v4867_v25, %v4868_v48  ;;  %v4847_v17 = vsel %vm13502_vm7, %v4845_v1, %v4846_v20  ;;  %v4848_v36 = vrot.slane %v11423_v3, 6  ;;  %vm13503_vm2 = vmmov %vm13498_vm5  ;;  %4940 = vmatpush.msrb.mxu2 %v4691_v58  ;;  %v4685_v25 = vld [vmem:[%s11451_s30 + $0x38] sm:$0xff]  ;;  %v4707_v1 = vld [vmem:[%s11451_s30 + $0xe8] sm:$0xff] }
 0x698   :  { %7800 = vrot.lane.b32.xlu1 %v7799_v60, %s8199_s20  ;;  %v4643_v61 = vadd.f32 %v4642_v31, %v4614_v52  ;;  %v11444_v23 = vsel %vm673_vm4, 0.0, %v4726_v33  ;;  %v4827_v59 = vsel %vm13500_vm15, %v4824_v12, %v4826_v21  ;;  %v4870_v46 = vrot.slane %v11423_v3, 7  ;;  %v4709_v21 = vld [vmem:[%s11451_s30 + $0xf8] sm:$0xff]  ;;  %v4700_v58 = vld [vmem:[%s11451_s30 + $0xb0] sm:$0xff] }
 0x699   :  { %v4792_v7 = vrot.slane %v11444_v23, 3  ;;  %v4770_v43 = vrot.slane %v11444_v23, 2  ;;  %v4748_v41 = vrot.slane %v11444_v23, 1  ;;  %v4849_v63 = vsel %vm13502_vm7, %v4846_v20, %v4848_v36  ;;  %4941 = vmatpush.msrb.mxu2 %v4690_v14  ;;  %4967 = vmatpush.msra.mxu1 %v4709_v21  ;;  %v4712_v36 = vld [vmem:[%s11451_s30 + $0x110] sm:$0xff]  ;;  %v4710_v14 = vld [vmem:[%s11451_s30 + $0x100] sm:$0xff] }
 0x69a   :  { %v4672_v8 = vadd.f32 %v4671_v24, %v4643_v61  ;;  %v4871_v55 = vsel %vm2796_vm0, %v4868_v48, %v4870_v46  ;;  %v4828_v51 = vrot.slane %v11444_v23, 5  ;;  %v4850_v29 = vrot.slane %v11444_v23, 6  ;;  %v4711_v46 = vld [vmem:[%s11451_s30 + $0x108] sm:$0xff] }
 0x69b   :  { %4942 = vmatpush.msrb.mxu2 %v4689_v10  ;;  %v4872_v60 = vrot.slane %v11444_v23, 7  ;;  %v4696_v10 = vld [vmem:[%s11451_s30 + $0x90] sm:$0xff] }
 0x69c   :  { %v4677_v53 = vmax.f32 %v4672_v8, 0.0 }
 0x69d   :  { %4943 = vmatpush.msrb.mxu2 %v4688_v30  ;;  %v4695_v30 = vld [vmem:[%s11451_s30 + $0x88] sm:$0xff] }
 0x69e   :  { %v4727_v28 = vrot.slane %v4677_v53, 4 }
 0x69f   :  { %4944 = vmatpush.msrb.mxu2 %v4687_v49 }
 0x6a0   :  { %v11457_v34 = vsel %vm673_vm4, %v4726_v33, %v4727_v28  ;;  %4755 = vrot.lane.b32.xlu1 %v4747_v26, %s8199_s20  ;;  %v11468_v0 = vsel %vm673_vm4, %v4727_v28, 0.0  ;;  %v4686_v26 = vld [vmem:[%s11451_s30 + $0x40] sm:$0xff] }
 0x6a1   :  { %v4793_v11 = vrot.slane %v11457_v34, 3  ;;  %v4771_v2 = vrot.slane %v11457_v34, 2  ;;  %v4749_v38 = vrot.slane %v11457_v34, 1  ;;  %v4773_v62 = vrot.slane %v11468_v0, 2  ;;  %4945 = vmatpush.msrb.mxu2 %v4686_v26 }
 0x6a2   :  { %v4829_v15 = vrot.slane %v11457_v34, 5  ;;  %v4751_v57 = vrot.slane %v11468_v0, 1  ;;  %v4851_v18 = vrot.slane %v11457_v34, 6  ;;  %v4795_v6 = vrot.slane %v11468_v0, 3 }
 0x6a3   :  { %v4794_v32 = vsel %vm567_vm3, %v4792_v7, %v4793_v11  ;;  %v4772_v13 = vsel %vm13498_vm5, %v4770_v43, %v4771_v2  ;;  %v4750_v27 = vsel %vm13499_vm1, %v4748_v41, %v4749_v38  ;;  %v4774_v40 = vsel %vm13503_vm2, %v4771_v2, %v4773_v62  ;;  %vm13504_vm5 = vmmov %vm13499_vm1  ;;  %v4708_v7 = vld [vmem:[%s11451_s30 + $0xf0] sm:$0xff]  ;;  %4946 = vmatpush.msrb.mxu2 %v4685_v25  ;;  %v4706_v2 = vld [vmem:[%s11451_s30 + $0xe0] sm:$0xff] }
 0x6a4   :  { %v7819_v56 = vpack.i.bf16 %v4794_v32, %v4869_v9  ;;  %v7814_v50 = vpack.i.bf16 %v4772_v13, %v4847_v17  ;;  %v7824_v54 = vpack.i.bf16 %v4827_v59, %v4750_v27  ;;  %v7829_v4 = vpack.i.bf16 %v4774_v40, %v4849_v63  ;;  %vm13505_vm1 = vmmov %vm13500_vm15  ;;  %v4684_v43 = vld [vmem:[%s11451_s30 + $0x30] sm:$0xff]  ;;  %4968 = vmatpush.msra.mxu1 %v4708_v7  ;;  %v4682_v41 = vld [vmem:[%s11451_s30 + $0x20] sm:$0xff] }
 0x6a5   :  { %v4889_v12 = vsel %vm13504_vm5, %v4746_v39, %v10189_v16  ;;  %v4830_v19 = vsel %vm13505_vm1, %v4828_v51, %v4829_v15  ;;  %vm13506_vm15 = vmmov %vm13504_vm5  ;;  %v4873_v35 = vrot.slane %v11457_v34, 7  ;;  %v4831_v31 = vrot.slane %v11468_v0, 5  ;;  %4947 = vmatpush.msrb.mxu2 %v4684_v43  ;;  %v4705_v9 = vld [vmem:[%s11451_s30 + $0xd8] sm:$0xff]  ;;  %v4715_v32 = vld [vmem:[%s11451_s30 + $0x128] sm:$0xff] }
 0x6a6   :  { %7820 = vrot.lane.b32.xlu0 %v7819_v56, %s8197_s18  ;;  %7815 = vrot.lane.b32.xlu2 %v7814_v50, %s8198_s19  ;;  %v4752_v45 = vsel %vm13506_vm15, %v4749_v38, %v4751_v57  ;;  %vm13507_vm2 = vmmov %vm13502_vm7  ;;  %v4796_v61 = vsel %vm567_vm3, %v4793_v11, %v4795_v6  ;;  %v4853_v24 = vrot.slane %v11468_v0, 6  ;;  %v4875_v28 = vrot.slane %v11468_v0, 7  ;;  %v4717_v11 = vld [vmem:[%s11451_s30 + $0x138] sm:$0xff]  ;;  %v4716_v38 = vld [vmem:[%s11451_s30 + $0x130] sm:$0xff] }
 0x6a7   :  { %v4852_v52 = vsel %vm13507_vm2, %v4850_v29, %v4851_v18  ;;  %v4874_v33 = vsel %vm2796_vm0, %v4872_v60, %v4873_v35  ;;  %vm13508_vm7 = vmmov %vm13505_vm1  ;;  %4969 = vmatpush.msra.mxu1 %v4707_v1  ;;  %5004 = vmatpush.msrb.mxu0 %v4717_v11  ;;  %v4681_v17 = vld [vmem:[%s11451_s30 + $0x18] sm:$0xff]  ;;  %v4704_v13 = vld [vmem:[%s11451_s30 + $0xd0] sm:$0xff]  ;;  %vm13512_vm1 = vcmask 785408   ;;  %v4810_v60 = vrot.slane %v11420_v47, 4 }
 0x6a8   :  { %7825 = vrot.lane.b32.xlu1 %v7824_v54, %s8199_s20  ;;  %v7834_v8 = vpack.i.bf16 %v4874_v33, %v4796_v61  ;;  %v4832_v39 = vsel %vm13508_vm7, %v4829_v15, %v4831_v31  ;;  %vm13509_vm5 = vmmov %vm13507_vm2  ;;  %v4876_v20 = vsel %vm2796_vm0, %v4873_v35, %v4875_v28  ;;  %v4680_v27 = vld [vmem:[%s11451_s30 + $0x10] sm:$0xff]  ;;  %v4703_v59 = vld [vmem:[%s11451_s30 + $0xc8] sm:$0xff]  ;;  %vm13511_vm0 = vcmask 261120  }
 0x6a9   :  { %v4854_v53 = vsel %vm13509_vm5, %v4851_v18, %v4853_v24  ;;  %vm13510_vm3 = vmmov %vm13506_vm15  ;;  %4970 = vmatpush.msra.mxu1 %v4706_v2  ;;  %5005 = vmatpush.msrb.mxu0 %v4716_v38  ;;  %v4714_v56 = vld [vmem:[%s11451_s30 + $0x120] sm:$0xff]  ;;  %v4679_v50 = vld [vmem:[%s11451_s30 + $0x8] sm:$0xff]  ;;  %v4809_v24 = vrot.slane %v11415_v42, 4 }
 0x6aa   :  { %v4890_v48 = vsel %vm13510_vm3, %v4751_v57, %v10189_v16  ;;  %v4683_v16 = vld [vmem:[%s11451_s30 + $0x28] sm:$0xff]  ;;  %v4702_v54 = vld [vmem:[%s11451_s30 + $0xc0] sm:$0xff]  ;;  %v4713_v62 = vld [vmem:[%s11451_s30 + $0x118] sm:$0xff] }
 0x6ab   :  { %4948 = vmatpush.msrb.mxu2 %v4683_v16  ;;  %4971 = vmatpush.msra.mxu1 %v4705_v9  ;;  %v4699_v40 = vld [vmem:[%s11451_s30 + $0xa8] sm:$0xff]  ;;  %v4698_v63 = vld [vmem:[%s11451_s30 + $0xa0] sm:$0xff]  ;;  %vm13513_vm15 = vmmov %vm13511_vm0 }
 0x6ac   :  { %5006 = vmatpush.msrb.mxu0 %v4715_v32  ;;  %vm13514_vm2 = vmmov %vm13511_vm0 }
 0x6ad   :  { %4949 = vmatpush.msrb.mxu2 %v4682_v41  ;;  %4972 = vmatpush.msra.mxu1 %v4704_v13  ;;  %vm13515_vm7 = vmmov %vm13512_vm1 }
 0x6ae   :  { %4879 = vrot.lane.b32.xlu0 %v4871_v55, %s8197_s18  ;;  %7830 = vrot.lane.b32.xlu2 %v7829_v4, %s8198_s19  ;;  %v4697_v4 = vld [vmem:[%s11451_s30 + $0x98] sm:$0xff]  ;;  %vm13516_vm5 = vmmov %vm13512_vm1 }
 0x6af   :  { %4950 = vmatpush.msrb.mxu2 %v4681_v17  ;;  %4973 = vmatpush.msra.mxu1 %v4703_v59  ;;  %vm13517_vm3 = vmmov %vm13511_vm0 }
 0x6b0   :  { %4891 = vrot.lane.b32.xlu1 %v4889_v12, %s8199_s20  ;;  %5007 = vmatpush.msrb.mxu0 %v4714_v56  ;;  %v4694_v12 = vld [vmem:[%s11451_s30 + $0x80] sm:$0xff]  ;;  %s8224_s30 = smov 27  }
 0x6b1   :  { %4951 = vmatpush.msrb.mxu2 %v4680_v27  ;;  %4974 = vmatpush.msra.mxu1 %v4702_v54  ;;  %s13242_s1 = sld [smem:[%s13297_s0 + %s8224_s30]]  }
 0x6b2   :  { %5008 = vmatpush.msrb.mxu0 %v4713_v62 }
 0x6b3   :  { %4952 = vmatpush.msrb.mxu2 %v4679_v50  ;;  %4975 = vmatpush.msra.mxu1 %v4701_v44 }
 0x6b4   :  { %5009 = vmatpush.msrb.mxu0 %v4712_v36 }
 0x6b5   :  { %4953 = vmatpush.msrb.mxu2 %v4678_v22  ;;  %4976 = vmatpush.msra.mxu1 %v4700_v58  ;;  %v4815_v58 = vrot.slane %v11457_v34, 4 }
 0x6b6   :  { %4837 = vrot.lane.b32.xlu0 %v4830_v19, %s8199_s20  ;;  %4759 = vrot.lane.b32.xlu2 %v4752_v45, %s8199_s20 }
 0x6b7   :  { %5010 = vmatpush.msrb.mxu0 %v4711_v46  ;;  %4977 = vmatpush.msra.mxu1 %v4699_v40  ;;  %v4814_v40 = vrot.slane %v11444_v23, 4 }
 0x6b8   :  { %4859 = vrot.lane.b32.xlu1 %v4852_v52, %s8198_s19 }
 0x6b9   :  { %5011 = vmatpush.msrb.mxu0 %v4710_v14  ;;  %4978 = vmatpush.msra.mxu1 %v4698_v63  ;;  %v4816_v63 = vsel %vm673_vm4, %v4814_v40, %v4815_v58 }
 0x6bb   :  { %4979 = vmatpush.msra.mxu1 %v4697_v4 }
 0x6bd   :  { %4980 = vmatpush.msra.mxu1 %v4696_v10 }
 0x6be   :  { %4839 = vrot.lane.b32.xlu0 %v4832_v39, %s8199_s20  ;;  %7835 = vrot.lane.b32.xlu2 %v7834_v8, %s8197_s18 }
 0x6bf   :  { %4981 = vmatpush.msra.mxu1 %v4695_v30 }
 0x6c0   :  { %4861 = vrot.lane.b32.xlu1 %v4854_v53, %s8198_s19  ;;  %v4811_v53 = vsel %vm673_vm4, %v4809_v24, %v4810_v60 }
 0x6c1   :  { %4982 = vmatpush.msra.mxu1 %v4694_v12 }
 0x6c6   :  { %4893 = vrot.lane.b32.xlu0 %v4890_v48, %s8199_s20  ;;  %4883 = vrot.lane.b32.xlu2 %v4876_v20, %s8197_s18  ;;  %s8217_s18 = smov 20  }
 0x6c7   :  { %s11567_s2 = sld [smem:[%s13297_s0 + %s8217_s18]]  }
 0x6f0   :  { %v7806_v55 = vpop.permute.xlu2 %7805 }
 0x6f1   :  { %v7807_v18 = vunpack.i.l.bf16 %v7806_v55  ;;  %v7808_v52 = vunpack.i.h.bf16 %v7806_v55 }
 0x700   :  { %v7816_v49 = vpop.permute.xlu2 %7815 }
 0x701   :  { %v7817_v26 = vunpack.i.l.bf16 %v7816_v49  ;;  %v7818_v11 = vunpack.i.h.bf16 %v7816_v49 }
 0x708   :  { %v7811_v15 = vpop.permute.xlu0 %7810  ;;  %v7831_v29 = vpop.permute.xlu2 %7830 }
 0x709   :  { %v7812_v19 = vunpack.i.l.bf16 %v7811_v15  ;;  %v7813_v39 = vunpack.i.h.bf16 %v7811_v15  ;;  %v7832_v13 = vunpack.i.l.bf16 %v7831_v29  ;;  %v7833_v36 = vunpack.i.h.bf16 %v7831_v29 }
 0x70a   :  { %v7801_v57 = vpop.permute.xlu1 %7800 }
 0x70b   :  { %v7802_v51 = vunpack.i.l.bf16 %v7801_v57  ;;  %v7803_v61 = vunpack.i.h.bf16 %v7801_v57 }
 0x70d   :  { %v4897_v45 = vsel %vm13511_vm0, %v11415_v42, %v7802_v51  ;;  %v4909_v48 = vsel %vm13514_vm2, %v4811_v53, %v7803_v61  ;;  %v4812_v42 = vrot.slane %v11423_v3, 4  ;;  %vm13518_vm0 = vmmov %vm13512_vm1 }
 0x70e   :  { %v4901_v6 = vsel %vm1165_vm6, %v4897_v45, %v7807_v18 }
 0x70f   :  { %v4905_v35 = vsel %vm13512_vm1, %v4901_v6, %v7812_v19  ;;  %v4813_v9 = vsel %vm673_vm4, %v4810_v60, %v4812_v42  ;;  %vm13519_vm1 = vmmov %vm13514_vm2 }
 0x710   :  { %4954 = vmatmul.f32.vlgmr.msrb.gmra.mxu2 %v4905_v35  ;;  %v4760_v28 = vpop.permute.xlu2 %4759  ;;  %vm13521_vm2 = vmmov %vm13519_vm1  ;;  %v11621_v35 = vld [vmem:[%s11567_s2] ss:$0 sm:$0xff]  ;;  %s8225_s2 = smov 28  }
 0x711   :  { %s13264_s5 = sld [smem:[%s13297_s0 + %s8225_s2]]  }
 0x712   :  { %v4756_v31 = vpop.permute.xlu1 %4755 }
 0x713   :  { %v4898_v33 = vsel %vm13513_vm15, %v11420_v47, %v4756_v31  ;;  %v4913_v47 = vsel %vm1165_vm6, %v4909_v48, %v7817_v26  ;;  %vm13520_vm15 = vmmov %vm13519_vm1 }
 0x714   :  { %7395 = vmatmul.msk.f32.vlgmr.msrb.gmra.mxu0 %vm1165_vm6, %v4898_v33  ;;  %v4902_v8 = vsel %vm1165_vm6, %v4898_v33, %v7808_v52  ;;  %v4900_v54 = vsel %vm13520_vm15, %v11457_v34, %v4760_v28  ;;  %vm13525_vm15 = vmmov %vm13518_vm0  ;;  %v7853_v52 = vld [vmem:[%s11129_s15] ss:$0 sm:$0xff]  ;;  %s8221_s15 = smov 24  }
 0x715   :  { %v4906_v20 = vsel %vm13515_vm7, %v4902_v8, %v7813_v39  ;;  %vm13522_vm7 = vmmov %vm13518_vm0  ;;  %v4904_v46 = vsel %vm1165_vm6, %v4900_v54, %v7833_v36  ;;  %v11626_v61 = vadd.f32 %v7853_v52, %v11409_v37  ;;  %v11629_v53 = vadd.f32 %v7853_v52, %v11412_v5  ;;  %s11659_s21 = sld [smem:[%s13297_s0 + %s8221_s15]]  }
 0x717   :  { %v5211_v28 = vrot.slane %v11626_v61, 1  ;;  %v5213_v26 = vrot.slane %v11626_v61, 3 }
 0x718   :  { %4957 = vmatmul.f32.gmra.mxu2 %v4906_v20  ;;  %v7821_v25 = vpop.permute.xlu0 %7820  ;;  %v7836_v27 = vpop.permute.xlu2 %7835  ;;  %v5212_v20 = vrot.slane %v11626_v61, 2 }
 0x719   :  { %v7822_v21 = vunpack.i.l.bf16 %v7821_v25  ;;  %v7823_v2 = vunpack.i.h.bf16 %v7821_v25  ;;  %v7837_v62 = vunpack.i.l.bf16 %v7836_v27  ;;  %v7838_v10 = vunpack.i.h.bf16 %v7836_v27 }
 0x71a   :  { %v7826_v7 = vpop.permute.xlu1 %7825 }
 0x71b   :  { %v7828_v43 = vunpack.i.h.bf16 %v7826_v7  ;;  %v7827_v16 = vunpack.i.l.bf16 %v7826_v7  ;;  %v4917_v1 = vsel %vm13516_vm5, %v4913_v47, %v7822_v21  ;;  %vm13523_vm5 = vmmov %vm13518_vm0 }
 0x71c   :  { %4983 = vmatmul.f32.vlgmr.msra.gmra.mxu1 %v4917_v1  ;;  %v4908_v14 = vsel %vm13523_vm5, %v4904_v46, %v7837_v62  ;;  %vm13545_vm5 = vmmov %vm13519_vm1 }
 0x71d   :  { %v4899_v41 = vsel %vm13517_vm3, %v11444_v23, %v7827_v16  ;;  %v4910_v32 = vsel %vm13519_vm1, %v4813_v9, %v7828_v43  ;;  %vm13524_vm3 = vmmov %vm13519_vm1  ;;  %v4817_v23 = vrot.slane %v11468_v0, 4 }
 0x71e   :  { %v4903_v38 = vsel %vm1165_vm6, %v4899_v41, %v7818_v11  ;;  %v4914_v50 = vsel %vm1165_vm6, %v4910_v32, %v7832_v13 }
 0x71f   :  { %v4907_v17 = vsel %vm13518_vm0, %v4903_v38, %v7823_v2  ;;  %v4818_v12 = vsel %vm673_vm4, %v4815_v58, %v4817_v23 }
 0x720   :  { %4960 = vmatmul.f32.gmra.mxu2 %v4907_v17  ;;  %v4880_v59 = vpop.permute.xlu0 %4879  ;;  %v4884_v51 = vpop.permute.xlu2 %4883 }
 0x721   :  { %v4918_v44 = vsel %vm13522_vm7, %v4914_v50, %v4880_v59  ;;  %vm13544_vm7 = vmmov %vm13519_vm1 }
 0x722   :  { %v4892_v56 = vpop.permute.xlu1 %4891 }
 0x723   :  { %v4921_v22 = vsel %vm13521_vm2, %v11423_v3, %v4892_v56  ;;  %vm13526_vm2 = vmmov %vm13519_vm1 }
 0x724   :  { %7396 = vmatmul.msk.f32.gmra.mxu0 %vm1165_vm6, %v4921_v22  ;;  %4986 = vmatmul.f32.gmra.mxu1 %v4918_v44 }
 0x728   :  { %4963 = vmatmul.f32.gmra.mxu2 %v4908_v14  ;;  %v4838_v4 = vpop.permute.xlu0 %4837 }
 0x729   :  { %v4911_v3 = vsel %vm13524_vm3, %v4816_v63, %v4838_v4  ;;  %vm13549_vm3 = vmmov %vm13519_vm1 }
 0x72a   :  { %v4860_v55 = vpop.permute.xlu1 %4859 }
 0x72b   :  { %v4915_v30 = vsel %vm1165_vm6, %v4911_v3, %v4860_v55 }
 0x72c   :  { %7397 = vmatmul.msk.f32.gmra.mxu0 %vm1165_vm6, %v4900_v54  ;;  %v4919_v34 = vsel %vm13518_vm0, %v4915_v30, %v7838_v10  ;;  %vm13558_vm0 = vmmov %vm13519_vm1 }
 0x72d   :  { %4989 = vmatmul.f32.gmra.mxu1 %v4919_v34 }
 0x730   :  { %v4840_v49 = vpop.permute.xlu0 %4839 }
 0x731   :  { %v4912_v15 = vsel %vm13519_vm1, %v4818_v12, %v4840_v49 }
 0x732   :  { %v4862_v57 = vpop.permute.xlu1 %4861 }
 0x733   :  { %v4916_v18 = vsel %vm1165_vm6, %v4912_v15, %v4862_v57 }
 0x734   :  { %v4920_v29 = vsel %vm13525_vm15, %v4916_v18, %v4884_v51  ;;  %v11663_v18 = vld [vmem:[%s11585_s6] ss:$0 sm:$0xff] }
 0x735   :  { %4992 = vmatmul.f32.gmra.mxu1 %v4920_v29  ;;  %v11666_v29 = vld [vmem:[%s11592_s10] ss:$0 sm:$0xff] }
 0x738   :  { %v4894_v19 = vpop.permute.xlu0 %4893 }
 0x739   :  { %v4922_v45 = vsel %vm13526_vm2, %v11468_v0, %v4894_v19 }
 0x73a   :  { %7398 = vmatmul.msk.f32.gmra.mxu0 %vm1165_vm6, %v4922_v45 }
 0x791   :  { %v5013_v24 = vpop.f32.mrf.mxu0 }
 0x793   :  { %v4955_v6 = vpop.f32.mrf.mxu2 }
 0x794   :  { %v4956_v60 = vadd.f32 %v11621_v35, %v4955_v6 }
 0x799   :  { %v4984_v31 = vpop.f32.mrf.mxu1 }
 0x79a   :  { %v4985_v33 = vadd.f32 %v4984_v31, %v4956_v60  ;;  %v5272_v31 = vld [vmem:[%s11646_s14 + $0x78] sm:$0xff] }
 0x79b   :  { %v4958_v8 = vpop.f32.mrf.mxu2  ;;  %5412 = vmatpush.msrb.mxu1 %v5272_v31 }
 0x79c   :  { %v5014_v39 = vadd.f32 %v5013_v24, %v4985_v33  ;;  %v4959_v48 = vadd.f32 %v11621_v35, %v4958_v8  ;;  %v5268_v33 = vld [vmem:[%s11646_s14 + $0x58] sm:$0xff] }
 0x79d   :  { %5413 = vmatpush.msrb.mxu1 %v5268_v33 }
 0x79e   :  { %v5025_v0 = vmax.f32 %v5014_v39, 0.0 }
 0x7a0   :  { %v5033_v37 = vrot.slane %v5025_v0, 2  ;;  %v5034_v21 = vrot.slane %v5025_v0, 4  ;;  %v5035_v7 = vrot.slane %v5025_v0, 6  ;;  %v5057_v47 = vsel %vm3730_vm8, %v5025_v0, -inf }
 0x7a1   :  { %v5058_v42 = vrot.slane %v5057_v47, 4  ;;  %v4987_v43 = vpop.f32.mrf.mxu1  ;;  %v5016_v27 = vpop.f32.mrf.mxu0 }
 0x7a2   :  { %v5064_v11 = vsel %vm3730_vm8, %v5033_v37, -inf  ;;  %v5071_v2 = vsel %vm3730_vm8, %v5034_v21, -inf  ;;  %v5078_v41 = vsel %vm3730_vm8, %v5035_v7, -inf  ;;  %v4988_v38 = vadd.f32 %v4987_v43, %v4959_v48  ;;  %v5270_v48 = vld [vmem:[%s11646_s14 + $0x68] sm:$0xff]  ;;  %v5269_v21 = vld [vmem:[%s11646_s14 + $0x60] sm:$0xff] }
 0x7a3   :  { %v5059_v9 = vmax.f32 %v5057_v47, %v5058_v42  ;;  %v5065_v17 = vrot.slane %v5064_v11, 4  ;;  %v5072_v32 = vrot.slane %v5071_v2, 4  ;;  %v5079_v13 = vrot.slane %v5078_v41, 4  ;;  %v4961_v59 = vpop.f32.mrf.mxu2  ;;  %v5266_v37 = vld [vmem:[%s11646_s14 + $0x48] sm:$0xff]  ;;  %5366 = vmatpush.msra.mxu2 %v5270_v48  ;;  %5343 = vmatpush.msrb.mxu3 %v5269_v21 }
 0x7a4   :  { %v5017_v56 = vadd.f32 %v5016_v27, %v4988_v38  ;;  %v11652_v46 = vadd.f32 %v11621_v35, %v4961_v59 }
 0x7a5   :  { %v5060_v22 = vrot.slane %v5059_v9, 2  ;;  %v5066_v44 = vmax.f32 %v5064_v11, %v5065_v17  ;;  %v5073_v36 = vmax.f32 %v5071_v2, %v5072_v32  ;;  %v5080_v58 = vmax.f32 %v5078_v41, %v5079_v13  ;;  %v5264_v11 = vld [vmem:[%s11646_s14 + $0x38] sm:$0xff]  ;;  %v5265_v2 = vld [vmem:[%s11646_s14 + $0x40] sm:$0xff]  ;;  %v5262_v32 = vld [vmem:[%s11646_s14 + $0x28] sm:$0xff]  ;;  %5367 = vmatpush.msra.mxu2 %v5266_v37 }
 0x7a6   :  { %v5026_v40 = vmax.f32 %v5017_v56, 0.0  ;;  %v5261_v13 = vld [vmem:[%s11646_s14 + $0x20] sm:$0xff]  ;;  %5344 = vmatpush.msrb.mxu3 %v5265_v2  ;;  %5414 = vmatpush.msrb.mxu1 %v5264_v11 }
 0x7a7   :  { %v5061_v4 = vmax.f32 %v5059_v9, %v5060_v22  ;;  %v5067_v3 = vrot.slane %v5066_v44, 2  ;;  %v5074_v10 = vrot.slane %v5073_v36, 2  ;;  %v5081_v55 = vrot.slane %v5080_v58, 2  ;;  %5368 = vmatpush.msra.mxu2 %v5262_v32 }
 0x7a8   :  { %v5036_v30 = vrot.slane %v5026_v40, 2  ;;  %v5037_v34 = vrot.slane %v5026_v40, 4  ;;  %v5038_v23 = vrot.slane %v5026_v40, 6  ;;  %v5085_v12 = vsel %vm3730_vm8, %v5026_v40, -inf  ;;  %5345 = vmatpush.msrb.mxu3 %v5261_v13 }
 0x7a9   :  { %v5062_v49 = vrot.slane %v5061_v4, 1  ;;  %v5068_v15 = vmax.f32 %v5066_v44, %v5067_v3  ;;  %v5075_v57 = vmax.f32 %v5073_v36, %v5074_v10  ;;  %v5082_v51 = vmax.f32 %v5080_v58, %v5081_v55  ;;  %v5260_v44 = vld [vmem:[%s11646_s14 + $0x18] sm:$0xff]  ;;  %v5019_v3 = vpop.f32.mrf.mxu0  ;;  %v5258_v10 = vld [vmem:[%s11646_s14 + $0x8] sm:$0xff] }
 0x7aa   :  { %v5086_v19 = vrot.slane %v5085_v12, 4  ;;  %v5092_v45 = vsel %vm3730_vm8, %v5036_v30, -inf  ;;  %v5099_v6 = vsel %vm3730_vm8, %v5037_v34, -inf  ;;  %v5106_v52 = vsel %vm3730_vm8, %v5038_v23, -inf  ;;  %v11671_v60 = vpop.f32.mrf.mxu1  ;;  %v11690_v55 = vld [vmem:[%s11659_s21 + $0x1f8] sm:$0xff]  ;;  %5415 = vmatpush.msrb.mxu1 %v5260_v44  ;;  %5369 = vmatpush.msra.mxu2 %v5258_v10 }
 0x7ab   :  { %v5063_v24 = vmax.f32 %v5061_v4, %v5062_v49  ;;  %v5069_v8 = vrot.slane %v5068_v15, 1  ;;  %v5076_v39 = vrot.slane %v5075_v57, 1  ;;  %v5083_v0 = vrot.slane %v5082_v51, 1  ;;  %v4964_v49 = vpop.f32.mrf.mxu2 }
 0x7ac   :  { %v5087_v7 = vmax.f32 %v5085_v12, %v5086_v19  ;;  %v5093_v47 = vrot.slane %v5092_v45, 4  ;;  %v5100_v42 = vrot.slane %v5099_v6, 4  ;;  %v5107_v43 = vrot.slane %v5106_v52, 4  ;;  %5547 = vmatpush.msra.mxu1 %v11690_v55 }
 0x7ad   :  { %v5070_v41 = vmax.f32 %v5068_v15, %v5069_v8  ;;  %v5077_v38 = vmax.f32 %v5075_v57, %v5076_v39  ;;  %v5084_v9 = vmax.f32 %v5082_v51, %v5083_v0  ;;  %v5173_v17 = vmul.f32 %v11663_v18, %v5063_v24  ;;  %v11693_v15 = vld [vmem:[%s11659_s21 + $0x1e8] sm:$0xff] }
 0x7ae   :  { %v5088_v27 = vrot.slane %v5087_v7, 2  ;;  %v5094_v59 = vmax.f32 %v5092_v45, %v5093_v47  ;;  %v5101_v56 = vmax.f32 %v5099_v6, %v5100_v42  ;;  %v5108_v22 = vmax.f32 %v5106_v52, %v5107_v43  ;;  %v5257_v6 = vld [vmem:[%s11646_s14] sm:$0xff]  ;;  %v11701_v52 = vld [vmem:[%s11659_s21 + $0x1d8] sm:$0xff]  ;;  %v11705_v0 = vld [vmem:[%s11659_s21 + $0x1c8] sm:$0xff]  ;;  %5507 = vmatpush.msrb.mxu2 %v11693_v15 }
 0x7af   :  { %v5174_v36 = vmul.f32 %v11663_v18, %v5070_v41  ;;  %v5175_v58 = vmul.f32 %v11663_v18, %v5077_v38  ;;  %v5176_v40 = vmul.f32 %v11663_v18, %v5084_v9  ;;  %v5193_v4 = vadd.f32 %v11666_v29, %v5173_v17  ;;  %v11718_v47 = vld [vmem:[%s11659_s21 + $0x1e0] sm:$0xff]  ;;  %v11721_v42 = vld [vmem:[%s11659_s21 + $0x1b8] sm:$0xff]  ;;  %5346 = vmatpush.msrb.mxu3 %v5257_v6  ;;  %v5267_v6 = vld [vmem:[%s11646_s14 + $0x50] sm:$0xff] }
 0x7b0   :  { %v5089_v30 = vmax.f32 %v5087_v7, %v5088_v27  ;;  %v5095_v34 = vrot.slane %v5094_v59, 2  ;;  %v5102_v23 = vrot.slane %v5101_v56, 2  ;;  %v5109_v12 = vrot.slane %v5108_v22, 2  ;;  %5548 = vmatpush.msra.mxu1 %v11701_v52  ;;  %5508 = vmatpush.msrb.mxu2 %v11705_v0  ;;  %v11737_v9 = vld [vmem:[%s11659_s21 + $0x198] sm:$0xff] }
 0x7b1   :  { %v5194_v57 = vadd.f32 %v11666_v29, %v5174_v36  ;;  %v5195_v51 = vadd.f32 %v11666_v29, %v5175_v58  ;;  %v5196_v19 = vadd.f32 %v11666_v29, %v5176_v40  ;;  %v5241_v45 = vadd.f32 %v5193_v4, %v11626_v61  ;;  %5487 = vmatpush.msra.mxu0 %v11718_v47  ;;  %v11755_v40 = vld [vmem:[%s11659_s21 + $0x178] sm:$0xff]  ;;  %v5271_v4 = vld [vmem:[%s11646_s14 + $0x70] sm:$0xff]  ;;  %v11845_v58 = vld [vmem:[%s11659_s21 + $0xc8] sm:$0xff] }
 0x7b2   :  { %v5090_v31 = vrot.slane %v5089_v30, 1  ;;  %v5096_v33 = vmax.f32 %v5094_v59, %v5095_v34  ;;  %v5103_v24 = vmax.f32 %v5101_v56, %v5102_v23  ;;  %v5110_v8 = vmax.f32 %v5108_v22, %v5109_v12  ;;  %v4993_v39 = vpop.f32.mrf.mxu1  ;;  %5549 = vmatpush.msra.mxu1 %v11721_v42  ;;  %v11742_v59 = vld [vmem:[%s11659_s21 + $0x188] sm:$0xff]  ;;  %v11745_v56 = vld [vmem:[%s11659_s21 + $0x1a0] sm:$0xff]  ;;  %5389 = vmatpush.msra.mxu3 %v5271_v4 }
 0x7b3   :  { %v5242_v48 = vadd.f32 %v5211_v28, %v5194_v57  ;;  %v11711_v37 = vadd.f32 %v5212_v20, %v5195_v51  ;;  %v4965_v21 = vadd.f32 %v11621_v35, %v4964_v49  ;;  %v4991_v7 = vadd.f32 %v11671_v60, %v11652_v46  ;;  %v11725_v35 = vld [vmem:[%s11659_s21 + $0x1a8] sm:$0xff]  ;;  %v11728_v20 = vld [vmem:[%s11659_s21 + $0x1c0] sm:$0xff]  ;;  %13530 = vst [vmem:[#allocation7_spill] sm:$0xff] %v11845_v58 }
 0x7b4   :  { %v5091_v43 = vmax.f32 %v5089_v30, %v5090_v31  ;;  %v5097_v11 = vrot.slane %v5096_v33, 1  ;;  %v5104_v2 = vrot.slane %v5103_v24, 1  ;;  %v5111_v28 = vrot.slane %v5110_v8, 1  ;;  %5509 = vmatpush.msrb.mxu2 %v11725_v35  ;;  %5488 = vmatpush.msra.mxu0 %v11728_v20  ;;  %v11765_v23 = vld [vmem:[%s11659_s21 + $0x168] sm:$0xff]  ;;  %v11768_v12 = vld [vmem:[%s11659_s21 + $0x180] sm:$0xff] }
 0x7b5   :  { %v5299_v46 = vrot.slane %v5242_v48, 7  ;;  %v5020_v60 = vadd.f32 %v5019_v3, %v4991_v7  ;;  %v4994_v41 = vadd.f32 %v4993_v39, %v4965_v21  ;;  %v11733_v38 = vadd.f32 %v5213_v26, %v5196_v19  ;;  %5550 = vmatpush.msra.mxu1 %v11737_v9  ;;  %v11785_v39 = vld [vmem:[%s11659_s21 + $0x148] sm:$0xff]  ;;  %v11788_v48 = vld [vmem:[%s11659_s21 + $0x160] sm:$0xff]  ;;  %5390 = vmatpush.msra.mxu3 %v5267_v6 }
 0x7b6   :  { %v5098_v17 = vmax.f32 %v5096_v33, %v5097_v11  ;;  %v5105_v32 = vmax.f32 %v5103_v24, %v5104_v2  ;;  %v5112_v13 = vmax.f32 %v5110_v8, %v5111_v28  ;;  %v5177_v27 = vmul.f32 %v11663_v18, %v5091_v43  ;;  %5510 = vmatpush.msrb.mxu2 %v11742_v59  ;;  %v11799_v2 = vld [vmem:[%s11659_s21 + $0x138] sm:$0xff]  ;;  %v5263_v28 = vld [vmem:[%s11646_s14 + $0x30] sm:$0xff]  ;;  %v11821_v6 = vld [vmem:[%s11659_s21 + $0x120] sm:$0xff] }
 0x7b7   :  { %v5027_v26 = vmax.f32 %v5020_v60, 0.0  ;;  %v5022_v22 = vpop.f32.mrf.mxu0  ;;  %v11748_v44 = vsel %vm2219_vm11, %v5299_v46, %v5241_v45  ;;  %5489 = vmatpush.msra.mxu0 %v11745_v56  ;;  %v11774_v45 = vld [vmem:[%s11659_s21 + $0x158] sm:$0xff]  ;;  %5551 = vmatpush.msra.mxu1 %v11755_v40 }
 0x7b8   :  { %v5178_v3 = vmul.f32 %v11663_v18, %v5098_v17  ;;  %v11760_v10 = vadd.f32 %v11666_v29, %v5177_v27  ;;  %v5023_v30 = vadd.f32 %v5022_v22, %v4994_v41  ;;  %v5179_v34 = vmul.f32 %v11663_v18, %v5105_v32  ;;  %5511 = vmatpush.msrb.mxu2 %v11765_v23  ;;  %v11804_v32 = vld [vmem:[%s11659_s21 + $0x128] sm:$0xff] }
 0x7b9   :  { %v5039_v49 = vrot.slane %v5027_v26, 2  ;;  %v5040_v57 = vrot.slane %v5027_v26, 4  ;;  %v5041_v51 = vrot.slane %v5027_v26, 6  ;;  %v5113_v19 = vsel %vm3730_vm8, %v5027_v26, -inf  ;;  %5490 = vmatpush.msra.mxu0 %v11768_v12  ;;  %5552 = vmatpush.msra.mxu1 %v11774_v45 }
 0x7ba   :  { %v5114_v31 = vrot.slane %v5113_v19, 4  ;;  %v5028_v33 = vmax.f32 %v5023_v30, 0.0  ;;  %v11778_v24 = vmul.f32 %v11663_v18, %v5112_v13  ;;  %v11781_v8 = vadd.f32 %v11666_v29, %v5178_v3  ;;  %v11807_v13 = vld [vmem:[%s11659_s21 + $0x140] sm:$0xff]  ;;  %5512 = vmatpush.msrb.mxu2 %v11785_v39  ;;  %v11813_v3 = vld [vmem:[%s11659_s21 + $0x118] sm:$0xff]  ;;  %v5259_v30 = vld [vmem:[%s11646_s14 + $0x10] sm:$0xff]  ;;  %5391 = vmatpush.msra.mxu3 %v5263_v28 }
 0x7bb   :  { %v5120_v21 = vsel %vm3730_vm8, %v5039_v49, -inf  ;;  %v5127_v7 = vsel %vm3730_vm8, %v5040_v57, -inf  ;;  %v5134_v43 = vsel %vm3730_vm8, %v5041_v51, -inf  ;;  %v11794_v11 = vadd.f32 %v11666_v29, %v5179_v34  ;;  %5491 = vmatpush.msra.mxu0 %v11788_v48  ;;  %5553 = vmatpush.msra.mxu1 %v11799_v2 }
 0x7bc   :  { %v5115_v46 = vmax.f32 %v5113_v19, %v5114_v31  ;;  %v5121_v60 = vrot.slane %v5120_v21, 4  ;;  %v5128_v41 = vrot.slane %v5127_v7, 4  ;;  %v5135_v17 = vrot.slane %v5134_v43, 4  ;;  %v11818_v19 = vld [vmem:[%s11659_s21 + $0x108] sm:$0xff]  ;;  %5513 = vmatpush.msrb.mxu2 %v11804_v32  ;;  %5392 = vmatpush.msra.mxu3 %v5259_v30 }
 0x7bd   :  { %v5042_v27 = vrot.slane %v5028_v33, 2  ;;  %v5043_v26 = vrot.slane %v5028_v33, 4  ;;  %v5044_v22 = vrot.slane %v5028_v33, 6  ;;  %v5141_v4 = vsel %vm3730_vm8, %v5028_v33, -inf  ;;  %5492 = vmatpush.msra.mxu0 %v11807_v13  ;;  %5554 = vmatpush.msra.mxu1 %v11813_v3 }
 0x7be   :  { %v5116_v34 = vrot.slane %v5115_v46, 2  ;;  %v5122_v49 = vmax.f32 %v5120_v21, %v5121_v60  ;;  %v5129_v57 = vmax.f32 %v5127_v7, %v5128_v41  ;;  %v5136_v51 = vmax.f32 %v5134_v43, %v5135_v17  ;;  %v11829_v21 = vld [vmem:[%s11659_s21 + $0xf8] sm:$0xff]  ;;  %v11833_v41 = vld [vmem:[%s11659_s21 + $0xe8] sm:$0xff]  ;;  %v11836_v17 = vld [vmem:[%s11659_s21 + $0x100] sm:$0xff]  ;;  %5514 = vmatpush.msrb.mxu2 %v11818_v19 }
 0x7bf   :  { %v5142_v31 = vrot.slane %v5141_v4, 4  ;;  %v5148_v33 = vsel %vm3730_vm8, %v5042_v27, -inf  ;;  %v5155_v63 = vsel %vm3730_vm8, %v5043_v26, -inf  ;;  %v5162_v14 = vsel %vm3730_vm8, %v5044_v22, -inf  ;;  %13527 = vst [vmem:[#allocation4_spill] sm:$0xff] %v11829_v21  ;;  %5493 = vmatpush.msra.mxu0 %v11821_v6  ;;  %5555 = vmatpush.msra.mxu1 %v11829_v21 }
 0x7c0   :  { %v5117_v7 = vmax.f32 %v5115_v46, %v5116_v34  ;;  %v5123_v43 = vrot.slane %v5122_v49, 2  ;;  %v5130_v28 = vrot.slane %v5129_v57, 2  ;;  %v5137_v60 = vrot.slane %v5136_v51, 2  ;;  %13528 = vst [vmem:[#allocation6_spill] sm:$0xff] %v11833_v41  ;;  %v11841_v46 = vld [vmem:[%s11659_s21 + $0xd8] sm:$0xff]  ;;  %5515 = vmatpush.msrb.mxu2 %v11833_v41 }
 0x7c1   :  { %v5143_v27 = vmax.f32 %v5141_v4, %v5142_v31  ;;  %v5149_v26 = vrot.slane %v5148_v33, 4  ;;  %v5156_v22 = vrot.slane %v5155_v63, 4  ;;  %v5163_v62 = vrot.slane %v5162_v14, 4  ;;  %13529 = vst [vmem:[#allocation5_spill] sm:$0xff] %v11841_v46  ;;  %v11848_v4 = vld [vmem:[%s11659_s21 + $0xe0] sm:$0xff]  ;;  %5494 = vmatpush.msra.mxu0 %v11836_v17  ;;  %5556 = vmatpush.msra.mxu1 %v11841_v46  ;;  %v11870_v46 = vld [vmem:[%s11659_s21 + $0x88] sm:$0xff] }
 0x7c2   :  { %v5118_v34 = vrot.slane %v5117_v7, 1  ;;  %v5124_v54 = vmax.f32 %v5122_v49, %v5123_v43  ;;  %v5131_v50 = vmax.f32 %v5129_v57, %v5130_v28  ;;  %v5138_v30 = vmax.f32 %v5136_v51, %v5137_v60  ;;  %v11853_v49 = vld [vmem:[%s11659_s21 + $0xb8] sm:$0xff]  ;;  %v11857_v60 = vld [vmem:[%s11659_s21 + $0xa8] sm:$0xff]  ;;  %5516 = vmatpush.msrb.mxu2 %v11845_v58  ;;  %13533 = vst [vmem:[#allocation9_spill] sm:$0xff] %v11870_v46 }
 0x7c3   :  { %v5144_v31 = vrot.slane %v5143_v27, 2  ;;  %v5150_v36 = vmax.f32 %v5148_v33, %v5149_v26  ;;  %v5157_v1 = vmax.f32 %v5155_v63, %v5156_v22  ;;  %v5164_v16 = vmax.f32 %v5162_v14, %v5163_v62  ;;  %13531 = vst [vmem:[#allocation3_spill] sm:$0xff] %v11853_v49  ;;  %v11860_v33 = vld [vmem:[%s11659_s21 + $0xc0] sm:$0xff]  ;;  %5495 = vmatpush.msra.mxu0 %v11848_v4 }
 0x7c4   :  { %v5119_v57 = vmax.f32 %v5117_v7, %v5118_v34  ;;  %v5125_v51 = vrot.slane %v5124_v54, 1  ;;  %v5132_v43 = vrot.slane %v5131_v50, 1  ;;  %v5139_v28 = vrot.slane %v5138_v30, 1  ;;  %v11865_v7 = vld [vmem:[%s11659_s21 + $0x98] sm:$0xff]  ;;  %5557 = vmatpush.msra.mxu1 %v11853_v49  ;;  %5517 = vmatpush.msrb.mxu2 %v11857_v60 }
 0x7c5   :  { %v5145_v62 = vmax.f32 %v5143_v27, %v5144_v31  ;;  %v5151_v14 = vrot.slane %v5150_v36, 2  ;;  %v5158_v63 = vrot.slane %v5157_v1, 2  ;;  %v5165_v26 = vrot.slane %v5164_v16, 2  ;;  %13532 = vst [vmem:[#allocation8_spill] sm:$0xff] %v11865_v7  ;;  %v11873_v27 = vld [vmem:[%s11659_s21 + $0xa0] sm:$0xff]  ;;  %5496 = vmatpush.msra.mxu0 %v11860_v33 }
 0x7c6   :  { %v5126_v22 = vmax.f32 %v5124_v54, %v5125_v51  ;;  %v5133_v34 = vmax.f32 %v5131_v50, %v5132_v43  ;;  %v5140_v5 = vmax.f32 %v5138_v30, %v5139_v28  ;;  %v5181_v25 = vmul.f32 %v11663_v18, %v5119_v57  ;;  %v11878_v50 = vld [vmem:[%s11659_s21 + $0x78] sm:$0xff]  ;;  %5558 = vmatpush.msra.mxu1 %v11865_v7 }
 0x7c7   :  { %v5146_v31 = vrot.slane %v5145_v62, 1  ;;  %v5152_v21 = vmax.f32 %v5150_v36, %v5151_v14  ;;  %v5159_v58 = vmax.f32 %v5157_v1, %v5158_v63  ;;  %v5166_v41 = vmax.f32 %v5164_v16, %v5165_v26  ;;  %v11888_v16 = vld [vmem:[%s11659_s21 + $0x68] sm:$0xff]  ;;  %5518 = vmatpush.msrb.mxu2 %v11870_v46  ;;  %5497 = vmatpush.msra.mxu0 %v11873_v27  ;;  %v11893_v14 = vld [vmem:[%s11659_s21 + $0x80] sm:$0xff] }
 0x7c8   :  { %v5182_v54 = vmul.f32 %v11663_v18, %v5126_v22  ;;  %v5183_v30 = vmul.f32 %v11663_v18, %v5133_v34  ;;  %v5184_v57 = vmul.f32 %v11663_v18, %v5140_v5  ;;  %v11884_v51 = vadd.f32 %v11666_v29, %v5181_v25  ;;  %v11896_v5 = vld [vmem:[%s11659_s21 + $0x58] sm:$0xff]  ;;  %5559 = vmatpush.msra.mxu1 %v11878_v50 }
 0x7c9   :  { %v5147_v1 = vmax.f32 %v5145_v62, %v5146_v31  ;;  %v5153_v36 = vrot.slane %v5152_v21, 1  ;;  %v5160_v43 = vrot.slane %v5159_v58, 1  ;;  %v5167_v28 = vrot.slane %v5166_v41, 1  ;;  %v11909_v31 = vld [vmem:[%s11659_s21 + $0x48] sm:$0xff]  ;;  %5519 = vmatpush.msrb.mxu2 %v11888_v16  ;;  %5498 = vmatpush.msra.mxu0 %v11893_v14 }
 0x7ca   :  { %v5202_v25 = vadd.f32 %v11666_v29, %v5182_v54  ;;  %v5200_v63 = vadd.f32 %v11666_v29, %v11778_v24  ;;  %v13534_v62 = vrot.slane %v11626_v61, 4  ;;  %v13535_v22 = vrot.slane %v11626_v61, 5  ;;  %5560 = vmatpush.msra.mxu1 %v11896_v5 }
 0x7cb   :  { %v5154_v7 = vmax.f32 %v5152_v21, %v5153_v36  ;;  %v5161_v46 = vmax.f32 %v5159_v58, %v5160_v43  ;;  %v5185_v54 = vmul.f32 %v11663_v18, %v5147_v1  ;;  %v13536_v24 = vrot.slane %v11626_v61, 6  ;;  %5520 = vmatpush.msrb.mxu2 %v11909_v31 }
 0x7cc   :  { %v5245_v26 = vadd.f32 %v13534_v62, %v11760_v10  ;;  %v5246_v34 = vadd.f32 %v13535_v22, %v11781_v8  ;;  %v11917_v10 = vld [vmem:[%s11659_s21 + $0x60] sm:$0xff]  ;;  %v11920_v62 = vld [vmem:[%s11659_s21 + $0x38] sm:$0xff]  ;;  %v13537_v8 = vrot.slane %v11626_v61, 7  ;;  %v13538_v21 = vrot.slane %v11711_v37, 6 }
 0x7cd   :  { %v5247_v49 = vadd.f32 %v13536_v24, %v11794_v11  ;;  %v11931_v11 = vld [vmem:[%s11659_s21 + $0x28] sm:$0xff]  ;;  %v13539_v43 = vrot.slane %v11733_v38, 5  ;;  %v11939_v37 = vld [vmem:[%s11659_s21 + $0x40] sm:$0xff]  ;;  %5499 = vmatpush.msra.mxu0 %v11917_v10  ;;  %5561 = vmatpush.msra.mxu1 %v11920_v62  ;;  %vm13541_vm8 = vcmask 1047559  }
 0x7ce   :  { %v5248_v22 = vadd.f32 %v13537_v8, %v5200_v63  ;;  %v5302_v58 = vsel %vm2222_vm10, %v13538_v21, %v11748_v44  ;;  %v5305_v1 = vrot.slane %v5245_v26, 4  ;;  %v5307_v36 = vrot.slane %v5246_v34, 3  ;;  %v11947_v38 = vld [vmem:[%s11659_s21 + $0x8] sm:$0xff]  ;;  %5521 = vmatpush.msrb.mxu2 %v11931_v11 }
 0x7cf   :  { %v5304_v24 = vsel %vm2225_vm12, %v13539_v43, %v5302_v58  ;;  %v5309_v61 = vrot.slane %v5247_v49, 2  ;;  %v5168_v63 = vmax.f32 %v5166_v41, %v5167_v28  ;;  %v5186_v8 = vmul.f32 %v11663_v18, %v5154_v7  ;;  %13540 = vst [vmem:[#allocation10_spill] sm:$0xff] %v11947_v38  ;;  %5500 = vmatpush.msra.mxu0 %v11939_v37 }
 0x7d0   :  { %v5306_v44 = vsel %vm2228_vm13, %v5305_v1, %v5304_v24  ;;  %v5311_v26 = vrot.slane %v5248_v22, 1  ;;  %v5187_v34 = vmul.f32 %v11663_v18, %v5161_v46  ;;  %v5203_v21 = vadd.f32 %v11666_v29, %v5183_v30  ;;  %v11956_v30 = vld [vmem:[%s11659_s21 + $0x1f0] sm:$0xff]  ;;  %5522 = vmatpush.msrb.mxu2 %v11947_v38  ;;  %v11997_v38 = vld [vmem:[%s11659_s21] sm:$0xff] }
 0x7d1   :  { %v5308_v41 = vsel %vm2231_vm9, %v5307_v36, %v5306_v44  ;;  %v5188_v49 = vmul.f32 %v11663_v18, %v5168_v63  ;;  %v5204_v7 = vadd.f32 %v11666_v29, %v5184_v57  ;;  %v5205_v28 = vadd.f32 %v11666_v29, %v5185_v54  ;;  %v11975_v63 = vld [vmem:[%s11659_s21 + $0x20] sm:$0xff] }
 0x7d2   :  { %v5310_v46 = vsel %vm2234_vm14, %v5309_v61, %v5308_v41  ;;  %v5206_v22 = vadd.f32 %v11666_v29, %v5186_v8  ;;  %v5207_v58 = vadd.f32 %v11666_v29, %v5187_v34  ;;  %v5223_v1 = vrot.slane %v11629_v53, 6  ;;  %v11972_v61 = vld [vmem:[%s11659_s21 + $0x18] sm:$0xff]  ;;  %5501 = vmatpush.msra.mxu0 %v11975_v63 }
 0x7d3   :  { %v11963_v18 = vsel %vm13541_vm8, %v5311_v26, %v5310_v46  ;;  %v5208_v57 = vadd.f32 %v11666_v29, %v5188_v49  ;;  %v13542_v54 = vrot.slane %v11629_v53, 1  ;;  %v13543_v43 = vrot.slane %v11629_v53, 2  ;;  %v11982_v29 = vld [vmem:[%s11659_s21 + $0x1d0] sm:$0xff]  ;;  %5562 = vmatpush.msra.mxu1 %v11972_v61 }
 0x7d4   :  { %7399 = vmatmul.msk.f32.vlgmr.msrb.gmra.mxu3 %vm13544_vm7, %v11963_v18  ;;  %7401 = vmatmul.msk.f32.vlgmr.msra.gmra.mxu2 %vm13545_vm5, %v11963_v18  ;;  %v13546_v8 = vrot.slane %v11629_v53, 3  ;;  %v13547_v26 = vrot.slane %v11629_v53, 4  ;;  %v5249_v49 = vadd.f32 %v11884_v51, %v11629_v53  ;;  %v5255_v46 = vadd.f32 %v5223_v1, %v5207_v58  ;;  %v12008_v51 = vld [vmem:[%s11659_s21 + $0x190] sm:$0xff] }
 0x7d5   :  { %v5250_v36 = vadd.f32 %v13542_v54, %v5202_v25  ;;  %v5251_v24 = vadd.f32 %v13543_v43, %v5203_v21  ;;  %v5224_v25 = vrot.slane %v11629_v53, 7  ;;  %v13548_v21 = vrot.slane %v11629_v53, 5  ;;  %7405 = vmatmul.msk.f32.vlgmr.msrb.gmra.mxu1 %vm13549_vm3, %v11963_v18  ;;  %5527 = vmatpush.msrb.mxu3 %v11956_v30 }
 0x7d6   :  { %v5252_v44 = vadd.f32 %v13546_v8, %v5204_v7  ;;  %v5253_v34 = vadd.f32 %v13547_v26, %v5205_v28  ;;  %v12000_v7 = vld [vmem:[%s11659_s21 + $0x1b0] sm:$0xff]  ;;  %5732 = vmatpush.msra.mxu2 %v11693_v15  ;;  %v5323_v1 = vrot.slane %v5255_v46, 2  ;;  %5502 = vmatpush.msra.mxu0 %v11997_v38 }
 0x7d7   :  { %v5254_v41 = vadd.f32 %v13548_v21, %v5206_v22  ;;  %v5313_v54 = vrot.slane %v5250_v36, 7  ;;  %v5315_v43 = vrot.slane %v5251_v24, 6  ;;  %5528 = vmatpush.msrb.mxu3 %v11982_v29  ;;  %v5256_v22 = vadd.f32 %v5224_v25, %v5208_v57  ;;  %5772 = vmatpush.msrb.mxu1 %v11690_v55  ;;  %v12018_v25 = vld [vmem:[%s11659_s21 + $0x170] sm:$0xff] }
 0x7d8   :  { %v5319_v28 = vrot.slane %v5253_v34, 4  ;;  %v5317_v26 = vrot.slane %v5252_v44, 5  ;;  %v13550_v36 = vmov 0.0   ;;  %5712 = vmatpush.msrb.mxu0 %v11718_v47  ;;  %5733 = vmatpush.msra.mxu2 %v11705_v0  ;;  %v12037_v46 = vld [vmem:[%s11659_s21 + $0x130] sm:$0xff] }
 0x7d9   :  { %v5314_v8 = vsel %vm2219_vm11, %v5313_v54, %v5249_v49  ;;  %v5321_v53 = vrot.slane %v5254_v41, 3  ;;  %5529 = vmatpush.msrb.mxu3 %v12000_v7  ;;  %5503 = vmatmul.f32.vlgmr.msra.gmra.mxu0 %v13550_v36  ;;  %v5325_v34 = vrot.slane %v5256_v22, 1  ;;  %v12027_v41 = vld [vmem:[%s11659_s21 + $0x150] sm:$0xff] }
 0x7da   :  { %v5316_v58 = vsel %vm2222_vm10, %v5315_v43, %v5314_v8  ;;  %5773 = vmatpush.msrb.mxu1 %v11701_v52  ;;  %5713 = vmatpush.msrb.mxu0 %v11728_v20  ;;  %vm13551_vm10 = vmmov %vm13541_vm8  ;;  %v12042_v54 = vld [vmem:[%s11659_s21 + $0x110] sm:$0xff] }
 0x7db   :  { %v5318_v57 = vsel %vm2225_vm12, %v5317_v26, %v5316_v58  ;;  %5530 = vmatpush.msrb.mxu3 %v12008_v51  ;;  %5734 = vmatpush.msra.mxu2 %v11725_v35  ;;  %vm13552_vm12 = vmmov %vm13519_vm1  ;;  %v12049_v43 = vld [vmem:[%s11659_s21 + $0xf0] sm:$0xff] }
 0x7dc   :  { %v5320_v24 = vsel %vm2228_vm13, %v5319_v28, %v5318_v57  ;;  %5774 = vmatpush.msrb.mxu1 %v11721_v42  ;;  %vm13554_vm13 = vmmov %vm13519_vm1  ;;  %5714 = vmatpush.msrb.mxu0 %v11745_v56  ;;  %v12056_v28 = vld [vmem:[%s11659_s21 + $0xd0] sm:$0xff]  ;;  %v13559_v57 = vld [vmem:[#allocation7_spill] sm:$0xff] }
 0x7dd   :  { %v5322_v44 = vsel %vm2231_vm9, %v5321_v53, %v5320_v24  ;;  %5531 = vmatpush.msrb.mxu3 %v12018_v25  ;;  %vm13553_vm9 = vmmov %vm13519_vm1  ;;  %5735 = vmatpush.msra.mxu2 %v11742_v59  ;;  %v12066_v22 = vld [vmem:[%s11659_s21 + $0xb0] sm:$0xff]  ;;  %v13556_v53 = vld [vmem:[#allocation6_spill] sm:$0xff] }
 0x7de   :  { %v5324_v21 = vsel %vm2234_vm14, %v5323_v1, %v5322_v44  ;;  %5775 = vmatpush.msrb.mxu1 %v11737_v9  ;;  %5715 = vmatpush.msrb.mxu0 %v11768_v12  ;;  %vm13555_vm14 = vmmov %vm13519_vm1  ;;  %v12071_v8 = vld [vmem:[%s11659_s21 + $0x90] sm:$0xff] }
 0x7df   :  { %v5326_v49 = vsel %vm13551_vm10, %v5325_v34, %v5324_v21  ;;  %5532 = vmatpush.msrb.mxu3 %v12027_v41  ;;  %5736 = vmatpush.msra.mxu2 %v11765_v23  ;;  %v12085_v26 = vld [vmem:[%s11659_s21 + $0x50] sm:$0xff]  ;;  %v13561_v34 = vld [vmem:[#allocation3_spill] sm:$0xff] }
 0x7e0   :  { %7400 = vmatmul.msk.f32.gmra.mxu3 %vm13552_vm12, %v5326_v49  ;;  %7402 = vmatmul.msk.f32.gmra.mxu2 %vm13553_vm9, %v5326_v49  ;;  %v13557_v58 = vld [vmem:[#allocation4_spill] sm:$0xff]  ;;  %v13560_v44 = vld [vmem:[#allocation5_spill] sm:$0xff] }
 0x7e1   :  { %7406 = vmatmul.msk.f32.gmra.mxu1 %vm13554_vm13, %v5326_v49  ;;  %5533 = vmatpush.msrb.mxu3 %v12037_v46  ;;  %v12093_v1 = vld [vmem:[%s11659_s21 + $0x30] sm:$0xff] }
 0x7e2   :  { %5776 = vmatpush.msrb.mxu1 %v11755_v40  ;;  %5716 = vmatpush.msrb.mxu0 %v11788_v48  ;;  %v12099_v24 = vld [vmem:[%s11659_s21 + $0x10] sm:$0xff] }
 0x7e3   :  { %5534 = vmatpush.msrb.mxu3 %v12042_v54  ;;  %5737 = vmatpush.msra.mxu2 %v11785_v39  ;;  %v13562_v21 = vld [vmem:[#allocation9_spill] sm:$0xff] }
 0x7e4   :  { %5777 = vmatpush.msrb.mxu1 %v11774_v45  ;;  %5717 = vmatpush.msrb.mxu0 %v11807_v13 }
 0x7e5   :  { %5535 = vmatpush.msrb.mxu3 %v12049_v43  ;;  %5738 = vmatpush.msra.mxu2 %v11804_v32 }
 0x7e6   :  { %5778 = vmatpush.msrb.mxu1 %v11799_v2  ;;  %5718 = vmatpush.msrb.mxu0 %v11821_v6 }
 0x7e7   :  { %5536 = vmatpush.msrb.mxu3 %v12056_v28  ;;  %5739 = vmatpush.msra.mxu2 %v11818_v19 }
 0x7e8   :  { %7403 = vmatmul.msk.f32.vlgmr.msra.gmra.mxu3 %vm13555_vm14, %v11963_v18  ;;  %5523 = vmatmul.f32.vlgmr.msrb.gmra.mxu2 %v13550_v36  ;;  %v12078_v18 = vld [vmem:[%s11659_s21 + $0x70] sm:$0xff] }
 0x7e9   :  { %5563 = vmatmul.f32.vlgmr.msra.gmra.mxu1 %v13550_v36  ;;  %5537 = vmatpush.msrb.mxu3 %v12066_v22 }
 0x7ea   :  { %5779 = vmatpush.msrb.mxu1 %v11813_v3  ;;  %5719 = vmatpush.msrb.mxu0 %v11836_v17 }
 0x7eb   :  { %5538 = vmatpush.msrb.mxu3 %v12071_v8  ;;  %5740 = vmatpush.msra.mxu2 %v13556_v53 }
 0x7ec   :  { %5780 = vmatpush.msrb.mxu1 %v13557_v58  ;;  %5720 = vmatpush.msrb.mxu0 %v11848_v4 }
 0x7ed   :  { %5539 = vmatpush.msrb.mxu3 %v12078_v18  ;;  %5741 = vmatpush.msra.mxu2 %v13559_v57 }
 0x7ee   :  { %5721 = vmatpush.msrb.mxu0 %v11860_v33  ;;  %5781 = vmatpush.msrb.mxu1 %v13560_v44 }
 0x7ef   :  { %5540 = vmatpush.msrb.mxu3 %v12085_v26  ;;  %5742 = vmatpush.msra.mxu2 %v11857_v60 }
 0x7f0   :  { %7404 = vmatmul.msk.f32.gmra.mxu3 %vm13558_vm0, %v5326_v49  ;;  %5722 = vmatpush.msrb.mxu0 %v11873_v27  ;;  %v13563_v49 = vld [vmem:[#allocation8_spill] sm:$0xff] }
 0x7f1   :  { %5541 = vmatpush.msrb.mxu3 %v12093_v1  ;;  %5782 = vmatpush.msrb.mxu1 %v13561_v34 }
 0x7f2   :  { %5743 = vmatpush.msra.mxu2 %v13562_v21  ;;  %5723 = vmatpush.msrb.mxu0 %v11893_v14 }
 0x7f3   :  { %5542 = vmatpush.msrb.mxu3 %v12099_v24  ;;  %5783 = vmatpush.msrb.mxu1 %v13563_v49 }
 0x7f4   :  { %5744 = vmatpush.msra.mxu2 %v11888_v16  ;;  %5724 = vmatpush.msrb.mxu0 %v11917_v10 }
 0x7f5   :  { %5752 = vmatpush.msra.mxu3 %v11956_v30  ;;  %5784 = vmatpush.msrb.mxu1 %v11878_v50 }
 0x7f6   :  { %5725 = vmatpush.msrb.mxu0 %v11939_v37  ;;  %5745 = vmatpush.msra.mxu2 %v11909_v31 }
 0x7f7   :  { %5753 = vmatpush.msra.mxu3 %v11982_v29  ;;  %5785 = vmatpush.msrb.mxu1 %v11896_v5 }
 0x7f8   :  { %5543 = vmatmul.f32.vlgmr.msrb.gmra.mxu3 %v13550_v36  ;;  %5726 = vmatpush.msrb.mxu0 %v11975_v63  ;;  %v13564_v36 = vld [vmem:[#allocation10_spill] sm:$0xff] }
 0x7f9   :  { %5754 = vmatpush.msra.mxu3 %v12000_v7  ;;  %5746 = vmatpush.msra.mxu2 %v11931_v11 }
 0x7fa   :  { %5786 = vmatpush.msrb.mxu1 %v11920_v62  ;;  %5727 = vmatpush.msrb.mxu0 %v11997_v38 }
 0x7fb   :  { %5755 = vmatpush.msra.mxu3 %v12008_v51  ;;  %5747 = vmatpush.msra.mxu2 %v13564_v36 }
 0x7fc   :  { %5787 = vmatpush.msrb.mxu1 %v11972_v61  ;;  %5929 = vmatpush.msra.mxu0 %v11718_v47 }
 0x7fd   :  { %5756 = vmatpush.msra.mxu3 %v12018_v25  ;;  %5949 = vmatpush.msrb.mxu2 %v11693_v15  ;;  %v12207_v15 = vld [vmem:[%s7355_s25] sm:$0xf] }
 0x7fe   :  { %5989 = vmatpush.msra.mxu1 %v11690_v55  ;;  %5930 = vmatpush.msra.mxu0 %v11728_v20  ;;  %v5276_v20 = vperm.slane %v12207_v15, 1 }
 0x7ff   :  { %5757 = vmatpush.msra.mxu3 %v12027_v41  ;;  %5950 = vmatpush.msrb.mxu2 %v11705_v0  ;;  %v5278_v0 = vperm.slane %v12207_v15, 3 }
 0x800   :  { %5990 = vmatpush.msra.mxu1 %v11701_v52  ;;  %5931 = vmatpush.msra.mxu0 %v11745_v56 }
 0x801   :  { %5758 = vmatpush.msra.mxu3 %v12037_v46  ;;  %5951 = vmatpush.msrb.mxu2 %v11725_v35 }
 0x802   :  { %5991 = vmatpush.msra.mxu1 %v11721_v42  ;;  %5932 = vmatpush.msra.mxu0 %v11768_v12 }
 0x803   :  { %5759 = vmatpush.msra.mxu3 %v12042_v54  ;;  %5952 = vmatpush.msrb.mxu2 %v11742_v59 }
 0x804   :  { %5992 = vmatpush.msra.mxu1 %v11737_v9  ;;  %5933 = vmatpush.msra.mxu0 %v11788_v48 }
 0x805   :  { %5760 = vmatpush.msra.mxu3 %v12049_v43  ;;  %5953 = vmatpush.msrb.mxu2 %v11765_v23 }
 0x806   :  { %5993 = vmatpush.msra.mxu1 %v11755_v40  ;;  %5934 = vmatpush.msra.mxu0 %v11807_v13 }
 0x807   :  { %5761 = vmatpush.msra.mxu3 %v12056_v28  ;;  %5954 = vmatpush.msrb.mxu2 %v11785_v39 }
 0x808   :  { %5994 = vmatpush.msra.mxu1 %v11774_v45  ;;  %5935 = vmatpush.msra.mxu0 %v11821_v6 }
 0x809   :  { %5762 = vmatpush.msra.mxu3 %v12066_v22  ;;  %5955 = vmatpush.msrb.mxu2 %v11804_v32 }
 0x80a   :  { %5995 = vmatpush.msra.mxu1 %v11799_v2  ;;  %5936 = vmatpush.msra.mxu0 %v11836_v17  ;;  %v5275_v17 = vperm.slane %v12207_v15, 0 }
 0x80b   :  { %5763 = vmatpush.msra.mxu3 %v12071_v8  ;;  %5956 = vmatpush.msrb.mxu2 %v11818_v19 }
 0x80c   :  { %5996 = vmatpush.msra.mxu1 %v11813_v3  ;;  %5937 = vmatpush.msra.mxu0 %v11848_v4 }
 0x80d   :  { %5764 = vmatpush.msra.mxu3 %v12078_v18  ;;  %5957 = vmatpush.msrb.mxu2 %v13556_v53 }
 0x80e   :  { %5997 = vmatpush.msra.mxu1 %v13557_v58  ;;  %5938 = vmatpush.msra.mxu0 %v11860_v33 }
 0x80f   :  { %5765 = vmatpush.msra.mxu3 %v12085_v26  ;;  %5958 = vmatpush.msrb.mxu2 %v13559_v57 }
 0x810   :  { %5998 = vmatpush.msra.mxu1 %v13560_v44  ;;  %5939 = vmatpush.msra.mxu0 %v11873_v27 }
 0x811   :  { %5766 = vmatpush.msra.mxu3 %v12093_v1  ;;  %5959 = vmatpush.msrb.mxu2 %v11857_v60 }
 0x812   :  { %5999 = vmatpush.msra.mxu1 %v13561_v34  ;;  %5940 = vmatpush.msra.mxu0 %v11893_v14 }
 0x813   :  { %5767 = vmatpush.msra.mxu3 %v12099_v24  ;;  %5960 = vmatpush.msrb.mxu2 %v13562_v21 }
 0x814   :  { %6000 = vmatpush.msra.mxu1 %v13563_v49  ;;  %5941 = vmatpush.msra.mxu0 %v11917_v10 }
 0x815   :  { %5969 = vmatpush.msrb.mxu3 %v11956_v30  ;;  %5961 = vmatpush.msrb.mxu2 %v11888_v16 }
 0x816   :  { %6001 = vmatpush.msra.mxu1 %v11878_v50  ;;  %5942 = vmatpush.msra.mxu0 %v11939_v37 }
 0x817   :  { %5970 = vmatpush.msrb.mxu3 %v11982_v29  ;;  %5962 = vmatpush.msrb.mxu2 %v11909_v31 }
 0x818   :  { %6002 = vmatpush.msra.mxu1 %v11896_v5  ;;  %5943 = vmatpush.msra.mxu0 %v11975_v63 }
 0x819   :  { %5971 = vmatpush.msrb.mxu3 %v12000_v7  ;;  %5963 = vmatpush.msrb.mxu2 %v11931_v11 }
 0x81a   :  { %6003 = vmatpush.msra.mxu1 %v11920_v62  ;;  %5944 = vmatpush.msra.mxu0 %v11997_v38 }
 0x81b   :  { %5972 = vmatpush.msrb.mxu3 %v12008_v51  ;;  %5964 = vmatpush.msrb.mxu2 %v13564_v36 }
 0x81c   :  { %6004 = vmatpush.msra.mxu1 %v11972_v61 }
 0x81d   :  { %5973 = vmatpush.msrb.mxu3 %v12018_v25 }
 0x81f   :  { %5974 = vmatpush.msrb.mxu3 %v12027_v41 }
 0x821   :  { %5975 = vmatpush.msrb.mxu3 %v12037_v46 }
 0x823   :  { %5976 = vmatpush.msrb.mxu3 %v12042_v54 }
 0x825   :  { %5977 = vmatpush.msrb.mxu3 %v12049_v43 }
 0x827   :  { %5978 = vmatpush.msrb.mxu3 %v12056_v28 }
 0x829   :  { %5979 = vmatpush.msrb.mxu3 %v12066_v22 }
 0x82b   :  { %5980 = vmatpush.msrb.mxu3 %v12071_v8 }
 0x82d   :  { %5981 = vmatpush.msrb.mxu3 %v12078_v18 }
 0x82f   :  { %5982 = vmatpush.msrb.mxu3 %v12085_v26 }
 0x831   :  { %5983 = vmatpush.msrb.mxu3 %v12093_v1 }
 0x833   :  { %5984 = vmatpush.msrb.mxu3 %v12099_v24 }
 0x852   :  { %v5417_v55 = vpop.f32.mrf.mxu1 }
 0x853   :  { %v5418_v35 = vadd.f32 %v5417_v55, %v5278_v0 }
 0x855   :  { %v5586_v40 = vrot.slane %v5418_v35, 7  ;;  %v5803_v27 = vrot.slane %v5418_v35, 6  ;;  %v6022_v50 = vrot.slane %v5418_v35, 5  ;;  %v6241_v16 = vrot.slane %v5418_v35, 4 }
 0x856   :  { %v6460_v5 = vrot.slane %v5418_v35, 3  ;;  %v6679_v31 = vrot.slane %v5418_v35, 2  ;;  %v6897_v10 = vrot.slane %v5418_v35, 1 }
 0x857   :  { %v5371_v52 = vpop.f32.mrf.mxu2  ;;  %v5348_v6 = vpop.f32.mrf.mxu3 }
 0x858   :  { %v12217_v48 = vadd.f32 %v5371_v52, %v5276_v20  ;;  %v12228_v4 = vadd.f32 %v5348_v6, %v5275_v17 }
 0x85a   :  { %v5792_v14 = vrot.slane %v12228_v4, 1  ;;  %v5794_v11 = vrot.slane %v12217_v48, 1  ;;  %v6009_v55 = vrot.slane %v12228_v4, 2 }
 0x85e   :  { %v5420_v47 = vpop.f32.mrf.mxu1 }
 0x85f   :  { %v5421_v42 = vadd.f32 %v5420_v47, %v5278_v0  ;;  %v6012_v47 = vrot.slane %v12217_v48, 2 }
 0x861   :  { %v5587_v9 = vrot.slane %v5421_v42, 6  ;;  %v5804_v62 = vrot.slane %v5421_v42, 5  ;;  %v6023_v53 = vrot.slane %v5421_v42, 4  ;;  %v6242_v58 = vrot.slane %v5421_v42, 3 }
 0x862   :  { %v6461_v57 = vrot.slane %v5421_v42, 2  ;;  %v6680_v44 = vrot.slane %v5421_v42, 1  ;;  %v12235_v34 = vsel %vm2219_vm11, %v5421_v42, %v6897_v10  ;;  %v7114_v21 = vrot.slane %v5421_v42, 7 }
 0x863   :  { %v5374_v59 = vpop.f32.mrf.mxu2  ;;  %v5588_v12 = vsel %vm2219_vm11, %v5587_v9, %v5586_v40  ;;  %v5351_v60 = vpop.f32.mrf.mxu3  ;;  %13565 = vst [vmem:[#allocation6_spill] sm:$0xff] %v12235_v34  ;;  %v12238_v49 = vsel %vm2219_vm11, %v5804_v62, %v5803_v27  ;;  %v12242_v52 = vsel %vm2219_vm11, %v6023_v53, %v6022_v50  ;;  %v12245_v0 = vsel %vm2219_vm11, %v6242_v58, %v6241_v16  ;;  %v12483_v34 = vld [vmem:[%s11659_s21 + $0xf8] sm:$0xff] }
 0x864   :  { %v12211_v56 = vadd.f32 %v5374_v59, %v5276_v20  ;;  %v12230_v33 = vadd.f32 %v5351_v60, %v5275_v17  ;;  %13566 = vst [vmem:[#allocation4_spill] sm:$0xff] %v12242_v52  ;;  %v12249_v20 = vsel %vm2219_vm11, %v6461_v57, %v6460_v5  ;;  %v12252_v9 = vsel %vm2219_vm11, %v6680_v44, %v6679_v31 }
 0x865   :  { %13567 = vst [vmem:[#allocation7_spill] sm:$0xff] %v12245_v0  ;;  %v12255_v42 = vsel %vm2219_vm11, %v7114_v21, %v5418_v35  ;;  %v6228_v59 = vrot.slane %v12228_v4, 3  ;;  %v6231_v40 = vrot.slane %v12217_v48, 3 }
 0x866   :  { %v5564_v23 = vpop.f32.mrf.mxu1  ;;  %v5573_v39 = vrot.slane %v12211_v56, 7  ;;  %13568 = vst [vmem:[#allocation5_spill] sm:$0xff] %v12249_v20  ;;  %v12267_v35 = vsel %vm2219_vm11, %v12230_v33, %v5792_v14  ;;  %v12271_v6 = vsel %vm2219_vm11, %v12211_v56, %v5794_v11  ;;  %v6010_v17 = vrot.slane %v12230_v33, 1  ;;  %v12535_v20 = vld [vmem:[%s11659_s21 + $0x78] sm:$0xff] }
 0x867   :  { %v12214_v45 = vadd.f32 %v5588_v12, %v5564_v23  ;;  %13569 = vst [vmem:[#allocation3_spill] sm:$0xff] %v12252_v9  ;;  %v6447_v23 = vrot.slane %v12228_v4, 4  ;;  %v6450_v12 = vrot.slane %v12217_v48, 4  ;;  %v6013_v60 = vrot.slane %v12211_v56, 1  ;;  %v12509_v9 = vld [vmem:[%s11659_s21 + $0xb8] sm:$0xff] }
 0x868   :  { %v5574_v32 = vsel %vm2219_vm11, %v5573_v39, %v12217_v48  ;;  %13570 = vst [vmem:[#allocation9_spill] sm:$0xff] %v12255_v42  ;;  %v6229_v27 = vrot.slane %v12230_v33, 2  ;;  %v6232_v50 = vrot.slane %v12211_v56, 2  ;;  %v6448_v16 = vrot.slane %v12230_v33, 3 }
 0x869   :  { %7860 = vtanh.f32 %v12214_v45  ;;  %v6451_v5 = vrot.slane %v12211_v56, 3  ;;  %v12280_v31 = vsel %vm2219_vm11, %v6010_v17, %v6009_v55  ;;  %v12283_v14 = vsel %vm2219_vm11, %v6013_v60, %v6012_v47  ;;  %13594 = vst [vmem:[#allocation32_spill] sm:$0xff] %v12509_v9 }
 0x86a   :  { %13571 = vst [vmem:[#allocation8_spill] sm:$0xff] %v12280_v31  ;;  %v6667_v10 = vrot.slane %v12230_v33, 4  ;;  %v6670_v62 = vrot.slane %v12211_v56, 4  ;;  %v12288_v11 = vsel %vm2219_vm11, %v6229_v27, %v6228_v59  ;;  %v12291_v53 = vsel %vm2219_vm11, %v6232_v50, %v6231_v40 }
 0x86b   :  { %v5524_v2 = vpop.f32.mrf.mxu2  ;;  %v5394_v39 = vpop.f32.mrf.mxu3  ;;  %13572 = vst [vmem:[#allocation10_spill] sm:$0xff] %v12283_v14  ;;  %v12294_v58 = vsel %vm2219_vm11, %v6448_v16, %v6447_v23  ;;  %v12297_v57 = vsel %vm2219_vm11, %v6451_v5, %v6450_v12  ;;  %v6886_v55 = vrot.slane %v12230_v33, 5  ;;  %v6889_v47 = vrot.slane %v12211_v56, 5 }
 0x86c   :  { %v12222_v13 = vadd.f32 %v5574_v32, %v5524_v2  ;;  %v6666_v2 = vrot.slane %v12228_v4, 5  ;;  %v6669_v32 = vrot.slane %v12217_v48, 5  ;;  %13573 = vst [vmem:[#allocation11_spill] sm:$0xff] %v12288_v11  ;;  %v7102_v59 = vrot.slane %v12228_v4, 7  ;;  %v12550_v11 = vld [vmem:[%s11659_s21 + $0x28] sm:$0xff] }
 0x86d   :  { %13574 = vst [vmem:[#allocation12_spill] sm:$0xff] %v12291_v53  ;;  %v7103_v40 = vrot.slane %v12230_v33, 6  ;;  %v7105_v23 = vrot.slane %v12217_v48, 7  ;;  %v7106_v17 = vrot.slane %v12211_v56, 6  ;;  %v5571_v27 = vrot.slane %v12230_v33, 7 }
 0x86e   :  { %7862 = vtanh.f32 %v12222_v13  ;;  %13575 = vst [vmem:[#allocation13_spill] sm:$0xff] %v12294_v58  ;;  %v12300_v44 = vsel %vm2219_vm11, %v6667_v10, %v6666_v2  ;;  %v12303_v21 = vsel %vm2219_vm11, %v6670_v62, %v6669_v32  ;;  %v5277_v50 = vperm.slane %v12207_v15, 2  ;;  %v12517_v58 = vld [vmem:[%s11659_s21 + $0x88] sm:$0xff] }
 0x86f   :  { %v7861_v3 = vpop.eup %7860  ;;  %13576 = vst [vmem:[#allocation14_spill] sm:$0xff] %v12297_v57  ;;  %v12318_v32 = vsel %vm2219_vm11, %v7103_v40, %v7102_v59  ;;  %v12321_v60 = vsel %vm2219_vm11, %v7106_v17, %v7105_v23  ;;  %v5572_v56 = vsel %vm2219_vm11, %v5571_v27, %v12228_v4  ;;  %v12530_v57 = vld [vmem:[%s11659_s21 + $0x68] sm:$0xff] }
 0x870   :  { %5690 = vrot.lane.b32.xlu1 %v7861_v3, %s8198_s19  ;;  %v6885_v3 = vrot.slane %v12228_v4, 6  ;;  %13577 = vst [vmem:[#allocation15_spill] sm:$0xff] %v12300_v44  ;;  %v12491_v44 = vld [vmem:[%s11659_s21 + $0xc8] sm:$0xff] }
 0x871   :  { %13578 = vst [vmem:[#allocation16_spill] sm:$0xff] %v12303_v21  ;;  %v12504_v21 = vld [vmem:[%s11659_s21 + $0xa8] sm:$0xff] }
 0x872   :  { %v12312_v12 = vsel %vm2219_vm11, %v6886_v55, %v6885_v3  ;;  %13581 = vst [vmem:[#allocation19_spill] sm:$0xff] %v12318_v32  ;;  %v5395_v3 = vadd.f32 %v5394_v39, %v5277_v50 }
 0x873   :  { %13579 = vst [vmem:[#allocation17_spill] sm:$0xff] %v12312_v12  ;;  %v5397_v16 = vpop.f32.mrf.mxu3 }
 0x874   :  { %v7863_v19 = vpop.eup %7862  ;;  %13582 = vst [vmem:[#allocation20_spill] sm:$0xff] %v12321_v60  ;;  %v5398_v5 = vadd.f32 %v5397_v16, %v5277_v50  ;;  %v6019_v55 = vrot.slane %v5395_v3, 5  ;;  %v6238_v15 = vrot.slane %v5395_v3, 4  ;;  %v6457_v32 = vrot.slane %v5395_v3, 3 }
 0x875   :  { %5634 = vrot.lane.b32.xlu2 %v7863_v19, %s8198_s19  ;;  %v6888_v19 = vrot.slane %v12217_v48, 6  ;;  %v5504_v48 = vpop.f32.mrf.mxu0  ;;  %v6676_v39 = vrot.slane %v5395_v3, 2  ;;  %13593 = vst [vmem:[#allocation31_spill] sm:$0xff] %v12504_v21 }
 0x876   :  { %v5577_v10 = vadd.f32 %v5572_v56, %v5504_v48  ;;  %v5801_v62 = vrot.slane %v5398_v5, 5  ;;  %v6020_v59 = vrot.slane %v5398_v5, 4  ;;  %v6239_v40 = vrot.slane %v5398_v5, 3  ;;  %13596 = vst [vmem:[#allocation34_spill] sm:$0xff] %v12517_v58 }
 0x877   :  { %v12315_v2 = vsel %vm2219_vm11, %v6889_v47, %v6888_v19  ;;  %v5800_v19 = vrot.slane %v5395_v3, 6  ;;  %v6895_v47 = vrot.slane %v5395_v3, 1  ;;  %v6458_v23 = vrot.slane %v5398_v5, 2  ;;  %13599 = vst [vmem:[#allocation37_spill] sm:$0xff] %v12530_v57 }
 0x878   :  { %13580 = vst [vmem:[#allocation18_spill] sm:$0xff] %v12315_v2  ;;  %v6677_v17 = vrot.slane %v5398_v5, 1  ;;  %v12334_v4 = vsel %vm2219_vm11, %v6020_v59, %v6019_v55  ;;  %v12337_v27 = vsel %vm2219_vm11, %v6239_v40, %v6238_v15  ;;  %v7407_v16 = vmul.f32 -1.442695, %v5577_v10  ;;  %v12478_v2 = vld [vmem:[%s11659_s21 + $0xe8] sm:$0xff] }
 0x879   :  { %v12328_v33 = vsel %vm2219_vm11, %v5801_v62, %v5800_v19  ;;  %v12331_v60 = vsel %vm2219_vm11, %v5398_v5, %v6895_v47  ;;  %13584 = vst [vmem:[#allocation22_spill] sm:$0xff] %v12334_v4  ;;  %v12340_v50 = vsel %vm2219_vm11, %v6458_v23, %v6457_v32  ;;  %v7112_v56 = vrot.slane %v5398_v5, 7 }
 0x87a   :  { %13583 = vst [vmem:[#allocation21_spill] sm:$0xff] %v12331_v60  ;;  %v12343_v48 = vsel %vm2219_vm11, %v6677_v17, %v6676_v39  ;;  %7864 = vpow2.f32 %v7407_v16  ;;  %v5584_v47 = vrot.slane %v5398_v5, 6  ;;  %v5583_v59 = vrot.slane %v5395_v3, 7 }
 0x87b   :  { %13585 = vst [vmem:[#allocation23_spill] sm:$0xff] %v12337_v27  ;;  %v12346_v19 = vsel %vm2219_vm11, %v7112_v56, %v5395_v3  ;;  %v5544_v55 = vpop.f32.mrf.mxu3  ;;  %v12545_v27 = vld [vmem:[%s11659_s21 + $0x58] sm:$0xff] }
 0x87c   :  { %13586 = vst [vmem:[#allocation24_spill] sm:$0xff] %v12340_v50  ;;  %v5585_v40 = vsel %vm2219_vm11, %v5584_v47, %v5583_v59  ;;  %v12522_v50 = vld [vmem:[%s11659_s21 + $0x98] sm:$0xff] }
 0x87d   :  { %13587 = vst [vmem:[#allocation25_spill] sm:$0xff] %v12343_v48  ;;  %v5591_v15 = vadd.f32 %v5585_v40, %v5544_v55  ;;  %v12496_v48 = vld [vmem:[%s11659_s21 + $0xd8] sm:$0xff] }
 0x87e   :  { %13588 = vst [vmem:[#allocation26_spill] sm:$0xff] %v12346_v19 }
 0x87f   :  { %v7409_v32 = vmul.f32 -1.442695, %v5591_v15  ;;  %13591 = vst [vmem:[#allocation29_spill] sm:$0xff] %v12496_v48 }
 0x880   :  { %v7865_v62 = vpop.eup %7864  ;;  %13597 = vst [vmem:[#allocation35_spill] sm:$0xff] %v12522_v50 }
 0x881   :  { %v5599_v42 = vadd.f32 1.0, %v7865_v62  ;;  %13600 = vst [vmem:[#allocation38_spill] sm:$0xff] %v12535_v20 }
 0x882   :  { %13602 = vst [vmem:[#allocation40_spill] sm:$0xff] %v12545_v27 }
 0x883   :  { %7866 = vrcp.f32 %v5599_v42  ;;  %v5612_v16 = vand.u32 2147483648, %v5599_v42  ;;  %vm5606_vm15 = vweird.f32 %v5599_v42  ;;  %v5610_v5 = vand.u32 2147483647, %v5599_v42  ;;  %13603 = vst [vmem:[#allocation41_spill] sm:$0xff] %v12550_v11 }
 0x884   :  { %7868 = vpow2.f32 %v7409_v32 }
 0x885   :  { %v5613_v47 = vor.u32 1.1754944e-38, %v5612_v16  ;;  %vm5611_vm11 = vcmp.eq.f32.partialorder %v5610_v5, 8.507059e+37 }
 0x889   :  { %v7867_v23 = vpop.eup %7866 }
 0x88a   :  { %v5602_v10 = vmul.f32 %v7867_v23, %v5599_v42  ;;  %v7869_v17 = vpop.eup %7868  ;;  %vm5607_vm1 = vweird.f32 %v7867_v23 }
 0x88b   :  { %v5655_v60 = vadd.f32 1.0, %v7869_v17  ;;  %vm5608_vm2 = vmor %vm5606_vm15, %vm5607_vm1 }
 0x88c   :  { %v5603_v39 = vsub.f32 1.0, %v5602_v10 }
 0x88d   :  { %7870 = vrcp.f32 %v5655_v60  ;;  %vm5662_vm7 = vweird.f32 %v5655_v60 }
 0x88e   :  { %v5604_v12 = vmul.f32 %v7867_v23, %v5603_v39  ;;  %v5666_v39 = vand.u32 2147483647, %v5655_v60 }
 0x890   :  { %v5605_v56 = vadd.f32 %v7867_v23, %v5604_v12  ;;  %v5668_v12 = vand.u32 2147483648, %v5655_v60  ;;  %vm5667_vm3 = vcmp.eq.f32.partialorder %v5666_v39, 8.507059e+37 }
 0x892   :  { %v5609_v62 = vsel %vm5608_vm2, %v7867_v23, %v5605_v56  ;;  %v5669_v19 = vor.u32 1.1754944e-38, %v5668_v12 }
 0x893   :  { %v7871_v3 = vpop.eup %7870  ;;  %v5614_v59 = vsel %vm5611_vm11, %v5613_v47, %v5609_v62 }
 0x894   :  { %v5658_v40 = vmul.f32 %v7871_v3, %v5655_v60  ;;  %vm5663_vm8 = vweird.f32 %v7871_v3  ;;  %v5632_v5 = vmul.f32 0.0, %v5614_v59 }
 0x895   :  { %vm5664_vm5 = vmor %vm5662_vm7, %vm5663_vm8 }
 0x896   :  { %v5659_v32 = vsub.f32 1.0, %v5658_v40 }
 0x898   :  { %v5660_v10 = vmul.f32 %v7871_v3, %v5659_v32 }
 0x89a   :  { %v5661_v17 = vadd.f32 %v7871_v3, %v5660_v10 }
 0x89c   :  { %v5665_v42 = vsel %vm5664_vm5, %v7871_v3, %v5661_v17 }
 0x89d   :  { %v5670_v56 = vsel %vm5667_vm3, %v5669_v19, %v5665_v42  ;;  %v7410_v19 = vmul.f32 -1.442695, %v12214_v45 }
 0x89e   :  { %v5688_v40 = vmul.f32 0.0, %v5670_v56 }
 0x8cf   :  { %v5635_v55 = vpop.permute.xlu2 %5634 }
 0x8d0   :  { %v5637_v15 = vmul.f32 %v5635_v55, %v5614_v59 }
 0x8d2   :  { %5639 = vrot.lane.b32.xlu1 %v5637_v15, %s8198_s19 }
 0x8e2   :  { %v5691_v23 = vpop.permute.xlu1 %5690 }
 0x8e3   :  { %v5693_v16 = vmul.f32 %v5691_v23, %v5670_v56 }
 0x8e5   :  { %5695 = vrot.lane.b32.xlu0 %v5693_v16, %s8198_s19 }
 0x944   :  { %v5640_v62 = vpop.permute.xlu1 %5639 }
 0x945   :  { %v12351_v47 = vadd.f32 %v5640_v62, %v5632_v5 }
 0x947   :  { %7872 = vtanh.f32 %v12351_v47 }
 0x94d   :  { %v7873_v55 = vpop.eup %7872 }
 0x94e   :  { %5645 = vrot.lane.b32.xlu0 %v7873_v55, %s8198_s19 }
 0x957   :  { %v5696_v60 = vpop.permute.xlu0 %5695 }
 0x958   :  { %v12355_v15 = vadd.f32 %v5696_v60, %v5688_v40  ;;  %v7408_v40 = vmul.f32 -1.442695, %v12222_v13 }
 0x95a   :  { %7874 = vtanh.f32 %v12355_v15 }
 0x95b   :  { %7876 = vpow2.f32 %v7410_v19 }
 0x960   :  { %v7875_v3 = vpop.eup %7874 }
 0x961   :  { %5701 = vrot.lane.b32.xlu2 %v7875_v3, %s8198_s19  ;;  %v7877_v59 = vpop.eup %7876 }
 0x962   :  { %v5656_v32 = vadd.f32 1.0, %v7877_v59 }
 0x964   :  { %7878 = vrcp.f32 %v5656_v32  ;;  %v5683_v23 = vand.u32 2147483648, %v5656_v32  ;;  %vm5677_vm12 = vweird.f32 %v5656_v32  ;;  %v5681_v56 = vand.u32 2147483647, %v5656_v32 }
 0x965   :  { %7880 = vpow2.f32 %v7408_v40  ;;  %v12374_v40 = vld [vmem:[%s11659_s21 + $0x1e8] sm:$0xff] }
 0x966   :  { %v5684_v5 = vor.u32 1.1754944e-38, %v5683_v23  ;;  %vm5682_vm13 = vcmp.eq.f32.partialorder %v5681_v56, 8.507059e+37 }
 0x96a   :  { %v7879_v10 = vpop.eup %7878 }
 0x96b   :  { %v5673_v17 = vmul.f32 %v7879_v10, %v5656_v32  ;;  %vm5678_vm10 = vweird.f32 %v7879_v10  ;;  %v7881_v60 = vpop.eup %7880 }
 0x96c   :  { %vm5679_vm9 = vmor %vm5677_vm12, %vm5678_vm10  ;;  %v5600_v3 = vadd.f32 1.0, %v7881_v60  ;;  %v12379_v60 = vld [vmem:[%s11659_s21 + $0x1f8] sm:$0xff] }
 0x96d   :  { %v5674_v12 = vsub.f32 1.0, %v5673_v17 }
 0x96e   :  { %7882 = vrcp.f32 %v5600_v3  ;;  %vm5621_vm0 = vweird.f32 %v5600_v3 }
 0x96f   :  { %v5675_v39 = vmul.f32 %v7879_v10, %v5674_v12  ;;  %v5627_v12 = vand.u32 2147483648, %v5600_v3 }
 0x971   :  { %v5676_v42 = vadd.f32 %v7879_v10, %v5675_v39  ;;  %v5625_v39 = vand.u32 2147483647, %v5600_v3  ;;  %v5628_v23 = vor.u32 1.1754944e-38, %v5627_v12  ;;  %v12418_v12 = vld [vmem:[%s11659_s21 + $0x198] sm:$0xff] }
 0x973   :  { %v5680_v16 = vsel %vm5679_vm9, %v7879_v10, %v5676_v42  ;;  %vm5626_vm15 = vcmp.eq.f32.partialorder %v5625_v39, 8.507059e+37  ;;  %v12426_v39 = vld [vmem:[%s11659_s21 + $0x168] sm:$0xff] }
 0x974   :  { %v5685_v62 = vsel %vm5682_vm13, %v5684_v5, %v5680_v16  ;;  %v7883_v19 = vpop.eup %7882 }
 0x975   :  { %v5617_v59 = vmul.f32 %v7883_v19, %v5600_v3  ;;  %vm5622_vm14 = vweird.f32 %v7883_v19  ;;  %v12383_v3 = vld [vmem:[%s11659_s21 + $0x1c0] sm:$0xff] }
 0x976   :  { %vm5623_vm1 = vmor %vm5621_vm0, %vm5622_vm14 }
 0x977   :  { %v5618_v32 = vsub.f32 1.0, %v5617_v59  ;;  %v12392_v59 = vld [vmem:[%s11659_s21 + $0x1d8] sm:$0xff] }
 0x979   :  { %v5619_v17 = vmul.f32 %v7883_v19, %v5618_v32  ;;  %v12400_v32 = vld [vmem:[%s11659_s21 + $0x1a8] sm:$0xff] }
 0x97b   :  { %v5620_v10 = vadd.f32 %v7883_v19, %v5619_v17  ;;  %v12405_v17 = vld [vmem:[%s11659_s21 + $0x1b8] sm:$0xff] }
 0x97d   :  { %v5624_v42 = vsel %vm5623_vm1, %v7883_v19, %v5620_v10  ;;  %v12387_v19 = vld [vmem:[%s11659_s21 + $0x1c8] sm:$0xff] }
 0x97e   :  { %v5629_v56 = vsel %vm5626_vm15, %v5628_v23, %v5624_v42  ;;  %v12413_v10 = vld [vmem:[%s11659_s21 + $0x188] sm:$0xff]  ;;  %v12431_v42 = vld [vmem:[%s11659_s21 + $0x178] sm:$0xff] }
 0x97f   :  { %v12439_v23 = vld [vmem:[%s11659_s21 + $0x148] sm:$0xff] }
 0x9bb   :  { %v5702_v55 = vpop.permute.xlu2 %5701 }
 0x9bc   :  { %v12360_v45 = vmul.f32 %v5702_v55, %v5685_v62  ;;  %v12370_v55 = vld [vmem:[%s11659_s21 + $0x1e0] sm:$0xff] }
 0x9be   :  { %13589 = vst [vmem:[#allocation27_spill] sm:$0xff] %v12360_v45  ;;  %5706 = vrot.lane.b32.xlu1 %v12360_v45, %s8198_s19 }
 0x9c0   :  { %v5646_v13 = vpop.permute.xlu0 %5645 }
 0x9c1   :  { %v12365_v16 = vmul.f32 %v5646_v13, %v5629_v56  ;;  %v12444_v13 = vld [vmem:[%s11659_s21 + $0x158] sm:$0xff]  ;;  %v12452_v56 = vld [vmem:[%s11659_s21 + $0x128] sm:$0xff] }
 0x9c3   :  { %13590 = vst [vmem:[#allocation28_spill] sm:$0xff] %v12365_v16 }
 0xa30   :  { %v5707_v5 = vpop.permute.xlu1 %5706 }
 0xa31   :  { %v5709_v62 = vsel %vm1165_vm6, %v12365_v16, %v5707_v5  ;;  %v12457_v5 = vld [vmem:[%s11659_s21 + $0x138] sm:$0xff] }
 0xa32   :  { %5728 = vmatmul.f32.vlgmr.msrb.gmra.mxu0 %v5709_v62  ;;  %5748 = vmatmul.f32.vlgmr.msra.gmra.mxu2 %v5709_v62  ;;  %v12470_v16 = vld [vmem:[%s11659_s21 + $0x118] sm:$0xff] }
 0xa33   :  { %5768 = vmatmul.f32.vlgmr.msra.gmra.mxu3 %v5709_v62  ;;  %5788 = vmatmul.f32.vlgmr.msrb.gmra.mxu1 %v5709_v62  ;;  %v12465_v62 = vld [vmem:[%s11659_s21 + $0x108] sm:$0xff] }
 0xa34   :  { %6148 = vmatpush.msrb.mxu0 %v12370_v55  ;;  %6168 = vmatpush.msra.mxu2 %v12374_v40 }
 0xa35   :  { %6188 = vmatpush.msra.mxu3 %v11956_v30  ;;  %6208 = vmatpush.msrb.mxu1 %v12379_v60  ;;  %v12396_v30 = vld [vmem:[%s11659_s21 + $0x1a0] sm:$0xff] }
 0xa36   :  { %6149 = vmatpush.msrb.mxu0 %v12383_v3  ;;  %6169 = vmatpush.msra.mxu2 %v12387_v19 }
 0xa37   :  { %6189 = vmatpush.msra.mxu3 %v11982_v29  ;;  %6209 = vmatpush.msrb.mxu1 %v12392_v59  ;;  %v12409_v29 = vld [vmem:[%s11659_s21 + $0x180] sm:$0xff] }
 0xa38   :  { %6150 = vmatpush.msrb.mxu0 %v12396_v30  ;;  %6170 = vmatpush.msra.mxu2 %v12400_v32 }
 0xa39   :  { %6190 = vmatpush.msra.mxu3 %v12000_v7  ;;  %6210 = vmatpush.msrb.mxu1 %v12405_v17  ;;  %v12422_v7 = vld [vmem:[%s11659_s21 + $0x160] sm:$0xff] }
 0xa3a   :  { %6151 = vmatpush.msrb.mxu0 %v12409_v29  ;;  %6171 = vmatpush.msra.mxu2 %v12413_v10 }
 0xa3b   :  { %6191 = vmatpush.msra.mxu3 %v12008_v51  ;;  %6211 = vmatpush.msrb.mxu1 %v12418_v12  ;;  %v12435_v51 = vld [vmem:[%s11659_s21 + $0x140] sm:$0xff] }
 0xa3c   :  { %6152 = vmatpush.msrb.mxu0 %v12422_v7  ;;  %6172 = vmatpush.msra.mxu2 %v12426_v39 }
 0xa3d   :  { %6192 = vmatpush.msra.mxu3 %v12018_v25  ;;  %6212 = vmatpush.msrb.mxu1 %v12431_v42  ;;  %v12448_v25 = vld [vmem:[%s11659_s21 + $0x120] sm:$0xff] }
 0xa3e   :  { %6153 = vmatpush.msrb.mxu0 %v12435_v51  ;;  %6173 = vmatpush.msra.mxu2 %v12439_v23 }
 0xa3f   :  { %6193 = vmatpush.msra.mxu3 %v12027_v41  ;;  %6213 = vmatpush.msrb.mxu1 %v12444_v13  ;;  %v12461_v41 = vld [vmem:[%s11659_s21 + $0x100] sm:$0xff] }
 0xa40   :  { %6154 = vmatpush.msrb.mxu0 %v12448_v25  ;;  %6174 = vmatpush.msra.mxu2 %v12452_v56 }
 0xa41   :  { %6194 = vmatpush.msra.mxu3 %v12037_v46  ;;  %6214 = vmatpush.msrb.mxu1 %v12457_v5  ;;  %v12474_v46 = vld [vmem:[%s11659_s21 + $0xe0] sm:$0xff] }
 0xa42   :  { %6155 = vmatpush.msrb.mxu0 %v12461_v41  ;;  %6175 = vmatpush.msra.mxu2 %v12465_v62 }
 0xa43   :  { %6195 = vmatpush.msra.mxu3 %v12042_v54  ;;  %6215 = vmatpush.msrb.mxu1 %v12470_v16  ;;  %v12487_v54 = vld [vmem:[%s11659_s21 + $0xc0] sm:$0xff] }
 0xa44   :  { %6156 = vmatpush.msrb.mxu0 %v12474_v46  ;;  %6176 = vmatpush.msra.mxu2 %v12478_v2 }
 0xa45   :  { %6196 = vmatpush.msra.mxu3 %v12049_v43  ;;  %6216 = vmatpush.msrb.mxu1 %v12483_v34  ;;  %v12500_v43 = vld [vmem:[%s11659_s21 + $0xa0] sm:$0xff] }
 0xa46   :  { %6157 = vmatpush.msrb.mxu0 %v12487_v54  ;;  %6177 = vmatpush.msra.mxu2 %v12491_v44  ;;  %13592 = vst [vmem:[#allocation30_spill] sm:$0xff] %v12500_v43 }
 0xa47   :  { %6197 = vmatpush.msra.mxu3 %v12056_v28  ;;  %6217 = vmatpush.msrb.mxu1 %v12496_v48  ;;  %v12513_v28 = vld [vmem:[%s11659_s21 + $0x80] sm:$0xff] }
 0xa48   :  { %6158 = vmatpush.msrb.mxu0 %v12500_v43  ;;  %6178 = vmatpush.msra.mxu2 %v12504_v21  ;;  %13595 = vst [vmem:[#allocation33_spill] sm:$0xff] %v12513_v28 }
 0xa49   :  { %6198 = vmatpush.msra.mxu3 %v12066_v22  ;;  %6218 = vmatpush.msrb.mxu1 %v12509_v9  ;;  %v12526_v22 = vld [vmem:[%s11659_s21 + $0x60] sm:$0xff] }
 0xa4a   :  { %6159 = vmatpush.msrb.mxu0 %v12513_v28  ;;  %6179 = vmatpush.msra.mxu2 %v12517_v58  ;;  %13598 = vst [vmem:[#allocation36_spill] sm:$0xff] %v12526_v22 }
 0xa4b   :  { %6199 = vmatpush.msra.mxu3 %v12071_v8  ;;  %6219 = vmatpush.msrb.mxu1 %v12522_v50  ;;  %v12540_v8 = vld [vmem:[%s11659_s21 + $0x48] sm:$0xff] }
 0xa4c   :  { %6160 = vmatpush.msrb.mxu0 %v12526_v22  ;;  %6180 = vmatpush.msra.mxu2 %v12530_v57  ;;  %13601 = vst [vmem:[#allocation39_spill] sm:$0xff] %v12540_v8 }
 0xa4d   :  { %6200 = vmatpush.msra.mxu3 %v12078_v18  ;;  %6220 = vmatpush.msrb.mxu1 %v12535_v20  ;;  %v12555_v18 = vld [vmem:[%s11659_s21 + $0x38] sm:$0xff] }
 0xa4e   :  { %6161 = vmatpush.msrb.mxu0 %v11939_v37  ;;  %6181 = vmatpush.msra.mxu2 %v12540_v8  ;;  %13604 = vst [vmem:[#allocation42_spill] sm:$0xff] %v12555_v18 }
 0xa4f   :  { %6201 = vmatpush.msra.mxu3 %v12085_v26  ;;  %6221 = vmatpush.msrb.mxu1 %v12545_v27 }
 0xa50   :  { %6162 = vmatpush.msrb.mxu0 %v11975_v63  ;;  %6182 = vmatpush.msra.mxu2 %v12550_v11 }
 0xa51   :  { %6202 = vmatpush.msra.mxu3 %v12093_v1  ;;  %6222 = vmatpush.msrb.mxu1 %v12555_v18 }
 0xa52   :  { %6163 = vmatpush.msrb.mxu0 %v11997_v38  ;;  %6183 = vmatpush.msra.mxu2 %v13564_v36 }
 0xa53   :  { %6203 = vmatpush.msra.mxu3 %v12099_v24  ;;  %6223 = vmatpush.msrb.mxu1 %v11972_v61 }
 0xaaf   :  { %v5729_v0 = vpop.f32.mrf.mxu0 }
 0xab0   :  { %v5789_v37 = vpop.f32.mrf.mxu1 }
 0xab1   :  { %v12563_v63 = vadd.f32 %v12238_v49, %v5789_v37 }
 0xab3   :  { %7884 = vtanh.f32 %v12563_v63 }
 0xab5   :  { %v5749_v26 = vpop.f32.mrf.mxu2 }
 0xab6   :  { %v12567_v1 = vadd.f32 %v12271_v6, %v5749_v26  ;;  %v5769_v24 = vpop.f32.mrf.mxu3  ;;  %v5798_v6 = vadd.f32 %v12267_v35, %v5729_v0 }
 0xab7   :  { %v5808_v61 = vadd.f32 %v12328_v33, %v5769_v24 }
 0xab8   :  { %7886 = vtanh.f32 %v12567_v1  ;;  %v7411_v31 = vmul.f32 -1.442695, %v5798_v6 }
 0xab9   :  { %v7885_v53 = vpop.eup %7884  ;;  %v7413_v36 = vmul.f32 -1.442695, %v5808_v61 }
 0xaba   :  { %5907 = vrot.lane.b32.xlu2 %v7885_v53, %s8198_s19 }
 0xabb   :  { %7888 = vpow2.f32 %v7413_v36 }
 0xabe   :  { %v7887_v38 = vpop.eup %7886 }
 0xabf   :  { %5851 = vrot.lane.b32.xlu0 %v7887_v38, %s8198_s19 }
 0xac1   :  { %v7889_v49 = vpop.eup %7888 }
 0xac2   :  { %v5872_v37 = vadd.f32 1.0, %v7889_v49 }
 0xac4   :  { %7890 = vrcp.f32 %v5872_v37  ;;  %v5885_v52 = vand.u32 2147483648, %v5872_v37  ;;  %vm5879_vm11 = vweird.f32 %v5872_v37  ;;  %v5883_v33 = vand.u32 2147483647, %v5872_v37 }
 0xac5   :  { %7892 = vpow2.f32 %v7411_v31 }
 0xac6   :  { %v5886_v36 = vor.u32 1.1754944e-38, %v5885_v52  ;;  %vm5884_vm7 = vcmp.eq.f32.partialorder %v5883_v33, 8.507059e+37 }
 0xaca   :  { %v7891_v45 = vpop.eup %7890 }
 0xacb   :  { %v5875_v26 = vmul.f32 %v7891_v45, %v5872_v37  ;;  %vm5880_vm2 = vweird.f32 %v7891_v45  ;;  %v7893_v38 = vpop.eup %7892 }
 0xacc   :  { %vm5881_vm8 = vmor %vm5879_vm11, %vm5880_vm2  ;;  %v5816_v24 = vadd.f32 1.0, %v7893_v38 }
 0xacd   :  { %v5876_v4 = vsub.f32 1.0, %v5875_v26 }
 0xace   :  { %7894 = vrcp.f32 %v5816_v24  ;;  %vm5823_vm3 = vweird.f32 %v5816_v24  ;;  %v5827_v37 = vand.u32 2147483647, %v5816_v24 }
 0xacf   :  { %v5877_v53 = vmul.f32 %v7891_v45, %v5876_v4 }
 0xad0   :  { %vm5828_vm12 = vcmp.eq.f32.partialorder %v5827_v37, 8.507059e+37 }
 0xad1   :  { %v5878_v14 = vadd.f32 %v7891_v45, %v5877_v53  ;;  %v5829_v53 = vand.u32 2147483648, %v5816_v24 }
 0xad3   :  { %v5882_v61 = vsel %vm5881_vm8, %v7891_v45, %v5878_v14  ;;  %v5830_v14 = vor.u32 1.1754944e-38, %v5829_v53 }
 0xad4   :  { %v5887_v18 = vsel %vm5884_vm7, %v5886_v36, %v5882_v61  ;;  %v7895_v35 = vpop.eup %7894 }
 0xad5   :  { %v5819_v31 = vmul.f32 %v7895_v35, %v5816_v24  ;;  %vm5824_vm5 = vweird.f32 %v7895_v35  ;;  %v5905_v61 = vmul.f32 %v5887_v18, %v12355_v15  ;;  %v7414_v15 = vmul.f32 -1.442695, %v12563_v63 }
 0xad6   :  { %vm5825_vm10 = vmor %vm5823_vm3, %vm5824_vm5 }
 0xad7   :  { %v5820_v4 = vsub.f32 1.0, %v5819_v31 }
 0xad9   :  { %v5821_v6 = vmul.f32 %v7895_v35, %v5820_v4 }
 0xadb   :  { %v5822_v26 = vadd.f32 %v7895_v35, %v5821_v6 }
 0xadd   :  { %v5826_v38 = vsel %vm5825_vm10, %v7895_v35, %v5822_v26 }
 0xade   :  { %v5831_v45 = vsel %vm5828_vm12, %v5830_v14, %v5826_v38 }
 0xb14   :  { %v5908_v49 = vpop.permute.xlu2 %5907 }
 0xb15   :  { %v5910_v0 = vmul.f32 %v5908_v49, %v5887_v18 }
 0xb17   :  { %5912 = vrot.lane.b32.xlu1 %v5910_v0, %s8198_s19  ;;  %v5849_v0 = vmul.f32 %v5831_v45, %v12351_v47 }
 0xb31   :  { %v5852_v52 = vpop.permute.xlu0 %5851 }
 0xb32   :  { %v5854_v33 = vmul.f32 %v5852_v52, %v5831_v45 }
 0xb34   :  { %5856 = vrot.lane.b32.xlu2 %v5854_v33, %s8198_s19 }
 0xb89   :  { %v5913_v36 = vpop.permute.xlu1 %5912 }
 0xb8a   :  { %v12577_v49 = vadd.f32 %v5913_v36, %v5905_v61 }
 0xb8c   :  { %7896 = vtanh.f32 %v12577_v49 }
 0xb8e   :  { %v5857_v31 = vpop.permute.xlu2 %5856 }
 0xb8f   :  { %v12581_v24 = vadd.f32 %v5857_v31, %v5849_v0  ;;  %v7412_v0 = vmul.f32 -1.442695, %v12567_v1 }
 0xb91   :  { %7898 = vtanh.f32 %v12581_v24 }
 0xb92   :  { %v7897_v35 = vpop.eup %7896  ;;  %7900 = vpow2.f32 %v7414_v15 }
 0xb93   :  { %5918 = vrot.lane.b32.xlu0 %v7897_v35, %s8198_s19 }
 0xb97   :  { %v7899_v4 = vpop.eup %7898 }
 0xb98   :  { %5862 = vrot.lane.b32.xlu1 %v7899_v4, %s8198_s19  ;;  %v7901_v18 = vpop.eup %7900 }
 0xb99   :  { %v5873_v6 = vadd.f32 1.0, %v7901_v18 }
 0xb9b   :  { %7902 = vrcp.f32 %v5873_v6  ;;  %v5900_v14 = vand.u32 2147483648, %v5873_v6  ;;  %vm5894_vm13 = vweird.f32 %v5873_v6  ;;  %v5898_v52 = vand.u32 2147483647, %v5873_v6 }
 0xb9c   :  { %7904 = vpow2.f32 %v7412_v0  ;;  %v12613_v0 = vld [vmem:[%s11659_s21 + $0x1b0] sm:$0xff] }
 0xb9d   :  { %v5901_v33 = vor.u32 1.1754944e-38, %v5900_v14  ;;  %vm5899_vm0 = vcmp.eq.f32.partialorder %v5898_v52, 8.507059e+37 }
 0xba1   :  { %v7903_v26 = vpop.eup %7902 }
 0xba2   :  { %v5890_v53 = vmul.f32 %v7903_v26, %v5873_v6  ;;  %vm5895_vm9 = vweird.f32 %v7903_v26  ;;  %v7905_v31 = vpop.eup %7904 }
 0xba3   :  { %vm5896_vm14 = vmor %vm5894_vm13, %vm5895_vm9  ;;  %v5817_v35 = vadd.f32 1.0, %v7905_v31  ;;  %v12620_v31 = vld [vmem:[%s11659_s21 + $0x190] sm:$0xff] }
 0xba4   :  { %v5891_v47 = vsub.f32 1.0, %v5890_v53 }
 0xba5   :  { %7906 = vrcp.f32 %v5817_v35  ;;  %v5844_v53 = vand.u32 2147483648, %v5817_v35  ;;  %vm5838_vm15 = vweird.f32 %v5817_v35 }
 0xba6   :  { %v5892_v37 = vmul.f32 %v7903_v26, %v5891_v47  ;;  %v5842_v47 = vand.u32 2147483647, %v5817_v35 }
 0xba8   :  { %v5893_v38 = vadd.f32 %v7903_v26, %v5892_v37  ;;  %vm5843_vm11 = vcmp.eq.f32.partialorder %v5842_v47, 8.507059e+37  ;;  %v12676_v47 = vld [vmem:[%s11659_s21 + $0x90] sm:$0xff] }
 0xba9   :  { %13607 = vst [vmem:[#allocation45_spill] sm:$0xff] %v12676_v47 }
 0xbaa   :  { %v5897_v45 = vsel %vm5896_vm14, %v7903_v26, %v5893_v38  ;;  %v5845_v38 = vor.u32 1.1754944e-38, %v5844_v53  ;;  %v12669_v53 = vld [vmem:[%s11659_s21 + $0xb0] sm:$0xff] }
 0xbab   :  { %v5902_v61 = vsel %vm5899_vm0, %v5901_v33, %v5897_v45  ;;  %v7907_v4 = vpop.eup %7906  ;;  %13606 = vst [vmem:[#allocation44_spill] sm:$0xff] %v12669_v53 }
 0xbac   :  { %v5834_v15 = vmul.f32 %v7907_v4, %v5817_v35  ;;  %vm5839_vm1 = vweird.f32 %v7907_v4  ;;  %v12627_v35 = vld [vmem:[%s11659_s21 + $0x170] sm:$0xff] }
 0xbad   :  { %vm5840_vm2 = vmor %vm5838_vm15, %vm5839_vm1 }
 0xbae   :  { %v5835_v18 = vsub.f32 1.0, %v5834_v15  ;;  %v12641_v15 = vld [vmem:[%s11659_s21 + $0x130] sm:$0xff] }
 0xbb0   :  { %v5836_v6 = vmul.f32 %v7907_v4, %v5835_v18  ;;  %v12648_v18 = vld [vmem:[%s11659_s21 + $0x110] sm:$0xff] }
 0xbb2   :  { %v5837_v26 = vadd.f32 %v7907_v4, %v5836_v6  ;;  %v12655_v6 = vld [vmem:[%s11659_s21 + $0xf0] sm:$0xff] }
 0xbb4   :  { %v5841_v37 = vsel %vm5840_vm2, %v7907_v4, %v5837_v26  ;;  %v12634_v4 = vld [vmem:[%s11659_s21 + $0x150] sm:$0xff] }
 0xbb5   :  { %v5846_v1 = vsel %vm5843_vm11, %v5845_v38, %v5841_v37  ;;  %v12662_v26 = vld [vmem:[%s11659_s21 + $0xd0] sm:$0xff]  ;;  %v12688_v38 = vld [vmem:[%s11659_s21 + $0x40] sm:$0xff] }
 0xbb6   :  { %v12683_v37 = vld [vmem:[%s11659_s21 + $0x70] sm:$0xff]  ;;  %13609 = vst [vmem:[#allocation47_spill] sm:$0xff] %v12688_v38 }
 0xbb7   :  { %13608 = vst [vmem:[#allocation46_spill] sm:$0xff] %v12683_v37 }
 0xc05   :  { %v5919_v36 = vpop.permute.xlu0 %5918 }
 0xc06   :  { %v12587_v63 = vmul.f32 %v5919_v36, %v5902_v61  ;;  %v12599_v61 = vld [vmem:[%s11659_s21 + $0x1f0] sm:$0xff] }
 0xc07   :  { %v12606_v36 = vld [vmem:[%s11659_s21 + $0x1d0] sm:$0xff] }
 0xc08   :  { %5923 = vrot.lane.b32.xlu2 %v12587_v63, %s8198_s19 }
 0xc0a   :  { %v5863_v14 = vpop.permute.xlu1 %5862 }
 0xc0b   :  { %v12592_v52 = vmul.f32 %v5863_v14, %v5846_v1  ;;  %v12693_v14 = vld [vmem:[%s11659_s21 + $0x50] sm:$0xff]  ;;  %v12698_v1 = vld [vmem:[%s11659_s21 + $0x20] sm:$0xff] }
 0xc0c   :  { %13610 = vst [vmem:[#allocation48_spill] sm:$0xff] %v12693_v14 }
 0xc0d   :  { %13605 = vst [vmem:[#allocation43_spill] sm:$0xff] %v12592_v52 }
 0xc0e   :  { %13611 = vst [vmem:[#allocation49_spill] sm:$0xff] %v12698_v1 }
 0xc62   :  { %v5924_v45 = vpop.permute.xlu2 %5923 }
 0xc63   :  { %v5926_v33 = vsel %vm1165_vm6, %v12592_v52, %v5924_v45  ;;  %v12703_v45 = vld [vmem:[%s11659_s21 + $0x30] sm:$0xff]  ;;  %v12708_v52 = vld [vmem:[%s11659_s21] sm:$0xff] }
 0xc64   :  { %5945 = vmatmul.f32.vlgmr.msra.gmra.mxu0 %v5926_v33  ;;  %5965 = vmatmul.f32.vlgmr.msrb.gmra.mxu2 %v5926_v33  ;;  %13612 = vst [vmem:[#allocation50_spill] sm:$0xff] %v12703_v45 }
 0xc65   :  { %5985 = vmatmul.f32.vlgmr.msrb.gmra.mxu3 %v5926_v33  ;;  %6005 = vmatmul.f32.vlgmr.msra.gmra.mxu1 %v5926_v33  ;;  %v13613_v33 = vld [vmem:[#allocation42_spill] sm:$0xff]  ;;  %13614 = vst [vmem:[#allocation51_spill] sm:$0xff] %v12708_v52 }
 0xc66   :  { %6367 = vmatpush.msra.mxu0 %v12370_v55  ;;  %6387 = vmatpush.msrb.mxu2 %v12374_v40 }
 0xc67   :  { %6407 = vmatpush.msrb.mxu3 %v12599_v61  ;;  %6427 = vmatpush.msra.mxu1 %v12379_v60 }
 0xc68   :  { %6368 = vmatpush.msra.mxu0 %v12383_v3  ;;  %6388 = vmatpush.msrb.mxu2 %v12387_v19 }
 0xc69   :  { %6408 = vmatpush.msrb.mxu3 %v12606_v36  ;;  %6428 = vmatpush.msra.mxu1 %v12392_v59 }
 0xc6a   :  { %6369 = vmatpush.msra.mxu0 %v12396_v30  ;;  %6389 = vmatpush.msrb.mxu2 %v12400_v32 }
 0xc6b   :  { %6409 = vmatpush.msrb.mxu3 %v12613_v0  ;;  %6429 = vmatpush.msra.mxu1 %v12405_v17 }
 0xc6c   :  { %6370 = vmatpush.msra.mxu0 %v12409_v29  ;;  %6390 = vmatpush.msrb.mxu2 %v12413_v10 }
 0xc6d   :  { %6410 = vmatpush.msrb.mxu3 %v12620_v31  ;;  %6430 = vmatpush.msra.mxu1 %v12418_v12 }
 0xc6e   :  { %6371 = vmatpush.msra.mxu0 %v12422_v7  ;;  %6391 = vmatpush.msrb.mxu2 %v12426_v39 }
 0xc6f   :  { %6411 = vmatpush.msrb.mxu3 %v12627_v35  ;;  %6431 = vmatpush.msra.mxu1 %v12431_v42 }
 0xc70   :  { %6372 = vmatpush.msra.mxu0 %v12435_v51  ;;  %6392 = vmatpush.msrb.mxu2 %v12439_v23 }
 0xc71   :  { %6412 = vmatpush.msrb.mxu3 %v12634_v4  ;;  %6432 = vmatpush.msra.mxu1 %v12444_v13 }
 0xc72   :  { %6373 = vmatpush.msra.mxu0 %v12448_v25  ;;  %6393 = vmatpush.msrb.mxu2 %v12452_v56 }
 0xc73   :  { %6413 = vmatpush.msrb.mxu3 %v12641_v15  ;;  %6433 = vmatpush.msra.mxu1 %v12457_v5 }
 0xc74   :  { %6374 = vmatpush.msra.mxu0 %v12461_v41  ;;  %6394 = vmatpush.msrb.mxu2 %v12465_v62 }
 0xc75   :  { %6414 = vmatpush.msrb.mxu3 %v12648_v18  ;;  %6434 = vmatpush.msra.mxu1 %v12470_v16 }
 0xc76   :  { %6375 = vmatpush.msra.mxu0 %v12474_v46  ;;  %6395 = vmatpush.msrb.mxu2 %v12478_v2 }
 0xc77   :  { %6415 = vmatpush.msrb.mxu3 %v12655_v6  ;;  %6435 = vmatpush.msra.mxu1 %v12483_v34 }
 0xc78   :  { %6376 = vmatpush.msra.mxu0 %v12487_v54  ;;  %6396 = vmatpush.msrb.mxu2 %v12491_v44 }
 0xc79   :  { %6416 = vmatpush.msrb.mxu3 %v12662_v26  ;;  %6436 = vmatpush.msra.mxu1 %v12496_v48 }
 0xc7a   :  { %6377 = vmatpush.msra.mxu0 %v12500_v43  ;;  %6397 = vmatpush.msrb.mxu2 %v12504_v21 }
 0xc7b   :  { %6417 = vmatpush.msrb.mxu3 %v12669_v53  ;;  %6437 = vmatpush.msra.mxu1 %v12509_v9 }
 0xc7c   :  { %6378 = vmatpush.msra.mxu0 %v12513_v28  ;;  %6398 = vmatpush.msrb.mxu2 %v12517_v58 }
 0xc7d   :  { %6418 = vmatpush.msrb.mxu3 %v12676_v47  ;;  %6438 = vmatpush.msra.mxu1 %v12522_v50 }
 0xc7e   :  { %6379 = vmatpush.msra.mxu0 %v12526_v22  ;;  %6399 = vmatpush.msrb.mxu2 %v12530_v57 }
 0xc7f   :  { %6419 = vmatpush.msrb.mxu3 %v12683_v37  ;;  %6439 = vmatpush.msra.mxu1 %v12535_v20 }
 0xc80   :  { %6380 = vmatpush.msra.mxu0 %v12688_v38  ;;  %6400 = vmatpush.msrb.mxu2 %v12540_v8  ;;  %v12712_v8 = vld [vmem:[%s11659_s21 + $0x8] sm:$0xff] }
 0xc81   :  { %6420 = vmatpush.msrb.mxu3 %v12693_v14  ;;  %6440 = vmatpush.msra.mxu1 %v12545_v27  ;;  %13615 = vst [vmem:[#allocation52_spill] sm:$0xff] %v12712_v8  ;;  %v12716_v27 = vld [vmem:[%s11659_s21 + $0x10] sm:$0xff] }
 0xc82   :  { %6381 = vmatpush.msra.mxu0 %v12698_v1  ;;  %6401 = vmatpush.msrb.mxu2 %v12550_v11  ;;  %13616 = vst [vmem:[#allocation53_spill] sm:$0xff] %v12716_v27  ;;  %v12720_v1 = vld [vmem:[%s11659_s21 + $0x18] sm:$0xff] }
 0xc83   :  { %6421 = vmatpush.msrb.mxu3 %v12703_v45  ;;  %6441 = vmatpush.msra.mxu1 %v13613_v33  ;;  %13617 = vst [vmem:[#allocation54_spill] sm:$0xff] %v12720_v1  ;;  %v13618_v45 = vld [vmem:[#allocation4_spill] sm:$0xff] }
 0xc84   :  { %6382 = vmatpush.msra.mxu0 %v12708_v52  ;;  %6402 = vmatpush.msrb.mxu2 %v12712_v8  ;;  %v13619_v52 = vld [vmem:[#allocation10_spill] sm:$0xff] }
 0xc85   :  { %6422 = vmatpush.msrb.mxu3 %v12716_v27  ;;  %6442 = vmatpush.msra.mxu1 %v12720_v1  ;;  %v13620_v1 = vld [vmem:[#allocation22_spill] sm:$0xff] }
 0xce1   :  { %v5946_v57 = vpop.f32.mrf.mxu0 }
 0xce2   :  { %v6006_v11 = vpop.f32.mrf.mxu1 }
 0xce3   :  { %v12724_v14 = vadd.f32 %v13618_v45, %v6006_v11  ;;  %v13621_v45 = vld [vmem:[#allocation8_spill] sm:$0xff] }
 0xce4   :  { %v6017_v22 = vadd.f32 %v13621_v45, %v5946_v57 }
 0xce5   :  { %7908 = vtanh.f32 %v12724_v14 }
 0xce6   :  { %v7415_v50 = vmul.f32 -1.442695, %v6017_v22 }
 0xce7   :  { %v5966_v33 = vpop.f32.mrf.mxu2 }
 0xce8   :  { %v12728_v38 = vadd.f32 %v13619_v52, %v5966_v33  ;;  %v5986_v20 = vpop.f32.mrf.mxu3 }
 0xce9   :  { %v6027_v37 = vadd.f32 %v13620_v1, %v5986_v20 }
 0xcea   :  { %7910 = vtanh.f32 %v12728_v38 }
 0xceb   :  { %v7909_v8 = vpop.eup %7908  ;;  %v7417_v11 = vmul.f32 -1.442695, %v6027_v37 }
 0xcec   :  { %6126 = vrot.lane.b32.xlu0 %v7909_v8, %s8198_s19 }
 0xced   :  { %7912 = vpow2.f32 %v7417_v11 }
 0xcee   :  { %7914 = vpow2.f32 %v7415_v50 }
 0xcf0   :  { %v7911_v27 = vpop.eup %7910 }
 0xcf1   :  { %6070 = vrot.lane.b32.xlu1 %v7911_v27, %s8198_s19 }
 0xcf3   :  { %v7913_v52 = vpop.eup %7912 }
 0xcf4   :  { %v6091_v33 = vadd.f32 1.0, %v7913_v52  ;;  %v7915_v47 = vpop.eup %7914 }
 0xcf5   :  { %v6035_v58 = vadd.f32 1.0, %v7915_v47 }
 0xcf6   :  { %7916 = vrcp.f32 %v6091_v33  ;;  %v6104_v37 = vand.u32 2147483648, %v6091_v33  ;;  %vm6098_vm7 = vweird.f32 %v6091_v33  ;;  %v6102_v22 = vand.u32 2147483647, %v6091_v33 }
 0xcf7   :  { %7918 = vrcp.f32 %v6035_v58  ;;  %v6048_v47 = vand.u32 2147483648, %v6035_v58  ;;  %vm6042_vm12 = vweird.f32 %v6035_v58 }
 0xcf8   :  { %v6105_v11 = vor.u32 1.1754944e-38, %v6104_v37  ;;  %vm6103_vm10 = vcmp.eq.f32.partialorder %v6102_v22, 8.507059e+37 }
 0xcfc   :  { %v7917_v8 = vpop.eup %7916 }
 0xcfd   :  { %v6094_v28 = vmul.f32 %v7917_v8, %v6091_v33  ;;  %v7919_v9 = vpop.eup %7918  ;;  %vm6099_vm8 = vweird.f32 %v7917_v8 }
 0xcfe   :  { %v6038_v53 = vmul.f32 %v7919_v9, %v6035_v58  ;;  %vm6100_vm5 = vmor %vm6098_vm7, %vm6099_vm8  ;;  %vm6043_vm3 = vweird.f32 %v7919_v9 }
 0xcff   :  { %v6095_v27 = vsub.f32 1.0, %v6094_v28  ;;  %v6046_v28 = vand.u32 2147483647, %v6035_v58  ;;  %vm6044_vm9 = vmor %vm6042_vm12, %vm6043_vm3 }
 0xd00   :  { %v6039_v20 = vsub.f32 1.0, %v6038_v53 }
 0xd01   :  { %v6096_v21 = vmul.f32 %v7917_v8, %v6095_v27  ;;  %vm6047_vm13 = vcmp.eq.f32.partialorder %v6046_v28, 8.507059e+37 }
 0xd02   :  { %v6040_v57 = vmul.f32 %v7919_v9, %v6039_v20 }
 0xd03   :  { %v6097_v1 = vadd.f32 %v7917_v8, %v6096_v21  ;;  %v6049_v21 = vor.u32 1.1754944e-38, %v6048_v47 }
 0xd04   :  { %v6041_v45 = vadd.f32 %v7919_v9, %v6040_v57 }
 0xd05   :  { %v6101_v50 = vsel %vm6100_vm5, %v7917_v8, %v6097_v1 }
 0xd06   :  { %v6106_v43 = vsel %vm6103_vm10, %v6105_v11, %v6101_v50  ;;  %v6045_v53 = vsel %vm6044_vm9, %v7919_v9, %v6041_v45 }
 0xd07   :  { %v6050_v33 = vsel %vm6047_vm13, %v6049_v21, %v6045_v53  ;;  %v6124_v8 = vmul.f32 %v6106_v43, %v12577_v49 }
 0xd08   :  { %v6068_v9 = vmul.f32 %v6050_v33, %v12581_v24 }
 0xd5e   :  { %v6127_v52 = vpop.permute.xlu0 %6126 }
 0xd5f   :  { %v6129_v48 = vmul.f32 %v6127_v52, %v6106_v43  ;;  %v7418_v43 = vmul.f32 -1.442695, %v12724_v14  ;;  %v13622_v14 = vld [vmem:[#allocation27_spill] sm:$0xff] }
 0xd61   :  { %6131 = vrot.lane.b32.xlu2 %v6129_v48, %s8198_s19 }
 0xd63   :  { %v6071_v27 = vpop.permute.xlu1 %6070 }
 0xd64   :  { %v6073_v20 = vmul.f32 %v6071_v27, %v6050_v33 }
 0xd66   :  { %6075 = vrot.lane.b32.xlu0 %v6073_v20, %s8198_s19 }
 0xdbb   :  { %v6132_v1 = vpop.permute.xlu2 %6131 }
 0xdbc   :  { %v12738_v37 = vadd.f32 %v6132_v1, %v6124_v8  ;;  %v5928_v8 = vadd.f32 %v12587_v63, %v13622_v14 }
 0xdbe   :  { %7920 = vtanh.f32 %v12738_v37 }
 0xdc4   :  { %v7921_v58 = vpop.eup %7920 }
 0xdc5   :  { %6137 = vrot.lane.b32.xlu1 %v7921_v58, %s8198_s19 }
 0xdd8   :  { %v6076_v48 = vpop.permute.xlu0 %6075 }
 0xdd9   :  { %v12743_v57 = vadd.f32 %v6076_v48, %v6068_v9  ;;  %v7416_v9 = vmul.f32 -1.442695, %v12728_v38 }
 0xddb   :  { %7922 = vtanh.f32 %v12743_v57 }
 0xddc   :  { %7924 = vpow2.f32 %v7418_v43 }
 0xde1   :  { %v7923_v22 = vpop.eup %7922 }
 0xde2   :  { %6081 = vrot.lane.b32.xlu2 %v7923_v22, %s8198_s19  ;;  %v7925_v49 = vpop.eup %7924 }
 0xde3   :  { %v6092_v50 = vadd.f32 1.0, %v7925_v49 }
 0xde5   :  { %7926 = vrcp.f32 %v6092_v50  ;;  %v6119_v24 = vand.u32 2147483648, %v6092_v50  ;;  %vm6113_vm0 = vweird.f32 %v6092_v50  ;;  %v6117_v53 = vand.u32 2147483647, %v6092_v50 }
 0xde6   :  { %7928 = vpow2.f32 %v7416_v9  ;;  %v13651_v9 = vld [vmem:[#allocation11_spill] sm:$0xff] }
 0xde7   :  { %v6120_v27 = vor.u32 1.1754944e-38, %v6119_v24  ;;  %vm6118_vm15 = vcmp.eq.f32.partialorder %v6117_v53, 8.507059e+37 }
 0xdeb   :  { %v7927_v11 = vpop.eup %7926 }
 0xdec   :  { %v6109_v45 = vmul.f32 %v7927_v11, %v6092_v50  ;;  %vm6114_vm14 = vweird.f32 %v7927_v11  ;;  %v7929_v48 = vpop.eup %7928 }
 0xded   :  { %vm6115_vm1 = vmor %vm6113_vm0, %vm6114_vm14  ;;  %v6036_v22 = vadd.f32 1.0, %v7929_v48 }
 0xdee   :  { %v6110_v47 = vsub.f32 1.0, %v6109_v45 }
 0xdef   :  { %7930 = vrcp.f32 %v6036_v22  ;;  %vm6057_vm11 = vweird.f32 %v6036_v22  ;;  %v6061_v63 = vand.u32 2147483647, %v6036_v22 }
 0xdf0   :  { %v6111_v52 = vmul.f32 %v7927_v11, %v6110_v47  ;;  %v6063_v47 = vand.u32 2147483648, %v6036_v22 }
 0xdf1   :  { %vm6062_vm7 = vcmp.eq.f32.partialorder %v6061_v63, 8.507059e+37 }
 0xdf2   :  { %v6112_v28 = vadd.f32 %v7927_v11, %v6111_v52 }
 0xdf4   :  { %v6116_v21 = vsel %vm6115_vm1, %v7927_v11, %v6112_v28  ;;  %v6064_v28 = vor.u32 1.1754944e-38, %v6063_v47 }
 0xdf5   :  { %v6121_v33 = vsel %vm6118_vm15, %v6120_v27, %v6116_v21  ;;  %v7931_v43 = vpop.eup %7930 }
 0xdf6   :  { %v6053_v49 = vmul.f32 %v7931_v43, %v6036_v22  ;;  %vm6058_vm2 = vweird.f32 %v7931_v43 }
 0xdf7   :  { %vm6059_vm8 = vmor %vm6057_vm11, %vm6058_vm2 }
 0xdf8   :  { %v6054_v50 = vsub.f32 1.0, %v6053_v49 }
 0xdfa   :  { %v6055_v11 = vmul.f32 %v7931_v43, %v6054_v50 }
 0xdfc   :  { %v6056_v45 = vadd.f32 %v7931_v43, %v6055_v11  ;;  %v13652_v11 = vld [vmem:[#allocation23_spill] sm:$0xff] }
 0xdfe   :  { %v6060_v52 = vsel %vm6059_vm8, %v7931_v43, %v6056_v45 }
 0xdff   :  { %v6065_v53 = vsel %vm6062_vm7, %v6064_v28, %v6060_v52 }
 0xe37   :  { %v6138_v20 = vpop.permute.xlu1 %6137 }
 0xe38   :  { %v6140_v1 = vmul.f32 %v6138_v20, %v6121_v33  ;;  %v13650_v33 = vld [vmem:[#allocation12_spill] sm:$0xff] }
 0xe3a   :  { %v12750_v58 = vadd.f32 %v6140_v1, %v5928_v8  ;;  %6142 = vrot.lane.b32.xlu0 %v6140_v1, %s8198_s19 }
 0xe3c   :  { %v6082_v24 = vpop.permute.xlu2 %6081 }
 0xe3d   :  { %v12754_v38 = vmul.f32 %v6082_v24, %v6065_v53 }
 0xe3f   :  { %13623 = vst [vmem:[#allocation4_spill] sm:$0xff] %v12754_v38 }
 0xeac   :  { %v6143_v21 = vpop.permute.xlu0 %6142 }
 0xead   :  { %v6145_v27 = vsel %vm1165_vm6, %v12754_v38, %v6143_v21 }
 0xeae   :  { %6164 = vmatmul.f32.vlgmr.msrb.gmra.mxu0 %v6145_v27  ;;  %6184 = vmatmul.f32.vlgmr.msra.gmra.mxu2 %v6145_v27 }
 0xeaf   :  { %6204 = vmatmul.f32.vlgmr.msra.gmra.mxu3 %v6145_v27  ;;  %6224 = vmatmul.f32.vlgmr.msrb.gmra.mxu1 %v6145_v27 }
 0xeb0   :  { %6586 = vmatpush.msrb.mxu0 %v12370_v55  ;;  %6606 = vmatpush.msra.mxu2 %v12374_v40  ;;  %v13624_v55 = vld [vmem:[#allocation29_spill] sm:$0xff]  ;;  %v13625_v40 = vld [vmem:[#allocation30_spill] sm:$0xff] }
 0xeb1   :  { %6626 = vmatpush.msra.mxu3 %v12599_v61  ;;  %6646 = vmatpush.msrb.mxu1 %v12379_v60  ;;  %v13626_v60 = vld [vmem:[#allocation31_spill] sm:$0xff] }
 0xeb2   :  { %6587 = vmatpush.msrb.mxu0 %v12383_v3  ;;  %6607 = vmatpush.msra.mxu2 %v12387_v19  ;;  %v13628_v3 = vld [vmem:[#allocation32_spill] sm:$0xff]  ;;  %v13630_v19 = vld [vmem:[#allocation34_spill] sm:$0xff] }
 0xeb3   :  { %6627 = vmatpush.msra.mxu3 %v12606_v36  ;;  %6647 = vmatpush.msrb.mxu1 %v12392_v59  ;;  %v13632_v59 = vld [vmem:[#allocation35_spill] sm:$0xff] }
 0xeb4   :  { %6588 = vmatpush.msrb.mxu0 %v12396_v30  ;;  %6608 = vmatpush.msra.mxu2 %v12400_v32  ;;  %v13634_v30 = vld [vmem:[#allocation37_spill] sm:$0xff]  ;;  %v13635_v32 = vld [vmem:[#allocation46_spill] sm:$0xff] }
 0xeb5   :  { %6628 = vmatpush.msra.mxu3 %v12613_v0  ;;  %6648 = vmatpush.msrb.mxu1 %v12405_v17  ;;  %v13636_v17 = vld [vmem:[#allocation38_spill] sm:$0xff] }
 0xeb6   :  { %6589 = vmatpush.msrb.mxu0 %v12409_v29  ;;  %6609 = vmatpush.msra.mxu2 %v12413_v10  ;;  %v13637_v29 = vld [vmem:[#allocation47_spill] sm:$0xff] }
 0xeb7   :  { %6629 = vmatpush.msra.mxu3 %v12620_v31  ;;  %6649 = vmatpush.msrb.mxu1 %v12418_v12  ;;  %v13638_v10 = vld [vmem:[#allocation39_spill] sm:$0xff]  ;;  %v13639_v12 = vld [vmem:[#allocation48_spill] sm:$0xff] }
 0xeb8   :  { %6590 = vmatpush.msrb.mxu0 %v12422_v7  ;;  %6610 = vmatpush.msra.mxu2 %v12426_v39  ;;  %v13640_v7 = vld [vmem:[#allocation40_spill] sm:$0xff]  ;;  %v13641_v39 = vld [vmem:[#allocation49_spill] sm:$0xff] }
 0xeb9   :  { %6630 = vmatpush.msra.mxu3 %v12627_v35  ;;  %6650 = vmatpush.msrb.mxu1 %v12431_v42  ;;  %v13642_v42 = vld [vmem:[#allocation41_spill] sm:$0xff] }
 0xeba   :  { %6591 = vmatpush.msrb.mxu0 %v12435_v51  ;;  %6611 = vmatpush.msra.mxu2 %v12439_v23  ;;  %v13643_v51 = vld [vmem:[#allocation50_spill] sm:$0xff] }
 0xebb   :  { %6631 = vmatpush.msra.mxu3 %v12634_v4  ;;  %6651 = vmatpush.msrb.mxu1 %v12444_v13  ;;  %v13644_v23 = vld [vmem:[#allocation42_spill] sm:$0xff]  ;;  %v13645_v13 = vld [vmem:[#allocation51_spill] sm:$0xff] }
 0xebc   :  { %6592 = vmatpush.msrb.mxu0 %v12448_v25  ;;  %6612 = vmatpush.msra.mxu2 %v12452_v56  ;;  %v13646_v25 = vld [vmem:[#allocation52_spill] sm:$0xff]  ;;  %v13647_v56 = vld [vmem:[#allocation53_spill] sm:$0xff] }
 0xebd   :  { %6632 = vmatpush.msra.mxu3 %v12641_v15  ;;  %6652 = vmatpush.msrb.mxu1 %v12457_v5  ;;  %v13648_v5 = vld [vmem:[#allocation54_spill] sm:$0xff] }
 0xebe   :  { %6593 = vmatpush.msrb.mxu0 %v12461_v41  ;;  %6613 = vmatpush.msra.mxu2 %v12465_v62  ;;  %v13649_v62 = vld [vmem:[#allocation7_spill] sm:$0xff] }
 0xebf   :  { %6633 = vmatpush.msra.mxu3 %v12648_v18  ;;  %6653 = vmatpush.msrb.mxu1 %v12470_v16  ;;  %v13627_v16 = vld [vmem:[#allocation44_spill] sm:$0xff] }
 0xec0   :  { %6594 = vmatpush.msrb.mxu0 %v12474_v46  ;;  %6614 = vmatpush.msra.mxu2 %v12478_v2  ;;  %v13629_v2 = vld [vmem:[#allocation33_spill] sm:$0xff] }
 0xec1   :  { %6634 = vmatpush.msra.mxu3 %v12655_v6  ;;  %6654 = vmatpush.msrb.mxu1 %v12483_v34  ;;  %v13631_v34 = vld [vmem:[#allocation45_spill] sm:$0xff] }
 0xec2   :  { %6595 = vmatpush.msrb.mxu0 %v12487_v54  ;;  %6615 = vmatpush.msra.mxu2 %v12491_v44  ;;  %v13633_v44 = vld [vmem:[#allocation36_spill] sm:$0xff] }
 0xec3   :  { %6635 = vmatpush.msra.mxu3 %v12662_v26  ;;  %6655 = vmatpush.msrb.mxu1 %v13624_v55 }
 0xec4   :  { %6596 = vmatpush.msrb.mxu0 %v13625_v40  ;;  %6616 = vmatpush.msra.mxu2 %v13626_v60 }
 0xec5   :  { %6636 = vmatpush.msra.mxu3 %v13627_v16  ;;  %6656 = vmatpush.msrb.mxu1 %v13628_v3 }
 0xec6   :  { %6597 = vmatpush.msrb.mxu0 %v13629_v2  ;;  %6617 = vmatpush.msra.mxu2 %v13630_v19 }
 0xec7   :  { %6637 = vmatpush.msra.mxu3 %v13631_v34  ;;  %6657 = vmatpush.msrb.mxu1 %v13632_v59 }
 0xec8   :  { %6598 = vmatpush.msrb.mxu0 %v13633_v44  ;;  %6618 = vmatpush.msra.mxu2 %v13634_v30 }
 0xec9   :  { %6638 = vmatpush.msra.mxu3 %v13635_v32  ;;  %6658 = vmatpush.msrb.mxu1 %v13636_v17 }
 0xeca   :  { %6599 = vmatpush.msrb.mxu0 %v13637_v29  ;;  %6619 = vmatpush.msra.mxu2 %v13638_v10 }
 0xecb   :  { %6639 = vmatpush.msra.mxu3 %v13639_v12  ;;  %6659 = vmatpush.msrb.mxu1 %v13640_v7 }
 0xecc   :  { %6600 = vmatpush.msrb.mxu0 %v13641_v39  ;;  %6620 = vmatpush.msra.mxu2 %v13642_v42 }
 0xecd   :  { %6640 = vmatpush.msra.mxu3 %v13643_v51  ;;  %6660 = vmatpush.msrb.mxu1 %v13644_v23 }
 0xece   :  { %6601 = vmatpush.msrb.mxu0 %v13645_v13  ;;  %6621 = vmatpush.msra.mxu2 %v13646_v25 }
 0xecf   :  { %6641 = vmatpush.msra.mxu3 %v13647_v56  ;;  %6661 = vmatpush.msrb.mxu1 %v13648_v5 }
 0xf2b   :  { %v6165_v1 = vpop.f32.mrf.mxu0 }
 0xf2c   :  { %v6225_v41 = vpop.f32.mrf.mxu1  ;;  %v6236_v48 = vadd.f32 %v13651_v9, %v6165_v1 }
 0xf2d   :  { %v12823_v46 = vadd.f32 %v13649_v62, %v6225_v41 }
 0xf2e   :  { %v7419_v22 = vmul.f32 -1.442695, %v6236_v48 }
 0xf2f   :  { %7932 = vtanh.f32 %v12823_v46 }
 0xf31   :  { %v6185_v54 = vpop.f32.mrf.mxu2 }
 0xf32   :  { %v12827_v20 = vadd.f32 %v13650_v33, %v6185_v54  ;;  %v6205_v49 = vpop.f32.mrf.mxu3 }
 0xf33   :  { %v6246_v45 = vadd.f32 %v13652_v11, %v6205_v49 }
 0xf34   :  { %7934 = vtanh.f32 %v12827_v20 }
 0xf35   :  { %v7933_v14 = vpop.eup %7932  ;;  %7936 = vpow2.f32 %v7419_v22  ;;  %v7421_v47 = vmul.f32 -1.442695, %v6246_v45 }
 0xf36   :  { %6345 = vrot.lane.b32.xlu1 %v7933_v14, %s8198_s19 }
 0xf3a   :  { %v7935_v8 = vpop.eup %7934 }
 0xf3b   :  { %6289 = vrot.lane.b32.xlu2 %v7935_v8, %s8198_s19  ;;  %v7937_v43 = vpop.eup %7936 }
 0xf3c   :  { %v6254_v50 = vadd.f32 1.0, %v7937_v43 }
 0xf3e   :  { %7938 = vrcp.f32 %v6254_v50  ;;  %v6267_v55 = vand.u32 2147483648, %v6254_v50  ;;  %vm6261_vm3 = vweird.f32 %v6254_v50  ;;  %v6265_v40 = vand.u32 2147483647, %v6254_v50 }
 0xf3f   :  { %7940 = vpow2.f32 %v7421_v47 }
 0xf40   :  { %v6268_v2 = vor.u32 1.1754944e-38, %v6267_v55  ;;  %vm6266_vm12 = vcmp.eq.f32.partialorder %v6265_v40, 8.507059e+37 }
 0xf44   :  { %v7939_v63 = vpop.eup %7938 }
 0xf45   :  { %v6257_v52 = vmul.f32 %v7939_v63, %v6254_v50  ;;  %v7941_v28 = vpop.eup %7940  ;;  %vm6262_vm5 = vweird.f32 %v7939_v63 }
 0xf46   :  { %v6310_v53 = vadd.f32 1.0, %v7941_v28  ;;  %vm6263_vm10 = vmor %vm6261_vm3, %vm6262_vm5 }
 0xf47   :  { %v6258_v24 = vsub.f32 1.0, %v6257_v52 }
 0xf48   :  { %7942 = vrcp.f32 %v6310_v53  ;;  %v6323_v42 = vand.u32 2147483648, %v6310_v53  ;;  %vm6317_vm13 = vweird.f32 %v6310_v53  ;;  %v6321_v23 = vand.u32 2147483647, %v6310_v53 }
 0xf49   :  { %v6259_v21 = vmul.f32 %v7939_v63, %v6258_v24 }
 0xf4a   :  { %v6324_v62 = vor.u32 1.1754944e-38, %v6323_v42  ;;  %vm6322_vm0 = vcmp.eq.f32.partialorder %v6321_v23, 8.507059e+37 }
 0xf4b   :  { %v6260_v27 = vadd.f32 %v7939_v63, %v6259_v21 }
 0xf4d   :  { %v6264_v3 = vsel %vm6263_vm10, %v7939_v63, %v6260_v27 }
 0xf4e   :  { %v7943_v60 = vpop.eup %7942  ;;  %v6269_v59 = vsel %vm6266_vm12, %v6268_v2, %v6264_v3  ;;  %v7420_v3 = vmul.f32 -1.442695, %v12827_v20 }
 0xf4f   :  { %v6313_v44 = vmul.f32 %v7943_v60, %v6310_v53  ;;  %vm6318_vm9 = vweird.f32 %v7943_v60  ;;  %v6287_v8 = vmul.f32 %v6269_v59, %v12743_v57  ;;  %v7422_v57 = vmul.f32 -1.442695, %v12823_v46 }
 0xf50   :  { %vm6319_vm14 = vmor %vm6317_vm13, %vm6318_vm9 }
 0xf51   :  { %v6314_v17 = vsub.f32 1.0, %v6313_v44 }
 0xf53   :  { %v6315_v10 = vmul.f32 %v7943_v60, %v6314_v17 }
 0xf55   :  { %v6316_v7 = vadd.f32 %v7943_v60, %v6315_v10 }
 0xf57   :  { %v6320_v41 = vsel %vm6319_vm14, %v7943_v60, %v6316_v7 }
 0xf58   :  { %v6325_v33 = vsel %vm6322_vm0, %v6324_v62, %v6320_v41 }
 0xf59   :  { %v6343_v22 = vmul.f32 %v6325_v33, %v12738_v37 }
 0xf95   :  { %v6290_v19 = vpop.permute.xlu2 %6289 }
 0xf96   :  { %v6292_v30 = vmul.f32 %v6290_v19, %v6269_v59 }
 0xf98   :  { %6294 = vrot.lane.b32.xlu1 %v6292_v30, %s8198_s19 }
 0xfa8   :  { %v6346_v54 = vpop.permute.xlu1 %6345 }
 0xfa9   :  { %v6348_v14 = vmul.f32 %v6346_v54, %v6325_v33 }
 0xfab   :  { %6350 = vrot.lane.b32.xlu0 %v6348_v14, %s8198_s19  ;;  %v12857_v14 = vld [vmem:[%s11659_s21 + $0x1e0] sm:$0xff] }
0x100a   :  { %v6295_v1 = vpop.permute.xlu1 %6294 }
0x100b   :  { %v12837_v9 = vadd.f32 %v6295_v1, %v6287_v8  ;;  %v12861_v8 = vld [vmem:[%s11659_s21 + $0x1e8] sm:$0xff]  ;;  %v12866_v1 = vld [vmem:[%s11659_s21 + $0x1f8] sm:$0xff] }
0x100d   :  { %7944 = vtanh.f32 %v12837_v9 }
0x1013   :  { %v7945_v48 = vpop.eup %7944 }
0x1014   :  { %6300 = vrot.lane.b32.xlu0 %v7945_v48, %s8198_s19  ;;  %v12870_v48 = vld [vmem:[%s11659_s21 + $0x1c0] sm:$0xff] }
0x101d   :  { %v6351_v43 = vpop.permute.xlu0 %6350 }
0x101e   :  { %v12842_v49 = vadd.f32 %v6351_v43, %v6343_v22  ;;  %v12874_v22 = vld [vmem:[%s11659_s21 + $0x1c8] sm:$0xff]  ;;  %v12879_v43 = vld [vmem:[%s11659_s21 + $0x1d8] sm:$0xff] }
0x1020   :  { %7946 = vtanh.f32 %v12842_v49 }
0x1021   :  { %7948 = vpow2.f32 %v7422_v57  ;;  %v12892_v57 = vld [vmem:[%s11659_s21 + $0x1b8] sm:$0xff] }
0x1026   :  { %v7947_v50 = vpop.eup %7946 }
0x1027   :  { %6356 = vrot.lane.b32.xlu2 %v7947_v50, %s8198_s19  ;;  %v7949_v11 = vpop.eup %7948  ;;  %v12887_v50 = vld [vmem:[%s11659_s21 + $0x1a8] sm:$0xff] }
0x1028   :  { %v6311_v45 = vadd.f32 1.0, %v7949_v11  ;;  %v12900_v11 = vld [vmem:[%s11659_s21 + $0x188] sm:$0xff] }
0x102a   :  { %7950 = vrcp.f32 %v6311_v45  ;;  %v6338_v37 = vand.u32 2147483648, %v6311_v45  ;;  %vm6332_vm15 = vweird.f32 %v6311_v45  ;;  %v6336_v53 = vand.u32 2147483647, %v6311_v45 }
0x102b   :  { %7952 = vpow2.f32 %v7420_v3  ;;  %v12991_v3 = vld [vmem:[%s11659_s21 + $0xa8] sm:$0xff] }
0x102c   :  { %v6339_v27 = vor.u32 1.1754944e-38, %v6338_v37  ;;  %vm6337_vm11 = vcmp.eq.f32.partialorder %v6336_v53, 8.507059e+37  ;;  %v12944_v37 = vld [vmem:[%s11659_s21 + $0x138] sm:$0xff]  ;;  %v12952_v53 = vld [vmem:[%s11659_s21 + $0x108] sm:$0xff] }
0x1030   :  { %v7951_v47 = vpop.eup %7950 }
0x1031   :  { %v6328_v63 = vmul.f32 %v7951_v47, %v6311_v45  ;;  %vm6333_vm1 = vweird.f32 %v7951_v47  ;;  %v7953_v2 = vpop.eup %7952  ;;  %v12905_v45 = vld [vmem:[%s11659_s21 + $0x198] sm:$0xff] }
0x1032   :  { %vm6334_vm2 = vmor %vm6332_vm15, %vm6333_vm1  ;;  %v6255_v19 = vadd.f32 1.0, %v7953_v2  ;;  %v12996_v2 = vld [vmem:[%s11659_s21 + $0xb8] sm:$0xff] }
0x1033   :  { %v6329_v52 = vsub.f32 1.0, %v6328_v63  ;;  %v12918_v63 = vld [vmem:[%s11659_s21 + $0x178] sm:$0xff] }
0x1034   :  { %7954 = vrcp.f32 %v6255_v19  ;;  %v6282_v7 = vand.u32 2147483648, %v6255_v19  ;;  %vm6276_vm7 = vweird.f32 %v6255_v19  ;;  %v6280_v42 = vand.u32 2147483647, %v6255_v19 }
0x1035   :  { %v6330_v28 = vmul.f32 %v7951_v47, %v6329_v52  ;;  %v12926_v52 = vld [vmem:[%s11659_s21 + $0x148] sm:$0xff] }
0x1036   :  { %v6283_v23 = vor.u32 1.1754944e-38, %v6282_v7  ;;  %vm6281_vm3 = vcmp.eq.f32.partialorder %v6280_v42, 8.507059e+37 }
0x1037   :  { %v6331_v24 = vadd.f32 %v7951_v47, %v6330_v28  ;;  %v12931_v28 = vld [vmem:[%s11659_s21 + $0x158] sm:$0xff] }
0x1039   :  { %v6335_v21 = vsel %vm6334_vm2, %v7951_v47, %v6331_v24  ;;  %v12913_v47 = vld [vmem:[%s11659_s21 + $0x168] sm:$0xff] }
0x103a   :  { %v6340_v55 = vsel %vm6337_vm11, %v6339_v27, %v6335_v21  ;;  %v7955_v59 = vpop.eup %7954  ;;  %v12939_v24 = vld [vmem:[%s11659_s21 + $0x128] sm:$0xff]  ;;  %v12957_v21 = vld [vmem:[%s11659_s21 + $0x118] sm:$0xff] }
0x103b   :  { %v6272_v44 = vmul.f32 %v7955_v59, %v6255_v19  ;;  %vm6277_vm8 = vweird.f32 %v7955_v59  ;;  %v12965_v27 = vld [vmem:[%s11659_s21 + $0xe8] sm:$0xff] }
0x103c   :  { %vm6278_vm5 = vmor %vm6276_vm7, %vm6277_vm8  ;;  %v13004_v19 = vld [vmem:[%s11659_s21 + $0x88] sm:$0xff] }
0x103d   :  { %v6273_v30 = vsub.f32 1.0, %v6272_v44  ;;  %v13017_v44 = vld [vmem:[%s11659_s21 + $0x68] sm:$0xff] }
0x103f   :  { %v6274_v17 = vmul.f32 %v7955_v59, %v6273_v30  ;;  %v13022_v30 = vld [vmem:[%s11659_s21 + $0x78] sm:$0xff] }
0x1041   :  { %v6275_v10 = vadd.f32 %v7955_v59, %v6274_v17  ;;  %v13032_v17 = vld [vmem:[%s11659_s21 + $0x58] sm:$0xff] }
0x1081   :  { %v6357_v40 = vpop.permute.xlu2 %6356 }
0x1082   :  { %v6359_v46 = vmul.f32 %v6357_v40, %v6340_v55  ;;  %v12970_v55 = vld [vmem:[%s11659_s21 + $0xf8] sm:$0xff]  ;;  %v12978_v40 = vld [vmem:[%s11659_s21 + $0xc8] sm:$0xff] }
0x1084   :  { %v12848_v60 = vadd.f32 %v6359_v46, %v12750_v58  ;;  %6361 = vrot.lane.b32.xlu1 %v6359_v46, %s8198_s19  ;;  %v6279_v58 = vsel %vm6278_vm5, %v7955_v59, %v6275_v10  ;;  %v12983_v46 = vld [vmem:[%s11659_s21 + $0xd8] sm:$0xff]  ;;  %v13037_v10 = vld [vmem:[%s11659_s21 + $0x28] sm:$0xff] }
0x1085   :  { %v6284_v41 = vsel %vm6281_vm3, %v6283_v23, %v6279_v58  ;;  %v13009_v59 = vld [vmem:[%s11659_s21 + $0x98] sm:$0xff]  ;;  %13654 = vst [vmem:[#allocation22_spill] sm:$0xff] %v13037_v10 }
0x1086   :  { %v6301_v20 = vpop.permute.xlu0 %6300 }
0x1087   :  { %v12852_v62 = vmul.f32 %v6301_v20, %v6284_v41 }
0x1089   :  { %13653 = vst [vmem:[#allocation10_spill] sm:$0xff] %v12852_v62 }
0x10f6   :  { %v6362_v54 = vpop.permute.xlu1 %6361 }
0x10f7   :  { %v6364_v33 = vsel %vm1165_vm6, %v12852_v62, %v6362_v54 }
0x10f8   :  { %6383 = vmatmul.f32.vlgmr.msra.gmra.mxu0 %v6364_v33  ;;  %6403 = vmatmul.f32.vlgmr.msrb.gmra.mxu2 %v6364_v33 }
0x10f9   :  { %6423 = vmatmul.f32.vlgmr.msrb.gmra.mxu3 %v6364_v33  ;;  %6443 = vmatmul.f32.vlgmr.msra.gmra.mxu1 %v6364_v33 }
0x10fa   :  { %6805 = vmatpush.msra.mxu0 %v12857_v14  ;;  %6825 = vmatpush.msrb.mxu2 %v12861_v8 }
0x10fb   :  { %6845 = vmatpush.msrb.mxu3 %v12599_v61  ;;  %6865 = vmatpush.msra.mxu1 %v12866_v1  ;;  %v12883_v61 = vld [vmem:[%s11659_s21 + $0x1a0] sm:$0xff] }
0x10fc   :  { %6806 = vmatpush.msra.mxu0 %v12870_v48  ;;  %6826 = vmatpush.msrb.mxu2 %v12874_v22 }
0x10fd   :  { %6846 = vmatpush.msrb.mxu3 %v12606_v36  ;;  %6866 = vmatpush.msra.mxu1 %v12879_v43  ;;  %v12896_v36 = vld [vmem:[%s11659_s21 + $0x180] sm:$0xff] }
0x10fe   :  { %6807 = vmatpush.msra.mxu0 %v12883_v61  ;;  %6827 = vmatpush.msrb.mxu2 %v12887_v50 }
0x10ff   :  { %6847 = vmatpush.msrb.mxu3 %v12613_v0  ;;  %6867 = vmatpush.msra.mxu1 %v12892_v57  ;;  %v12909_v0 = vld [vmem:[%s11659_s21 + $0x160] sm:$0xff] }
0x1100   :  { %6808 = vmatpush.msra.mxu0 %v12896_v36  ;;  %6828 = vmatpush.msrb.mxu2 %v12900_v11 }
0x1101   :  { %6848 = vmatpush.msrb.mxu3 %v12620_v31  ;;  %6868 = vmatpush.msra.mxu1 %v12905_v45  ;;  %v12922_v31 = vld [vmem:[%s11659_s21 + $0x140] sm:$0xff] }
0x1102   :  { %6809 = vmatpush.msra.mxu0 %v12909_v0  ;;  %6829 = vmatpush.msrb.mxu2 %v12913_v47 }
0x1103   :  { %6849 = vmatpush.msrb.mxu3 %v12627_v35  ;;  %6869 = vmatpush.msra.mxu1 %v12918_v63  ;;  %v12935_v35 = vld [vmem:[%s11659_s21 + $0x120] sm:$0xff] }
0x1104   :  { %6810 = vmatpush.msra.mxu0 %v12922_v31  ;;  %6830 = vmatpush.msrb.mxu2 %v12926_v52 }
0x1105   :  { %6850 = vmatpush.msrb.mxu3 %v12634_v4  ;;  %6870 = vmatpush.msra.mxu1 %v12931_v28  ;;  %v12948_v4 = vld [vmem:[%s11659_s21 + $0x100] sm:$0xff] }
0x1106   :  { %6811 = vmatpush.msra.mxu0 %v12935_v35  ;;  %6831 = vmatpush.msrb.mxu2 %v12939_v24 }
0x1107   :  { %6851 = vmatpush.msrb.mxu3 %v12641_v15  ;;  %6871 = vmatpush.msra.mxu1 %v12944_v37  ;;  %v12961_v15 = vld [vmem:[%s11659_s21 + $0xe0] sm:$0xff] }
0x1108   :  { %6812 = vmatpush.msra.mxu0 %v12948_v4  ;;  %6832 = vmatpush.msrb.mxu2 %v12952_v53 }
0x1109   :  { %6852 = vmatpush.msrb.mxu3 %v12648_v18  ;;  %6872 = vmatpush.msra.mxu1 %v12957_v21  ;;  %v12974_v18 = vld [vmem:[%s11659_s21 + $0xc0] sm:$0xff] }
0x110a   :  { %6813 = vmatpush.msra.mxu0 %v12961_v15  ;;  %6833 = vmatpush.msrb.mxu2 %v12965_v27 }
0x110b   :  { %6853 = vmatpush.msrb.mxu3 %v12655_v6  ;;  %6873 = vmatpush.msra.mxu1 %v12970_v55  ;;  %v12987_v6 = vld [vmem:[%s11659_s21 + $0xa0] sm:$0xff] }
0x110c   :  { %6814 = vmatpush.msra.mxu0 %v12974_v18  ;;  %6834 = vmatpush.msrb.mxu2 %v12978_v40 }
0x110d   :  { %6854 = vmatpush.msrb.mxu3 %v12662_v26  ;;  %6874 = vmatpush.msra.mxu1 %v12983_v46  ;;  %v13000_v26 = vld [vmem:[%s11659_s21 + $0x80] sm:$0xff] }
0x110e   :  { %6815 = vmatpush.msra.mxu0 %v12987_v6  ;;  %6835 = vmatpush.msrb.mxu2 %v12991_v3 }
0x110f   :  { %6855 = vmatpush.msrb.mxu3 %v13627_v16  ;;  %6875 = vmatpush.msra.mxu1 %v12996_v2  ;;  %v13013_v16 = vld [vmem:[%s11659_s21 + $0x60] sm:$0xff] }
0x1110   :  { %6816 = vmatpush.msra.mxu0 %v13000_v26  ;;  %6836 = vmatpush.msrb.mxu2 %v13004_v19 }
0x1111   :  { %6856 = vmatpush.msrb.mxu3 %v13631_v34  ;;  %6876 = vmatpush.msra.mxu1 %v13009_v59  ;;  %v13027_v34 = vld [vmem:[%s11659_s21 + $0x48] sm:$0xff] }
0x1112   :  { %6817 = vmatpush.msra.mxu0 %v13013_v16  ;;  %6837 = vmatpush.msrb.mxu2 %v13017_v44 }
0x1113   :  { %6857 = vmatpush.msrb.mxu3 %v13635_v32  ;;  %6877 = vmatpush.msra.mxu1 %v13022_v30  ;;  %v13042_v32 = vld [vmem:[%s11659_s21 + $0x38] sm:$0xff] }
0x1114   :  { %6818 = vmatpush.msra.mxu0 %v13637_v29  ;;  %6838 = vmatpush.msrb.mxu2 %v13027_v34  ;;  %13655 = vst [vmem:[#allocation8_spill] sm:$0xff] %v13042_v32 }
0x1115   :  { %6858 = vmatpush.msrb.mxu3 %v13639_v12  ;;  %6878 = vmatpush.msra.mxu1 %v13032_v17  ;;  %v13656_v12 = vld [vmem:[#allocation5_spill] sm:$0xff] }
0x1116   :  { %6819 = vmatpush.msra.mxu0 %v13641_v39  ;;  %6839 = vmatpush.msrb.mxu2 %v13037_v10 }
0x1117   :  { %6859 = vmatpush.msrb.mxu3 %v13643_v51  ;;  %6879 = vmatpush.msra.mxu1 %v13042_v32  ;;  %v13657_v51 = vld [vmem:[#allocation14_spill] sm:$0xff] }
0x1118   :  { %6820 = vmatpush.msra.mxu0 %v13645_v13  ;;  %6840 = vmatpush.msrb.mxu2 %v13646_v25 }
0x1119   :  { %6860 = vmatpush.msrb.mxu3 %v13647_v56  ;;  %6880 = vmatpush.msra.mxu1 %v13648_v5  ;;  %v13658_v56 = vld [vmem:[#allocation24_spill] sm:$0xff] }
0x1175   :  { %v6384_v54 = vpop.f32.mrf.mxu0 }
0x1176   :  { %v6444_v29 = vpop.f32.mrf.mxu1 }
0x1177   :  { %v13050_v39 = vadd.f32 %v13656_v12, %v6444_v29  ;;  %v13659_v29 = vld [vmem:[#allocation13_spill] sm:$0xff] }
0x1178   :  { %v6455_v12 = vadd.f32 %v13659_v29, %v6384_v54 }
0x1179   :  { %7956 = vtanh.f32 %v13050_v39 }
0x117b   :  { %v6404_v7 = vpop.f32.mrf.mxu2 }
0x117c   :  { %v13054_v42 = vadd.f32 %v13657_v51, %v6404_v7  ;;  %v6424_v25 = vpop.f32.mrf.mxu3  ;;  %v7423_v51 = vmul.f32 -1.442695, %v6455_v12 }
0x117d   :  { %v6465_v5 = vadd.f32 %v13658_v56, %v6424_v25 }
0x117e   :  { %7958 = vtanh.f32 %v13054_v42 }
0x117f   :  { %v7957_v58 = vpop.eup %7956  ;;  %v7425_v23 = vmul.f32 -1.442695, %v6465_v5 }
0x1180   :  { %6564 = vrot.lane.b32.xlu2 %v7957_v58, %s8198_s19 }
0x1181   :  { %7960 = vpow2.f32 %v7425_v23 }
0x1184   :  { %v7959_v13 = vpop.eup %7958 }
0x1185   :  { %6508 = vrot.lane.b32.xlu0 %v7959_v13, %s8198_s19 }
0x1187   :  { %v7961_v20 = vpop.eup %7960 }
0x1188   :  { %v6529_v41 = vadd.f32 1.0, %v7961_v20 }
0x118a   :  { %7962 = vrcp.f32 %v6529_v41  ;;  %v6542_v32 = vand.u32 2147483648, %v6529_v41  ;;  %vm6536_vm12 = vweird.f32 %v6529_v41  ;;  %v6540_v25 = vand.u32 2147483647, %v6529_v41 }
0x118b   :  { %7964 = vpow2.f32 %v7423_v51 }
0x118c   :  { %v6543_v23 = vor.u32 1.1754944e-38, %v6542_v32  ;;  %vm6541_vm13 = vcmp.eq.f32.partialorder %v6540_v25, 8.507059e+37 }
0x1190   :  { %v7963_v33 = vpop.eup %7962 }
0x1191   :  { %v6532_v7 = vmul.f32 %v7963_v33, %v6529_v41  ;;  %vm6537_vm10 = vweird.f32 %v7963_v33  ;;  %v7965_v13 = vpop.eup %7964 }
0x1192   :  { %vm6538_vm9 = vmor %vm6536_vm12, %vm6537_vm10  ;;  %v6473_v56 = vadd.f32 1.0, %v7965_v13 }
0x1193   :  { %v6533_v62 = vsub.f32 1.0, %v6532_v7 }
0x1194   :  { %7966 = vrcp.f32 %v6473_v56  ;;  %vm6480_vm0 = vweird.f32 %v6473_v56  ;;  %v6484_v41 = vand.u32 2147483647, %v6473_v56 }
0x1195   :  { %v6534_v58 = vmul.f32 %v7963_v33, %v6533_v62 }
0x1196   :  { %vm6485_vm15 = vcmp.eq.f32.partialorder %v6484_v41, 8.507059e+37 }
0x1197   :  { %v6535_v38 = vadd.f32 %v7963_v33, %v6534_v58  ;;  %v6486_v58 = vand.u32 2147483648, %v6473_v56 }
0x1199   :  { %v6539_v5 = vsel %vm6538_vm9, %v7963_v33, %v6535_v38  ;;  %v6487_v38 = vor.u32 1.1754944e-38, %v6486_v58 }
0x119a   :  { %v6544_v10 = vsel %vm6541_vm13, %v6543_v23, %v6539_v5  ;;  %v7967_v29 = vpop.eup %7966 }
0x119b   :  { %v6476_v12 = vmul.f32 %v7967_v29, %v6473_v56  ;;  %vm6481_vm14 = vweird.f32 %v7967_v29  ;;  %v6562_v5 = vmul.f32 %v6544_v10, %v12842_v49  ;;  %v7426_v49 = vmul.f32 -1.442695, %v13050_v39 }
0x119c   :  { %vm6482_vm1 = vmor %vm6480_vm0, %vm6481_vm14 }
0x119d   :  { %v6477_v62 = vsub.f32 1.0, %v6476_v12 }
0x119f   :  { %v6478_v7 = vmul.f32 %v7967_v29, %v6477_v62 }
0x11a1   :  { %v6479_v51 = vadd.f32 %v7967_v29, %v6478_v7 }
0x11a3   :  { %v6483_v13 = vsel %vm6482_vm1, %v7967_v29, %v6479_v51 }
0x11a4   :  { %v6488_v33 = vsel %vm6485_vm15, %v6487_v38, %v6483_v13 }
0x11da   :  { %v6565_v20 = vpop.permute.xlu2 %6564 }
0x11db   :  { %v6567_v54 = vmul.f32 %v6565_v20, %v6544_v10 }
0x11dd   :  { %6569 = vrot.lane.b32.xlu1 %v6567_v54, %s8198_s19  ;;  %v6506_v54 = vmul.f32 %v6488_v33, %v12837_v9 }
0x11f7   :  { %v6509_v32 = vpop.permute.xlu0 %6508 }
0x11f8   :  { %v6511_v25 = vmul.f32 %v6509_v32, %v6488_v33 }
0x11fa   :  { %6513 = vrot.lane.b32.xlu2 %v6511_v25, %s8198_s19 }
0x124f   :  { %v6570_v23 = vpop.permute.xlu1 %6569 }
0x1250   :  { %v13064_v20 = vadd.f32 %v6570_v23, %v6562_v5 }
0x1252   :  { %7968 = vtanh.f32 %v13064_v20 }
0x1254   :  { %v6514_v12 = vpop.permute.xlu2 %6513 }
0x1255   :  { %v13068_v56 = vadd.f32 %v6514_v12, %v6506_v54  ;;  %v7424_v12 = vmul.f32 -1.442695, %v13054_v42 }
0x1257   :  { %7970 = vtanh.f32 %v13068_v56 }
0x1258   :  { %v7969_v29 = vpop.eup %7968  ;;  %7972 = vpow2.f32 %v7426_v49 }
0x1259   :  { %6575 = vrot.lane.b32.xlu0 %v7969_v29, %s8198_s19 }
0x125d   :  { %v7971_v62 = vpop.eup %7970 }
0x125e   :  { %6519 = vrot.lane.b32.xlu1 %v7971_v62, %s8198_s19  ;;  %v7973_v10 = vpop.eup %7972 }
0x125f   :  { %v6530_v7 = vadd.f32 1.0, %v7973_v10 }
0x1261   :  { %7974 = vrcp.f32 %v6530_v7  ;;  %v6557_v38 = vand.u32 2147483648, %v6530_v7  ;;  %vm6551_vm11 = vweird.f32 %v6530_v7  ;;  %v6555_v32 = vand.u32 2147483647, %v6530_v7 }
0x1262   :  { %7976 = vpow2.f32 %v7424_v12 }
0x1263   :  { %v6558_v25 = vor.u32 1.1754944e-38, %v6557_v38  ;;  %vm6556_vm7 = vcmp.eq.f32.partialorder %v6555_v32, 8.507059e+37 }
0x1267   :  { %v7975_v51 = vpop.eup %7974 }
0x1268   :  { %v6547_v58 = vmul.f32 %v7975_v51, %v6530_v7  ;;  %vm6552_vm2 = vweird.f32 %v7975_v51  ;;  %v7977_v29 = vpop.eup %7976 }
0x1269   :  { %vm6553_vm8 = vmor %vm6551_vm11, %vm6552_vm2  ;;  %v6474_v62 = vadd.f32 1.0, %v7977_v29 }
0x126a   :  { %v6548_v9 = vsub.f32 1.0, %v6547_v58 }
0x126b   :  { %7978 = vrcp.f32 %v6474_v62  ;;  %vm6495_vm3 = vweird.f32 %v6474_v62 }
0x126c   :  { %v6549_v41 = vmul.f32 %v7975_v51, %v6548_v9  ;;  %v6501_v9 = vand.u32 2147483648, %v6474_v62 }
0x126e   :  { %v6550_v13 = vadd.f32 %v7975_v51, %v6549_v41  ;;  %v6499_v41 = vand.u32 2147483647, %v6474_v62 }
0x1270   :  { %v6554_v33 = vsel %vm6553_vm8, %v7975_v51, %v6550_v13  ;;  %v6502_v13 = vor.u32 1.1754944e-38, %v6501_v9  ;;  %vm6500_vm12 = vcmp.eq.f32.partialorder %v6499_v41, 8.507059e+37 }
0x1271   :  { %v6559_v5 = vsel %vm6556_vm7, %v6558_v25, %v6554_v33  ;;  %v7979_v49 = vpop.eup %7978 }
0x1272   :  { %v6491_v10 = vmul.f32 %v7979_v49, %v6474_v62  ;;  %vm6496_vm5 = vweird.f32 %v7979_v49 }
0x1273   :  { %vm6497_vm10 = vmor %vm6495_vm3, %vm6496_vm5 }
0x1274   :  { %v6492_v7 = vsub.f32 1.0, %v6491_v10 }
0x1276   :  { %v6493_v51 = vmul.f32 %v7979_v49, %v6492_v7 }
0x1278   :  { %v6494_v58 = vadd.f32 %v7979_v49, %v6493_v51 }
0x12cb   :  { %v6576_v23 = vpop.permute.xlu0 %6575 }
0x12cc   :  { %v6578_v39 = vmul.f32 %v6576_v23, %v6559_v5  ;;  %v8172_v5 = vld [vmem:[%s11659_s21 + $0x1f0] sm:$0xff] }
0x12cd   :  { %v8173_v23 = vld [vmem:[%s11659_s21 + $0x1d0] sm:$0xff] }
0x12ce   :  { %v13075_v54 = vadd.f32 %v6578_v39, %v12848_v60  ;;  %6580 = vrot.lane.b32.xlu2 %v6578_v39, %s8198_s19  ;;  %v6498_v60 = vsel %vm6497_vm10, %v7979_v49, %v6494_v58 }
0x12cf   :  { %v6503_v42 = vsel %vm6500_vm12, %v6502_v13, %v6498_v60 }
0x12d0   :  { %v6520_v38 = vpop.permute.xlu1 %6519 }
0x12d1   :  { %v13079_v32 = vmul.f32 %v6520_v38, %v6503_v42 }
0x1328   :  { %v6581_v33 = vpop.permute.xlu2 %6580 }
0x1329   :  { %v6583_v25 = vsel %vm1165_vm6, %v13079_v32, %v6581_v33 }
0x132a   :  { %6602 = vmatmul.f32.vlgmr.msrb.gmra.mxu0 %v6583_v25  ;;  %6622 = vmatmul.f32.vlgmr.msra.gmra.mxu2 %v6583_v25 }
0x132b   :  { %6642 = vmatmul.f32.vlgmr.msra.gmra.mxu3 %v6583_v25  ;;  %6662 = vmatmul.f32.vlgmr.msrb.gmra.mxu1 %v6583_v25 }
0x132c   :  { %7022 = vmatpush.msrb.mxu0 %v12857_v14  ;;  %7042 = vmatpush.msra.mxu2 %v12861_v8  ;;  %v8174_v14 = vld [vmem:[%s11659_s21 + $0x1b0] sm:$0xff] }
0x132d   :  { %7062 = vmatpush.msra.mxu3 %v8172_v5  ;;  %7082 = vmatpush.msrb.mxu1 %v12866_v1  ;;  %v8175_v8 = vld [vmem:[%s11659_s21 + $0x190] sm:$0xff] }
0x132e   :  { %7023 = vmatpush.msrb.mxu0 %v12870_v48  ;;  %7043 = vmatpush.msra.mxu2 %v12874_v22  ;;  %v8176_v1 = vld [vmem:[%s11659_s21 + $0x170] sm:$0xff] }
0x132f   :  { %7063 = vmatpush.msra.mxu3 %v8173_v23  ;;  %7083 = vmatpush.msrb.mxu1 %v12879_v43  ;;  %v8177_v48 = vld [vmem:[%s11659_s21 + $0x150] sm:$0xff] }
0x1330   :  { %7024 = vmatpush.msrb.mxu0 %v12883_v61  ;;  %7044 = vmatpush.msra.mxu2 %v12887_v50  ;;  %v8178_v22 = vld [vmem:[%s11659_s21 + $0x130] sm:$0xff] }
0x1331   :  { %7064 = vmatpush.msra.mxu3 %v8174_v14  ;;  %7084 = vmatpush.msrb.mxu1 %v12892_v57  ;;  %v8179_v43 = vld [vmem:[%s11659_s21 + $0x110] sm:$0xff] }
0x1332   :  { %7025 = vmatpush.msrb.mxu0 %v12896_v36  ;;  %7045 = vmatpush.msra.mxu2 %v12900_v11  ;;  %v8180_v61 = vld [vmem:[%s11659_s21 + $0xf0] sm:$0xff] }
0x1333   :  { %7065 = vmatpush.msra.mxu3 %v8175_v8  ;;  %7085 = vmatpush.msrb.mxu1 %v12905_v45  ;;  %v8181_v50 = vld [vmem:[%s11659_s21 + $0xd0] sm:$0xff]  ;;  %v8185_v45 = vld [vmem:[%s11659_s21 + $0x40] sm:$0xff] }
0x1334   :  { %7026 = vmatpush.msrb.mxu0 %v12909_v0  ;;  %7046 = vmatpush.msra.mxu2 %v12913_v47  ;;  %v8182_v57 = vld [vmem:[%s11659_s21 + $0xb0] sm:$0xff]  ;;  %v8187_v47 = vld [vmem:[%s11659_s21 + $0x20] sm:$0xff] }
0x1335   :  { %7066 = vmatpush.msra.mxu3 %v8176_v1  ;;  %7086 = vmatpush.msrb.mxu1 %v12918_v63  ;;  %v8183_v36 = vld [vmem:[%s11659_s21 + $0x90] sm:$0xff]  ;;  %v13660_v63 = vld [vmem:[#allocation22_spill] sm:$0xff] }
0x1336   :  { %7027 = vmatpush.msrb.mxu0 %v12922_v31  ;;  %7047 = vmatpush.msra.mxu2 %v12926_v52  ;;  %v8184_v11 = vld [vmem:[%s11659_s21 + $0x70] sm:$0xff] }
0x1337   :  { %7067 = vmatpush.msra.mxu3 %v8177_v48  ;;  %7087 = vmatpush.msrb.mxu1 %v12931_v28  ;;  %v8186_v0 = vld [vmem:[%s11659_s21 + $0x50] sm:$0xff]  ;;  %v8189_v28 = vld [vmem:[%s11659_s21] sm:$0xff] }
0x1338   :  { %7028 = vmatpush.msrb.mxu0 %v12935_v35  ;;  %7048 = vmatpush.msra.mxu2 %v12939_v24  ;;  %v8188_v31 = vld [vmem:[%s11659_s21 + $0x30] sm:$0xff]  ;;  %v8190_v35 = vld [vmem:[%s11659_s21 + $0x8] sm:$0xff] }
0x1339   :  { %7068 = vmatpush.msra.mxu3 %v8178_v22  ;;  %7088 = vmatpush.msrb.mxu1 %v12944_v37  ;;  %v13661_v52 = vld [vmem:[#allocation8_spill] sm:$0xff]  ;;  %v8192_v37 = vld [vmem:[%s11659_s21 + $0x18] sm:$0xff] }
0x133a   :  { %7029 = vmatpush.msrb.mxu0 %v12948_v4  ;;  %7049 = vmatpush.msra.mxu2 %v12952_v53  ;;  %v8191_v24 = vld [vmem:[%s11659_s21 + $0x10] sm:$0xff]  ;;  %v13662_v53 = vld [vmem:[#allocation3_spill] sm:$0xff] }
0x133b   :  { %7069 = vmatpush.msra.mxu3 %v8179_v43  ;;  %7089 = vmatpush.msrb.mxu1 %v12957_v21 }
0x133c   :  { %7030 = vmatpush.msrb.mxu0 %v12961_v15  ;;  %7050 = vmatpush.msra.mxu2 %v12965_v27  ;;  %v13663_v27 = vld [vmem:[#allocation16_spill] sm:$0xff] }
0x133d   :  { %7070 = vmatpush.msra.mxu3 %v8180_v61  ;;  %7090 = vmatpush.msrb.mxu1 %v12970_v55 }
0x133e   :  { %7031 = vmatpush.msrb.mxu0 %v12974_v18  ;;  %7051 = vmatpush.msra.mxu2 %v12978_v40 }
0x133f   :  { %7071 = vmatpush.msra.mxu3 %v8181_v50  ;;  %7091 = vmatpush.msrb.mxu1 %v12983_v46 }
0x1340   :  { %7032 = vmatpush.msrb.mxu0 %v12987_v6  ;;  %7052 = vmatpush.msra.mxu2 %v12991_v3  ;;  %v13664_v6 = vld [vmem:[#allocation25_spill] sm:$0xff] }
0x1341   :  { %7072 = vmatpush.msra.mxu3 %v8182_v57  ;;  %7092 = vmatpush.msrb.mxu1 %v12996_v2 }
0x1342   :  { %7033 = vmatpush.msrb.mxu0 %v13000_v26  ;;  %7053 = vmatpush.msra.mxu2 %v13004_v19  ;;  %v13665_v19 = vld [vmem:[#allocation15_spill] sm:$0xff] }
0x1343   :  { %7073 = vmatpush.msra.mxu3 %v8183_v36  ;;  %7093 = vmatpush.msrb.mxu1 %v13009_v59 }
0x1344   :  { %7034 = vmatpush.msrb.mxu0 %v13013_v16  ;;  %7054 = vmatpush.msra.mxu2 %v13017_v44 }
0x1345   :  { %7074 = vmatpush.msra.mxu3 %v8184_v11  ;;  %7094 = vmatpush.msrb.mxu1 %v13022_v30 }
0x1346   :  { %7035 = vmatpush.msrb.mxu0 %v8185_v45  ;;  %7055 = vmatpush.msra.mxu2 %v13027_v34 }
0x1347   :  { %7075 = vmatpush.msra.mxu3 %v8186_v0  ;;  %7095 = vmatpush.msrb.mxu1 %v13032_v17 }
0x1348   :  { %7036 = vmatpush.msrb.mxu0 %v8187_v47  ;;  %7056 = vmatpush.msra.mxu2 %v13660_v63 }
0x1349   :  { %7076 = vmatpush.msra.mxu3 %v8188_v31  ;;  %7096 = vmatpush.msrb.mxu1 %v13661_v52 }
0x134a   :  { %7037 = vmatpush.msrb.mxu0 %v8189_v28  ;;  %7057 = vmatpush.msra.mxu2 %v8190_v35 }
0x134b   :  { %7077 = vmatpush.msra.mxu3 %v8191_v24  ;;  %7097 = vmatpush.msrb.mxu1 %v8192_v37 }
0x13a7   :  { %v6603_v2 = vpop.f32.mrf.mxu0 }
0x13a8   :  { %v6663_v4 = vpop.f32.mrf.mxu1  ;;  %v6674_v59 = vadd.f32 %v13665_v19, %v6603_v2 }
0x13a9   :  { %v13148_v21 = vadd.f32 %v13662_v53, %v6663_v4 }
0x13aa   :  { %v7427_v16 = vmul.f32 -1.442695, %v6674_v59 }
0x13ab   :  { %7980 = vtanh.f32 %v13148_v21 }
0x13ad   :  { %v6623_v15 = vpop.f32.mrf.mxu2 }
0x13ae   :  { %v13152_v55 = vadd.f32 %v13663_v27, %v6623_v15  ;;  %v6643_v46 = vpop.f32.mrf.mxu3 }
0x13af   :  { %v6684_v3 = vadd.f32 %v13664_v6, %v6643_v46 }
0x13b0   :  { %7982 = vtanh.f32 %v13152_v55 }
0x13b1   :  { %v7981_v18 = vpop.eup %7980  ;;  %v7429_v26 = vmul.f32 -1.442695, %v6684_v3 }
0x13b2   :  { %6783 = vrot.lane.b32.xlu0 %v7981_v18, %s8198_s19 }
0x13b3   :  { %7984 = vpow2.f32 %v7429_v26 }
0x13b4   :  { %7986 = vpow2.f32 %v7427_v16 }
0x13b6   :  { %v7983_v40 = vpop.eup %7982 }
0x13b7   :  { %6727 = vrot.lane.b32.xlu1 %v7983_v40, %s8198_s19  ;;  %v7428_v40 = vmul.f32 -1.442695, %v13152_v55 }
0x13b9   :  { %v7985_v44 = vpop.eup %7984 }
0x13ba   :  { %v6748_v30 = vadd.f32 1.0, %v7985_v44  ;;  %v7987_v34 = vpop.eup %7986 }
0x13bb   :  { %v6692_v17 = vadd.f32 1.0, %v7987_v34 }
0x13bc   :  { %7988 = vrcp.f32 %v6748_v30  ;;  %v6761_v58 = vand.u32 2147483648, %v6748_v30  ;;  %vm6755_vm13 = vweird.f32 %v6748_v30  ;;  %v6759_v41 = vand.u32 2147483647, %v6748_v30 }
0x13bd   :  { %7990 = vrcp.f32 %v6692_v17  ;;  %v6705_v42 = vand.u32 2147483648, %v6692_v17  ;;  %vm6699_vm15 = vweird.f32 %v6692_v17  ;;  %v6703_v5 = vand.u32 2147483647, %v6692_v17 }
0x13be   :  { %v6762_v13 = vor.u32 1.1754944e-38, %v6761_v58  ;;  %vm6760_vm1 = vcmp.eq.f32.partialorder %v6759_v41, 8.507059e+37 }
0x13bf   :  { %v6706_v8 = vor.u32 1.1754944e-38, %v6705_v42  ;;  %vm6704_vm11 = vcmp.eq.f32.partialorder %v6703_v5, 8.507059e+37  ;;  %v13669_v5 = vld [vmem:[#allocation21_spill] sm:$0xff] }
0x13c2   :  { %v7989_v39 = vpop.eup %7988 }
0x13c3   :  { %v6751_v12 = vmul.f32 %v7989_v39, %v6748_v30  ;;  %v7991_v29 = vpop.eup %7990  ;;  %vm6756_vm9 = vweird.f32 %v7989_v39 }
0x13c4   :  { %v6695_v49 = vmul.f32 %v7991_v29, %v6692_v17  ;;  %vm6757_vm14 = vmor %vm6755_vm13, %vm6756_vm9  ;;  %vm6700_vm0 = vweird.f32 %v7991_v29 }
0x13c5   :  { %v6752_v62 = vsub.f32 1.0, %v6751_v12  ;;  %vm6701_vm2 = vmor %vm6699_vm15, %vm6700_vm0 }
0x13c6   :  { %v6696_v7 = vsub.f32 1.0, %v6695_v49 }
0x13c7   :  { %v6753_v10 = vmul.f32 %v7989_v39, %v6752_v62  ;;  %v13666_v62 = vld [vmem:[#allocation6_spill] sm:$0xff] }
0x13c8   :  { %v6697_v9 = vmul.f32 %v7991_v29, %v6696_v7  ;;  %v13667_v7 = vld [vmem:[#allocation18_spill] sm:$0xff] }
0x13c9   :  { %v6754_v51 = vadd.f32 %v7989_v39, %v6753_v10 }
0x13ca   :  { %v6698_v38 = vadd.f32 %v7991_v29, %v6697_v9 }
0x13cb   :  { %v6758_v60 = vsel %vm6757_vm14, %v7989_v39, %v6754_v51 }
0x13cc   :  { %v6763_v25 = vsel %vm6760_vm1, %v6762_v13, %v6758_v60  ;;  %v6702_v14 = vsel %vm6701_vm2, %v7991_v29, %v6698_v38  ;;  %v13668_v60 = vld [vmem:[#allocation17_spill] sm:$0xff] }
0x13cd   :  { %v6707_v48 = vsel %vm6704_vm11, %v6706_v8, %v6702_v14  ;;  %v6781_v43 = vmul.f32 %v6763_v25, %v13064_v20  ;;  %v7430_v20 = vmul.f32 -1.442695, %v13148_v21 }
0x13ce   :  { %v6725_v36 = vmul.f32 %v6707_v48, %v13068_v56 }
0x1424   :  { %v6784_v33 = vpop.permute.xlu0 %6783 }
0x1425   :  { %v6786_v23 = vmul.f32 %v6784_v33, %v6763_v25 }
0x1427   :  { %6788 = vrot.lane.b32.xlu2 %v6786_v23, %s8198_s19 }
0x1429   :  { %v6728_v1 = vpop.permute.xlu1 %6727 }
0x142a   :  { %v6730_v22 = vmul.f32 %v6728_v1, %v6707_v48 }
0x142c   :  { %6732 = vrot.lane.b32.xlu0 %v6730_v22, %s8198_s19 }
0x1481   :  { %v6789_v61 = vpop.permute.xlu2 %6788 }
0x1482   :  { %v13162_v50 = vadd.f32 %v6789_v61, %v6781_v43 }
0x1484   :  { %7992 = vtanh.f32 %v13162_v50 }
0x148a   :  { %v7993_v57 = vpop.eup %7992 }
0x148b   :  { %6794 = vrot.lane.b32.xlu1 %v7993_v57, %s8198_s19 }
0x149e   :  { %v6733_v11 = vpop.permute.xlu0 %6732 }
0x149f   :  { %v13167_v45 = vadd.f32 %v6733_v11, %v6725_v36 }
0x14a1   :  { %7994 = vtanh.f32 %v13167_v45 }
0x14a2   :  { %7996 = vpow2.f32 %v7430_v20 }
0x14a7   :  { %v7995_v0 = vpop.eup %7994 }
0x14a8   :  { %6738 = vrot.lane.b32.xlu2 %v7995_v0, %s8198_s19  ;;  %v7997_v47 = vpop.eup %7996 }
0x14a9   :  { %v6749_v63 = vadd.f32 1.0, %v7997_v47 }
0x14ab   :  { %7998 = vrcp.f32 %v6749_v63  ;;  %v6776_v56 = vand.u32 2147483648, %v6749_v63  ;;  %vm6770_vm7 = vweird.f32 %v6749_v63  ;;  %v6774_v37 = vand.u32 2147483647, %v6749_v63 }
0x14ac   :  { %8000 = vpow2.f32 %v7428_v40 }
0x14ad   :  { %v6777_v53 = vor.u32 1.1754944e-38, %v6776_v56  ;;  %vm6775_vm3 = vcmp.eq.f32.partialorder %v6774_v37, 8.507059e+37 }
0x14b1   :  { %v7999_v31 = vpop.eup %7998 }
0x14b2   :  { %v6766_v52 = vmul.f32 %v7999_v31, %v6749_v63  ;;  %vm6771_vm8 = vweird.f32 %v7999_v31  ;;  %v8001_v46 = vpop.eup %8000 }
0x14b3   :  { %vm6772_vm5 = vmor %vm6770_vm7, %vm6771_vm8  ;;  %v6693_v6 = vadd.f32 1.0, %v8001_v46 }
0x14b4   :  { %v6767_v28 = vsub.f32 1.0, %v6766_v52 }
0x14b5   :  { %8002 = vrcp.f32 %v6693_v6  ;;  %v6720_v16 = vand.u32 2147483648, %v6693_v6  ;;  %vm6714_vm12 = vweird.f32 %v6693_v6  ;;  %v6718_v44 = vand.u32 2147483647, %v6693_v6 }
0x14b6   :  { %v6768_v35 = vmul.f32 %v7999_v31, %v6767_v28 }
0x14b7   :  { %v6721_v30 = vor.u32 1.1754944e-38, %v6720_v16  ;;  %vm6719_vm13 = vcmp.eq.f32.partialorder %v6718_v44, 8.507059e+37 }
0x14b8   :  { %v6769_v24 = vadd.f32 %v7999_v31, %v6768_v35 }
0x14ba   :  { %v6773_v4 = vsel %vm6772_vm5, %v7999_v31, %v6769_v24 }
0x14bb   :  { %v6778_v15 = vsel %vm6775_vm3, %v6777_v53, %v6773_v4  ;;  %v8003_v3 = vpop.eup %8002 }
0x14bc   :  { %v6710_v2 = vmul.f32 %v8003_v3, %v6693_v6  ;;  %vm6715_vm10 = vweird.f32 %v8003_v3 }
0x14bd   :  { %vm6716_vm9 = vmor %vm6714_vm12, %vm6715_vm10 }
0x14be   :  { %v6711_v26 = vsub.f32 1.0, %v6710_v2 }
0x14c0   :  { %v6712_v19 = vmul.f32 %v8003_v3, %v6711_v26 }
0x14c2   :  { %v6713_v59 = vadd.f32 %v8003_v3, %v6712_v19 }
0x14fd   :  { %v6795_v27 = vpop.permute.xlu1 %6794 }
0x14fe   :  { %v6797_v21 = vmul.f32 %v6795_v27, %v6778_v15 }
0x1500   :  { %v13173_v18 = vadd.f32 %v6797_v21, %v13075_v54  ;;  %6799 = vrot.lane.b32.xlu0 %v6797_v21, %s8198_s19  ;;  %v6717_v54 = vsel %vm6716_vm9, %v8003_v3, %v6713_v59 }
0x1501   :  { %v6722_v17 = vsel %vm6719_vm13, %v6721_v30, %v6717_v54 }
0x1502   :  { %v6739_v34 = vpop.permute.xlu2 %6738 }
0x1503   :  { %v13177_v55 = vmul.f32 %v6739_v34, %v6722_v17 }
0x1572   :  { %v6800_v39 = vpop.permute.xlu0 %6799 }
0x1573   :  { %v6802_v12 = vsel %vm1165_vm6, %v13177_v55, %v6800_v39 }
0x1574   :  { %6821 = vmatmul.f32.vlgmr.msra.gmra.mxu0 %v6802_v12  ;;  %6841 = vmatmul.f32.vlgmr.msrb.gmra.mxu2 %v6802_v12 }
0x1575   :  { %6861 = vmatmul.f32.vlgmr.msrb.gmra.mxu3 %v6802_v12  ;;  %6881 = vmatmul.f32.vlgmr.msra.gmra.mxu1 %v6802_v12 }
0x15f1   :  { %v6822_v41 = vpop.f32.mrf.mxu0 }
0x15f2   :  { %v6882_v29 = vpop.f32.mrf.mxu1  ;;  %v6893_v13 = vadd.f32 %v13668_v60, %v6822_v41 }
0x15f3   :  { %v13182_v49 = vadd.f32 %v13666_v62, %v6882_v29 }
0x15f4   :  { %v7431_v38 = vmul.f32 -1.442695, %v6893_v13 }
0x15f5   :  { %8004 = vtanh.f32 %v13182_v49 }
0x15f7   :  { %v6842_v10 = vpop.f32.mrf.mxu2 }
0x15f8   :  { %v13186_v51 = vadd.f32 %v13667_v7, %v6842_v10  ;;  %v6862_v33 = vpop.f32.mrf.mxu3 }
0x15f9   :  { %v6901_v23 = vadd.f32 %v13669_v5, %v6862_v33 }
0x15fa   :  { %8006 = vtanh.f32 %v13186_v51  ;;  %v7432_v41 = vmul.f32 -1.442695, %v13186_v51 }
0x15fb   :  { %v8005_v58 = vpop.eup %8004  ;;  %8008 = vpow2.f32 %v7431_v38  ;;  %v7433_v14 = vmul.f32 -1.442695, %v6901_v23 }
0x15fc   :  { %7000 = vrot.lane.b32.xlu1 %v8005_v58, %s8198_s19 }
0x1600   :  { %v8007_v9 = vpop.eup %8006 }
0x1601   :  { %6944 = vrot.lane.b32.xlu2 %v8007_v9, %s8198_s19  ;;  %v8009_v42 = vpop.eup %8008 }
0x1602   :  { %v6909_v25 = vadd.f32 1.0, %v8009_v42 }
0x1604   :  { %8010 = vrcp.f32 %v6909_v25  ;;  %v6922_v36 = vand.u32 2147483648, %v6909_v25  ;;  %vm6916_vm0 = vweird.f32 %v6909_v25  ;;  %v6920_v11 = vand.u32 2147483647, %v6909_v25 }
0x1605   :  { %8012 = vpow2.f32 %v7433_v14 }
0x1606   :  { %v6923_v47 = vor.u32 1.1754944e-38, %v6922_v36  ;;  %vm6921_vm15 = vcmp.eq.f32.partialorder %v6920_v11, 8.507059e+37 }
0x160a   :  { %v8011_v8 = vpop.eup %8010 }
0x160b   :  { %v6912_v1 = vmul.f32 %v8011_v8, %v6909_v25  ;;  %v8013_v48 = vpop.eup %8012  ;;  %vm6917_vm14 = vweird.f32 %v8011_v8 }
0x160c   :  { %v6965_v43 = vadd.f32 1.0, %v8013_v48  ;;  %vm6918_vm1 = vmor %vm6916_vm0, %vm6917_vm14 }
0x160d   :  { %v6913_v22 = vsub.f32 1.0, %v6912_v1 }
0x160e   :  { %8014 = vrcp.f32 %v6965_v43  ;;  %v6978_v37 = vand.u32 2147483648, %v6965_v43  ;;  %vm6972_vm11 = vweird.f32 %v6965_v43  ;;  %v6976_v4 = vand.u32 2147483647, %v6965_v43 }
0x160f   :  { %v6914_v61 = vmul.f32 %v8011_v8, %v6913_v22 }
0x1610   :  { %v6979_v15 = vor.u32 1.1754944e-38, %v6978_v37  ;;  %vm6977_vm7 = vcmp.eq.f32.partialorder %v6976_v4, 8.507059e+37 }
0x1611   :  { %v6915_v57 = vadd.f32 %v8011_v8, %v6914_v61 }
0x1613   :  { %v6919_v20 = vsel %vm6918_vm1, %v8011_v8, %v6915_v57  ;;  %v13670_v57 = vld [vmem:[#allocation9_spill] sm:$0xff] }
0x1614   :  { %v8015_v0 = vpop.eup %8014  ;;  %v6924_v31 = vsel %vm6921_vm15, %v6923_v47, %v6919_v20 }
0x1615   :  { %v6968_v52 = vmul.f32 %v8015_v0, %v6965_v43  ;;  %vm6973_vm2 = vweird.f32 %v8015_v0  ;;  %v6942_v46 = vmul.f32 %v6924_v31, %v13167_v45  ;;  %v7434_v45 = vmul.f32 -1.442695, %v13182_v49 }
0x1616   :  { %vm6974_vm8 = vmor %vm6972_vm11, %vm6973_vm2 }
0x1617   :  { %v6969_v35 = vsub.f32 1.0, %v6968_v52  ;;  %v13672_v52 = vld [vmem:[#allocation26_spill] sm:$0xff] }
0x1619   :  { %v6970_v24 = vmul.f32 %v8015_v0, %v6969_v35 }
0x161b   :  { %v6971_v56 = vadd.f32 %v8015_v0, %v6970_v24 }
0x161d   :  { %v6975_v53 = vsel %vm6974_vm8, %v8015_v0, %v6971_v56  ;;  %v13671_v0 = vld [vmem:[#allocation20_spill] sm:$0xff] }
0x161e   :  { %v6980_v21 = vsel %vm6977_vm7, %v6979_v15, %v6975_v53  ;;  %v13673_v53 = vld [vmem:[#allocation19_spill] sm:$0xff] }
0x161f   :  { %v6998_v26 = vmul.f32 %v6980_v21, %v13162_v50 }
0x165b   :  { %v6945_v63 = vpop.permute.xlu2 %6944 }
0x165c   :  { %v6947_v28 = vmul.f32 %v6945_v63, %v6924_v31 }
0x165e   :  { %6949 = vrot.lane.b32.xlu1 %v6947_v28, %s8198_s19 }
0x166e   :  { %v7001_v27 = vpop.permute.xlu1 %7000 }
0x166f   :  { %v7003_v40 = vmul.f32 %v7001_v27, %v6980_v21 }
0x1671   :  { %7005 = vrot.lane.b32.xlu0 %v7003_v40, %s8198_s19 }
0x16d0   :  { %v6950_v6 = vpop.permute.xlu1 %6949 }
0x16d1   :  { %v13196_v3 = vadd.f32 %v6950_v6, %v6942_v46 }
0x16d3   :  { %8016 = vtanh.f32 %v13196_v3 }
0x16d9   :  { %v8017_v2 = vpop.eup %8016 }
0x16da   :  { %6955 = vrot.lane.b32.xlu0 %v8017_v2, %s8198_s19 }
0x16e3   :  { %v7006_v19 = vpop.permute.xlu0 %7005 }
0x16e4   :  { %v13201_v59 = vadd.f32 %v7006_v19, %v6998_v26 }
0x16e6   :  { %8018 = vtanh.f32 %v13201_v59 }
0x16e7   :  { %8020 = vpow2.f32 %v7434_v45 }
0x16ec   :  { %v8019_v16 = vpop.eup %8018 }
0x16ed   :  { %7011 = vrot.lane.b32.xlu2 %v8019_v16, %s8198_s19  ;;  %v8021_v44 = vpop.eup %8020 }
0x16ee   :  { %v6966_v54 = vadd.f32 1.0, %v8021_v44 }
0x16f0   :  { %8022 = vrcp.f32 %v6966_v54  ;;  %v6993_v50 = vand.u32 2147483648, %v6966_v54  ;;  %vm6987_vm3 = vweird.f32 %v6966_v54  ;;  %v6991_v29 = vand.u32 2147483647, %v6966_v54 }
0x16f1   :  { %8024 = vpow2.f32 %v7432_v41 }
0x16f2   :  { %v6994_v10 = vor.u32 1.1754944e-38, %v6993_v50  ;;  %vm6992_vm12 = vcmp.eq.f32.partialorder %v6991_v29, 8.507059e+37 }
0x16f6   :  { %v8023_v30 = vpop.eup %8022 }
0x16f7   :  { %v6983_v34 = vmul.f32 %v8023_v30, %v6966_v54  ;;  %vm6988_vm5 = vweird.f32 %v8023_v30  ;;  %v8025_v60 = vpop.eup %8024 }
0x16f8   :  { %vm6989_vm10 = vmor %vm6987_vm3, %vm6988_vm5  ;;  %v6910_v13 = vadd.f32 1.0, %v8025_v60 }
0x16f9   :  { %v6984_v17 = vsub.f32 1.0, %v6983_v34 }
0x16fa   :  { %8026 = vrcp.f32 %v6910_v13  ;;  %v6937_v23 = vand.u32 2147483648, %v6910_v13  ;;  %vm6931_vm13 = vweird.f32 %v6910_v13  ;;  %v6935_v14 = vand.u32 2147483647, %v6910_v13 }
0x16fb   :  { %v6985_v39 = vmul.f32 %v8023_v30, %v6984_v17 }
0x16fc   :  { %v6938_v8 = vor.u32 1.1754944e-38, %v6937_v23  ;;  %vm6936_vm0 = vcmp.eq.f32.partialorder %v6935_v14, 8.507059e+37 }
0x16fd   :  { %v6986_v12 = vadd.f32 %v8023_v30, %v6985_v39 }
0x16ff   :  { %v6990_v62 = vsel %vm6989_vm10, %v8023_v30, %v6986_v12 }
0x1700   :  { %v6995_v7 = vsel %vm6992_vm12, %v6994_v10, %v6990_v62  ;;  %v8027_v38 = vpop.eup %8026 }
0x1701   :  { %v6927_v42 = vmul.f32 %v8027_v38, %v6910_v13  ;;  %vm6932_vm9 = vweird.f32 %v8027_v38 }
0x1702   :  { %vm6933_vm14 = vmor %vm6931_vm13, %vm6932_vm9 }
0x1703   :  { %v6928_v33 = vsub.f32 1.0, %v6927_v42 }
0x1705   :  { %v6929_v25 = vmul.f32 %v8027_v38, %v6928_v33 }
0x1707   :  { %v6930_v5 = vadd.f32 %v8027_v38, %v6929_v25 }
0x1747   :  { %v7012_v58 = vpop.permute.xlu2 %7011 }
0x1748   :  { %v7014_v49 = vmul.f32 %v7012_v58, %v6995_v7 }
0x174a   :  { %v13207_v9 = vadd.f32 %v7014_v49, %v13173_v18  ;;  %7016 = vrot.lane.b32.xlu1 %v7014_v49, %s8198_s19  ;;  %v6934_v18 = vsel %vm6933_vm14, %v8027_v38, %v6930_v5 }
0x174b   :  { %v6939_v48 = vsel %vm6936_vm0, %v6938_v8, %v6934_v18 }
0x174c   :  { %v6956_v1 = vpop.permute.xlu0 %6955 }
0x174d   :  { %v13211_v51 = vmul.f32 %v6956_v1, %v6939_v48 }
0x17bc   :  { %v7017_v22 = vpop.permute.xlu1 %7016 }
0x17bd   :  { %v7019_v43 = vsel %vm1165_vm6, %v13211_v51, %v7017_v22  ;;  %v7253_v22 = vld [vmem:[%s13237_s29 + $0x68] sm:$0xff] }
0x17be   :  { %7038 = vmatmul.f32.vlgmr.msrb.gmra.mxu0 %v7019_v43  ;;  %7058 = vmatmul.f32.vlgmr.msra.gmra.mxu2 %v7019_v43 }
0x17bf   :  { %7078 = vmatmul.f32.vlgmr.msra.gmra.mxu3 %v7019_v43  ;;  %7098 = vmatmul.f32.vlgmr.msrb.gmra.mxu1 %v7019_v43  ;;  %v7252_v43 = vld [vmem:[%s13237_s29 + $0x60] sm:$0xff] }
0x183b   :  { %v7039_v37 = vpop.f32.mrf.mxu0 }
0x183c   :  { %v7099_v61 = vpop.f32.mrf.mxu1  ;;  %v7110_v15 = vadd.f32 %v13673_v53, %v7039_v37  ;;  %v7244_v37 = vld [vmem:[%s13237_s29 + $0x20] sm:$0xff] }
0x183d   :  { %v13216_v36 = vadd.f32 %v13670_v57, %v7099_v61  ;;  %v7251_v57 = vld [vmem:[%s13237_s29 + $0x58] sm:$0xff] }
0x183e   :  { %v7435_v21 = vmul.f32 -1.442695, %v7110_v15  ;;  %v7243_v15 = vld [vmem:[%s13237_s29 + $0x18] sm:$0xff] }
0x183f   :  { %8028 = vtanh.f32 %v13216_v36  ;;  %v7438_v18 = vmul.f32 -1.442695, %v13216_v36  ;;  %v7250_v36 = vld [vmem:[%s13237_s29 + $0x50] sm:$0xff] }
0x1841   :  { %v7059_v11 = vpop.f32.mrf.mxu2 }
0x1842   :  { %v13220_v20 = vadd.f32 %v13671_v0, %v7059_v11  ;;  %v7079_v31 = vpop.f32.mrf.mxu3  ;;  %v7249_v0 = vld [vmem:[%s13237_s29 + $0x48] sm:$0xff] }
0x1843   :  { %v7118_v28 = vadd.f32 %v13672_v52, %v7079_v31  ;;  %v7247_v31 = vld [vmem:[%s13237_s29 + $0x38] sm:$0xff]  ;;  %v7246_v52 = vld [vmem:[%s13237_s29 + $0x30] sm:$0xff] }
0x1844   :  { %8030 = vtanh.f32 %v13220_v20 }
0x1845   :  { %v8029_v47 = vpop.eup %8028  ;;  %v7437_v35 = vmul.f32 -1.442695, %v7118_v28 }
0x1846   :  { %7217 = vrot.lane.b32.xlu2 %v8029_v47, %s8198_s19  ;;  %v7248_v47 = vld [vmem:[%s13237_s29 + $0x40] sm:$0xff] }
0x1847   :  { %8032 = vpow2.f32 %v7437_v35 }
0x184a   :  { %v8031_v63 = vpop.eup %8030 }
0x184b   :  { %7161 = vrot.lane.b32.xlu0 %v8031_v63, %s8198_s19 }
0x184d   :  { %v8033_v24 = vpop.eup %8032 }
0x184e   :  { %v7182_v56 = vadd.f32 1.0, %v8033_v24  ;;  %v7245_v24 = vld [vmem:[%s13237_s29 + $0x28] sm:$0xff] }
0x1850   :  { %8034 = vrcp.f32 %v7182_v56  ;;  %v7195_v26 = vand.u32 2147483648, %v7182_v56  ;;  %vm7189_vm15 = vweird.f32 %v7182_v56  ;;  %v7193_v19 = vand.u32 2147483647, %v7182_v56 }
0x1851   :  { %8036 = vpow2.f32 %v7435_v21 }
0x1852   :  { %v7196_v44 = vor.u32 1.1754944e-38, %v7195_v26  ;;  %vm7194_vm11 = vcmp.eq.f32.partialorder %v7193_v19, 8.507059e+37 }
0x1856   :  { %v8035_v4 = vpop.eup %8034 }
0x1857   :  { %v7185_v27 = vmul.f32 %v8035_v4, %v7182_v56  ;;  %vm7190_vm1 = vweird.f32 %v8035_v4  ;;  %v8037_v2 = vpop.eup %8036 }
0x1858   :  { %vm7191_vm2 = vmor %vm7189_vm15, %vm7190_vm1  ;;  %v7126_v16 = vadd.f32 1.0, %v8037_v2  ;;  %v7436_v2 = vmul.f32 -1.442695, %v13220_v20  ;;  %vm7298_vm15 = vcmask 818176  }
0x1859   :  { %v7186_v40 = vsub.f32 1.0, %v7185_v27 }
0x185a   :  { %8038 = vrcp.f32 %v7126_v16  ;;  %v7139_v62 = vand.u32 2147483648, %v7126_v16  ;;  %vm7133_vm7 = vweird.f32 %v7126_v16  ;;  %v7137_v10 = vand.u32 2147483647, %v7126_v16 }
0x185b   :  { %v7187_v46 = vmul.f32 %v8035_v4, %v7186_v40  ;;  %v7242_v40 = vld [vmem:[%s13237_s29 + $0x10] sm:$0xff] }
0x185c   :  { %v7140_v58 = vor.u32 1.1754944e-38, %v7139_v62  ;;  %vm7138_vm3 = vcmp.eq.f32.partialorder %v7137_v10, 8.507059e+37  ;;  %v7286_v62 = vld [vmem:[%s13264_s5 + $0x28] sm:$0xff]  ;;  %v7285_v10 = vld [vmem:[%s13264_s5 + $0x20] sm:$0xff] }
0x185d   :  { %v7188_v6 = vadd.f32 %v8035_v4, %v7187_v46 }
0x185f   :  { %v7192_v45 = vsel %vm7191_vm2, %v8035_v4, %v7188_v6 }
0x1860   :  { %v7197_v30 = vsel %vm7194_vm11, %v7196_v44, %v7192_v45  ;;  %v8039_v17 = vpop.eup %8038  ;;  %v7293_v45 = vld [vmem:[%s13264_s5 + $0x60] sm:$0xf]  ;;  %v7292_v44 = vld [vmem:[%s13264_s5 + $0x58] sm:$0xff] }
0x1861   :  { %v7129_v39 = vmul.f32 %v8039_v17, %v7126_v16  ;;  %vm7134_vm8 = vweird.f32 %v8039_v17  ;;  %v7215_v13 = vmul.f32 %v7197_v30, %v13201_v59  ;;  %v7254_v59 = vld [vmem:[%s13237_s29 + $0x70] sm:$0xff]  ;;  %v7240_v16 = vld [vmem:[%s13237_s29] sm:$0xff]  ;;  %7439 = vmatpush.msk.msrb.mxu2 %vm673_vm4, %v7293_v45 }
0x1862   :  { %vm7135_vm5 = vmor %vm7133_vm7, %vm7134_vm8 }
0x1863   :  { %v7130_v12 = vsub.f32 1.0, %v7129_v39  ;;  %7309 = vmatpush.msrb.mxu2 %v7292_v44 }
0x1865   :  { %v7131_v50 = vmul.f32 %v8039_v17, %v7130_v12  ;;  %v7288_v12 = vld [vmem:[%s13264_s5 + $0x38] sm:$0xff] }
0x1867   :  { %v7132_v29 = vadd.f32 %v8039_v17, %v7131_v50  ;;  %v7287_v50 = vld [vmem:[%s13264_s5 + $0x30] sm:$0xff] }
0x1869   :  { %v7136_v7 = vsel %vm7135_vm5, %v8039_v17, %v7132_v29  ;;  %v7289_v17 = vld [vmem:[%s13264_s5 + $0x40] sm:$0xff] }
0x186a   :  { %v7141_v41 = vsel %vm7138_vm3, %v7140_v58, %v7136_v7  ;;  %v13674_v7 = vld [vmem:[#allocation28_spill] sm:$0xff]  ;;  %v13675_v58 = vld [vmem:[#allocation43_spill] sm:$0xff] }
0x186b   :  { %v7159_v33 = vmul.f32 %v7141_v41, %v13196_v3  ;;  %v7255_v3 = vld [vmem:[%s13237_s29 + $0x78] sm:$0xff] }
0x186c   :  { %7260 = vmatpush.msra.mxu0 %v7255_v3 }
0x186e   :  { %7261 = vmatpush.msra.mxu0 %v7254_v59 }
0x1870   :  { %7262 = vmatpush.msra.mxu0 %v7253_v22 }
0x1872   :  { %7263 = vmatpush.msra.mxu0 %v7252_v43 }
0x1874   :  { %7264 = vmatpush.msra.mxu0 %v7251_v57 }
0x1876   :  { %7265 = vmatpush.msra.mxu0 %v7250_v36  ;;  %v7282_v36 = vld [vmem:[%s13264_s5 + $0x8] sm:$0xff] }
0x1878   :  { %7266 = vmatpush.msra.mxu0 %v7249_v0 }
0x187a   :  { %7267 = vmatpush.msra.mxu0 %v7248_v47 }
0x187c   :  { %7268 = vmatpush.msra.mxu0 %v7247_v31 }
0x187e   :  { %7269 = vmatpush.msra.mxu0 %v7246_v52 }
0x1880   :  { %7270 = vmatpush.msra.mxu0 %v7245_v24 }
0x1882   :  { %7271 = vmatpush.msra.mxu0 %v7244_v37 }
0x1884   :  { %7272 = vmatpush.msra.mxu0 %v7243_v15 }
0x1886   :  { %7273 = vmatpush.msra.mxu0 %v7242_v40 }
0x18a0   :  { %v7218_v54 = vpop.permute.xlu2 %7217 }
0x18a1   :  { %v7220_v34 = vmul.f32 %v7218_v54, %v7197_v30  ;;  %v7291_v54 = vld [vmem:[%s13264_s5 + $0x50] sm:$0xff] }
0x18a2   :  { %7310 = vmatpush.msrb.mxu2 %v7291_v54 }
0x18a3   :  { %7222 = vrot.lane.b32.xlu1 %v7220_v34, %s8198_s19  ;;  %v7290_v34 = vld [vmem:[%s13264_s5 + $0x48] sm:$0xff] }
0x18a4   :  { %7311 = vmatpush.msrb.mxu2 %v7290_v34 }
0x18a6   :  { %7312 = vmatpush.msrb.mxu2 %v7289_v17 }
0x18a8   :  { %7313 = vmatpush.msrb.mxu2 %v7288_v12 }
0x18aa   :  { %7314 = vmatpush.msrb.mxu2 %v7287_v50 }
0x18ac   :  { %7315 = vmatpush.msrb.mxu2 %v7286_v62 }
0x18ae   :  { %7316 = vmatpush.msrb.mxu2 %v7285_v10 }
0x18bd   :  { %v7162_v49 = vpop.permute.xlu0 %7161 }
0x18be   :  { %v7164_v60 = vmul.f32 %v7162_v49, %v7141_v41  ;;  %v5927_v49 = vadd.f32 %v13675_v58, %v13674_v7 }
0x18c0   :  { %7166 = vrot.lane.b32.xlu2 %v7164_v60, %s8198_s19 }
0x1915   :  { %v7223_v38 = vpop.permute.xlu1 %7222 }
0x1916   :  { %v7225_v42 = vadd.f32 %v7223_v38, %v7215_v13  ;;  %v7284_v13 = vld [vmem:[%s13264_s5 + $0x18] sm:$0xff]  ;;  %v13676_v38 = vld [vmem:[#allocation4_spill] sm:$0xff] }
0x1917   :  { %7317 = vmatpush.msrb.mxu2 %v7284_v13 }
0x1918   :  { %8040 = vtanh.f32 %v7225_v42  ;;  %v6146_v42 = vadd.f32 %v13676_v38, %v5927_v49 }
0x191a   :  { %v7167_v25 = vpop.permute.xlu2 %7166 }
0x191b   :  { %v7169_v5 = vadd.f32 %v7167_v25, %v7159_v33  ;;  %v13677_v25 = vld [vmem:[#allocation10_spill] sm:$0xff] }
0x191d   :  { %8042 = vtanh.f32 %v7169_v5  ;;  %v6365_v5 = vadd.f32 %v13677_v25, %v6146_v42 }
0x191e   :  { %v8041_v23 = vpop.eup %8040  ;;  %8044 = vpow2.f32 %v7438_v18 }
0x191f   :  { %7228 = vrot.lane.b32.xlu0 %v8041_v23, %s8198_s19 }
0x1923   :  { %v8043_v14 = vpop.eup %8042 }
0x1924   :  { %7172 = vrot.lane.b32.xlu1 %v8043_v14, %s8198_s19  ;;  %v8045_v8 = vpop.eup %8044 }
0x1925   :  { %v7183_v1 = vadd.f32 1.0, %v8045_v8  ;;  %v6584_v8 = vadd.f32 %v13079_v32, %v6365_v5  ;;  %v7283_v32 = vld [vmem:[%s13264_s5 + $0x10] sm:$0xff] }
0x1926   :  { %7318 = vmatpush.msrb.mxu2 %v7283_v32 }
0x1927   :  { %8046 = vrcp.f32 %v7183_v1  ;;  %v7210_v35 = vand.u32 2147483648, %v7183_v1  ;;  %vm7204_vm12 = vweird.f32 %v7183_v1  ;;  %v7208_v56 = vand.u32 2147483647, %v7183_v1 }
0x1928   :  { %8048 = vpow2.f32 %v7436_v2  ;;  %v6803_v3 = vadd.f32 %v13177_v55, %v6584_v8  ;;  %7319 = vmatpush.msrb.mxu2 %v7282_v36 }
0x1929   :  { %v7211_v53 = vor.u32 1.1754944e-38, %v7210_v35  ;;  %vm7209_vm13 = vcmp.eq.f32.partialorder %v7208_v56, 8.507059e+37 }
0x192d   :  { %v8047_v48 = vpop.eup %8046 }
0x192e   :  { %v7200_v61 = vmul.f32 %v8047_v48, %v7183_v1  ;;  %vm7205_vm10 = vweird.f32 %v8047_v48  ;;  %v8049_v26 = vpop.eup %8048 }
0x192f   :  { %vm7206_vm9 = vmor %vm7204_vm12, %vm7205_vm10  ;;  %v7127_v19 = vadd.f32 1.0, %v8049_v26 }
0x1930   :  { %v7201_v11 = vsub.f32 1.0, %v7200_v61 }
0x1931   :  { %8050 = vrcp.f32 %v7127_v19  ;;  %v7154_v60 = vand.u32 2147483648, %v7127_v19  ;;  %vm7148_vm14 = vweird.f32 %v7127_v19  ;;  %v7152_v33 = vand.u32 2147483647, %v7127_v19 }
0x1932   :  { %v7202_v63 = vmul.f32 %v8047_v48, %v7201_v11  ;;  %v7281_v11 = vld [vmem:[%s13264_s5] sm:$0xff] }
0x1933   :  { %v7155_v14 = vor.u32 1.1754944e-38, %v7154_v60  ;;  %vm7153_vm1 = vcmp.eq.f32.partialorder %v7152_v33, 8.507059e+37  ;;  %7320 = vmatpush.msrb.mxu2 %v7281_v11 }
0x1934   :  { %v7203_v28 = vadd.f32 %v8047_v48, %v7202_v63 }
0x1936   :  { %v7207_v4 = vsel %vm7206_vm9, %v8047_v48, %v7203_v28  ;;  %v7020_v48 = vadd.f32 %v13211_v51, %v6803_v3  ;;  %v7858_v51 = vld [vmem:[%s13242_s1] ss:$0 sm:$0xff] }
0x1937   :  { %v7212_v27 = vsel %vm7209_vm13, %v7211_v53, %v7207_v4  ;;  %v8051_v20 = vpop.eup %8050 }
0x1938   :  { %v7144_v30 = vmul.f32 %v8051_v20, %v7127_v19  ;;  %vm7149_vm4 = vweird.f32 %v8051_v20 }
0x1939   :  { %vm7150_vm0 = vmor %vm7148_vm14, %vm7149_vm4 }
0x193a   :  { %v7145_v39 = vsub.f32 1.0, %v7144_v30 }
0x193c   :  { %v7146_v29 = vmul.f32 %v8051_v20, %v7145_v39 }
0x193e   :  { %v7147_v41 = vadd.f32 %v8051_v20, %v7146_v29 }
0x1940   :  { %v7151_v23 = vsel %vm7150_vm0, %v8051_v20, %v7147_v41 }
0x1941   :  { %v7156_v1 = vsel %vm7153_vm1, %v7155_v14, %v7151_v23 }
0x1991   :  { %v7229_v21 = vpop.permute.xlu0 %7228 }
0x1992   :  { %v7231_v46 = vmul.f32 %v7229_v21, %v7212_v27 }
0x1994   :  { %v7233_v6 = vadd.f32 %v7231_v46, %v13207_v9  ;;  %v7241_v9 = vld [vmem:[%s13237_s29 + $0x8] sm:$0xff] }
0x1995   :  { %7274 = vmatpush.msra.mxu0 %v7241_v9 }
0x1996   :  { %7235 = vrot.lane.b32.xlu2 %v7233_v6, %s8198_s19  ;;  %v7173_v18 = vpop.permute.xlu1 %7172  ;;  %s8226_s19 = smov 29  }
0x1997   :  { %7275 = vmatpush.msra.mxu0 %v7240_v16  ;;  %v7175_v59 = vmul.f32 %v7173_v18, %v7156_v1  ;;  %s7359_s8 = sld [smem:[%s13297_s0 + %s8226_s19]]  }
0x1999   :  { %v7232_v22 = vadd.f32 %v7175_v59, %v7020_v48 }
0x199d   :  { %v66_v55 = vstv %s7359_s8 }
0x199e   :  { %67 = vst [vmem:[#allocation2] sm:$0x1] %v66_v55 }
0x19a5   :  { %v7859_v31 = vld [vmem:[#allocation2] ss:$0 sm:$0xff] }
0x19f0   :  { %v7236_v43 = vpop.permute.xlu2 %7235 }
0x19f1   :  { %v7238_v61 = vsel %vm1165_vm6, %v7232_v22, %v7236_v43  ;;  %vm7325_vm6 = vcmask 1024  }
0x19f2   :  { %v7239_v57 = vmul.f32 0.125, %v7238_v61 }
0x19f4   :  { %7276 = vmatmul.f32.vlgmr.msra.gmra.mxu0 %v7239_v57 }
0x1a71   :  { %v7277_v0 = vpop.f32.mrf.mxu0 }
0x1a72   :  { %v7278_v47 = vadd.f32 %v7858_v51, %v7277_v0 }
0x1a74   :  { %v7280_v63 = vmax.f32 %v7278_v47, 0.0 }
0x1a76   :  { %7440 = vmatmul.msk.f32.vlgmr.msrb.gmra.mxu2 %vm7298_vm15, %v7280_v63 }
0x1af9   :  { %v7322_v52 = vpop.f32.mrf.mxu2 }
0x1afa   :  { %v7323_v28 = vadd.f32 %v7859_v31, %v7322_v52 }
0x1afc   :  { %7326 = vst.msk [vmem:[%s7360_s12] sm:$0x3] %vm7325_vm6, %v7323_v28 }

</bundles_post_ra>
